<compile_context>
chip_gen: v7x
topology: tpu7x:2x2x1
jax: 0.10.0
libtpu: 0.0.40
codegen_flags: <defaults>
</compile_context>

<pallas_src>
import functools

import jax
import jax.numpy as jnp
from jax import lax
from jax.experimental import pallas as pl
from jax.experimental.pallas import tpu as pltpu


# ------------------------------ tiling helpers ------------------------------ #

def _pick_tile(dim, candidates):
    """Largest candidate that divides `dim`, else the full dim (full-dim blocks are
    always legal on TPU)."""
    for c in candidates:
        if dim % c == 0:
            return c
    return dim


_TM_CANDS = (512, 256, 128, 64, 32, 16, 8)
_TN_CANDS = (512, 256, 128)
_TK_CANDS = (512, 384, 256, 128)


# ------------------------------ Pallas kernels ------------------------------ #

def _matmul_kernel(x_ref, w_ref, b_ref, y_ref, *rest, activation, with_stats):
    """Tiled y = x @ w + b with optional fused tanh and fused per-tile BN partial
    statistics (column sum / sum-of-squares taken from the f32 accumulator)."""
    if with_stats:
        stats_ref, acc_ref = rest
    else:
        (acc_ref,) = rest

    @pl.when(pl.program_id(2) == 0)
    def _init():
        acc_ref[...] = jnp.zeros_like(acc_ref)

    acc_ref[...] += jnp.dot(x_ref[...], w_ref[...],
                            preferred_element_type=jnp.float32)

    @pl.when(pl.program_id(2) == pl.num_programs(2) - 1)
    def _finalize():
        acc = acc_ref[...] + b_ref[...]          # b is (1, tn), broadcasts over rows
        if activation == "tanh":
            acc = jnp.tanh(acc)
        y_ref[...] = acc.astype(y_ref.dtype)
        if with_stats:
            s1 = jnp.sum(acc, axis=0, keepdims=True)          # (1, tn)
            s2 = jnp.sum(acc * acc, axis=0, keepdims=True)    # (1, tn)
            stats_ref[0] = jnp.concatenate([s1, s2], axis=0)  # (2, tn)


def _bn_relu_kernel(y_ref, tot_ref, o_ref, *, inv_m, eps):
    """Training-mode batch-norm (gamma=1, beta=0) + ReLU from precomputed column
    totals tot = [[sum], [sum_sq]] over the true row count."""
    tot = tot_ref[...]                                   # (2, tn) f32
    mean = tot[0:1, :] * inv_m                           # (1, tn)
    var = tot[1:2, :] * inv_m - mean * mean              # biased variance
    scale = lax.rsqrt(var + eps)
    y = y_ref[...].astype(jnp.float32)
    o_ref[...] = jnp.maximum((y - mean) * scale, 0.0).astype(o_ref.dtype)


# ------------------------------ kernel wrappers ------------------------------ #

def matmul_bias_act(x, w, b, *, activation=None, with_stats=False,
                    out_dtype=jnp.bfloat16):
    """Tiled Pallas matmul: (M,K) @ (K,N) + b, bf16 inputs, f32 accumulation.
    Optionally returns per-M-tile BN partial stats of shape (M//tm, 2, N)."""
    M, K = x.shape
    Kw, N = w.shape
    assert K == Kw
    tm = _pick_tile(M, _TM_CANDS)
    tn = _pick_tile(N, _TN_CANDS)
    tk = _pick_tile(K, _TK_CANDS)
    n_i = M // tm
    grid = (n_i, N // tn, K // tk)

    x = x.astype(jnp.bfloat16)
    w = w.astype(jnp.bfloat16)
    b2 = b.reshape(1, N).astype(jnp.float32)

    out_shape = [jax.ShapeDtypeStruct((M, N), out_dtype)]
    out_specs = [pl.BlockSpec((tm, tn), lambda i, j, k: (i, j))]
    if with_stats:
        out_shape.append(jax.ShapeDtypeStruct((n_i, 2, N), jnp.float32))
        out_specs.append(pl.BlockSpec((1, 2, tn), lambda i, j, k: (i, 0, j)))

    res = pl.pallas_call(
        functools.partial(_matmul_kernel, activation=activation,
                          with_stats=with_stats),
        grid=grid,
        in_specs=[
            pl.BlockSpec((tm, tk), lambda i, j, k: (i, k)),
            pl.BlockSpec((tk, tn), lambda i, j, k: (k, j)),
            pl.BlockSpec((1, tn), lambda i, j, k: (0, j)),
        ],
        out_specs=tuple(out_specs) if with_stats else out_specs[0],
        out_shape=tuple(out_shape) if with_stats else out_shape[0],
        scratch_shapes=[pltpu.VMEM((tm, tn), jnp.float32)],
        compiler_params=pltpu.CompilerParams(
            dimension_semantics=("parallel", "parallel", "arbitrary")),
    )(x, w, b2)

    if with_stats:
        y, stats = res
        return y, stats
    return res


def batchnorm_relu(y, stats_partial, *, m_total, eps=1e-5,
                   out_dtype=jnp.bfloat16):
    """Finish the fused BN: tiny glue reduction of the per-tile partials, then a
    tiled normalize+ReLU Pallas pass over the (rows, channels) slab."""
    M, N = y.shape
    tot = jnp.sum(stats_partial, axis=0)                 # (2, N) f32 — tiny
    tm = _pick_tile(M, _TM_CANDS)
    tn = _pick_tile(N, _TN_CANDS)
    return pl.pallas_call(
        functools.partial(_bn_relu_kernel, inv_m=1.0 / float(m_total),
                          eps=float(eps)),
        grid=(M // tm, N // tn),
        in_specs=[
            pl.BlockSpec((tm, tn), lambda i, j: (i, j)),
            pl.BlockSpec((2, tn), lambda i, j: (0, j)),
        ],
        out_specs=pl.BlockSpec((tm, tn), lambda i, j: (i, j)),
        out_shape=jax.ShapeDtypeStruct((M, N), out_dtype),
        compiler_params=pltpu.CompilerParams(
            dimension_semantics=("parallel", "parallel")),
    )(y, tot)


# ------------------------------- glue (NHWC) -------------------------------- #

def _im2col(x_pad, k):
    """x_pad: (B, Hp, Wp, C) NHWC -> (B*Ho*Wo, k*k*C), taps flattened (dy, dx, c)."""
    B, Hp, Wp, C = x_pad.shape
    Ho, Wo = Hp - k + 1, Wp - k + 1
    taps = [x_pad[:, dy:dy + Ho, dx:dx + Wo, :]
            for dy in range(k) for dx in range(k)]
    p = jnp.stack(taps, axis=3)                          # (B, Ho, Wo, k*k, C)
    return p.reshape(B * Ho * Wo, k * k * C)


def conv_transpose_4x4_s2(h, w_phases, b):
    """ConvTranspose2d(k=4, s=2, p=1) via sub-pixel phase decomposition.
    h: (B, H, W, Cin) NHWC bf16; w_phases: 4 matmul-ready (4*Cin, Cout) matrices.
    Returns pre-BN output (B, 2H, 2W, Cout) and concatenated BN partial stats."""
    B, H, W, _ = h.shape
    ys, sts = [], []
    for py in (0, 1):                                    # output-row parity
        for px in (0, 1):                                # output-col parity
            xp = jnp.pad(h, ((0, 0), (1 - py, py), (1 - px, px), (0, 0)))
            patches = _im2col(xp, 2)                     # (B*H*W, 4*Cin)
            y, st = matmul_bias_act(patches, w_phases[2 * py + px], b,
                                    with_stats=True)
            ys.append(y)
            sts.append(st)
    Cout = ys[0].shape[-1]
    y4 = jnp.stack(ys, axis=0).reshape(2, 2, B, H, W, Cout)
    full = jnp.transpose(y4, (2, 3, 0, 4, 1, 5)).reshape(B, 2 * H, 2 * W, Cout)
    return full, jnp.concatenate(sts, axis=0)


def conv3x3_s1_p1_tanh(h, w_mat, b):
    """ConvTranspose2d(k=3, s=1, p=1) == direct 3x3 conv (pad 1) with the flipped
    kernel; tanh fused into the matmul epilogue; f32 output."""
    B, H, W, _ = h.shape
    xp = jnp.pad(h, ((0, 0), (1, 1), (1, 1), (0, 0)))
    patches = _im2col(xp, 3)                             # (B*H*W, 9*C)
    y = matmul_bias_act(patches, w_mat, b, activation="tanh",
                        with_stats=False, out_dtype=jnp.float32)
    return y.reshape(B, H, W, -1)


# ------------------------------ model parameters ----------------------------- #

def init_params(key, z_dim, dim, color_channels):
    s = dim // 8
    ks = jax.random.split(key, 5)
    std = 0.02

    # fc1: drawn with the PyTorch (out laid out as C=512,H=s,W=s) convention, then
    # columns pre-permuted to (H, W, C) so the fc1 output is already NHWC-flattened
    # (same linear map; removes all NCHW<->NHWC round-trips downstream).
    w = std * jax.random.normal(ks[0], (z_dim, 512, s, s), jnp.float32)
    fc1_w = jnp.transpose(w, (0, 2, 3, 1)).reshape(z_dim, 512 * s * s)

    def phase_mats(w_t, cout_pad):
        """Build the 4 matmul-ready (4*Cin, Cout) phase weights for k=4, s=2, p=1.
        Phase (py, px): output pixel (2m+py, 2n+px) is a 2x2 direct conv with the
        kernel sub-slice kh in {3,1} (py=0) / {2,0} (py=1), likewise for kw."""
        Cin, Cout = w_t.shape[0], w_t.shape[1]
        mats = []
        for py in (0, 1):
            for px in (0, 1):
                sub = w_t[:, :, (1 - py)::2, :][:, :, ::-1, :]
                sub = sub[:, :, :, (1 - px)::2][:, :, :, ::-1]   # (Cin, Cout, 2, 2)
                m = jnp.transpose(sub, (2, 3, 0, 1)).reshape(4 * Cin, Cout)
                if cout_pad > Cout:
                    m = jnp.pad(m, ((0, 0), (0, cout_pad - Cout)))
                mats.append(m.astype(jnp.bfloat16))
        return mats

    c1_t = std * jax.random.normal(ks[1], (512, 256, 4, 4), jnp.float32)
    c2_t = std * jax.random.normal(ks[2], (256, 128, 4, 4), jnp.float32)
    c3_t = std * jax.random.normal(ks[3], (128, 64, 4, 4), jnp.float32)
    c4_t = std * jax.random.normal(ks[4], (64, color_channels, 3, 3), jnp.float32)

    # c4: flip spatially + swap channels -> direct conv weight, laid out (kh,kw,ci,co)
    # to match the im2col tap order.  Cin padded 64->128 (c3 output is lane-padded
    # with zero channels) and Cout padded to 128 so the last matmul is lane-dense.
    c4_flip = c4_t[:, :, ::-1, ::-1]
    c4_m = jnp.transpose(c4_flip, (2, 3, 0, 1))                  # (3, 3, 64, cc)
    c4_m = jnp.pad(c4_m, ((0, 0), (0, 0), (0, 128 - 64), (0, 128 - color_channels)))
    c4_w = c4_m.reshape(9 * 128, 128).astype(jnp.bfloat16)

    return {
        "fc1_w": fc1_w.astype(jnp.bfloat16),
        "fc1_b": jnp.zeros((512 * s * s,), jnp.float32),
        "c1_w": phase_mats(c1_t, 256), "c1_b": jnp.zeros((256,), jnp.float32),
        "c2_w": phase_mats(c2_t, 128), "c2_b": jnp.zeros((128,), jnp.float32),
        "c3_w": phase_mats(c3_t, 128), "c3_b": jnp.zeros((128,), jnp.float32),
        "c4_w": c4_w,                  "c4_b": jnp.zeros((128,), jnp.float32),
        # BatchNorm affine params are at PyTorch default init (gamma=1, beta=0),
        # so they are folded out of the normalization kernel.
    }


# -------------------------------- forward pass ------------------------------- #

def generator_sngan_forward(params, z, *, z_dim, dim, color_channels):
    B = z.shape[0]
    assert z.shape == (B, z_dim)
    s = dim // 8

    # fc1 -> bn1 -> relu  (BN stats fused into the matmul epilogue)
    y, st = matmul_bias_act(z, params["fc1_w"], params["fc1_b"], with_stats=True)
    h = batchnorm_relu(y, st, m_total=B)                 # (B, 512*s*s) bf16
    h = h.reshape(B, s, s, 512)                          # NHWC (columns pre-permuted)

    # c1/c2/c3 -> bn -> relu, all channels-last
    for name in ("c1", "c2", "c3"):
        full, st = conv_transpose_4x4_s2(h, params[name + "_w"], params[name + "_b"])
        Bc, Hc, Wc, Cc = full.shape
        h = batchnorm_relu(full.reshape(Bc * Hc * Wc, Cc), st,
                           m_total=Bc * Hc * Wc).reshape(Bc, Hc, Wc, Cc)

    # c4 (3x3, s=1, p=1) with fused tanh; slice off lane padding; one final NCHW.
    out = conv3x3_s1_p1_tanh(h, params["c4_w"], params["c4_b"])  # (B, dim, dim, 128)
    out = out[..., :color_channels]
    out = jnp.transpose(out, (0, 3, 1, 2))                       # NCHW
    assert out.shape == (B, color_channels, dim, dim)
    return out


# ------------------------------------ main ----------------------------------- #

if __name__ == "__main__":
    class Args:
        z_dim = 32            # small synthetic setting (module recommends 128)
        dim = 16
        color_channels = 3

    args = Args()
    batch = 2

    key = jax.random.PRNGKey(0)
    pkey, zkey = jax.random.split(key)
    params = init_params(pkey, args.z_dim, args.dim, args.color_channels)
    z = jax.random.normal(zkey, (batch, args.z_dim), jnp.float32)

    fwd = jax.jit(functools.partial(
        generator_sngan_forward,
        z_dim=args.z_dim, dim=args.dim, color_channels=args.color_channels))

    out = fwd(params, z)
    jax.block_until_ready(out)
    assert out.shape == (batch, args.color_channels, args.dim, args.dim)
    assert bool(jnp.all(jnp.isfinite(out)))
    assert bool(jnp.all(jnp.abs(out) <= 1.0 + 1e-3))     # tanh range
    print("KERNEL_OK")
</pallas_src>

<mosaic_0001>
module attributes {stable_mosaic.version = 11 : i64} {
  func.func @_matmul_kernel(%arg0: i32, %arg1: i32, %arg2: i32, %arg3: memref<2x32xbf16, #tpu.memory_space<vmem>>, %arg4: memref<32x512xbf16, #tpu.memory_space<vmem>>, %arg5: memref<1x512xf32, #tpu.memory_space<vmem>>, %arg6: memref<2x512xbf16, #tpu.memory_space<vmem>>, %arg7: memref<1x2x512xf32, #tpu.memory_space<vmem>>, %arg8: memref<2x512xf32, #tpu.memory_space<vmem>>) attributes {dimension_semantics = [#tpu.dimension_semantics<parallel>, #tpu.dimension_semantics<parallel>, #tpu.dimension_semantics<arbitrary>], iteration_bounds = array<i64: 1, 4, 1>, scalar_prefetch = 0 : i64, scratch_operands = 1 : i64, tpu.core_type = #tpu.core_type<tc>, window_params = [{transform_indices = @transform_0, window_bounds = array<i64: 2, 32>}, {transform_indices = @transform_1, window_bounds = array<i64: 32, 512>}, {transform_indices = @transform_2, window_bounds = array<i64: 1, 512>}, {transform_indices = @transform_3, window_bounds = array<i64: 2, 512>}, {transform_indices = @transform_4, window_bounds = array<i64: 1, 2, 512>}]} {
    %c0_i32 = arith.constant 0 : i32
    %0 = arith.cmpi eq, %arg2, %c0_i32 : i32
    %1 = arith.extui %0 : i1 to i32
    %c0_i32_0 = arith.constant 0 : i32
    %2 = arith.cmpi ne, %1, %c0_i32_0 : i32
    scf.if %2 {
      %cst_10 = arith.constant 0.000000e+00 : f32
      %12 = vector.broadcast %cst_10 : f32 to vector<2x512xf32>
      %c0_11 = arith.constant 0 : index
      %c0_12 = arith.constant 0 : index
      %13 = vector.load %arg8[%c0_11, %c0_12] : memref<2x512xf32, #tpu.memory_space<vmem>>, vector<2x512xf32>
      tpu.vector_store %arg8[%c0_11, %c0_12], %12 {strides = array<i32>} : memref<2x512xf32, #tpu.memory_space<vmem>>, vector<2x512xf32>,
    } else {
    }
    %c0 = arith.constant 0 : index
    %c0_1 = arith.constant 0 : index
    %3 = vector.load %arg8[%c0, %c0_1] : memref<2x512xf32, #tpu.memory_space<vmem>>, vector<2x512xf32>
    %c0_2 = arith.constant 0 : index
    %c0_3 = arith.constant 0 : index
    %4 = vector.load %arg3[%c0_2, %c0_3] : memref<2x32xbf16, #tpu.memory_space<vmem>>, vector<2x32xbf16>
    %c0_4 = arith.constant 0 : index
    %c0_5 = arith.constant 0 : index
    %5 = vector.load %arg4[%c0_4, %c0_5] : memref<32x512xbf16, #tpu.memory_space<vmem>>, vector<32x512xbf16>
    %cst = arith.constant dense<0.000000e+00> : vector<2x512xf32>
    %6 = tpu.matmul %4, %5, %cst {dimension_numbers = #tpu.dot_dimension_numbers<[1], [0], [0], [1], [0, 0, 1, 1], [], []>} : vector<2x32xbf16>, vector<32x512xbf16>, vector<2x512xf32> -> vector<2x512xf32>
    %7 = arith.addf %3, %6 : vector<2x512xf32>
    %c0_6 = arith.constant 0 : index
    %c0_7 = arith.constant 0 : index
    %8 = vector.load %arg8[%c0_6, %c0_7] : memref<2x512xf32, #tpu.memory_space<vmem>>, vector<2x512xf32>
    tpu.vector_store %arg8[%c0_6, %c0_7], %7 {strides = array<i32>} : memref<2x512xf32, #tpu.memory_space<vmem>>, vector<2x512xf32>,
    %c0_i32_8 = arith.constant 0 : i32
    %9 = arith.cmpi eq, %arg2, %c0_i32_8 : i32
    %10 = arith.extui %9 : i1 to i32
    %c0_i32_9 = arith.constant 0 : i32
    %11 = arith.cmpi ne, %10, %c0_i32_9 : i32
    scf.if %11 {
      %c0_10 = arith.constant 0 : index
      %c0_11 = arith.constant 0 : index
      %12 = vector.load %arg8[%c0_10, %c0_11] : memref<2x512xf32, #tpu.memory_space<vmem>>, vector<2x512xf32>
      %c0_12 = arith.constant 0 : index
      %c0_13 = arith.constant 0 : index
      %13 = vector.load %arg5[%c0_12, %c0_13] : memref<1x512xf32, #tpu.memory_space<vmem>>, vector<1x512xf32>
      %14 = vector.broadcast %13 : vector<1x512xf32> to vector<2x512xf32>
      %15 = arith.addf %12, %14 : vector<2x512xf32>
      %16 = arith.truncf %15 : vector<2x512xf32> to vector<2x512xbf16>
      %c0_14 = arith.constant 0 : index
      %c0_15 = arith.constant 0 : index
      %17 = vector.load %arg6[%c0_14, %c0_15] : memref<2x512xbf16, #tpu.memory_space<vmem>>, vector<2x512xbf16>
      tpu.vector_store %arg6[%c0_14, %c0_15], %16 {strides = array<i32>} : memref<2x512xbf16, #tpu.memory_space<vmem>>, vector<2x512xbf16>,
      %cst_16 = arith.constant dense<0.000000e+00> : vector<512xf32>
      %18 = vector.multi_reduction <add>, %15, %cst_16 [0] : vector<2x512xf32> to vector<512xf32>
      %19 = vector.shape_cast %18 : vector<512xf32> to vector<1x512xf32>
      %20 = arith.mulf %15, %15 : vector<2x512xf32>
      %cst_17 = arith.constant dense<0.000000e+00> : vector<512xf32>
      %21 = vector.multi_reduction <add>, %20, %cst_17 [0] : vector<2x512xf32> to vector<512xf32>
      %22 = vector.shape_cast %21 : vector<512xf32> to vector<1x512xf32>
      %23 = tpu.concatenate %19, %22 in 0 : vector<1x512xf32>, vector<1x512xf32> -> vector<2x512xf32>
      %c0_18 = arith.constant 0 : index
      %c0_19 = arith.constant 0 : index
      %c0_20 = arith.constant 0 : index
      %24 = vector.load %arg7[%c0_18, %c0_19, %c0_20] : memref<1x2x512xf32, #tpu.memory_space<vmem>>, vector<1x2x512xf32>
      %25 = vector.shape_cast %24 : vector<1x2x512xf32> to vector<2x512xf32>
      %26 = vector.shape_cast %23 : vector<2x512xf32> to vector<1x2x512xf32>
      tpu.vector_store %arg7[%c0_18, %c0_19, %c0_20], %26 {strides = array<i32>} : memref<1x2x512xf32, #tpu.memory_space<vmem>>, vector<1x2x512xf32>,
    } else {
    }
    return
  }
  func.func @transform_0(%arg0: i32, %arg1: i32, %arg2: i32) -> (i32, i32) {
    %c0_i32 = arith.constant 0 : i32
    return %arg0, %arg2 : i32, i32
  }
  func.func @transform_1(%arg0: i32, %arg1: i32, %arg2: i32) -> (i32, i32) {
    %c0_i32 = arith.constant 0 : i32
    return %arg2, %arg1 : i32, i32
  }
  func.func @transform_2(%arg0: i32, %arg1: i32, %arg2: i32) -> (i32, i32) {
    %c0_i32 = arith.constant 0 : i32
    %c0_i32_0 = arith.constant 0 : i32
    return %c0_i32, %arg1 : i32, i32
  }
  func.func @transform_3(%arg0: i32, %arg1: i32, %arg2: i32) -> (i32, i32) {
    %c0_i32 = arith.constant 0 : i32
    return %arg0, %arg1 : i32, i32
  }
  func.func @transform_4(%arg0: i32, %arg1: i32, %arg2: i32) -> (i32, i32, i32) {
    %c0_i32 = arith.constant 0 : i32
    %c0_i32_0 = arith.constant 0 : i32
    return %arg0, %c0_i32, %arg1 : i32, i32, i32
  }
}

module attributes {stable_mosaic.version = 11 : i64} {
  func.func @_bn_relu_kernel(%arg0: i32, %arg1: i32, %arg2: memref<2x512xbf16, #tpu.memory_space<vmem>>, %arg3: memref<2x512xf32, #tpu.memory_space<vmem>>, %arg4: memref<2x512xbf16, #tpu.memory_space<vmem>>) attributes {dimension_semantics = [#tpu.dimension_semantics<parallel>, #tpu.dimension_semantics<parallel>], iteration_bounds = array<i64: 1, 4>, scalar_prefetch = 0 : i64, scratch_operands = 0 : i64, tpu.core_type = #tpu.core_type<tc>, window_params = [{transform_indices = @transform_0, window_bounds = array<i64: 2, 512>}, {transform_indices = @transform_1, window_bounds = array<i64: 2, 512>}, {transform_indices = @transform_2, window_bounds = array<i64: 2, 512>}]} {
    %c0 = arith.constant 0 : index
    %c0_0 = arith.constant 0 : index
    %0 = vector.load %arg3[%c0, %c0_0] : memref<2x512xf32, #tpu.memory_space<vmem>>, vector<2x512xf32>
    %1 = vector.extract_strided_slice %0 {offsets = [0, 0], sizes = [1, 512], strides = [1, 1]} : vector<2x512xf32> to vector<1x512xf32>
    %cst = arith.constant 5.000000e-01 : f32
    %2 = vector.broadcast %cst : f32 to vector<1x512xf32>
    %3 = arith.mulf %1, %2 : vector<1x512xf32>
    %4 = vector.extract_strided_slice %0 {offsets = [1, 0], sizes = [1, 512], strides = [1, 1]} : vector<2x512xf32> to vector<1x512xf32>
    %cst_1 = arith.constant 5.000000e-01 : f32
    %5 = vector.broadcast %cst_1 : f32 to vector<1x512xf32>
    %6 = arith.mulf %4, %5 : vector<1x512xf32>
    %7 = arith.mulf %3, %3 : vector<1x512xf32>
    %8 = arith.subf %6, %7 : vector<1x512xf32>
    %cst_2 = arith.constant 9.99999974E-6 : f32
    %9 = vector.broadcast %cst_2 : f32 to vector<1x512xf32>
    %10 = arith.addf %8, %9 : vector<1x512xf32>
    %11 = math.rsqrt %10 : vector<1x512xf32>
    %c0_3 = arith.constant 0 : index
    %c0_4 = arith.constant 0 : index
    %12 = vector.load %arg2[%c0_3, %c0_4] : memref<2x512xbf16, #tpu.memory_space<vmem>>, vector<2x512xbf16>
    %13 = arith.extf %12 : vector<2x512xbf16> to vector<2x512xf32>
    %14 = vector.broadcast %3 : vector<1x512xf32> to vector<2x512xf32>
    %15 = arith.subf %13, %14 : vector<2x512xf32>
    %16 = vector.broadcast %11 : vector<1x512xf32> to vector<2x512xf32>
    %17 = arith.mulf %15, %16 : vector<2x512xf32>
    %cst_5 = arith.constant 0.000000e+00 : f32
    %18 = vector.broadcast %cst_5 : f32 to vector<2x512xf32>
    %19 = arith.maximumf %17, %18 : vector<2x512xf32>
    %20 = arith.truncf %19 : vector<2x512xf32> to vector<2x512xbf16>
    %c0_6 = arith.constant 0 : index
    %c0_7 = arith.constant 0 : index
    %21 = vector.load %arg4[%c0_6, %c0_7] : memref<2x512xbf16, #tpu.memory_space<vmem>>, vector<2x512xbf16>
    tpu.vector_store %arg4[%c0_6, %c0_7], %20 {strides = array<i32>} : memref<2x512xbf16, #tpu.memory_space<vmem>>, vector<2x512xbf16>,
    return
  }
  func.func @transform_0(%arg0: i32, %arg1: i32) -> (i32, i32) {
    %c0_i32 = arith.constant 0 : i32
    return %arg0, %arg1 : i32, i32
  }
  func.func @transform_1(%arg0: i32, %arg1: i32) -> (i32, i32) {
    %c0_i32 = arith.constant 0 : i32
    %c0_i32_0 = arith.constant 0 : i32
    return %c0_i32, %arg1 : i32, i32
  }
  func.func @transform_2(%arg0: i32, %arg1: i32) -> (i32, i32) {
    %c0_i32 = arith.constant 0 : i32
    return %arg0, %arg1 : i32, i32
  }
}

module attributes {stable_mosaic.version = 11 : i64} {
  func.func @_matmul_kernel(%arg0: i32, %arg1: i32, %arg2: i32, %arg3: memref<8x512xbf16, #tpu.memory_space<vmem>>, %arg4: memref<512x256xbf16, #tpu.memory_space<vmem>>, %arg5: memref<1x256xf32, #tpu.memory_space<vmem>>, %arg6: memref<8x256xbf16, #tpu.memory_space<vmem>>, %arg7: memref<1x2x256xf32, #tpu.memory_space<vmem>>, %arg8: memref<8x256xf32, #tpu.memory_space<vmem>>) attributes {dimension_semantics = [#tpu.dimension_semantics<parallel>, #tpu.dimension_semantics<parallel>, #tpu.dimension_semantics<arbitrary>], iteration_bounds = array<i64: 1, 1, 4>, scalar_prefetch = 0 : i64, scratch_operands = 1 : i64, tpu.core_type = #tpu.core_type<tc>, window_params = [{transform_indices = @transform_0, window_bounds = array<i64: 8, 512>}, {transform_indices = @transform_1, window_bounds = array<i64: 512, 256>}, {transform_indices = @transform_2, window_bounds = array<i64: 1, 256>}, {transform_indices = @transform_3, window_bounds = array<i64: 8, 256>}, {transform_indices = @transform_4, window_bounds = array<i64: 1, 2, 256>}]} {
    %c0_i32 = arith.constant 0 : i32
    %0 = arith.cmpi eq, %arg2, %c0_i32 : i32
    %1 = arith.extui %0 : i1 to i32
    %c0_i32_0 = arith.constant 0 : i32
    %2 = arith.cmpi ne, %1, %c0_i32_0 : i32
    scf.if %2 {
      %cst_9 = arith.constant 0.000000e+00 : f32
      %12 = vector.broadcast %cst_9 : f32 to vector<8x256xf32>
      %c0_10 = arith.constant 0 : index
      %c0_11 = arith.constant 0 : index
      %13 = vector.load %arg8[%c0_10, %c0_11] : memref<8x256xf32, #tpu.memory_space<vmem>>, vector<8x256xf32>
      tpu.vector_store %arg8[%c0_10, %c0_11], %12 {strides = array<i32>} : memref<8x256xf32, #tpu.memory_space<vmem>>, vector<8x256xf32>,
    } else {
    }
    %c0 = arith.constant 0 : index
    %c0_1 = arith.constant 0 : index
    %3 = vector.load %arg8[%c0, %c0_1] : memref<8x256xf32, #tpu.memory_space<vmem>>, vector<8x256xf32>
    %c0_2 = arith.constant 0 : index
    %c0_3 = arith.constant 0 : index
    %4 = vector.load %arg3[%c0_2, %c0_3] : memref<8x512xbf16, #tpu.memory_space<vmem>>, vector<8x512xbf16>
    %c0_4 = arith.constant 0 : index
    %c0_5 = arith.constant 0 : index
    %5 = vector.load %arg4[%c0_4, %c0_5] : memref<512x256xbf16, #tpu.memory_space<vmem>>, vector<512x256xbf16>
    %cst = arith.constant dense<0.000000e+00> : vector<8x256xf32>
    %6 = tpu.matmul %4, %5, %cst {dimension_numbers = #tpu.dot_dimension_numbers<[1], [0], [0], [1], [0, 0, 1, 1], [], []>} : vector<8x512xbf16>, vector<512x256xbf16>, vector<8x256xf32> -> vector<8x256xf32>
    %7 = arith.addf %3, %6 : vector<8x256xf32>
    %c0_6 = arith.constant 0 : index
    %c0_7 = arith.constant 0 : index
    %8 = vector.load %arg8[%c0_6, %c0_7] : memref<8x256xf32, #tpu.memory_space<vmem>>, vector<8x256xf32>
    tpu.vector_store %arg8[%c0_6, %c0_7], %7 {strides = array<i32>} : memref<8x256xf32, #tpu.memory_space<vmem>>, vector<8x256xf32>,
    %c3_i32 = arith.constant 3 : i32
    %9 = arith.cmpi eq, %arg2, %c3_i32 : i32
    %10 = arith.extui %9 : i1 to i32
    %c0_i32_8 = arith.constant 0 : i32
    %11 = arith.cmpi ne, %10, %c0_i32_8 : i32
    scf.if %11 {
      %c0_9 = arith.constant 0 : index
      %c0_10 = arith.constant 0 : index
      %12 = vector.load %arg8[%c0_9, %c0_10] : memref<8x256xf32, #tpu.memory_space<vmem>>, vector<8x256xf32>
      %c0_11 = arith.constant 0 : index
      %c0_12 = arith.constant 0 : index
      %13 = vector.load %arg5[%c0_11, %c0_12] : memref<1x256xf32, #tpu.memory_space<vmem>>, vector<1x256xf32>
      %14 = vector.broadcast %13 : vector<1x256xf32> to vector<8x256xf32>
      %15 = arith.addf %12, %14 : vector<8x256xf32>
      %16 = arith.truncf %15 : vector<8x256xf32> to vector<8x256xbf16>
      %c0_13 = arith.constant 0 : index
      %c0_14 = arith.constant 0 : index
      %17 = vector.load %arg6[%c0_13, %c0_14] : memref<8x256xbf16, #tpu.memory_space<vmem>>, vector<8x256xbf16>
      tpu.vector_store %arg6[%c0_13, %c0_14], %16 {strides = array<i32>} : memref<8x256xbf16, #tpu.memory_space<vmem>>, vector<8x256xbf16>,
      %cst_15 = arith.constant dense<0.000000e+00> : vector<256xf32>
      %18 = vector.multi_reduction <add>, %15, %cst_15 [0] : vector<8x256xf32> to vector<256xf32>
      %19 = vector.shape_cast %18 : vector<256xf32> to vector<1x256xf32>
      %20 = arith.mulf %15, %15 : vector<8x256xf32>
      %cst_16 = arith.constant dense<0.000000e+00> : vector<256xf32>
      %21 = vector.multi_reduction <add>, %20, %cst_16 [0] : vector<8x256xf32> to vector<256xf32>
      %22 = vector.shape_cast %21 : vector<256xf32> to vector<1x256xf32>
      %23 = tpu.concatenate %19, %22 in 0 : vector<1x256xf32>, vector<1x256xf32> -> vector<2x256xf32>
      %c0_17 = arith.constant 0 : index
      %c0_18 = arith.constant 0 : index
      %c0_19 = arith.constant 0 : index
      %24 = vector.load %arg7[%c0_17, %c0_18, %c0_19] : memref<1x2x256xf32, #tpu.memory_space<vmem>>, vector<1x2x256xf32>
      %25 = vector.shape_cast %24 : vector<1x2x256xf32> to vector<2x256xf32>
      %26 = vector.shape_cast %23 : vector<2x256xf32> to vector<1x2x256xf32>
      tpu.vector_store %arg7[%c0_17, %c0_18, %c0_19], %26 {strides = array<i32>} : memref<1x2x256xf32, #tpu.memory_space<vmem>>, vector<1x2x256xf32>,
    } else {
    }
    return
  }
  func.func @transform_0(%arg0: i32, %arg1: i32, %arg2: i32) -> (i32, i32) {
    %c0_i32 = arith.constant 0 : i32
    return %arg0, %arg2 : i32, i32
  }
  func.func @transform_1(%arg0: i32, %arg1: i32, %arg2: i32) -> (i32, i32) {
    %c0_i32 = arith.constant 0 : i32
    return %arg2, %arg1 : i32, i32
  }
  func.func @transform_2(%arg0: i32, %arg1: i32, %arg2: i32) -> (i32, i32) {
    %c0_i32 = arith.constant 0 : i32
    %c0_i32_0 = arith.constant 0 : i32
    return %c0_i32, %arg1 : i32, i32
  }
  func.func @transform_3(%arg0: i32, %arg1: i32, %arg2: i32) -> (i32, i32) {
    %c0_i32 = arith.constant 0 : i32
    return %arg0, %arg1 : i32, i32
  }
  func.func @transform_4(%arg0: i32, %arg1: i32, %arg2: i32) -> (i32, i32, i32) {
    %c0_i32 = arith.constant 0 : i32
    %c0_i32_0 = arith.constant 0 : i32
    return %arg0, %c0_i32, %arg1 : i32, i32, i32
  }
}

module attributes {stable_mosaic.version = 11 : i64} {
  func.func @_matmul_kernel(%arg0: i32, %arg1: i32, %arg2: i32, %arg3: memref<8x512xbf16, #tpu.memory_space<vmem>>, %arg4: memref<512x256xbf16, #tpu.memory_space<vmem>>, %arg5: memref<1x256xf32, #tpu.memory_space<vmem>>, %arg6: memref<8x256xbf16, #tpu.memory_space<vmem>>, %arg7: memref<1x2x256xf32, #tpu.memory_space<vmem>>, %arg8: memref<8x256xf32, #tpu.memory_space<vmem>>) attributes {dimension_semantics = [#tpu.dimension_semantics<parallel>, #tpu.dimension_semantics<parallel>, #tpu.dimension_semantics<arbitrary>], iteration_bounds = array<i64: 1, 1, 4>, scalar_prefetch = 0 : i64, scratch_operands = 1 : i64, tpu.core_type = #tpu.core_type<tc>, window_params = [{transform_indices = @transform_0, window_bounds = array<i64: 8, 512>}, {transform_indices = @transform_1, window_bounds = array<i64: 512, 256>}, {transform_indices = @transform_2, window_bounds = array<i64: 1, 256>}, {transform_indices = @transform_3, window_bounds = array<i64: 8, 256>}, {transform_indices = @transform_4, window_bounds = array<i64: 1, 2, 256>}]} {
    %c0_i32 = arith.constant 0 : i32
    %0 = arith.cmpi eq, %arg2, %c0_i32 : i32
    %1 = arith.extui %0 : i1 to i32
    %c0_i32_0 = arith.constant 0 : i32
    %2 = arith.cmpi ne, %1, %c0_i32_0 : i32
    scf.if %2 {
      %cst_9 = arith.constant 0.000000e+00 : f32
      %12 = vector.broadcast %cst_9 : f32 to vector<8x256xf32>
      %c0_10 = arith.constant 0 : index
      %c0_11 = arith.constant 0 : index
      %13 = vector.load %arg8[%c0_10, %c0_11] : memref<8x256xf32, #tpu.memory_space<vmem>>, vector<8x256xf32>
      tpu.vector_store %arg8[%c0_10, %c0_11], %12 {strides = array<i32>} : memref<8x256xf32, #tpu.memory_space<vmem>>, vector<8x256xf32>,
    } else {
    }
    %c0 = arith.constant 0 : index
    %c0_1 = arith.constant 0 : index
    %3 = vector.load %arg8[%c0, %c0_1] : memref<8x256xf32, #tpu.memory_space<vmem>>, vector<8x256xf32>
    %c0_2 = arith.constant 0 : index
    %c0_3 = arith.constant 0 : index
    %4 = vector.load %arg3[%c0_2, %c0_3] : memref<8x512xbf16, #tpu.memory_space<vmem>>, vector<8x512xbf16>
    %c0_4 = arith.constant 0 : index
    %c0_5 = arith.constant 0 : index
    %5 = vector.load %arg4[%c0_4, %c0_5] : memref<512x256xbf16, #tpu.memory_space<vmem>>, vector<512x256xbf16>
    %cst = arith.constant dense<0.000000e+00> : vector<8x256xf32>
    %6 = tpu.matmul %4, %5, %cst {dimension_numbers = #tpu.dot_dimension_numbers<[1], [0], [0], [1], [0, 0, 1, 1], [], []>} : vector<8x512xbf16>, vector<512x256xbf16>, vector<8x256xf32> -> vector<8x256xf32>
    %7 = arith.addf %3, %6 : vector<8x256xf32>
    %c0_6 = arith.constant 0 : index
    %c0_7 = arith.constant 0 : index
    %8 = vector.load %arg8[%c0_6, %c0_7] : memref<8x256xf32, #tpu.memory_space<vmem>>, vector<8x256xf32>
    tpu.vector_store %arg8[%c0_6, %c0_7], %7 {strides = array<i32>} : memref<8x256xf32, #tpu.memory_space<vmem>>, vector<8x256xf32>,
    %c3_i32 = arith.constant 3 : i32
    %9 = arith.cmpi eq, %arg2, %c3_i32 : i32
    %10 = arith.extui %9 : i1 to i32
    %c0_i32_8 = arith.constant 0 : i32
    %11 = arith.cmpi ne, %10, %c0_i32_8 : i32
    scf.if %11 {
      %c0_9 = arith.constant 0 : index
      %c0_10 = arith.constant 0 : index
      %12 = vector.load %arg8[%c0_9, %c0_10] : memref<8x256xf32, #tpu.memory_space<vmem>>, vector<8x256xf32>
      %c0_11 = arith.constant 0 : index
      %c0_12 = arith.constant 0 : index
      %13 = vector.load %arg5[%c0_11, %c0_12] : memref<1x256xf32, #tpu.memory_space<vmem>>, vector<1x256xf32>
      %14 = vector.broadcast %13 : vector<1x256xf32> to vector<8x256xf32>
      %15 = arith.addf %12, %14 : vector<8x256xf32>
      %16 = arith.truncf %15 : vector<8x256xf32> to vector<8x256xbf16>
      %c0_13 = arith.constant 0 : index
      %c0_14 = arith.constant 0 : index
      %17 = vector.load %arg6[%c0_13, %c0_14] : memref<8x256xbf16, #tpu.memory_space<vmem>>, vector<8x256xbf16>
      tpu.vector_store %arg6[%c0_13, %c0_14], %16 {strides = array<i32>} : memref<8x256xbf16, #tpu.memory_space<vmem>>, vector<8x256xbf16>,
      %cst_15 = arith.constant dense<0.000000e+00> : vector<256xf32>
      %18 = vector.multi_reduction <add>, %15, %cst_15 [0] : vector<8x256xf32> to vector<256xf32>
      %19 = vector.shape_cast %18 : vector<256xf32> to vector<1x256xf32>
      %20 = arith.mulf %15, %15 : vector<8x256xf32>
      %cst_16 = arith.constant dense<0.000000e+00> : vector<256xf32>
      %21 = vector.multi_reduction <add>, %20, %cst_16 [0] : vector<8x256xf32> to vector<256xf32>
      %22 = vector.shape_cast %21 : vector<256xf32> to vector<1x256xf32>
      %23 = tpu.concatenate %19, %22 in 0 : vector<1x256xf32>, vector<1x256xf32> -> vector<2x256xf32>
      %c0_17 = arith.constant 0 : index
      %c0_18 = arith.constant 0 : index
      %c0_19 = arith.constant 0 : index
      %24 = vector.load %arg7[%c0_17, %c0_18, %c0_19] : memref<1x2x256xf32, #tpu.memory_space<vmem>>, vector<1x2x256xf32>
      %25 = vector.shape_cast %24 : vector<1x2x256xf32> to vector<2x256xf32>
      %26 = vector.shape_cast %23 : vector<2x256xf32> to vector<1x2x256xf32>
      tpu.vector_store %arg7[%c0_17, %c0_18, %c0_19], %26 {strides = array<i32>} : memref<1x2x256xf32, #tpu.memory_space<vmem>>, vector<1x2x256xf32>,
    } else {
    }
    return
  }
  func.func @transform_0(%arg0: i32, %arg1: i32, %arg2: i32) -> (i32, i32) {
    %c0_i32 = arith.constant 0 : i32
    return %arg0, %arg2 : i32, i32
  }
  func.func @transform_1(%arg0: i32, %arg1: i32, %arg2: i32) -> (i32, i32) {
    %c0_i32 = arith.constant 0 : i32
    return %arg2, %arg1 : i32, i32
  }
  func.func @transform_2(%arg0: i32, %arg1: i32, %arg2: i32) -> (i32, i32) {
    %c0_i32 = arith.constant 0 : i32
    %c0_i32_0 = arith.constant 0 : i32
    return %c0_i32, %arg1 : i32, i32
  }
  func.func @transform_3(%arg0: i32, %arg1: i32, %arg2: i32) -> (i32, i32) {
    %c0_i32 = arith.constant 0 : i32
    return %arg0, %arg1 : i32, i32
  }
  func.func @transform_4(%arg0: i32, %arg1: i32, %arg2: i32) -> (i32, i32, i32) {
    %c0_i32 = arith.constant 0 : i32
    %c0_i32_0 = arith.constant 0 : i32
    return %arg0, %c0_i32, %arg1 : i32, i32, i32
  }
}

module attributes {stable_mosaic.version = 11 : i64} {
  func.func @_bn_relu_kernel(%arg0: i32, %arg1: i32, %arg2: memref<32x256xbf16, #tpu.memory_space<vmem>>, %arg3: memref<2x256xf32, #tpu.memory_space<vmem>>, %arg4: memref<32x256xbf16, #tpu.memory_space<vmem>>) attributes {dimension_semantics = [#tpu.dimension_semantics<parallel>, #tpu.dimension_semantics<parallel>], iteration_bounds = array<i64: 1, 1>, scalar_prefetch = 0 : i64, scratch_operands = 0 : i64, tpu.core_type = #tpu.core_type<tc>, window_params = [{transform_indices = @transform_0, window_bounds = array<i64: 32, 256>}, {transform_indices = @transform_1, window_bounds = array<i64: 2, 256>}, {transform_indices = @transform_2, window_bounds = array<i64: 32, 256>}]} {
    %c0 = arith.constant 0 : index
    %c0_0 = arith.constant 0 : index
    %0 = vector.load %arg3[%c0, %c0_0] : memref<2x256xf32, #tpu.memory_space<vmem>>, vector<2x256xf32>
    %1 = vector.extract_strided_slice %0 {offsets = [0, 0], sizes = [1, 256], strides = [1, 1]} : vector<2x256xf32> to vector<1x256xf32>
    %cst = arith.constant 3.125000e-02 : f32
    %2 = vector.broadcast %cst : f32 to vector<1x256xf32>
    %3 = arith.mulf %1, %2 : vector<1x256xf32>
    %4 = vector.extract_strided_slice %0 {offsets = [1, 0], sizes = [1, 256], strides = [1, 1]} : vector<2x256xf32> to vector<1x256xf32>
    %cst_1 = arith.constant 3.125000e-02 : f32
    %5 = vector.broadcast %cst_1 : f32 to vector<1x256xf32>
    %6 = arith.mulf %4, %5 : vector<1x256xf32>
    %7 = arith.mulf %3, %3 : vector<1x256xf32>
    %8 = arith.subf %6, %7 : vector<1x256xf32>
    %cst_2 = arith.constant 9.99999974E-6 : f32
    %9 = vector.broadcast %cst_2 : f32 to vector<1x256xf32>
    %10 = arith.addf %8, %9 : vector<1x256xf32>
    %11 = math.rsqrt %10 : vector<1x256xf32>
    %c0_3 = arith.constant 0 : index
    %c0_4 = arith.constant 0 : index
    %12 = vector.load %arg2[%c0_3, %c0_4] : memref<32x256xbf16, #tpu.memory_space<vmem>>, vector<32x256xbf16>
    %13 = arith.extf %12 : vector<32x256xbf16> to vector<32x256xf32>
    %14 = vector.broadcast %3 : vector<1x256xf32> to vector<32x256xf32>
    %15 = arith.subf %13, %14 : vector<32x256xf32>
    %16 = vector.broadcast %11 : vector<1x256xf32> to vector<32x256xf32>
    %17 = arith.mulf %15, %16 : vector<32x256xf32>
    %cst_5 = arith.constant 0.000000e+00 : f32
    %18 = vector.broadcast %cst_5 : f32 to vector<32x256xf32>
    %19 = arith.maximumf %17, %18 : vector<32x256xf32>
    %20 = arith.truncf %19 : vector<32x256xf32> to vector<32x256xbf16>
    %c0_6 = arith.constant 0 : index
    %c0_7 = arith.constant 0 : index
    %21 = vector.load %arg4[%c0_6, %c0_7] : memref<32x256xbf16, #tpu.memory_space<vmem>>, vector<32x256xbf16>
    tpu.vector_store %arg4[%c0_6, %c0_7], %20 {strides = array<i32>} : memref<32x256xbf16, #tpu.memory_space<vmem>>, vector<32x256xbf16>,
    return
  }
  func.func @transform_0(%arg0: i32, %arg1: i32) -> (i32, i32) {
    %c0_i32 = arith.constant 0 : i32
    return %arg0, %arg1 : i32, i32
  }
  func.func @transform_1(%arg0: i32, %arg1: i32) -> (i32, i32) {
    %c0_i32 = arith.constant 0 : i32
    %c0_i32_0 = arith.constant 0 : i32
    return %c0_i32, %arg1 : i32, i32
  }
  func.func @transform_2(%arg0: i32, %arg1: i32) -> (i32, i32) {
    %c0_i32 = arith.constant 0 : i32
    return %arg0, %arg1 : i32, i32
  }
}

module attributes {stable_mosaic.version = 11 : i64} {
  func.func @_matmul_kernel(%arg0: i32, %arg1: i32, %arg2: i32, %arg3: memref<32x512xbf16, #tpu.memory_space<vmem>>, %arg4: memref<512x128xbf16, #tpu.memory_space<vmem>>, %arg5: memref<1x128xf32, #tpu.memory_space<vmem>>, %arg6: memref<32x128xbf16, #tpu.memory_space<vmem>>, %arg7: memref<1x2x128xf32, #tpu.memory_space<vmem>>, %arg8: memref<32x128xf32, #tpu.memory_space<vmem>>) attributes {dimension_semantics = [#tpu.dimension_semantics<parallel>, #tpu.dimension_semantics<parallel>, #tpu.dimension_semantics<arbitrary>], iteration_bounds = array<i64: 1, 1, 2>, scalar_prefetch = 0 : i64, scratch_operands = 1 : i64, tpu.core_type = #tpu.core_type<tc>, window_params = [{transform_indices = @transform_0, window_bounds = array<i64: 32, 512>}, {transform_indices = @transform_1, window_bounds = array<i64: 512, 128>}, {transform_indices = @transform_2, window_bounds = array<i64: 1, 128>}, {transform_indices = @transform_3, window_bounds = array<i64: 32, 128>}, {transform_indices = @transform_4, window_bounds = array<i64: 1, 2, 128>}]} {
    %c0_i32 = arith.constant 0 : i32
    %0 = arith.cmpi eq, %arg2, %c0_i32 : i32
    %1 = arith.extui %0 : i1 to i32
    %c0_i32_0 = arith.constant 0 : i32
    %2 = arith.cmpi ne, %1, %c0_i32_0 : i32
    scf.if %2 {
      %cst_9 = arith.constant 0.000000e+00 : f32
      %12 = vector.broadcast %cst_9 : f32 to vector<32x128xf32>
      %c0_10 = arith.constant 0 : index
      %c0_11 = arith.constant 0 : index
      %13 = vector.load %arg8[%c0_10, %c0_11] : memref<32x128xf32, #tpu.memory_space<vmem>>, vector<32x128xf32>
      tpu.vector_store %arg8[%c0_10, %c0_11], %12 {strides = array<i32>} : memref<32x128xf32, #tpu.memory_space<vmem>>, vector<32x128xf32>,
    } else {
    }
    %c0 = arith.constant 0 : index
    %c0_1 = arith.constant 0 : index
    %3 = vector.load %arg8[%c0, %c0_1] : memref<32x128xf32, #tpu.memory_space<vmem>>, vector<32x128xf32>
    %c0_2 = arith.constant 0 : index
    %c0_3 = arith.constant 0 : index
    %4 = vector.load %arg3[%c0_2, %c0_3] : memref<32x512xbf16, #tpu.memory_space<vmem>>, vector<32x512xbf16>
    %c0_4 = arith.constant 0 : index
    %c0_5 = arith.constant 0 : index
    %5 = vector.load %arg4[%c0_4, %c0_5] : memref<512x128xbf16, #tpu.memory_space<vmem>>, vector<512x128xbf16>
    %cst = arith.constant dense<0.000000e+00> : vector<32x128xf32>
    %6 = tpu.matmul %4, %5, %cst {dimension_numbers = #tpu.dot_dimension_numbers<[1], [0], [0], [1], [0, 0, 1, 1], [], []>} : vector<32x512xbf16>, vector<512x128xbf16>, vector<32x128xf32> -> vector<32x128xf32>
    %7 = arith.addf %3, %6 : vector<32x128xf32>
    %c0_6 = arith.constant 0 : index
    %c0_7 = arith.constant 0 : index
    %8 = vector.load %arg8[%c0_6, %c0_7] : memref<32x128xf32, #tpu.memory_space<vmem>>, vector<32x128xf32>
    tpu.vector_store %arg8[%c0_6, %c0_7], %7 {strides = array<i32>} : memref<32x128xf32, #tpu.memory_space<vmem>>, vector<32x128xf32>,
    %c1_i32 = arith.constant 1 : i32
    %9 = arith.cmpi eq, %arg2, %c1_i32 : i32
    %10 = arith.extui %9 : i1 to i32
    %c0_i32_8 = arith.constant 0 : i32
    %11 = arith.cmpi ne, %10, %c0_i32_8 : i32
    scf.if %11 {
      %c0_9 = arith.constant 0 : index
      %c0_10 = arith.constant 0 : index
      %12 = vector.load %arg8[%c0_9, %c0_10] : memref<32x128xf32, #tpu.memory_space<vmem>>, vector<32x128xf32>
      %c0_11 = arith.constant 0 : index
      %c0_12 = arith.constant 0 : index
      %13 = vector.load %arg5[%c0_11, %c0_12] : memref<1x128xf32, #tpu.memory_space<vmem>>, vector<1x128xf32>
      %14 = vector.broadcast %13 : vector<1x128xf32> to vector<32x128xf32>
      %15 = arith.addf %12, %14 : vector<32x128xf32>
      %16 = arith.truncf %15 : vector<32x128xf32> to vector<32x128xbf16>
      %c0_13 = arith.constant 0 : index
      %c0_14 = arith.constant 0 : index
      %17 = vector.load %arg6[%c0_13, %c0_14] : memref<32x128xbf16, #tpu.memory_space<vmem>>, vector<32x128xbf16>
      tpu.vector_store %arg6[%c0_13, %c0_14], %16 {strides = array<i32>} : memref<32x128xbf16, #tpu.memory_space<vmem>>, vector<32x128xbf16>,
      %cst_15 = arith.constant dense<0.000000e+00> : vector<128xf32>
      %18 = vector.multi_reduction <add>, %15, %cst_15 [0] : vector<32x128xf32> to vector<128xf32>
      %19 = vector.shape_cast %18 : vector<128xf32> to vector<1x128xf32>
      %20 = arith.mulf %15, %15 : vector<32x128xf32>
      %cst_16 = arith.constant dense<0.000000e+00> : vector<128xf32>
      %21 = vector.multi_reduction <add>, %20, %cst_16 [0] : vector<32x128xf32> to vector<128xf32>
      %22 = vector.shape_cast %21 : vector<128xf32> to vector<1x128xf32>
      %23 = tpu.concatenate %19, %22 in 0 : vector<1x128xf32>, vector<1x128xf32> -> vector<2x128xf32>
      %c0_17 = arith.constant 0 : index
      %c0_18 = arith.constant 0 : index
      %c0_19 = arith.constant 0 : index
      %24 = vector.load %arg7[%c0_17, %c0_18, %c0_19] : memref<1x2x128xf32, #tpu.memory_space<vmem>>, vector<1x2x128xf32>
      %25 = vector.shape_cast %24 : vector<1x2x128xf32> to vector<2x128xf32>
      %26 = vector.shape_cast %23 : vector<2x128xf32> to vector<1x2x128xf32>
      tpu.vector_store %arg7[%c0_17, %c0_18, %c0_19], %26 {strides = array<i32>} : memref<1x2x128xf32, #tpu.memory_space<vmem>>, vector<1x2x128xf32>,
    } else {
    }
    return
  }
  func.func @transform_0(%arg0: i32, %arg1: i32, %arg2: i32) -> (i32, i32) {
    %c0_i32 = arith.constant 0 : i32
    return %arg0, %arg2 : i32, i32
  }
  func.func @transform_1(%arg0: i32, %arg1: i32, %arg2: i32) -> (i32, i32) {
    %c0_i32 = arith.constant 0 : i32
    return %arg2, %arg1 : i32, i32
  }
  func.func @transform_2(%arg0: i32, %arg1: i32, %arg2: i32) -> (i32, i32) {
    %c0_i32 = arith.constant 0 : i32
    %c0_i32_0 = arith.constant 0 : i32
    return %c0_i32, %arg1 : i32, i32
  }
  func.func @transform_3(%arg0: i32, %arg1: i32, %arg2: i32) -> (i32, i32) {
    %c0_i32 = arith.constant 0 : i32
    return %arg0, %arg1 : i32, i32
  }
  func.func @transform_4(%arg0: i32, %arg1: i32, %arg2: i32) -> (i32, i32, i32) {
    %c0_i32 = arith.constant 0 : i32
    %c0_i32_0 = arith.constant 0 : i32
    return %arg0, %c0_i32, %arg1 : i32, i32, i32
  }
}

module attributes {stable_mosaic.version = 11 : i64} {
  func.func @_bn_relu_kernel(%arg0: i32, %arg1: i32, %arg2: memref<128x128xbf16, #tpu.memory_space<vmem>>, %arg3: memref<2x128xf32, #tpu.memory_space<vmem>>, %arg4: memref<128x128xbf16, #tpu.memory_space<vmem>>) attributes {dimension_semantics = [#tpu.dimension_semantics<parallel>, #tpu.dimension_semantics<parallel>], iteration_bounds = array<i64: 1, 1>, scalar_prefetch = 0 : i64, scratch_operands = 0 : i64, tpu.core_type = #tpu.core_type<tc>, window_params = [{transform_indices = @transform_0, window_bounds = array<i64: 128, 128>}, {transform_indices = @transform_1, window_bounds = array<i64: 2, 128>}, {transform_indices = @transform_2, window_bounds = array<i64: 128, 128>}]} {
    %c0 = arith.constant 0 : index
    %c0_0 = arith.constant 0 : index
    %0 = vector.load %arg3[%c0, %c0_0] : memref<2x128xf32, #tpu.memory_space<vmem>>, vector<2x128xf32>
    %1 = vector.extract_strided_slice %0 {offsets = [0, 0], sizes = [1, 128], strides = [1, 1]} : vector<2x128xf32> to vector<1x128xf32>
    %cst = arith.constant 7.812500e-03 : f32
    %2 = vector.broadcast %cst : f32 to vector<1x128xf32>
    %3 = arith.mulf %1, %2 : vector<1x128xf32>
    %4 = vector.extract_strided_slice %0 {offsets = [1, 0], sizes = [1, 128], strides = [1, 1]} : vector<2x128xf32> to vector<1x128xf32>
    %cst_1 = arith.constant 7.812500e-03 : f32
    %5 = vector.broadcast %cst_1 : f32 to vector<1x128xf32>
    %6 = arith.mulf %4, %5 : vector<1x128xf32>
    %7 = arith.mulf %3, %3 : vector<1x128xf32>
    %8 = arith.subf %6, %7 : vector<1x128xf32>
    %cst_2 = arith.constant 9.99999974E-6 : f32
    %9 = vector.broadcast %cst_2 : f32 to vector<1x128xf32>
    %10 = arith.addf %8, %9 : vector<1x128xf32>
    %11 = math.rsqrt %10 : vector<1x128xf32>
    %c0_3 = arith.constant 0 : index
    %c0_4 = arith.constant 0 : index
    %12 = vector.load %arg2[%c0_3, %c0_4] : memref<128x128xbf16, #tpu.memory_space<vmem>>, vector<128x128xbf16>
    %13 = arith.extf %12 : vector<128x128xbf16> to vector<128x128xf32>
    %14 = vector.broadcast %3 : vector<1x128xf32> to vector<128x128xf32>
    %15 = arith.subf %13, %14 : vector<128x128xf32>
    %16 = vector.broadcast %11 : vector<1x128xf32> to vector<128x128xf32>
    %17 = arith.mulf %15, %16 : vector<128x128xf32>
    %cst_5 = arith.constant 0.000000e+00 : f32
    %18 = vector.broadcast %cst_5 : f32 to vector<128x128xf32>
    %19 = arith.maximumf %17, %18 : vector<128x128xf32>
    %20 = arith.truncf %19 : vector<128x128xf32> to vector<128x128xbf16>
    %c0_6 = arith.constant 0 : index
    %c0_7 = arith.constant 0 : index
    %21 = vector.load %arg4[%c0_6, %c0_7] : memref<128x128xbf16, #tpu.memory_space<vmem>>, vector<128x128xbf16>
    tpu.vector_store %arg4[%c0_6, %c0_7], %20 {strides = array<i32>} : memref<128x128xbf16, #tpu.memory_space<vmem>>, vector<128x128xbf16>,
    return
  }
  func.func @transform_0(%arg0: i32, %arg1: i32) -> (i32, i32) {
    %c0_i32 = arith.constant 0 : i32
    return %arg0, %arg1 : i32, i32
  }
  func.func @transform_1(%arg0: i32, %arg1: i32) -> (i32, i32) {
    %c0_i32 = arith.constant 0 : i32
    %c0_i32_0 = arith.constant 0 : i32
    return %c0_i32, %arg1 : i32, i32
  }
  func.func @transform_2(%arg0: i32, %arg1: i32) -> (i32, i32) {
    %c0_i32 = arith.constant 0 : i32
    return %arg0, %arg1 : i32, i32
  }
}

module attributes {stable_mosaic.version = 11 : i64} {
  func.func @_matmul_kernel(%arg0: i32, %arg1: i32, %arg2: i32, %arg3: memref<128x512xbf16, #tpu.memory_space<vmem>>, %arg4: memref<512x128xbf16, #tpu.memory_space<vmem>>, %arg5: memref<1x128xf32, #tpu.memory_space<vmem>>, %arg6: memref<128x128xbf16, #tpu.memory_space<vmem>>, %arg7: memref<1x2x128xf32, #tpu.memory_space<vmem>>, %arg8: memref<128x128xf32, #tpu.memory_space<vmem>>) attributes {dimension_semantics = [#tpu.dimension_semantics<parallel>, #tpu.dimension_semantics<parallel>, #tpu.dimension_semantics<arbitrary>], iteration_bounds = array<i64: 1, 1, 1>, scalar_prefetch = 0 : i64, scratch_operands = 1 : i64, tpu.core_type = #tpu.core_type<tc>, window_params = [{transform_indices = @transform_0, window_bounds = array<i64: 128, 512>}, {transform_indices = @transform_1, window_bounds = array<i64: 512, 128>}, {transform_indices = @transform_2, window_bounds = array<i64: 1, 128>}, {transform_indices = @transform_3, window_bounds = array<i64: 128, 128>}, {transform_indices = @transform_4, window_bounds = array<i64: 1, 2, 128>}]} {
    %c0_i32 = arith.constant 0 : i32
    %0 = arith.cmpi eq, %arg2, %c0_i32 : i32
    %1 = arith.extui %0 : i1 to i32
    %c0_i32_0 = arith.constant 0 : i32
    %2 = arith.cmpi ne, %1, %c0_i32_0 : i32
    scf.if %2 {
      %cst_10 = arith.constant 0.000000e+00 : f32
      %12 = vector.broadcast %cst_10 : f32 to vector<128x128xf32>
      %c0_11 = arith.constant 0 : index
      %c0_12 = arith.constant 0 : index
      %13 = vector.load %arg8[%c0_11, %c0_12] : memref<128x128xf32, #tpu.memory_space<vmem>>, vector<128x128xf32>
      tpu.vector_store %arg8[%c0_11, %c0_12], %12 {strides = array<i32>} : memref<128x128xf32, #tpu.memory_space<vmem>>, vector<128x128xf32>,
    } else {
    }
    %c0 = arith.constant 0 : index
    %c0_1 = arith.constant 0 : index
    %3 = vector.load %arg8[%c0, %c0_1] : memref<128x128xf32, #tpu.memory_space<vmem>>, vector<128x128xf32>
    %c0_2 = arith.constant 0 : index
    %c0_3 = arith.constant 0 : index
    %4 = vector.load %arg3[%c0_2, %c0_3] : memref<128x512xbf16, #tpu.memory_space<vmem>>, vector<128x512xbf16>
    %c0_4 = arith.constant 0 : index
    %c0_5 = arith.constant 0 : index
    %5 = vector.load %arg4[%c0_4, %c0_5] : memref<512x128xbf16, #tpu.memory_space<vmem>>, vector<512x128xbf16>
    %cst = arith.constant dense<0.000000e+00> : vector<128x128xf32>
    %6 = tpu.matmul %4, %5, %cst {dimension_numbers = #tpu.dot_dimension_numbers<[1], [0], [0], [1], [0, 0, 1, 1], [], []>} : vector<128x512xbf16>, vector<512x128xbf16>, vector<128x128xf32> -> vector<128x128xf32>
    %7 = arith.addf %3, %6 : vector<128x128xf32>
    %c0_6 = arith.constant 0 : index
    %c0_7 = arith.constant 0 : index
    %8 = vector.load %arg8[%c0_6, %c0_7] : memref<128x128xf32, #tpu.memory_space<vmem>>, vector<128x128xf32>
    tpu.vector_store %arg8[%c0_6, %c0_7], %7 {strides = array<i32>} : memref<128x128xf32, #tpu.memory_space<vmem>>, vector<128x128xf32>,
    %c0_i32_8 = arith.constant 0 : i32
    %9 = arith.cmpi eq, %arg2, %c0_i32_8 : i32
    %10 = arith.extui %9 : i1 to i32
    %c0_i32_9 = arith.constant 0 : i32
    %11 = arith.cmpi ne, %10, %c0_i32_9 : i32
    scf.if %11 {
      %c0_10 = arith.constant 0 : index
      %c0_11 = arith.constant 0 : index
      %12 = vector.load %arg8[%c0_10, %c0_11] : memref<128x128xf32, #tpu.memory_space<vmem>>, vector<128x128xf32>
      %c0_12 = arith.constant 0 : index
      %c0_13 = arith.constant 0 : index
      %13 = vector.load %arg5[%c0_12, %c0_13] : memref<1x128xf32, #tpu.memory_space<vmem>>, vector<1x128xf32>
      %14 = vector.broadcast %13 : vector<1x128xf32> to vector<128x128xf32>
      %15 = arith.addf %12, %14 : vector<128x128xf32>
      %16 = arith.truncf %15 : vector<128x128xf32> to vector<128x128xbf16>
      %c0_14 = arith.constant 0 : index
      %c0_15 = arith.constant 0 : index
      %17 = vector.load %arg6[%c0_14, %c0_15] : memref<128x128xbf16, #tpu.memory_space<vmem>>, vector<128x128xbf16>
      tpu.vector_store %arg6[%c0_14, %c0_15], %16 {strides = array<i32>} : memref<128x128xbf16, #tpu.memory_space<vmem>>, vector<128x128xbf16>,
      %cst_16 = arith.constant dense<0.000000e+00> : vector<128xf32>
      %18 = vector.multi_reduction <add>, %15, %cst_16 [0] : vector<128x128xf32> to vector<128xf32>
      %19 = vector.shape_cast %18 : vector<128xf32> to vector<1x128xf32>
      %20 = arith.mulf %15, %15 : vector<128x128xf32>
      %cst_17 = arith.constant dense<0.000000e+00> : vector<128xf32>
      %21 = vector.multi_reduction <add>, %20, %cst_17 [0] : vector<128x128xf32> to vector<128xf32>
      %22 = vector.shape_cast %21 : vector<128xf32> to vector<1x128xf32>
      %23 = tpu.concatenate %19, %22 in 0 : vector<1x128xf32>, vector<1x128xf32> -> vector<2x128xf32>
      %c0_18 = arith.constant 0 : index
      %c0_19 = arith.constant 0 : index
      %c0_20 = arith.constant 0 : index
      %24 = vector.load %arg7[%c0_18, %c0_19, %c0_20] : memref<1x2x128xf32, #tpu.memory_space<vmem>>, vector<1x2x128xf32>
      %25 = vector.shape_cast %24 : vector<1x2x128xf32> to vector<2x128xf32>
      %26 = vector.shape_cast %23 : vector<2x128xf32> to vector<1x2x128xf32>
      tpu.vector_store %arg7[%c0_18, %c0_19, %c0_20], %26 {strides = array<i32>} : memref<1x2x128xf32, #tpu.memory_space<vmem>>, vector<1x2x128xf32>,
    } else {
    }
    return
  }
  func.func @transform_0(%arg0: i32, %arg1: i32, %arg2: i32) -> (i32, i32) {
    %c0_i32 = arith.constant 0 : i32
    return %arg0, %arg2 : i32, i32
  }
  func.func @transform_1(%arg0: i32, %arg1: i32, %arg2: i32) -> (i32, i32) {
    %c0_i32 = arith.constant 0 : i32
    return %arg2, %arg1 : i32, i32
  }
  func.func @transform_2(%arg0: i32, %arg1: i32, %arg2: i32) -> (i32, i32) {
    %c0_i32 = arith.constant 0 : i32
    %c0_i32_0 = arith.constant 0 : i32
    return %c0_i32, %arg1 : i32, i32
  }
  func.func @transform_3(%arg0: i32, %arg1: i32, %arg2: i32) -> (i32, i32) {
    %c0_i32 = arith.constant 0 : i32
    return %arg0, %arg1 : i32, i32
  }
  func.func @transform_4(%arg0: i32, %arg1: i32, %arg2: i32) -> (i32, i32, i32) {
    %c0_i32 = arith.constant 0 : i32
    %c0_i32_0 = arith.constant 0 : i32
    return %arg0, %c0_i32, %arg1 : i32, i32, i32
  }
}

module attributes {stable_mosaic.version = 11 : i64} {
  func.func @_bn_relu_kernel(%arg0: i32, %arg1: i32, %arg2: memref<512x128xbf16, #tpu.memory_space<vmem>>, %arg3: memref<2x128xf32, #tpu.memory_space<vmem>>, %arg4: memref<512x128xbf16, #tpu.memory_space<vmem>>) attributes {dimension_semantics = [#tpu.dimension_semantics<parallel>, #tpu.dimension_semantics<parallel>], iteration_bounds = array<i64: 1, 1>, scalar_prefetch = 0 : i64, scratch_operands = 0 : i64, tpu.core_type = #tpu.core_type<tc>, window_params = [{transform_indices = @transform_0, window_bounds = array<i64: 512, 128>}, {transform_indices = @transform_1, window_bounds = array<i64: 2, 128>}, {transform_indices = @transform_2, window_bounds = array<i64: 512, 128>}]} {
    %c0 = arith.constant 0 : index
    %c0_0 = arith.constant 0 : index
    %0 = vector.load %arg3[%c0, %c0_0] : memref<2x128xf32, #tpu.memory_space<vmem>>, vector<2x128xf32>
    %1 = vector.extract_strided_slice %0 {offsets = [0, 0], sizes = [1, 128], strides = [1, 1]} : vector<2x128xf32> to vector<1x128xf32>
    %cst = arith.constant 0.001953125 : f32
    %2 = vector.broadcast %cst : f32 to vector<1x128xf32>
    %3 = arith.mulf %1, %2 : vector<1x128xf32>
    %4 = vector.extract_strided_slice %0 {offsets = [1, 0], sizes = [1, 128], strides = [1, 1]} : vector<2x128xf32> to vector<1x128xf32>
    %cst_1 = arith.constant 0.001953125 : f32
    %5 = vector.broadcast %cst_1 : f32 to vector<1x128xf32>
    %6 = arith.mulf %4, %5 : vector<1x128xf32>
    %7 = arith.mulf %3, %3 : vector<1x128xf32>
    %8 = arith.subf %6, %7 : vector<1x128xf32>
    %cst_2 = arith.constant 9.99999974E-6 : f32
    %9 = vector.broadcast %cst_2 : f32 to vector<1x128xf32>
    %10 = arith.addf %8, %9 : vector<1x128xf32>
    %11 = math.rsqrt %10 : vector<1x128xf32>
    %c0_3 = arith.constant 0 : index
    %c0_4 = arith.constant 0 : index
    %12 = vector.load %arg2[%c0_3, %c0_4] : memref<512x128xbf16, #tpu.memory_space<vmem>>, vector<512x128xbf16>
    %13 = arith.extf %12 : vector<512x128xbf16> to vector<512x128xf32>
    %14 = vector.broadcast %3 : vector<1x128xf32> to vector<512x128xf32>
    %15 = arith.subf %13, %14 : vector<512x128xf32>
    %16 = vector.broadcast %11 : vector<1x128xf32> to vector<512x128xf32>
    %17 = arith.mulf %15, %16 : vector<512x128xf32>
    %cst_5 = arith.constant 0.000000e+00 : f32
    %18 = vector.broadcast %cst_5 : f32 to vector<512x128xf32>
    %19 = arith.maximumf %17, %18 : vector<512x128xf32>
    %20 = arith.truncf %19 : vector<512x128xf32> to vector<512x128xbf16>
    %c0_6 = arith.constant 0 : index
    %c0_7 = arith.constant 0 : index
    %21 = vector.load %arg4[%c0_6, %c0_7] : memref<512x128xbf16, #tpu.memory_space<vmem>>, vector<512x128xbf16>
    tpu.vector_store %arg4[%c0_6, %c0_7], %20 {strides = array<i32>} : memref<512x128xbf16, #tpu.memory_space<vmem>>, vector<512x128xbf16>,
    return
  }
  func.func @transform_0(%arg0: i32, %arg1: i32) -> (i32, i32) {
    %c0_i32 = arith.constant 0 : i32
    return %arg0, %arg1 : i32, i32
  }
  func.func @transform_1(%arg0: i32, %arg1: i32) -> (i32, i32) {
    %c0_i32 = arith.constant 0 : i32
    %c0_i32_0 = arith.constant 0 : i32
    return %c0_i32, %arg1 : i32, i32
  }
  func.func @transform_2(%arg0: i32, %arg1: i32) -> (i32, i32) {
    %c0_i32 = arith.constant 0 : i32
    return %arg0, %arg1 : i32, i32
  }
}

module attributes {stable_mosaic.version = 11 : i64} {
  func.func @_matmul_kernel(%arg0: i32, %arg1: i32, %arg2: i32, %arg3: memref<512x384xbf16, #tpu.memory_space<vmem>>, %arg4: memref<384x128xbf16, #tpu.memory_space<vmem>>, %arg5: memref<1x128xf32, #tpu.memory_space<vmem>>, %arg6: memref<512x128xf32, #tpu.memory_space<vmem>>, %arg7: memref<512x128xf32, #tpu.memory_space<vmem>>) attributes {dimension_semantics = [#tpu.dimension_semantics<parallel>, #tpu.dimension_semantics<parallel>, #tpu.dimension_semantics<arbitrary>], iteration_bounds = array<i64: 1, 1, 3>, scalar_prefetch = 0 : i64, scratch_operands = 1 : i64, tpu.core_type = #tpu.core_type<tc>, window_params = [{transform_indices = @transform_0, window_bounds = array<i64: 512, 384>}, {transform_indices = @transform_1, window_bounds = array<i64: 384, 128>}, {transform_indices = @transform_2, window_bounds = array<i64: 1, 128>}, {transform_indices = @transform_3, window_bounds = array<i64: 512, 128>}]} {
    %c0_i32 = arith.constant 0 : i32
    %0 = arith.cmpi eq, %arg2, %c0_i32 : i32
    %1 = arith.extui %0 : i1 to i32
    %c0_i32_0 = arith.constant 0 : i32
    %2 = arith.cmpi ne, %1, %c0_i32_0 : i32
    scf.if %2 {
      %cst_9 = arith.constant 0.000000e+00 : f32
      %12 = vector.broadcast %cst_9 : f32 to vector<512x128xf32>
      %c0_10 = arith.constant 0 : index
      %c0_11 = arith.constant 0 : index
      %13 = vector.load %arg7[%c0_10, %c0_11] : memref<512x128xf32, #tpu.memory_space<vmem>>, vector<512x128xf32>
      tpu.vector_store %arg7[%c0_10, %c0_11], %12 {strides = array<i32>} : memref<512x128xf32, #tpu.memory_space<vmem>>, vector<512x128xf32>,
    } else {
    }
    %c0 = arith.constant 0 : index
    %c0_1 = arith.constant 0 : index
    %3 = vector.load %arg7[%c0, %c0_1] : memref<512x128xf32, #tpu.memory_space<vmem>>, vector<512x128xf32>
    %c0_2 = arith.constant 0 : index
    %c0_3 = arith.constant 0 : index
    %4 = vector.load %arg3[%c0_2, %c0_3] : memref<512x384xbf16, #tpu.memory_space<vmem>>, vector<512x384xbf16>
    %c0_4 = arith.constant 0 : index
    %c0_5 = arith.constant 0 : index
    %5 = vector.load %arg4[%c0_4, %c0_5] : memref<384x128xbf16, #tpu.memory_space<vmem>>, vector<384x128xbf16>
    %cst = arith.constant dense<0.000000e+00> : vector<512x128xf32>
    %6 = tpu.matmul %4, %5, %cst {dimension_numbers = #tpu.dot_dimension_numbers<[1], [0], [0], [1], [0, 0, 1, 1], [], []>} : vector<512x384xbf16>, vector<384x128xbf16>, vector<512x128xf32> -> vector<512x128xf32>
    %7 = arith.addf %3, %6 : vector<512x128xf32>
    %c0_6 = arith.constant 0 : index
    %c0_7 = arith.constant 0 : index
    %8 = vector.load %arg7[%c0_6, %c0_7] : memref<512x128xf32, #tpu.memory_space<vmem>>, vector<512x128xf32>
    tpu.vector_store %arg7[%c0_6, %c0_7], %7 {strides = array<i32>} : memref<512x128xf32, #tpu.memory_space<vmem>>, vector<512x128xf32>,
    %c2_i32 = arith.constant 2 : i32
    %9 = arith.cmpi eq, %arg2, %c2_i32 : i32
    %10 = arith.extui %9 : i1 to i32
    %c0_i32_8 = arith.constant 0 : i32
    %11 = arith.cmpi ne, %10, %c0_i32_8 : i32
    scf.if %11 {
      %c0_9 = arith.constant 0 : index
      %c0_10 = arith.constant 0 : index
      %12 = vector.load %arg7[%c0_9, %c0_10] : memref<512x128xf32, #tpu.memory_space<vmem>>, vector<512x128xf32>
      %c0_11 = arith.constant 0 : index
      %c0_12 = arith.constant 0 : index
      %13 = vector.load %arg5[%c0_11, %c0_12] : memref<1x128xf32, #tpu.memory_space<vmem>>, vector<1x128xf32>
      %14 = vector.broadcast %13 : vector<1x128xf32> to vector<512x128xf32>
      %15 = arith.addf %12, %14 : vector<512x128xf32>
      %16 = math.tanh %15 : vector<512x128xf32>
      %c0_13 = arith.constant 0 : index
      %c0_14 = arith.constant 0 : index
      %17 = vector.load %arg6[%c0_13, %c0_14] : memref<512x128xf32, #tpu.memory_space<vmem>>, vector<512x128xf32>
      tpu.vector_store %arg6[%c0_13, %c0_14], %16 {strides = array<i32>} : memref<512x128xf32, #tpu.memory_space<vmem>>, vector<512x128xf32>,
    } else {
    }
    return
  }
  func.func @transform_0(%arg0: i32, %arg1: i32, %arg2: i32) -> (i32, i32) {
    %c0_i32 = arith.constant 0 : i32
    return %arg0, %arg2 : i32, i32
  }
  func.func @transform_1(%arg0: i32, %arg1: i32, %arg2: i32) -> (i32, i32) {
    %c0_i32 = arith.constant 0 : i32
    return %arg2, %arg1 : i32, i32
  }
  func.func @transform_2(%arg0: i32, %arg1: i32, %arg2: i32) -> (i32, i32) {
    %c0_i32 = arith.constant 0 : i32
    %c0_i32_0 = arith.constant 0 : i32
    return %c0_i32, %arg1 : i32, i32
  }
  func.func @transform_3(%arg0: i32, %arg1: i32, %arg2: i32) -> (i32, i32) {
    %c0_i32 = arith.constant 0 : i32
    return %arg0, %arg1 : i32, i32
  }
}

</mosaic_0001>

<bundles_post_ra>
// kernel: generator_sngan_forward.19
= control target key start
LH: loop header
LB: loop body
LE: loop exit
PB: predicated region body
PF: predicated region fallthrough
CT: control target
= control target key end

     0   :  { %s561_s9 = smov 0   ;;  %s563_s10 = smov 0   ;;  %s602_s0 = inlined_call_operand.vmem [shape: bf16[2,2048], index: 0, kind: input, shape index: {}]   ;;  %s603_s1 = inlined_call_operand.vmem [shape: f32[2,2048], index: 1, kind: input, shape index: {}]   ;;  %s604_s2 = inlined_call_operand.vmem [shape: bf16[2,2048], index: 2, kind: output, shape index: {}]  }
   0x1   :  { %s565_s11 = smov 0  }
   0x2 LB: > { %s21_s12 = sadd.s32 1, %s538_s10  ;;  %p482_p0 = scmp.ge.s32.totalorder %s542_s11, 1  ;;  %s542_s11 = sphi %s565_s11, %s12_s11   ;;  %s538_s10 = sphi %s563_s10, %s606_s10   ;;  %s534_s9 = sphi %s561_s9, %s605_s9  }
   0x3   : > { %p22_p1 = scmp.ge.s32.totalorder %s21_s12, 4  ;;  %p143_p2 = scmp.lt.s32.totalorder %s542_s11, 5 }
   0x5   : > { %s608_s12 = smov (%p22_p1, %s21_s12), 0  ;;  %p144_p3 = pnand %p482_p0, %p143_p2 }
   0x6   : > { %s483_s13 = sshll.u32 (!%p144_p3), %s534_s9, 2  ;;  %v212_v0 = vlaneseq (!%p144_p3)  ;;  %v544_v11 = vmov (!%p144_p3), 1983009808   ;;  %v545_v50 = vmov (!%p144_p3), 1966171168  }
   0x7   : > { %147 = sbr.rel (%p144_p3) target bundleno = 66 (0x42), region = 28  ;;  %p179_p4 = scmp.lt.s32.totalorder (!%p144_p3), %s483_s13, 15  ;;  %v255_v12 = vunpack.c.l.s4 (!%p144_p3), %v544_v11  ;;  %v365_v51 = vunpack.c.l.s4 (!%p144_p3), %v545_v50 }
   0x8   : > { %v213_v1 = vshrl.u32 (!%p144_p3), %v212_v0, 7 }
   0x9   : > { %v256_v19 = vunpack.c.0.s8 (!%p144_p3), %v255_v12  ;;  %v366_v54 = vunpack.c.0.s8 (!%p144_p3), %v365_v51 }
   0xa   : > { %v214_v4 = vsub.s32 (!%p144_p3), 0, %v213_v1  ;;  %v218_v6 = vsub.s32 (!%p144_p3), 2, %v213_v1  ;;  %v222_v7 = vsub.s32 (!%p144_p3), 4, %v213_v1  ;;  %v226_v8 = vsub.s32 (!%p144_p3), 6, %v213_v1 }
   0xb   : > { %v259_v25 = vsub.s32 (!%p144_p3), %v256_v19, %v213_v1  ;;  %v274_v26 = vsub.s32 (!%p144_p3), 1, %v213_v1  ;;  %v278_v27 = vsub.s32 (!%p144_p3), 3, %v213_v1  ;;  %v282_v28 = vsub.s32 (!%p144_p3), 5, %v213_v1 }
   0xc   : > { %v286_v29 = vsub.s32 (!%p144_p3), 7, %v213_v1  ;;  %v369_v59 = vsub.s32 (!%p144_p3), %v366_v54, %v213_v1 }
   0xe   : > { %s610_s13 = smov (!%p179_p4, %s483_s13), 15 }
   0xf   : > { %s485_s14 = sshll.u32 %s610_s13, 1  ;;  %s183_s20 = scalar_lea.vmem %s602_s0, %s610_s13 }
  0x10   : > { %s189_s17 = scalar_lea.vmem %s603_s1, %s485_s14  ;;  %v209_v32 = vld [vmem:[%s183_s20] sm:$0xf]  ;;  %s198_s23 = scalar_lea.vmem %s604_s2, %s610_s13 }
  0x11   : > { %v200_v2 = vld [vmem:[%s189_s17] sm:$0xff]  ;;  %v210_v38 = vunpack.c.l.bf16 %v209_v32 }
  0x12   : > { %v201_v3 = vmul.f32 0.5, %v200_v2 }
  0x14   : > { %v202_v5 = vmul.f32 %v201_v3, %v201_v3  ;;  %v215_v10 = vrot.slane %v201_v3, %v214_v4  ;;  %v219_v14 = vrot.slane %v201_v3, %v218_v6  ;;  %v223_v15 = vrot.slane %v201_v3, %v222_v7 }
  0x15   : > { %v227_v16 = vrot.slane %v201_v3, %v226_v8 }
  0x16   : > { %v204_v9 = vrot.slane %v202_v5, 7  ;;  %v235_v18 = vrot.slane %v215_v10, %v214_v4  ;;  %v239_v20 = vrot.slane %v219_v14, %v214_v4  ;;  %v243_v21 = vrot.slane %v223_v15, %v214_v4 }
  0x17   : > { %v247_v22 = vrot.slane %v227_v16, %v214_v4 }
  0x18   : > { %v206_v13 = vsub.f32 %v201_v3, %v204_v9  ;;  %v252_v23 = vcombine.low %v235_v18, %v239_v20 }
  0x19   : > { %v253_v24 = vcombine.low %v243_v21, %v247_v22 }
  0x1a   : > { %v207_v17 = vadd.f32 1e-05, %v206_v13  ;;  %v260_v30 = vrot.slane %v252_v23, %v259_v25 }
  0x1b   : > { %v267_v31 = vrot.slane %v253_v24, %v259_v25 }
  0x1c   : > { %518 = vrsqrt.f32 %v207_v17 }
  0x1d   : > { %v268_v39 = vcombine.low %v260_v30, %v267_v31 }
  0x1f   : > { %v270_v46 = vsub.f32 %v210_v38, %v268_v39 }
  0x26   : > { %v519_v33 = vpop.eup %518 }
  0x27   : > { %v275_v34 = vrot.slane %v519_v33, %v274_v26  ;;  %v279_v35 = vrot.slane %v519_v33, %v278_v27  ;;  %v283_v36 = vrot.slane %v519_v33, %v282_v28  ;;  %v287_v37 = vrot.slane %v519_v33, %v286_v29 }
  0x29   : > { %v295_v40 = vrot.slane %v275_v34, %v274_v26  ;;  %v299_v41 = vrot.slane %v279_v35, %v274_v26  ;;  %v303_v42 = vrot.slane %v283_v36, %v274_v26  ;;  %v307_v43 = vrot.slane %v287_v37, %v274_v26 }
  0x2b   : > { %v312_v44 = vcombine.low %v295_v40, %v299_v41  ;;  %v313_v45 = vcombine.low %v303_v42, %v307_v43 }
  0x2d   : > { %v320_v47 = vrot.slane %v312_v44, %v259_v25  ;;  %v327_v48 = vrot.slane %v313_v45, %v259_v25 }
  0x2f   : > { %v328_v49 = vcombine.low %v320_v47, %v327_v48 }
  0x31   : > { %v330_v52 = vmul.f32 %v328_v49, %v270_v46 }
  0x33   : > { %v331_v53 = vmax.f32 %v330_v52, 0.0 }
  0x35   : > { %v333_v55 = vcombine.high %v331_v53, %v331_v53  ;;  %v340_v56 = vrot.slane %v331_v53, %v259_v25 }
  0x37   : > { %v347_v57 = vrot.slane %v333_v55, %v259_v25  ;;  %v348_v58 = vcombine.high %v340_v56, %v340_v56 }
  0x39   : > { %v349_v60 = vcombine.high %v347_v57, %v347_v57  ;;  %v487_v61 = vpack.c.bf16 %v348_v58, %v340_v56 }
  0x3b   : > { %v488_v62 = vpack.c.bf16 %v349_v60, %v347_v57  ;;  %v370_v63 = vrot.slane %v487_v61, %v369_v59 }
  0x3d   : > { %v377_v0 = vrot.slane %v488_v62, %v369_v59 }
  0x3f   : > { %v378_v2 = vcombine.low %v370_v63, %v377_v0 }
  0x41   : > { %489 = vst.sshfl [vmem:[%s198_s23] sm:$0x55 pattern:$0x73625140] %v378_v2 }
  0x42 PF: > { %s12_s11 = sadd.s32 1, %s542_s11   ;;  %s605_s9 = smov %s538_s10 }
  0x43   : > { %p9_p5 = scmp.ge.s32.totalorder %s12_s11, 6   ;;  %s606_s10 = smov %s608_s12 }
  0x45   :  { %11 = sbr.rel (!%p9_p5) target bundleno = 2 (0x2), region = 61 }

// kernel: generator_sngan_forward.18
= control target key start
LH: loop header
LB: loop body
LE: loop exit
PB: predicated region body
PF: predicated region fallthrough
CT: control target
= control target key end

     0   :  { %10 = vsyncpa [#allocation4], 0  ;;  %s1351_s0 = inlined_call_operand.vmem [shape: bf16[2,32], index: 0, kind: input, shape index: {}]   ;;  %s1352_s1 = inlined_call_operand.hbm [shape: bf16[32,2048], index: 1, kind: input, shape index: {}]   ;;  %s1353_s2 = inlined_call_operand.hbm [shape: f32[1,2048], index: 2, kind: input, shape index: {}]   ;;  %s1354_s3 = inlined_call_operand.vmem [shape: bf16[2,2048], index: 3, kind: output, shape index: {0}]   ;;  %s1355_s4 = inlined_call_operand.vmem [shape: f32[1,2,2048], index: 4, kind: output, shape index: {1}]  }
   0x1   :  { %12 = vsyncpa [#allocation4 + $0x1], 0 }
   0x2   :  { %13 = vsyncpa [#allocation6], 0 }
   0x3   :  { %15 = vsyncpa [#allocation6 + $0x1], 0  ;;  %s1153_s15 = smov 0   ;;  %s1155_s16 = smov 0  }
   0x4   :  { %s1157_s17 = smov 0   ;;  %s1159_s18 = smov 0  }
   0x5   :  { %s1161_s19 = smov 0   ;;  %s1163_s20 = smov 0  }
   0x6 LB: > { %s892_s21 = sadd.s32 4294967295, %s1118_s20   ;;  %s36_s22 = sadd.s32 1, %s1114_s19  ;;  %s1118_s20 = sphi %s1163_s20, %s21_s20   ;;  %s1114_s19 = sphi %s1161_s19, %s1368_s19   ;;  %s1110_s18 = sphi %s1159_s18, %s1367_s18   ;;  %s1106_s17 = sphi %s1157_s17, %s1366_s17   ;;  %s1102_s16 = sphi %s1155_s16, %s1365_s16   ;;  %s1098_s15 = sphi %s1153_s15, %s1364_s15  }
   0x7   : > { %p38_p0 = scmp.ge.s32.totalorder %s36_s22, 4  ;;  %s77_s23 = sadd.s32 1, %s1106_s17 }
   0x8   : > { %p84_p1 = scmp.ne.s32.totalorder %s1106_s17, %s1102_s16  ;;  %p85_p2 = scmp.eq.s32.totalorder %s1118_s20, 0 }
   0x9   : > { %s1370_s22 = smov (%p38_p0, %s36_s22), 0  ;;  %p90_p4 = scmp.ne.s32.totalorder %s1102_s16, %s1098_s15 }
   0xa   : > { %p1189_p3 = por %p85_p2, %p84_p1  ;;  %s73_s25 = ssub.s32 %s1114_s19, %s1370_s22 }
   0xb   : > { %p91_p5 = scmp.eq.s32.totalorder %s892_s21, 0  ;;  %p75_p6 = scmp.eq.s32.totalorder %s73_s25, 0 }
   0xc   : > { %p937_p8 = scmp.lt.s32.totalorder %s1118_s20, 4  ;;  %s1205_s28 = sand.u32 1, %s1106_s17  }
   0xd   : > { %p1196_p7 = por %p91_p5, %p90_p4  ;;  %s924_s29 = sshll.u32 %s1114_s19, 8 }
   0xe   : > { %s1202_s27 = scalar_select %p75_p6, %s1106_s17, %s77_s23  }
   0xf   : > { %s1358_s26 = scalar_select %p1196_p7, 1, 0 }
  0x10   : > { %s897_s30 = sshll.u32 %s1205_s28, 6  ;;  %s1212_s7 = scalar_lea.hbm %s1352_s1, %s924_s29 }
  0x11   : > { %s209_s8 = scalar_lea.vmem [#allocation3], %s897_s30  ;;  %p1216_p9 = pnand %p937_p8, %p1189_p3 }
  0x12   : > { %s219_s9 = sshll.u32 %s209_s8, 4  ;;  %s206_s11 = scalar_lea.sflag [#allocation4], %s1205_s28  ;;  %s1220_s9 = int_to_ptr.vmem [resolvable:$true] %s219_s9 }
  0x13   : > { %s1004_s12 = scalar_lea.hbm %s1212_s7, 1024  ;;  %p1006_p12 = pneg %p1216_p9 }
  0x14   : > { %p1005_p11 = scmp.ne.s32.totalorder %s1212_s7, %s1004_s12  ;;  %s1009_s15 = scalar_lea.hbm %s1352_s1, 4096 }
  0x15   : > { %p1010_p1 = scmp.lt.u32.totalorder %s1212_s7, %s1352_s1  ;;  %p1011_p2 = scmp.lt.u32.totalorder %s1009_s15, %s1004_s12 }
  0x16   : > { %p1007_p13 = pnand %p1006_p12, %p1005_p11  ;;  %p1013_p4 = scmp.lt.u32.totalorder %s1004_s12, %s1212_s7 }
  0x17   : > { %p1012_p3 = por %p1011_p2, %p1010_p1 }
  0x18   : > { %p1008_p0 = pneg %p1007_p13 }
  0x19   : > { %p1014_p5 = por %p1013_p4, %p1012_p3 }
  0x1b   : > { %p1015_p6 = pnand %p1014_p5, %p1008_p0 }
  0x1d   : > { %1018 = shalt.err (!%p1015_p6)
}
  0x1e   : > { %s1019_s24 = scalar_lea.vmem %s1220_s9, 1024  ;;  %s1120_s25 = smov [#allocation3]  }
  0x1f   : > { %p1020_p8 = scmp.ne.s32.totalorder %s1220_s9, %s1019_s24  ;;  %s1024_s29 = sshll.u32 %s1120_s25, 4  ;;  %s1025_s29 = int_to_ptr.vmem [resolvable:$false] %s1024_s29 }
  0x20   : > { %s1026_s30 = scalar_lea.vmem %s1025_s29, 2048  ;;  %p1027_p10 = scmp.lt.s32.totalorder %s1220_s9, %s1025_s29 }
  0x21   : > { %p1022_p11 = pnand %p1020_p8, %p1006_p12  ;;  %p1028_p1 = scmp.lt.s32.totalorder %s1026_s30, %s1019_s24 }
  0x23   : > { %p1023_p13 = pneg %p1022_p11  ;;  %p1029_p2 = por %p1028_p1, %p1027_p10 }
  0x25   : > { %p1030_p3 = pnand %p1029_p2, %p1023_p13 }
  0x27   : > { %1033 = shalt.err (!%p1030_p3)
}
  0x28   : > { %s1121_s5 = smov 1024   ;;  %s1122_s6 = smov 256  }
  0x29   : > { %s1123_s8 = smov 16   ;;  %p246_p0 = scmp.lt.s32.totalorder %s1118_s20, 5 }
  0x2a   : > { %933 = dma.hbm_to_vmem [thread:$0]  (!%p1216_p9), %s1212_s7, 1024, %s1220_s9, %s206_s11, %s1121_s5, %s1122_s6, %s1123_s8  }
  0x2b   : > { %s900_s12 = sshll.u32 %s1205_s28, 2  ;;  %s925_s13 = sshll.u32 %s1114_s19, 6 }
  0x2c   : > { %p1360_p10 = scmp.ge.s32.totalorder %s1118_s20, 1  ;;  %s1263_s23 = scalar_lea.hbm %s1353_s2, %s925_s13 }
  0x2d   : > { %s233_s24 = scalar_lea.vmem [#allocation5], %s900_s12  ;;  %s230_s7 = scalar_lea.sflag [#allocation6], %s1205_s28 }
  0x2e   : > { %p1256_p4 = pnand %p1360_p10, %p246_p0  ;;  %s241_s25 = sshll.u32 %s233_s24, 4  ;;  %s242_s25 = int_to_ptr.vmem [resolvable:$true] %s241_s25 }
  0x2f   : > { %s1034_s9 = scalar_lea.hbm %s1263_s23, 64  ;;  %s1039_s30 = scalar_lea.hbm %s1353_s2, 256 }
  0x30   : > { %s1361_s14 = scalar_select %p1256_p4, 1, 0 }
  0x31   : > { %p1035_p5 = scmp.ne.s32.totalorder %s1263_s23, %s1034_s9  ;;  %p1040_p11 = scmp.lt.u32.totalorder %s1263_s23, %s1353_s2 }
  0x32   : > { %p1041_p13 = scmp.lt.u32.totalorder %s1039_s30, %s1034_s9  ;;  %p1043_p2 = scmp.lt.u32.totalorder %s1034_s9, %s1263_s23 }
  0x33   : > { %p1037_p6 = pnand %p1035_p5, %p1006_p12 }
  0x34   : > { %p1042_p1 = por %p1041_p13, %p1040_p11 }
  0x35   : > { %p1038_p8 = pneg %p1037_p6 }
  0x36   : > { %p1044_p3 = por %p1043_p2, %p1042_p1 }
  0x38   : > { %p1045_p0 = pnand %p1044_p3, %p1038_p8 }
  0x3a   : > { %1048 = shalt.err (!%p1045_p0)
}
  0x3b   : > { %s1049_s28 = scalar_lea.vmem %s242_s25, 64  ;;  %s1124_s8 = smov [#allocation5]  }
  0x3c   : > { %p1050_p10 = scmp.ne.s32.totalorder %s242_s25, %s1049_s28  ;;  %s1054_s12 = sshll.u32 %s1124_s8, 4  ;;  %s1055_s12 = int_to_ptr.vmem [resolvable:$false] %s1054_s12 }
  0x3d   : > { %s1056_s13 = scalar_lea.vmem %s1055_s12, 128  ;;  %p1057_p7 = scmp.lt.s32.totalorder %s242_s25, %s1055_s12 }
  0x3e   : > { %p1052_p5 = pnand %p1050_p10, %p1006_p12  ;;  %p1058_p4 = scmp.lt.s32.totalorder %s1056_s13, %s1049_s28 }
  0x40   : > { %p1053_p6 = pneg %p1052_p5  ;;  %p1059_p11 = por %p1058_p4, %p1057_p7 }
  0x42   : > { %p1060_p13 = pnand %p1059_p11, %p1053_p6 }
  0x44   : > { %1063 = shalt.err (!%p1060_p13)
}
  0x45   : > { %936 = dma.hbm_to_vmem [thread:$0]  (!%p1216_p9), %s1263_s23, 64, %s242_s25, %s230_s7  }
  0x46   : > { %p1362_p8 = scmp.ne.s32.totalorder %s1361_s14, 0 }
  0x47   : > { %s252_s15 = sand.u32 (!%p1362_p8), 1, %s1102_s16   ;;  %p1363_p12 = scmp.ne.s32.totalorder (!%p1362_p8), %s1358_s26, 0 }
  0x48   : > { %250 = sbr.rel (%p1362_p8) target bundleno = 346 (0x15a), region = 32  ;;  %s904_s21 = sshll.u32 (!%p1362_p8), %s252_s15, 6 }
  0x49   : > { %s253_s24 = scalar_lea.sflag (!%p1362_p8), [#allocation4], %s252_s15  ;;  %s256_s9 = scalar_lea.vmem (!%p1362_p8), [#allocation3], %s904_s21 }
  0x4f   : > { %1089 = dma.done.wait (%p1363_p12), %s253_s24, 1024  }
  0x50   : > { %1091 = vsyncadd (%p1363_p12), %s253_s24, 4294966272  ;;  %s905_s11 = sshll.u32 %s252_s15, 2  ;;  %s262_s29 = scalar_lea.sflag [#allocation6], %s252_s15 }
  0x51   : > { %s1292_s10 = scalar_lea.vmem [#allocation5], %s905_s11 }
  0x52   : > { %1093 = dma.done.wait (%p1363_p12), %s262_s29, 64  }
  0x53   : > { %1095 = vsyncadd (%p1363_p12), %s262_s29, 4294967232  ;;  %v1125_v0 = vmov 0   ;;  %v992_v1 = vld [vmem:[%s256_s9 + $0x4] ss:$16 sps:$4 sm:$0xff]   ;;  %v994_v2 = vld [vmem:[%s256_s9 + $0xc] ss:$16 sps:$4 sm:$0xff]   ;;  %v492_v10 = vlaneseq }
  0x54   : > { %433 = vmatprep.mubr.bf16.mxu0 %v1125_v0  ;;  %474 = vmatprep.mubr.bf16.mxu1 %v1125_v0  ;;  %v996_v3 = vld [vmem:[%s256_s9] ss:$16 sps:$4 sm:$0xff]   ;;  %v997_v4 = vld [vmem:[%s256_s9 + $0x8] ss:$16 sps:$4 sm:$0xff]   ;;  %v998_v5 = vld [vmem:[%s256_s9 + $0x24] ss:$16 sps:$4 sm:$0xff]  }
  0x55   : > { %401 = vmatprep.subr.bf16.mxu0 %v992_v1  ;;  %442 = vmatprep.subr.bf16.mxu1 %v994_v2  ;;  %v1000_v6 = vld [vmem:[%s256_s9 + $0x2c] ss:$16 sps:$4 sm:$0xff]   ;;  %v1002_v7 = vld [vmem:[%s256_s9 + $0x20] ss:$16 sps:$4 sm:$0xff]   ;;  %v1003_v8 = vld [vmem:[%s256_s9 + $0x28] ss:$16 sps:$4 sm:$0xff]  }
  0x56   : > { %402 = vmatpush1.bf16.msra.mxu0 %v996_v3  ;;  %443 = vmatpush1.bf16.msra.mxu1 %v997_v4  ;;  %v348_v9 = vld [vmem:[%s1351_s0] sm:$0x1]  ;;  %vm397_vm0 = vcmask 261120   ;;  %v493_v11 = vshrl.u32 %v492_v10, 7  ;;  %v1126_v12 = vmov 1983009808  }
  0x57   : > { %403 = vmatprep.subr.bf16.mxu0 %v998_v5  ;;  %444 = vmatprep.subr.bf16.mxu1 %v1000_v6  ;;  %v490_v13 = vunpack.c.l.s4 %v1126_v12  ;;  %v511_v18 = vld [vmem:[%s1292_s10] sm:$0xf]  ;;  %v1127_v42 = vmov 1966171168   ;;  %s906_s23 = sshll.u32 %s1110_s18, 2  ;;  %vm604_vm1 = vcmask 1041408  }
  0x58   : > { %v515_v14 = vsub.s32 0, %v493_v11  ;;  %v519_v15 = vsub.s32 1, %v493_v11  ;;  %v523_v16 = vsub.s32 2, %v493_v11  ;;  %v527_v17 = vsub.s32 3, %v493_v11  ;;  %p325_p7 = scmp.lt.s32.totalorder %s906_s23, 15 }
  0x59   : > { %v491_v19 = vunpack.c.0.s8 %v490_v13  ;;  %v581_v43 = vunpack.c.l.s4 %v1127_v42  ;;  %vm684_vm2 = vcmask 1040384  }
  0x5a   : > { %404 = vmatpush1.bf16.msra.mxu0 %v1002_v7  ;;  %445 = vmatpush1.bf16.msra.mxu1 %v1003_v8  ;;  %v516_v20 = vrot.slane %v511_v18, %v515_v14  ;;  %v520_v21 = vrot.slane %v511_v18, %v519_v15  ;;  %v524_v22 = vrot.slane %v511_v18, %v523_v16  ;;  %s1372_s23 = smov (!%p325_p7, %s906_s23), 15 }
  0x5b   : > { %v528_v23 = vrot.slane %v511_v18, %v527_v17  ;;  %v1302_v24 = vsub.s32 %v491_v19, %v493_v11  ;;  %v582_v46 = vunpack.c.0.s8 %v581_v43  ;;  %s329_s7 = scalar_lea.vmem %s1354_s3, %s1372_s23  ;;  %s908_s30 = sshll.u32 %s1372_s23, 1 }
  0x5c   : > { %v529_v25 = vcombine.low %v516_v20, %v520_v21  ;;  %s339_s28 = scalar_lea.vmem %s1355_s4, %s908_s30 }
  0x5d   : > { %917 = vmatmul.mubr.msk.bf16.vlgmr.msra.gmra.mrb[0].mxu0 %vm397_vm0, %v348_v9  ;;  %918 = vmatmul.mubr.msk.bf16.vlgmr.msra.gmra.mrb[0].mxu1 %vm397_vm0, %v348_v9  ;;  %v530_v26 = vcombine.low %v524_v22, %v528_v23  ;;  %v585_v54 = vsub.s32 %v582_v46, %v493_v11 }
  0x5e   : > { %v537_v29 = vrot.slane %v529_v25, %v1302_v24 }
  0x5f   : > { %v544_v30 = vrot.slane %v530_v26, %v1302_v24 }
  0x61   : > { %v545_v41 = vcombine.low %v537_v29, %v544_v30 }
 0x130   : > { %v435_v27 = vpop.f32.mrb[0].mxu0  ;;  %v476_v28 = vpop.f32.mrb[0].mxu1 }
 0x131   : > { %v437_v31 = vpop.f32.mrb[1].mxu0  ;;  %v478_v32 = vpop.f32.mrb[1].mxu1 }
 0x132   : > { %v487_v33 = vcombine.low %v435_v27, %v437_v31  ;;  %v488_v34 = vcombine.low %v476_v28, %v478_v32  ;;  %v439_v35 = vpop.f32.mrb[2].mxu0  ;;  %v480_v36 = vpop.f32.mrb[2].mxu1 }
 0x133   : > { %v440_v37 = vpop.f32.mrb[3].mxu0  ;;  %v481_v38 = vpop.f32.mrb[3].mxu1 }
 0x134   : > { %v495_v39 = vrot.slane %v487_v33, %v1302_v24  ;;  %v502_v40 = vrot.slane %v488_v34, %v1302_v24 }
 0x136   : > { %v503_v44 = vcombine.low %v495_v39, %v502_v40 }
 0x138   : > { %v547_v45 = vadd.f32 %v545_v41, %v503_v44 }
 0x13a   : > { %v549_v47 = vcombine.high %v547_v45, %v547_v45  ;;  %v556_v48 = vrot.slane %v547_v45, %v1302_v24  ;;  %v633_v49 = vmul.f32 %v547_v45, %v547_v45 }
 0x13c   : > { %v563_v50 = vrot.slane %v549_v47, %v1302_v24  ;;  %v564_v51 = vcombine.high %v556_v48, %v556_v48  ;;  %v605_v52 = vsel %vm604_vm1, %v556_v48, 0.0  ;;  %v635_v53 = vcombine.high %v633_v49, %v633_v49 }
 0x13d   : > { %v606_v55 = vrot.slane %v605_v52, 4  ;;  %v642_v56 = vrot.slane %v633_v49, %v1302_v24 }
 0x13e   : > { %v565_v57 = vcombine.high %v563_v50, %v563_v50  ;;  %v919_v58 = vpack.c.bf16 %v564_v51, %v556_v48  ;;  %v612_v59 = vsel %vm604_vm1, %v564_v51, 0.0  ;;  %v619_v60 = vsel %vm604_vm1, %v563_v50, 0.0 }
 0x13f   : > { %v607_v61 = vadd.f32 %v606_v55, %v605_v52  ;;  %v613_v62 = vrot.slane %v612_v59, 4  ;;  %v620_v63 = vrot.slane %v619_v60, 4  ;;  %v649_v0 = vrot.slane %v635_v53, %v1302_v24 }
 0x140   : > { %v920_v1 = vpack.c.bf16 %v565_v57, %v563_v50  ;;  %v626_v2 = vsel %vm604_vm1, %v565_v57, 0.0  ;;  %v650_v3 = vcombine.high %v642_v56, %v642_v56  ;;  %v586_v4 = vrot.slane %v919_v58, %v585_v54 }
 0x141   : > { %v614_v5 = vadd.f32 %v613_v62, %v612_v59  ;;  %v621_v6 = vadd.f32 %v620_v63, %v619_v60  ;;  %v627_v7 = vrot.slane %v626_v2, 4  ;;  %v651_v9 = vcombine.high %v649_v0, %v649_v0 }
 0x142   : > { %v593_v8 = vrot.slane %v920_v1, %v585_v54  ;;  %v656_v10 = vsel %vm604_vm1, %v642_v56, 0.0  ;;  %v663_v11 = vsel %vm604_vm1, %v650_v3, 0.0  ;;  %v608_v12 = vrot.slane %v607_v61, 2 }
 0x143   : > { %v615_v13 = vrot.slane %v614_v5, 2  ;;  %v628_v14 = vadd.f32 %v627_v7, %v626_v2  ;;  %v657_v16 = vrot.slane %v656_v10, 4  ;;  %v664_v17 = vrot.slane %v663_v11, 4 }
 0x144   : > { %v594_v15 = vcombine.low %v586_v4, %v593_v8  ;;  %v670_v18 = vsel %vm604_vm1, %v649_v0, 0.0  ;;  %v622_v20 = vrot.slane %v621_v6, 2  ;;  %v677_v26 = vsel %vm604_vm1, %v651_v9, 0.0 }
 0x145   : > { %v616_v19 = vadd.f32 %v615_v13, %v614_v5  ;;  %v629_v21 = vrot.slane %v628_v14, 2  ;;  %v658_v22 = vadd.f32 %v657_v16, %v656_v10  ;;  %v665_v23 = vadd.f32 %v664_v17, %v663_v11 }
 0x146   : > { %921 = vst.sshfl [vmem:[%s329_s7] sm:$0x55 pattern:$0x73625140] %v594_v15  ;;  %v671_v25 = vrot.slane %v670_v18, 4  ;;  %v609_v27 = vadd.f32 %v608_v12, %v607_v61  ;;  %v678_v31 = vrot.slane %v677_v26, 4  ;;  %v623_v33 = vadd.f32 %v622_v20, %v621_v6 }
 0x147   : > { %v659_v28 = vrot.slane %v658_v22, 2  ;;  %v666_v29 = vrot.slane %v665_v23, 2  ;;  %v617_v32 = vrot.slane %v616_v19, 1  ;;  %v630_v34 = vadd.f32 %v629_v21, %v628_v14 }
 0x148   : > { %v672_v30 = vadd.f32 %v671_v25, %v670_v18  ;;  %v679_v38 = vadd.f32 %v678_v31, %v677_v26  ;;  %v610_v39 = vrot.slane %v609_v27, 1  ;;  %v624_v45 = vrot.slane %v623_v33, 1 }
 0x149   : > { %v660_v35 = vadd.f32 %v659_v28, %v658_v22  ;;  %v667_v36 = vadd.f32 %v666_v29, %v665_v23  ;;  %v618_v44 = vadd.f32 %v617_v32, %v616_v19  ;;  %v631_v46 = vrot.slane %v630_v34, 1 }
 0x14a   : > { %v673_v37 = vrot.slane %v672_v30, 2  ;;  %v680_v43 = vrot.slane %v679_v38, 2  ;;  %v611_v51 = vadd.f32 %v610_v39, %v609_v27  ;;  %v625_v55 = vadd.f32 %v624_v45, %v623_v33 }
 0x14b   : > { %v661_v40 = vrot.slane %v660_v35, 1  ;;  %v668_v41 = vrot.slane %v667_v36, 1  ;;  %v632_v56 = vadd.f32 %v631_v46, %v630_v34 }
 0x14c   : > { %v674_v42 = vadd.f32 %v673_v37, %v672_v30  ;;  %v681_v50 = vadd.f32 %v680_v43, %v679_v38 }
 0x14d   : > { %v662_v47 = vadd.f32 %v661_v40, %v660_v35  ;;  %v669_v48 = vadd.f32 %v668_v41, %v667_v36 }
 0x14e   : > { %v675_v49 = vrot.slane %v674_v42, 1  ;;  %v682_v53 = vrot.slane %v681_v50, 1 }
 0x14f   : > { %v686_v54 = vsel %vm684_vm2, %v618_v44, %v669_v48  ;;  %v685_v58 = vsel %vm684_vm2, %v611_v51, %v662_v47 }
 0x150   : > { %v676_v52 = vadd.f32 %v675_v49, %v674_v42  ;;  %v683_v57 = vadd.f32 %v682_v53, %v681_v50  ;;  %v693_v59 = vcombine.low %v685_v58, %v686_v54 }
 0x152   : > { %v687_v60 = vsel %vm684_vm2, %v625_v55, %v676_v52  ;;  %v688_v61 = vsel %vm684_vm2, %v632_v56, %v683_v57  ;;  %v701_v63 = vrot.slane %v693_v59, %v1302_v24 }
 0x153   : > { %v694_v62 = vcombine.low %v687_v60, %v688_v61 }
 0x155   : > { %v708_v0 = vrot.slane %v694_v62, %v1302_v24 }
 0x157   : > { %v709_v1 = vcombine.low %v701_v63, %v708_v0 }
 0x159   : > { %711 = vst [vmem:[%s339_s28] sm:$0xff] %v709_v1 }
 0x15a PF: > { %s21_s20 = sadd.s32 1, %s1118_s20   ;;  %s1364_s15 = smov %s1102_s16 }
 0x15b   : > { %p18_p9 = scmp.ge.s32.totalorder %s21_s20, 6   ;;  %s1365_s16 = smov %s1106_s17 }
 0x15c   : > { %s1366_s17 = smov %s1202_s27  ;;  %s1367_s18 = smov %s1114_s19 }
 0x15d   : > { %s1368_s19 = smov %s1370_s22  ;;  %20 = sbr.rel (!%p18_p9) target bundleno = 6 (0x6), region = 108 }
 0x164   :  { %765 = vsyncpa [#allocation4], 1 }
 0x165   :  { %767 = vsyncpa [#allocation4 + $0x1], 1 }
 0x166   :  { %768 = vsyncpa [#allocation6], 1 }
 0x167   :  { %770 = vsyncpa [#allocation6 + $0x1], 1 }

// kernel: generator_sngan_forward.23
= control target key start
LH: loop header
LB: loop body
LE: loop exit
PB: predicated region body
PF: predicated region fallthrough
CT: control target
= control target key end

     0   :  { %s1321_s15 = smov 0   ;;  %s1323_s16 = smov 0   ;;  %s1439_s0 = inlined_call_operand.vmem [shape: bf16[8,2048], index: 0, kind: input, shape index: {}]   ;;  %s1440_s1 = inlined_call_operand.vmem [shape: bf16[2048,256], index: 1, kind: input, shape index: {}]   ;;  %s1441_s2 = inlined_call_operand.vmem [shape: f32[1,256], index: 2, kind: input, shape index: {}]   ;;  %s1442_s3 = inlined_call_operand.vmem [shape: bf16[8,256], index: 3, kind: output, shape index: {0}]   ;;  %s1443_s4 = inlined_call_operand.vmem [shape: f32[1,2,256], index: 4, kind: output, shape index: {1}]  }
   0x1   :  { %s1325_s17 = smov 0  }
   0x2 LB: > { %s27_s18 = sadd.s32 1, %s1289_s16  ;;  %p1060_p0 = scmp.ge.s32.totalorder %s1293_s17, 1  ;;  %s1293_s17 = sphi %s1325_s17, %s15_s17   ;;  %s1289_s16 = sphi %s1323_s16, %s1445_s16   ;;  %s1285_s15 = sphi %s1321_s15, %s1444_s15  }
   0x3   : > { %p28_p1 = scmp.ge.s32.totalorder %s27_s18, 4  ;;  %p224_p2 = scmp.lt.s32.totalorder %s1293_s17, 5 }
   0x5   : > { %s1447_s18 = smov (%p28_p1, %s27_s18), 0  ;;  %p225_p3 = pnand %p1060_p0, %p224_p2 }
   0x6   : > { %s1061_s19 = sshll.u32 (!%p225_p3), %s1285_s15, 2  ;;  %s1063_s20 = sshll.u32 (!%p225_p3), %s1285_s15, 6 }
   0x7   : > { %228 = sbr.rel (%p225_p3) target bundleno = 335 (0x14f), region = 32  ;;  %p284_p4 = scmp.lt.s32.totalorder (!%p225_p3), %s1061_s19, 15 }
   0x8   : > { %p293_p5 = scmp.lt.s32.totalorder (!%p225_p3), %s1063_s20, 255  ;;  %p1066_p6 = scmp.ne.s32.totalorder (!%p225_p3), %s1285_s15, 0 }
   0xe   : > { %s1449_s19 = smov (!%p284_p4, %s1061_s19), 15  ;;  %s1451_s20 = smov (!%p293_p5, %s1063_s20), 255 }
   0xf   : > { %s1062_s21 = sshll.u32 %s1449_s19, 2  ;;  %s1144_s25 = sshll.u32 %s1451_s20, 3  ;;  %v1295_v0 = vmov (!%p1066_p6), 0.0  }
  0x10   : > { %s1346_s24 = scalar_lea.vmem %s1439_s0, %s1062_s21  ;;  %s1351_s28 = scalar_lea.vmem %s1440_s1, %s1144_s25  ;;  %332 = vst [vmem:[#allocation2] sm:$0xff] (!%p1066_p6), %v1295_v0  ;;  %333 = vst [vmem:[#allocation2 + $0x8] sm:$0xff] (!%p1066_p6), %v1295_v0 }
  0x11   : > { %331 = sbr.rel (%p1066_p6) target bundleno = 24 (0x18), region = 36 }
  0x18 PF: > { %v1171_v1 = vld [vmem:[%s1351_s28 + $0x4] ss:$8 sps:$4 sm:$0xff]   ;;  %v1175_v3 = vld [vmem:[%s1351_s28] ss:$8 sps:$4 sm:$0xff]   ;;  %v1177_v5 = vld [vmem:[%s1351_s28 + $0x14] ss:$8 sps:$4 sm:$0xff]  }
  0x19   : > { %v1173_v2 = vld [vmem:[%s1351_s28 + $0x104] ss:$8 sps:$4 sm:$0xff]   ;;  %736 = vmatprep.subr.bf16.mxu0 %v1171_v1  ;;  %v1176_v4 = vld [vmem:[%s1351_s28 + $0x100] ss:$8 sps:$4 sm:$0xff]   ;;  %v1179_v6 = vld [vmem:[%s1351_s28 + $0x114] ss:$8 sps:$4 sm:$0xff]  }
  0x1a   : > { %777 = vmatprep.subr.bf16.mxu1 %v1173_v2  ;;  %737 = vmatpush1.bf16.msra.mxu0 %v1175_v3  ;;  %v1181_v7 = vld [vmem:[%s1351_s28 + $0x10] ss:$8 sps:$4 sm:$0xff]   ;;  %v1183_v9 = vld [vmem:[%s1351_s28 + $0x24] ss:$8 sps:$4 sm:$0xff]   ;;  %v1187_v11 = vld [vmem:[%s1351_s28 + $0x20] ss:$8 sps:$4 sm:$0xff]  }
  0x1b   : > { %778 = vmatpush1.bf16.msra.mxu1 %v1176_v4  ;;  %738 = vmatprep.subr.bf16.mxu0 %v1177_v5  ;;  %v1182_v8 = vld [vmem:[%s1351_s28 + $0x110] ss:$8 sps:$4 sm:$0xff]   ;;  %v1185_v10 = vld [vmem:[%s1351_s28 + $0x124] ss:$8 sps:$4 sm:$0xff]   ;;  %v1188_v12 = vld [vmem:[%s1351_s28 + $0x120] ss:$8 sps:$4 sm:$0xff]  }
  0x1c   : > { %779 = vmatprep.subr.bf16.mxu1 %v1179_v6  ;;  %v1189_v13 = vld [vmem:[%s1351_s28 + $0x34] ss:$8 sps:$4 sm:$0xff]   ;;  %v1193_v15 = vld [vmem:[%s1351_s28 + $0x30] ss:$8 sps:$4 sm:$0xff]   ;;  %v1195_v17 = vld [vmem:[%s1351_s28 + $0x44] ss:$8 sps:$4 sm:$0xff]  }
  0x1d   : > { %v1191_v14 = vld [vmem:[%s1351_s28 + $0x134] ss:$8 sps:$4 sm:$0xff]   ;;  %v1194_v16 = vld [vmem:[%s1351_s28 + $0x130] ss:$8 sps:$4 sm:$0xff]   ;;  %v1197_v18 = vld [vmem:[%s1351_s28 + $0x144] ss:$8 sps:$4 sm:$0xff]  }
  0x1e   : > { %739 = vmatpush1.bf16.msra.mxu0 %v1181_v7  ;;  %v1199_v19 = vld [vmem:[%s1351_s28 + $0x40] ss:$8 sps:$4 sm:$0xff]   ;;  %v1201_v21 = vld [vmem:[%s1351_s28 + $0x54] ss:$8 sps:$4 sm:$0xff]   ;;  %v1205_v23 = vld [vmem:[%s1351_s28 + $0x50] ss:$8 sps:$4 sm:$0xff]  }
  0x1f   : > { %780 = vmatpush1.bf16.msra.mxu1 %v1182_v8  ;;  %740 = vmatprep.subr.bf16.mxu0 %v1183_v9  ;;  %v1200_v20 = vld [vmem:[%s1351_s28 + $0x140] ss:$8 sps:$4 sm:$0xff]   ;;  %v1203_v22 = vld [vmem:[%s1351_s28 + $0x154] ss:$8 sps:$4 sm:$0xff]   ;;  %v1206_v24 = vld [vmem:[%s1351_s28 + $0x150] ss:$8 sps:$4 sm:$0xff]  }
  0x20   : > { %781 = vmatprep.subr.bf16.mxu1 %v1185_v10  ;;  %v1207_v25 = vld [vmem:[%s1351_s28 + $0x64] ss:$8 sps:$4 sm:$0xff]   ;;  %v1211_v27 = vld [vmem:[%s1351_s28 + $0x60] ss:$8 sps:$4 sm:$0xff]   ;;  %v1213_v29 = vld [vmem:[%s1351_s28 + $0x74] ss:$8 sps:$4 sm:$0xff]  }
  0x21   : > { %v1209_v26 = vld [vmem:[%s1351_s28 + $0x164] ss:$8 sps:$4 sm:$0xff]   ;;  %v1212_v28 = vld [vmem:[%s1351_s28 + $0x160] ss:$8 sps:$4 sm:$0xff]   ;;  %v1215_v30 = vld [vmem:[%s1351_s28 + $0x174] ss:$8 sps:$4 sm:$0xff]  }
  0x22   : > { %741 = vmatpush1.bf16.msra.mxu0 %v1187_v11  ;;  %v1217_v31 = vld [vmem:[%s1351_s28 + $0x70] ss:$8 sps:$4 sm:$0xff]   ;;  %v1219_v33 = vld [vmem:[%s1351_s28 + $0x84] ss:$8 sps:$4 sm:$0xff]   ;;  %v1223_v35 = vld [vmem:[%s1351_s28 + $0x80] ss:$8 sps:$4 sm:$0xff]  }
  0x23   : > { %782 = vmatpush1.bf16.msra.mxu1 %v1188_v12  ;;  %742 = vmatprep.subr.bf16.mxu0 %v1189_v13  ;;  %v1218_v32 = vld [vmem:[%s1351_s28 + $0x170] ss:$8 sps:$4 sm:$0xff]   ;;  %v1221_v34 = vld [vmem:[%s1351_s28 + $0x184] ss:$8 sps:$4 sm:$0xff]   ;;  %v1224_v36 = vld [vmem:[%s1351_s28 + $0x180] ss:$8 sps:$4 sm:$0xff]  }
  0x24   : > { %783 = vmatprep.subr.bf16.mxu1 %v1191_v14  ;;  %v1225_v37 = vld [vmem:[%s1351_s28 + $0x94] ss:$8 sps:$4 sm:$0xff]   ;;  %v1229_v39 = vld [vmem:[%s1351_s28 + $0x90] ss:$8 sps:$4 sm:$0xff]   ;;  %v1231_v41 = vld [vmem:[%s1351_s28 + $0xa4] ss:$8 sps:$4 sm:$0xff]  }
  0x25   : > { %v1227_v38 = vld [vmem:[%s1351_s28 + $0x194] ss:$8 sps:$4 sm:$0xff]   ;;  %v1230_v40 = vld [vmem:[%s1351_s28 + $0x190] ss:$8 sps:$4 sm:$0xff]   ;;  %v1233_v42 = vld [vmem:[%s1351_s28 + $0x1a4] ss:$8 sps:$4 sm:$0xff]  }
  0x26   : > { %743 = vmatpush1.bf16.msra.mxu0 %v1193_v15  ;;  %v1235_v43 = vld [vmem:[%s1351_s28 + $0xa0] ss:$8 sps:$4 sm:$0xff]   ;;  %v1237_v45 = vld [vmem:[%s1351_s28 + $0xb4] ss:$8 sps:$4 sm:$0xff]   ;;  %v1241_v50 = vld [vmem:[%s1351_s28 + $0xb0] ss:$8 sps:$4 sm:$0xff]  }
  0x27   : > { %784 = vmatpush1.bf16.msra.mxu1 %v1194_v16  ;;  %744 = vmatprep.subr.bf16.mxu0 %v1195_v17  ;;  %v1236_v44 = vld [vmem:[%s1351_s28 + $0x1a0] ss:$8 sps:$4 sm:$0xff]   ;;  %v1239_v46 = vld [vmem:[%s1351_s28 + $0x1b4] ss:$8 sps:$4 sm:$0xff]   ;;  %v1242_v51 = vld [vmem:[%s1351_s28 + $0x1b0] ss:$8 sps:$4 sm:$0xff]  }
  0x28   : > { %785 = vmatprep.subr.bf16.mxu1 %v1197_v18  ;;  %v336_v47 = vld [vmem:[%s1346_s24] sm:$0xff]  ;;  %v337_v49 = vld [vmem:[%s1346_s24 + $0x8] sm:$0xff]  ;;  %v1249_v57 = vld [vmem:[%s1351_s28 + $0xd4] ss:$8 sps:$4 sm:$0xff]   ;;  %p1135_p7 = scmp.ne.s32.totalorder %s1285_s15, 3 }
  0x29   : > { %v1068_v48 = vcombine.high %v336_v47, %v336_v47  ;;  %v1070_v52 = vcombine.high %v337_v49, %v337_v49  ;;  %v1243_v53 = vld [vmem:[%s1351_s28 + $0xc4] ss:$8 sps:$4 sm:$0xff]   ;;  %v1247_v55 = vld [vmem:[%s1351_s28 + $0xc0] ss:$8 sps:$4 sm:$0xff]   ;;  %v1251_v58 = vld [vmem:[%s1351_s28 + $0x1d4] ss:$8 sps:$4 sm:$0xff]   ;;  %v1067_v5 = vcombine.low %v336_v47, %v336_v47  ;;  %v1069_v6 = vcombine.low %v337_v49, %v337_v49 }
  0x2a   : > { %745 = vmatpush1.bf16.msra.mxu0 %v1199_v19  ;;  %v1245_v54 = vld [vmem:[%s1351_s28 + $0x1c4] ss:$8 sps:$4 sm:$0xff]   ;;  %v1248_v56 = vld [vmem:[%s1351_s28 + $0x1c0] ss:$8 sps:$4 sm:$0xff]   ;;  %v1253_v59 = vld [vmem:[%s1351_s28 + $0xd0] ss:$8 sps:$4 sm:$0xff]  }
  0x2b   : > { %786 = vmatpush1.bf16.msra.mxu1 %v1200_v20  ;;  %746 = vmatprep.subr.bf16.mxu0 %v1201_v21  ;;  %v1254_v60 = vld [vmem:[%s1351_s28 + $0x1d0] ss:$8 sps:$4 sm:$0xff]   ;;  %v1255_v61 = vld [vmem:[%s1351_s28 + $0xe4] ss:$8 sps:$4 sm:$0xff]   ;;  %v1259_v63 = vld [vmem:[%s1351_s28 + $0xe0] ss:$8 sps:$4 sm:$0xff]   ;;  %v830_v21 = vlaneseq (!%p1135_p7) }
  0x2c   : > { %787 = vmatprep.subr.bf16.mxu1 %v1203_v22  ;;  %768 = vmatprep.mubr.bf16.mxu0 %v1068_v48  ;;  %v1257_v62 = vld [vmem:[%s1351_s28 + $0x1e4] ss:$8 sps:$4 sm:$0xff]   ;;  %v1260_v0 = vld [vmem:[%s1351_s28 + $0x1e0] ss:$8 sps:$4 sm:$0xff]   ;;  %v1261_v1 = vld [vmem:[%s1351_s28 + $0xf4] ss:$8 sps:$4 sm:$0xff]  }
  0x2d   : > { %809 = vmatprep.mubr.bf16.mxu1 %v1070_v52  ;;  %v1263_v2 = vld [vmem:[%s1351_s28 + $0x1f4] ss:$8 sps:$4 sm:$0xff]   ;;  %v1265_v3 = vld [vmem:[%s1351_s28 + $0xf0] ss:$8 sps:$4 sm:$0xff]   ;;  %v334_v8 = vld [vmem:[#allocation2] sm:$0xff]  ;;  %v831_v22 = vshrl.u32 (!%p1135_p7), %v830_v21, 7 }
  0x2e   : > { %747 = vmatpush1.bf16.msra.mxu0 %v1205_v23  ;;  %v1266_v4 = vld [vmem:[%s1351_s28 + $0x1f0] ss:$8 sps:$4 sm:$0xff]   ;;  %v335_v12 = vld [vmem:[#allocation2 + $0x8] sm:$0xff]  ;;  %v828_v23 = vld [vmem:[%s1441_s2] sm:$0x3] (!%p1135_p7)  ;;  %vm877_vm0 = vcmask (!%p1135_p7), 1040384  }
  0x2f   : > { %788 = vmatpush1.bf16.msra.mxu1 %v1206_v24  ;;  %748 = vmatprep.subr.bf16.mxu0 %v1207_v25  ;;  %v832_v24 = vsub.s32 (!%p1135_p7), 0, %v831_v22  ;;  %v836_v25 = vsub.s32 (!%p1135_p7), 1, %v831_v22 }
  0x30   : > { %789 = vmatprep.subr.bf16.mxu1 %v1209_v26 }
  0x32   : > { %749 = vmatpush1.bf16.msra.mxu0 %v1211_v27 }
  0x33   : > { %790 = vmatpush1.bf16.msra.mxu1 %v1212_v28  ;;  %750 = vmatprep.subr.bf16.mxu0 %v1213_v29  ;;  %v833_v28 = vrot.slane (!%p1135_p7), %v828_v23, %v832_v24  ;;  %v837_v29 = vrot.slane (!%p1135_p7), %v828_v23, %v836_v25 }
  0x34   : > { %791 = vmatprep.subr.bf16.mxu1 %v1215_v30 }
  0x36   : > { %751 = vmatpush1.bf16.msra.mxu0 %v1217_v31 }
  0x37   : > { %792 = vmatpush1.bf16.msra.mxu1 %v1218_v32  ;;  %752 = vmatprep.subr.bf16.mxu0 %v1219_v33 }
  0x38   : > { %793 = vmatprep.subr.bf16.mxu1 %v1221_v34 }
  0x3a   : > { %753 = vmatpush1.bf16.msra.mxu0 %v1223_v35 }
  0x3b   : > { %794 = vmatpush1.bf16.msra.mxu1 %v1224_v36  ;;  %754 = vmatprep.subr.bf16.mxu0 %v1225_v37 }
  0x3c   : > { %795 = vmatprep.subr.bf16.mxu1 %v1227_v38 }
  0x3e   : > { %755 = vmatpush1.bf16.msra.mxu0 %v1229_v39 }
  0x3f   : > { %796 = vmatpush1.bf16.msra.mxu1 %v1230_v40  ;;  %756 = vmatprep.subr.bf16.mxu0 %v1231_v41 }
  0x40   : > { %797 = vmatprep.subr.bf16.mxu1 %v1233_v42 }
  0x42   : > { %757 = vmatpush1.bf16.msra.mxu0 %v1235_v43 }
  0x43   : > { %798 = vmatpush1.bf16.msra.mxu1 %v1236_v44  ;;  %758 = vmatprep.subr.bf16.mxu0 %v1237_v45 }
  0x44   : > { %799 = vmatprep.subr.bf16.mxu1 %v1239_v46 }
  0x46   : > { %759 = vmatpush1.bf16.msra.mxu0 %v1241_v50 }
  0x47   : > { %800 = vmatpush1.bf16.msra.mxu1 %v1242_v51  ;;  %760 = vmatprep.subr.bf16.mxu0 %v1243_v53 }
  0x48   : > { %801 = vmatprep.subr.bf16.mxu1 %v1245_v54 }
  0x4a   : > { %761 = vmatpush1.bf16.msra.mxu0 %v1247_v55 }
  0x4b   : > { %802 = vmatpush1.bf16.msra.mxu1 %v1248_v56  ;;  %762 = vmatprep.subr.bf16.mxu0 %v1249_v57 }
  0x4c   : > { %803 = vmatprep.subr.bf16.mxu1 %v1251_v58 }
  0x4e   : > { %763 = vmatpush1.bf16.msra.mxu0 %v1253_v59 }
  0x4f   : > { %804 = vmatpush1.bf16.msra.mxu1 %v1254_v60  ;;  %764 = vmatprep.subr.bf16.mxu0 %v1255_v61 }
  0x50   : > { %805 = vmatprep.subr.bf16.mxu1 %v1257_v62 }
  0x52   : > { %765 = vmatpush1.bf16.msra.mxu0 %v1259_v63 }
  0x53   : > { %806 = vmatpush1.bf16.msra.mxu1 %v1260_v0  ;;  %766 = vmatprep.subr.bf16.mxu0 %v1261_v1 }
  0x54   : > { %807 = vmatprep.subr.bf16.mxu1 %v1263_v2 }
  0x56   : > { %767 = vmatpush1.bf16.msra.mxu0 %v1265_v3 }
  0x57   : > { %808 = vmatpush1.bf16.msra.mxu1 %v1266_v4 }
  0x59   : > { %769 = vmatmul.mubr.bf16.vlgmr.msra.gmra.mrb[0].mxu0 %v1067_v5 }
  0x5a   : > { %810 = vmatmul.mubr.bf16.vlgmr.msra.gmra.mrb[0].mxu1 %v1069_v6 }
 0x12c   : > { %v770_v7 = vpop.f32.mrb[0].mxu0 }
 0x12d   : > { %v811_v9 = vpop.f32.mrb[0].mxu1  ;;  %v772_v11 = vpop.f32.mrb[1].mxu0  ;;  %825 = sbr.rel (%p1135_p7) target bundleno = 335 (0x14f), region = 40 }
 0x12e   : > { %v812_v10 = vadd.f32 %v811_v9, %v770_v7  ;;  %v813_v13 = vpop.f32.mrb[1].mxu1  ;;  %v774_v15 = vpop.f32.mrb[2].mxu0 }
 0x12f   : > { %v814_v14 = vadd.f32 %v813_v13, %v772_v11  ;;  %v815_v16 = vpop.f32.mrb[2].mxu1  ;;  %v775_v18 = vpop.f32.mrb[3].mxu0 }
 0x130   : > { %v818_v17 = vadd.f32 %v812_v10, %v334_v8  ;;  %v816_v19 = vpop.f32.mrb[3].mxu1 }
 0x131   : > { %v819_v20 = vadd.f32 %v814_v14, %v335_v12 }
 0x132   : > { %820 = vst [vmem:[#allocation2] sm:$0xff] %v818_v17 }
 0x133   : > { %821 = vst [vmem:[#allocation2 + $0x8] sm:$0xff] %v819_v20 }
 0x139   : > { %v826_v26 = vld [vmem:[#allocation2] sm:$0xff] }
 0x13a   : > { %v827_v27 = vld [vmem:[#allocation2 + $0x8] sm:$0xff]  ;;  %v840_v30 = vadd.f32 %v833_v28, %v826_v26 }
 0x13b   : > { %v841_v31 = vadd.f32 %v837_v29, %v827_v27 }
 0x13c   : > { %v851_v33 = vrot.slane %v840_v30, 4  ;;  %v863_v35 = vmul.f32 %v840_v30, %v840_v30 }
 0x13d   : > { %v1145_v32 = vpack.c.bf16 %v841_v31, %v840_v30  ;;  %v857_v34 = vrot.slane %v841_v31, 4  ;;  %v864_v36 = vmul.f32 %v841_v31, %v841_v31 }
 0x13e   : > { %v852_v37 = vadd.f32 %v851_v33, %v840_v30  ;;  %v865_v39 = vrot.slane %v863_v35, 4 }
 0x13f   : > { %850 = vst [vmem:[%s1442_s3] sm:$0xff] %v1145_v32  ;;  %v858_v38 = vadd.f32 %v857_v34, %v841_v31  ;;  %v871_v40 = vrot.slane %v864_v36, 4 }
 0x140   : > { %v853_v41 = vrot.slane %v852_v37, 2  ;;  %v866_v43 = vadd.f32 %v865_v39, %v863_v35 }
 0x141   : > { %v859_v42 = vrot.slane %v858_v38, 2  ;;  %v872_v44 = vadd.f32 %v871_v40, %v864_v36 }
 0x142   : > { %v854_v45 = vadd.f32 %v853_v41, %v852_v37  ;;  %v867_v47 = vrot.slane %v866_v43, 2 }
 0x143   : > { %v860_v46 = vadd.f32 %v859_v42, %v858_v38  ;;  %v873_v48 = vrot.slane %v872_v44, 2 }
 0x144   : > { %v855_v49 = vrot.slane %v854_v45, 1  ;;  %v868_v51 = vadd.f32 %v867_v47, %v866_v43 }
 0x145   : > { %v861_v50 = vrot.slane %v860_v46, 1  ;;  %v874_v52 = vadd.f32 %v873_v48, %v872_v44 }
 0x146   : > { %v856_v53 = vadd.f32 %v855_v49, %v854_v45  ;;  %v869_v54 = vrot.slane %v868_v51, 1 }
 0x147   : > { %v862_v55 = vadd.f32 %v861_v50, %v860_v46  ;;  %v875_v56 = vrot.slane %v874_v52, 1 }
 0x148   : > { %v870_v57 = vadd.f32 %v869_v54, %v868_v51 }
 0x149   : > { %v876_v58 = vadd.f32 %v875_v56, %v874_v52 }
 0x14a   : > { %v878_v59 = vsel %vm877_vm0, %v856_v53, %v870_v57 }
 0x14b   : > { %v879_v60 = vsel %vm877_vm0, %v862_v55, %v876_v58 }
 0x14c   : > { %v882_v61 = vcombine.low %v878_v59, %v879_v60 }
 0x14e   : > { %1137 = vst.sshfl [vmem:[%s1443_s4] sm:$0x33 pattern:$0x76325410] %v882_v61 }
 0x14f PF: > { %s15_s17 = sadd.s32 1, %s1293_s17   ;;  %s1444_s15 = smov %s1289_s16 }
 0x150   : > { %p12_p8 = scmp.ge.s32.totalorder %s15_s17, 6   ;;  %s1445_s16 = smov %s1447_s18 }
 0x152   :  { %14 = sbr.rel (!%p12_p8) target bundleno = 2 (0x2), region = 88 }

// kernel: generator_sngan_forward.20
= control target key start
LH: loop header
LB: loop body
LE: loop exit
PB: predicated region body
PF: predicated region fallthrough
CT: control target
= control target key end

     0   :  { %10 = vsyncpa [#allocation4], 0  ;;  %s1727_s0 = inlined_call_operand.vmem [shape: bf16[8,2048], index: 0, kind: input, shape index: {}]   ;;  %s1728_s1 = inlined_call_operand.hbm [shape: bf16[2048,256], index: 1, kind: input, shape index: {}]   ;;  %s1729_s2 = inlined_call_operand.hbm [shape: f32[1,256], index: 2, kind: input, shape index: {}]   ;;  %s1730_s3 = inlined_call_operand.vmem [shape: bf16[8,256], index: 3, kind: output, shape index: {0}]   ;;  %s1731_s4 = inlined_call_operand.vmem [shape: f32[1,2,256], index: 4, kind: output, shape index: {1}]  }
   0x1   :  { %12 = vsyncpa [#allocation4 + $0x1], 0 }
   0x2   :  { %13 = vsyncpa [#allocation6], 0  ;;  %s1480_s15 = smov 0   ;;  %s1482_s16 = smov 0  }
   0x3   :  { %s1484_s17 = smov 0   ;;  %s1486_s18 = smov 0  }
   0x4   :  { %s1488_s19 = smov 0   ;;  %s1490_s20 = smov 0  }
   0x5 LB: > { %s1073_s21 = sadd.s32 4294967295, %s1448_s20   ;;  %s75_s22 = sadd.s32 1, %s1436_s17  ;;  %s1448_s20 = sphi %s1490_s20, %s19_s20   ;;  %s1444_s19 = sphi %s1488_s19, %s1752_s19   ;;  %s1440_s18 = sphi %s1486_s18, %s1751_s18   ;;  %s1436_s17 = sphi %s1484_s17, %s1750_s17   ;;  %s1432_s16 = sphi %s1482_s16, %s1749_s16   ;;  %s1428_s15 = sphi %s1480_s15, %s1748_s15  }
   0x6   : > { %p82_p0 = scmp.ne.s32.totalorder %s1436_s17, %s1432_s16  ;;  %p83_p1 = scmp.eq.s32.totalorder %s1448_s20, 0 }
   0x7   : > { %p88_p2 = scmp.ne.s32.totalorder %s1432_s16, %s1428_s15  ;;  %p1514_p3 = scmp.eq.s32.totalorder %s1073_s21, 0 }
   0x8   : > { %p84_p4 = por %p83_p1, %p82_p0  ;;  %p1074_p5 = scmp.ge.s32.totalorder %s1448_s20, 1 }
   0x9   : > { %s1737_s23 = scalar_select %p1514_p3, 1, 0 }
   0xa   : > { %p1521_p6 = por %p1514_p3, %p88_p2  ;;  %p181_p7 = scmp.lt.s32.totalorder %s1448_s20, 5 }
   0xb   : > { %s1450_s26 = smov [#allocation5]   ;;  %p1182_p10 = scmp.lt.s32.totalorder %s1448_s20, 4 }
   0xc   : > { %s1738_s24 = scalar_select %p1521_p6, 1, 0 }
   0xd   : > { %p1526_p8 = pnand %p1074_p5, %p181_p7  ;;  %s197_s27 = sshll.u32 %s1450_s26, 4  ;;  %s198_s27 = int_to_ptr.vmem [resolvable:$true] %s197_s27 }
   0xe   : > { %s221_s28 = sand.u32 1, %s1436_s17   ;;  %p1540_p12 = pnand %p1182_p10, %p84_p4 }
   0xf   : > { %s1739_s25 = scalar_select %p1526_p8, 1, 0 }
  0x10   : > { %p1173_p9 = pneg %p1526_p8  ;;  %s1336_s7 = scalar_lea.hbm %s1729_s2, 32 }
  0x11   : > { %s1741_s30 = scalar_select %p1540_p12, 1, 0 }
  0x12   : > { %p1536_p11 = pnand %p1173_p9, %p1514_p3  ;;  %p1337_p13 = scmp.ne.s32.totalorder %s1729_s2, %s1336_s7 }
  0x13   : > { %p1343_p5 = scmp.lt.u32.totalorder %s1336_s7, %s1729_s2 }
  0x14   : > { %p1338_p0 = pneg %p1536_p11 }
  0x16   : > { %p1339_p1 = pnand %p1338_p0, %p1337_p13 }
  0x18   : > { %p1340_p2 = pneg %p1339_p1 }
  0x1a   : > { %p1345_p4 = pnand %p1343_p5, %p1340_p2 }
  0x1c   : > { %1348 = shalt.err (!%p1345_p4)
}
  0x1d   : > { %s1349_s12 = scalar_lea.vmem %s198_s27, 32  ;;  %p1357_p3 = scmp.lt.s32.totalorder %s198_s27, %s198_s27 }
  0x1e   : > { %p1350_p7 = scmp.ne.s32.totalorder %s198_s27, %s1349_s12  ;;  %p1358_p6 = scmp.lt.s32.totalorder %s1349_s12, %s1349_s12 }
  0x20   : > { %p1352_p9 = pnand %p1350_p7, %p1338_p0  ;;  %p1359_p8 = por %p1358_p6, %p1357_p3 }
  0x22   : > { %p1353_p10 = pneg %p1352_p9 }
  0x24   : > { %p1360_p12 = pnand %p1359_p8, %p1353_p10 }
  0x26   : > { %1363 = shalt.err (!%p1360_p12)
}
  0x27   : > { %1176 = dma.hbm_to_vmem [thread:$0]  (!%p1536_p11), %s1729_s2, 32, %s198_s27, [#allocation6]  }
  0x28   : > { %s31_s15 = sadd.s32 1, %s1444_s19  ;;  %s1077_s21 = sshll.u32 %s221_s28, 9 }
  0x29   : > { %p32_p13 = scmp.ge.s32.totalorder %s31_s15, 4  ;;  %s1165_s26 = sshll.u32 %s1444_s19, 13 }
  0x2a   : > { %s225_s5 = scalar_lea.vmem [#allocation3], %s1077_s21  ;;  %s1569_s8 = scalar_lea.hbm %s1728_s1, %s1165_s26 }
  0x2b   : > { %s235_s6 = sshll.u32 %s225_s5, 4  ;;  %s1754_s15 = smov (%p32_p13, %s31_s15), 0  ;;  %s1571_s6 = int_to_ptr.vmem [resolvable:$true] %s235_s6 }
  0x2c   : > { %s70_s27 = ssub.s32 %s1444_s19, %s1754_s15  ;;  %s1581_s10 = scalar_lea.sflag [#allocation4], %s221_s28 }
  0x2d   : > { %p1575_p3 = scmp.eq.s32.totalorder %s70_s27, 0  ;;  %s1364_s11 = scalar_lea.hbm %s1569_s8, 8192 }
  0x2e   : > { %p1365_p6 = scmp.ne.s32.totalorder %s1569_s8, %s1364_s11  ;;  %p1743_p8 = scmp.ne.s32.totalorder %s1741_s30, 0 }
  0x2f   : > { %s1369_s14 = scalar_lea.hbm %s1728_s1, 32768  ;;  %p1370_p1 = scmp.lt.u32.totalorder %s1569_s8, %s1728_s1 }
  0x30   : > { %p1366_p11 = pneg %p1743_p8  ;;  %p1371_p2 = scmp.lt.u32.totalorder %s1369_s14, %s1364_s11 }
  0x31   : > { %p1373_p4 = scmp.lt.u32.totalorder %s1364_s11, %s1569_s8 }
  0x32   : > { %p1367_p12 = pnand %p1366_p11, %p1365_p6  ;;  %p1372_p5 = por %p1371_p2, %p1370_p1 }
  0x34   : > { %p1368_p0 = pneg %p1367_p12  ;;  %p1374_p7 = por %p1373_p4, %p1372_p5 }
  0x36   : > { %p1375_p9 = pnand %p1374_p7, %p1368_p0 }
  0x38   : > { %1378 = shalt.err (!%p1375_p9)
}
  0x39   : > { %s1379_s28 = scalar_lea.vmem %s1571_s6, 8192  ;;  %s1451_s5 = smov [#allocation3]  }
  0x3a   : > { %p1380_p10 = scmp.ne.s32.totalorder %s1571_s6, %s1379_s28  ;;  %s1384_s29 = sshll.u32 %s1451_s5, 4  ;;  %s1385_s29 = int_to_ptr.vmem [resolvable:$false] %s1384_s29 }
  0x3b   : > { %s1386_s7 = scalar_lea.vmem %s1385_s29, 16384  ;;  %p1387_p12 = scmp.lt.s32.totalorder %s1571_s6, %s1385_s29 }
  0x3c   : > { %p1382_p13 = pnand %p1380_p10, %p1366_p11  ;;  %p1388_p1 = scmp.lt.s32.totalorder %s1386_s7, %s1379_s28 }
  0x3e   : > { %p1383_p6 = pneg %p1382_p13  ;;  %p1389_p2 = por %p1388_p1, %p1387_p12 }
  0x40   : > { %p1390_p5 = pnand %p1389_p2, %p1383_p6 }
  0x42   : > { %1393 = shalt.err (!%p1390_p5)
}
  0x43   : > { %s1452_s27 = smov 128   ;;  %s1453_s11 = smov 8  }
  0x44   : > { %1180 = dma.hbm_to_vmem [thread:$0]  (!%p1743_p8), %s1569_s8, 8192, %s1571_s6, %s1581_s10, %s1452_s27, %s1452_s27, %s1453_s11  }
  0x45   : > { %s1614_s12 = scalar_select %p1575_p3, %s1436_s17, %s75_s22  }
  0x46   : > { %p1744_p11 = scmp.ne.s32.totalorder %s1739_s25, 0 }
  0x47   : > { %s249_s13 = sand.u32 (!%p1744_p11), 1, %s1432_s16   ;;  %p1745_p0 = scmp.ne.s32.totalorder (!%p1744_p11), %s1738_s24, 0 }
  0x48   : > { %247 = sbr.rel (%p1744_p11) target bundleno = 403 (0x193), region = 32  ;;  %s1082_s14 = sshll.u32 (!%p1744_p11), %s249_s13, 9 }
  0x49   : > { %s250_s21 = scalar_lea.sflag (!%p1744_p11), [#allocation4], %s249_s13  ;;  %s1619_s26 = scalar_lea.vmem (!%p1744_p11), [#allocation3], %s1082_s14 }
  0x4f   : > { %1419 = dma.done.wait (%p1745_p0), %s250_s21, 8192  }
  0x50   : > { %1421 = vsyncadd (%p1745_p0), %s250_s21, 4294959104  ;;  %p1746_p8 = scmp.ne.s32.totalorder %s1737_s23, 0 }
  0x52   : > { %1423 = dma.done.wait (%p1746_p8), [#allocation6], 32  }
  0x53   : > { %1425 = vsyncadd (%p1746_p8), [#allocation6], 4294967264  ;;  %s1084_s22 = sshll.u32 %s1440_s18, 2  ;;  %p1086_p4 = scmp.ne.s32.totalorder %s1440_s18, 0 }
  0x54   : > { %p307_p3 = scmp.lt.s32.totalorder %s1084_s22, 15  ;;  %v1454_v0 = vmov (!%p1086_p4), 0.0  }
  0x55   : > { %340 = sbr.rel (%p1086_p4) target bundleno = 92 (0x5c), region = 44  ;;  %341 = vst [vmem:[#allocation2] sm:$0xff] (!%p1086_p4), %v1454_v0  ;;  %342 = vst [vmem:[#allocation2 + $0x8] sm:$0xff] (!%p1086_p4), %v1454_v0 }
  0x56   : > { %s1756_s22 = smov (!%p307_p3, %s1084_s22), 15 }
  0x57   : > { %s1085_s25 = sshll.u32 %s1756_s22, 2 }
  0x58   : > { %s1633_s8 = scalar_lea.vmem %s1727_s0, %s1085_s25 }
  0x5c PF: > { %v1236_v1 = vld [vmem:[%s1619_s26 + $0x4] ss:$8 sps:$4 sm:$0xff]   ;;  %v1240_v3 = vld [vmem:[%s1619_s26] ss:$8 sps:$4 sm:$0xff]   ;;  %v1242_v5 = vld [vmem:[%s1619_s26 + $0x14] ss:$8 sps:$4 sm:$0xff]  }
  0x5d   : > { %v1238_v2 = vld [vmem:[%s1619_s26 + $0x104] ss:$8 sps:$4 sm:$0xff]   ;;  %745 = vmatprep.subr.bf16.mxu0 %v1236_v1  ;;  %v1241_v4 = vld [vmem:[%s1619_s26 + $0x100] ss:$8 sps:$4 sm:$0xff]   ;;  %v1244_v6 = vld [vmem:[%s1619_s26 + $0x114] ss:$8 sps:$4 sm:$0xff]  }
  0x5e   : > { %786 = vmatprep.subr.bf16.mxu1 %v1238_v2  ;;  %746 = vmatpush1.bf16.msra.mxu0 %v1240_v3  ;;  %v1246_v7 = vld [vmem:[%s1619_s26 + $0x10] ss:$8 sps:$4 sm:$0xff]   ;;  %v1248_v9 = vld [vmem:[%s1619_s26 + $0x24] ss:$8 sps:$4 sm:$0xff]   ;;  %v1252_v11 = vld [vmem:[%s1619_s26 + $0x20] ss:$8 sps:$4 sm:$0xff]  }
  0x5f   : > { %787 = vmatpush1.bf16.msra.mxu1 %v1241_v4  ;;  %747 = vmatprep.subr.bf16.mxu0 %v1242_v5  ;;  %v1247_v8 = vld [vmem:[%s1619_s26 + $0x110] ss:$8 sps:$4 sm:$0xff]   ;;  %v1250_v10 = vld [vmem:[%s1619_s26 + $0x124] ss:$8 sps:$4 sm:$0xff]   ;;  %v1253_v12 = vld [vmem:[%s1619_s26 + $0x120] ss:$8 sps:$4 sm:$0xff]  }
  0x60   : > { %788 = vmatprep.subr.bf16.mxu1 %v1244_v6  ;;  %v1254_v13 = vld [vmem:[%s1619_s26 + $0x34] ss:$8 sps:$4 sm:$0xff]   ;;  %v1258_v15 = vld [vmem:[%s1619_s26 + $0x30] ss:$8 sps:$4 sm:$0xff]   ;;  %v1260_v17 = vld [vmem:[%s1619_s26 + $0x44] ss:$8 sps:$4 sm:$0xff]  }
  0x61   : > { %v1256_v14 = vld [vmem:[%s1619_s26 + $0x134] ss:$8 sps:$4 sm:$0xff]   ;;  %v1259_v16 = vld [vmem:[%s1619_s26 + $0x130] ss:$8 sps:$4 sm:$0xff]   ;;  %v1262_v18 = vld [vmem:[%s1619_s26 + $0x144] ss:$8 sps:$4 sm:$0xff]  }
  0x62   : > { %748 = vmatpush1.bf16.msra.mxu0 %v1246_v7  ;;  %v1264_v19 = vld [vmem:[%s1619_s26 + $0x40] ss:$8 sps:$4 sm:$0xff]   ;;  %v1266_v21 = vld [vmem:[%s1619_s26 + $0x54] ss:$8 sps:$4 sm:$0xff]   ;;  %v1270_v23 = vld [vmem:[%s1619_s26 + $0x50] ss:$8 sps:$4 sm:$0xff]  }
  0x63   : > { %789 = vmatpush1.bf16.msra.mxu1 %v1247_v8  ;;  %749 = vmatprep.subr.bf16.mxu0 %v1248_v9  ;;  %v1265_v20 = vld [vmem:[%s1619_s26 + $0x140] ss:$8 sps:$4 sm:$0xff]   ;;  %v1268_v22 = vld [vmem:[%s1619_s26 + $0x154] ss:$8 sps:$4 sm:$0xff]   ;;  %v1271_v24 = vld [vmem:[%s1619_s26 + $0x150] ss:$8 sps:$4 sm:$0xff]  }
  0x64   : > { %790 = vmatprep.subr.bf16.mxu1 %v1250_v10  ;;  %v1272_v25 = vld [vmem:[%s1619_s26 + $0x64] ss:$8 sps:$4 sm:$0xff]   ;;  %v1276_v27 = vld [vmem:[%s1619_s26 + $0x60] ss:$8 sps:$4 sm:$0xff]   ;;  %v1278_v29 = vld [vmem:[%s1619_s26 + $0x74] ss:$8 sps:$4 sm:$0xff]  }
  0x65   : > { %v1274_v26 = vld [vmem:[%s1619_s26 + $0x164] ss:$8 sps:$4 sm:$0xff]   ;;  %v1277_v28 = vld [vmem:[%s1619_s26 + $0x160] ss:$8 sps:$4 sm:$0xff]   ;;  %v1280_v30 = vld [vmem:[%s1619_s26 + $0x174] ss:$8 sps:$4 sm:$0xff]  }
  0x66   : > { %750 = vmatpush1.bf16.msra.mxu0 %v1252_v11  ;;  %v1282_v31 = vld [vmem:[%s1619_s26 + $0x70] ss:$8 sps:$4 sm:$0xff]   ;;  %v1284_v33 = vld [vmem:[%s1619_s26 + $0x84] ss:$8 sps:$4 sm:$0xff]   ;;  %v1288_v35 = vld [vmem:[%s1619_s26 + $0x80] ss:$8 sps:$4 sm:$0xff]  }
  0x67   : > { %791 = vmatpush1.bf16.msra.mxu1 %v1253_v12  ;;  %751 = vmatprep.subr.bf16.mxu0 %v1254_v13  ;;  %v1283_v32 = vld [vmem:[%s1619_s26 + $0x170] ss:$8 sps:$4 sm:$0xff]   ;;  %v1286_v34 = vld [vmem:[%s1619_s26 + $0x184] ss:$8 sps:$4 sm:$0xff]   ;;  %v1289_v36 = vld [vmem:[%s1619_s26 + $0x180] ss:$8 sps:$4 sm:$0xff]  }
  0x68   : > { %792 = vmatprep.subr.bf16.mxu1 %v1256_v14  ;;  %v1290_v37 = vld [vmem:[%s1619_s26 + $0x94] ss:$8 sps:$4 sm:$0xff]   ;;  %v1294_v39 = vld [vmem:[%s1619_s26 + $0x90] ss:$8 sps:$4 sm:$0xff]   ;;  %v1296_v41 = vld [vmem:[%s1619_s26 + $0xa4] ss:$8 sps:$4 sm:$0xff]  }
  0x69   : > { %v1292_v38 = vld [vmem:[%s1619_s26 + $0x194] ss:$8 sps:$4 sm:$0xff]   ;;  %v1295_v40 = vld [vmem:[%s1619_s26 + $0x190] ss:$8 sps:$4 sm:$0xff]   ;;  %v1298_v42 = vld [vmem:[%s1619_s26 + $0x1a4] ss:$8 sps:$4 sm:$0xff]  }
  0x6a   : > { %752 = vmatpush1.bf16.msra.mxu0 %v1258_v15  ;;  %v1300_v43 = vld [vmem:[%s1619_s26 + $0xa0] ss:$8 sps:$4 sm:$0xff]   ;;  %v1302_v45 = vld [vmem:[%s1619_s26 + $0xb4] ss:$8 sps:$4 sm:$0xff]   ;;  %v1306_v50 = vld [vmem:[%s1619_s26 + $0xb0] ss:$8 sps:$4 sm:$0xff]  }
  0x6b   : > { %793 = vmatpush1.bf16.msra.mxu1 %v1259_v16  ;;  %753 = vmatprep.subr.bf16.mxu0 %v1260_v17  ;;  %v1301_v44 = vld [vmem:[%s1619_s26 + $0x1a0] ss:$8 sps:$4 sm:$0xff]   ;;  %v1304_v46 = vld [vmem:[%s1619_s26 + $0x1b4] ss:$8 sps:$4 sm:$0xff]   ;;  %v1307_v51 = vld [vmem:[%s1619_s26 + $0x1b0] ss:$8 sps:$4 sm:$0xff]  }
  0x6c   : > { %794 = vmatprep.subr.bf16.mxu1 %v1262_v18  ;;  %v345_v47 = vld [vmem:[%s1633_s8] sm:$0xff]  ;;  %v346_v49 = vld [vmem:[%s1633_s8 + $0x8] sm:$0xff]  ;;  %v1308_v53 = vld [vmem:[%s1619_s26 + $0xc4] ss:$8 sps:$4 sm:$0xff]   ;;  %p1155_p7 = scmp.ne.s32.totalorder %s1440_s18, 3 }
  0x6d   : > { %v1088_v48 = vcombine.high %v345_v47, %v345_v47  ;;  %v1090_v52 = vcombine.high %v346_v49, %v346_v49  ;;  %v1310_v54 = vld [vmem:[%s1619_s26 + $0x1c4] ss:$8 sps:$4 sm:$0xff]   ;;  %v1312_v55 = vld [vmem:[%s1619_s26 + $0xc0] ss:$8 sps:$4 sm:$0xff]   ;;  %v1314_v57 = vld [vmem:[%s1619_s26 + $0xd4] ss:$8 sps:$4 sm:$0xff]   ;;  %v1087_v5 = vcombine.low %v345_v47, %v345_v47  ;;  %v1089_v6 = vcombine.low %v346_v49, %v346_v49 }
  0x6e   : > { %754 = vmatpush1.bf16.msra.mxu0 %v1264_v19  ;;  %v1313_v56 = vld [vmem:[%s1619_s26 + $0x1c0] ss:$8 sps:$4 sm:$0xff]   ;;  %v1316_v58 = vld [vmem:[%s1619_s26 + $0x1d4] ss:$8 sps:$4 sm:$0xff]   ;;  %v1318_v59 = vld [vmem:[%s1619_s26 + $0xd0] ss:$8 sps:$4 sm:$0xff]  }
  0x6f   : > { %795 = vmatpush1.bf16.msra.mxu1 %v1265_v20  ;;  %755 = vmatprep.subr.bf16.mxu0 %v1266_v21  ;;  %v1319_v60 = vld [vmem:[%s1619_s26 + $0x1d0] ss:$8 sps:$4 sm:$0xff]   ;;  %v1320_v61 = vld [vmem:[%s1619_s26 + $0xe4] ss:$8 sps:$4 sm:$0xff]   ;;  %v1324_v63 = vld [vmem:[%s1619_s26 + $0xe0] ss:$8 sps:$4 sm:$0xff]   ;;  %v839_v21 = vlaneseq (!%p1155_p7) }
  0x70   : > { %796 = vmatprep.subr.bf16.mxu1 %v1268_v22  ;;  %777 = vmatprep.mubr.bf16.mxu0 %v1088_v48  ;;  %v1322_v62 = vld [vmem:[%s1619_s26 + $0x1e4] ss:$8 sps:$4 sm:$0xff]   ;;  %v1325_v0 = vld [vmem:[%s1619_s26 + $0x1e0] ss:$8 sps:$4 sm:$0xff]   ;;  %v1326_v1 = vld [vmem:[%s1619_s26 + $0xf4] ss:$8 sps:$4 sm:$0xff]  }
  0x71   : > { %818 = vmatprep.mubr.bf16.mxu1 %v1090_v52  ;;  %v1328_v2 = vld [vmem:[%s1619_s26 + $0x1f4] ss:$8 sps:$4 sm:$0xff]   ;;  %v1330_v3 = vld [vmem:[%s1619_s26 + $0xf0] ss:$8 sps:$4 sm:$0xff]   ;;  %v840_v22 = vshrl.u32 (!%p1155_p7), %v839_v21, 7  ;;  %vm886_vm0 = vcmask (!%p1155_p7), 1040384  }
  0x72   : > { %756 = vmatpush1.bf16.msra.mxu0 %v1270_v23  ;;  %v1331_v4 = vld [vmem:[%s1619_s26 + $0x1f0] ss:$8 sps:$4 sm:$0xff]   ;;  %v837_v23 = vld [vmem:[#allocation5] sm:$0x3] (!%p1155_p7) }
  0x73   : > { %797 = vmatpush1.bf16.msra.mxu1 %v1271_v24  ;;  %757 = vmatprep.subr.bf16.mxu0 %v1272_v25  ;;  %v343_v8 = vld [vmem:[#allocation2] sm:$0xff]  ;;  %v344_v12 = vld [vmem:[#allocation2 + $0x8] sm:$0xff]  ;;  %v841_v24 = vsub.s32 (!%p1155_p7), 0, %v840_v22  ;;  %v845_v25 = vsub.s32 (!%p1155_p7), 1, %v840_v22 }
  0x74   : > { %798 = vmatprep.subr.bf16.mxu1 %v1274_v26 }
  0x76   : > { %758 = vmatpush1.bf16.msra.mxu0 %v1276_v27 }
  0x77   : > { %799 = vmatpush1.bf16.msra.mxu1 %v1277_v28  ;;  %759 = vmatprep.subr.bf16.mxu0 %v1278_v29  ;;  %v842_v28 = vrot.slane (!%p1155_p7), %v837_v23, %v841_v24  ;;  %v846_v29 = vrot.slane (!%p1155_p7), %v837_v23, %v845_v25 }
  0x78   : > { %800 = vmatprep.subr.bf16.mxu1 %v1280_v30 }
  0x7a   : > { %760 = vmatpush1.bf16.msra.mxu0 %v1282_v31 }
  0x7b   : > { %801 = vmatpush1.bf16.msra.mxu1 %v1283_v32  ;;  %761 = vmatprep.subr.bf16.mxu0 %v1284_v33 }
  0x7c   : > { %802 = vmatprep.subr.bf16.mxu1 %v1286_v34 }
  0x7e   : > { %762 = vmatpush1.bf16.msra.mxu0 %v1288_v35 }
  0x7f   : > { %803 = vmatpush1.bf16.msra.mxu1 %v1289_v36  ;;  %763 = vmatprep.subr.bf16.mxu0 %v1290_v37 }
  0x80   : > { %804 = vmatprep.subr.bf16.mxu1 %v1292_v38 }
  0x82   : > { %764 = vmatpush1.bf16.msra.mxu0 %v1294_v39 }
  0x83   : > { %805 = vmatpush1.bf16.msra.mxu1 %v1295_v40  ;;  %765 = vmatprep.subr.bf16.mxu0 %v1296_v41 }
  0x84   : > { %806 = vmatprep.subr.bf16.mxu1 %v1298_v42 }
  0x86   : > { %766 = vmatpush1.bf16.msra.mxu0 %v1300_v43 }
  0x87   : > { %807 = vmatpush1.bf16.msra.mxu1 %v1301_v44  ;;  %767 = vmatprep.subr.bf16.mxu0 %v1302_v45 }
  0x88   : > { %808 = vmatprep.subr.bf16.mxu1 %v1304_v46 }
  0x8a   : > { %768 = vmatpush1.bf16.msra.mxu0 %v1306_v50 }
  0x8b   : > { %809 = vmatpush1.bf16.msra.mxu1 %v1307_v51  ;;  %769 = vmatprep.subr.bf16.mxu0 %v1308_v53 }
  0x8c   : > { %810 = vmatprep.subr.bf16.mxu1 %v1310_v54 }
  0x8e   : > { %770 = vmatpush1.bf16.msra.mxu0 %v1312_v55 }
  0x8f   : > { %811 = vmatpush1.bf16.msra.mxu1 %v1313_v56  ;;  %771 = vmatprep.subr.bf16.mxu0 %v1314_v57 }
  0x90   : > { %812 = vmatprep.subr.bf16.mxu1 %v1316_v58 }
  0x92   : > { %772 = vmatpush1.bf16.msra.mxu0 %v1318_v59 }
  0x93   : > { %813 = vmatpush1.bf16.msra.mxu1 %v1319_v60  ;;  %773 = vmatprep.subr.bf16.mxu0 %v1320_v61 }
  0x94   : > { %814 = vmatprep.subr.bf16.mxu1 %v1322_v62 }
  0x96   : > { %774 = vmatpush1.bf16.msra.mxu0 %v1324_v63 }
  0x97   : > { %815 = vmatpush1.bf16.msra.mxu1 %v1325_v0  ;;  %775 = vmatprep.subr.bf16.mxu0 %v1326_v1 }
  0x98   : > { %816 = vmatprep.subr.bf16.mxu1 %v1328_v2 }
  0x9a   : > { %776 = vmatpush1.bf16.msra.mxu0 %v1330_v3 }
  0x9b   : > { %817 = vmatpush1.bf16.msra.mxu1 %v1331_v4 }
  0x9d   : > { %778 = vmatmul.mubr.bf16.vlgmr.msra.gmra.mrb[0].mxu0 %v1087_v5 }
  0x9e   : > { %819 = vmatmul.mubr.bf16.vlgmr.msra.gmra.mrb[0].mxu1 %v1089_v6 }
 0x170   : > { %v779_v7 = vpop.f32.mrb[0].mxu0 }
 0x171   : > { %v820_v9 = vpop.f32.mrb[0].mxu1  ;;  %v781_v11 = vpop.f32.mrb[1].mxu0  ;;  %834 = sbr.rel (%p1155_p7) target bundleno = 403 (0x193), region = 48 }
 0x172   : > { %v821_v10 = vadd.f32 %v820_v9, %v779_v7  ;;  %v822_v13 = vpop.f32.mrb[1].mxu1  ;;  %v783_v15 = vpop.f32.mrb[2].mxu0 }
 0x173   : > { %v823_v14 = vadd.f32 %v822_v13, %v781_v11  ;;  %v824_v16 = vpop.f32.mrb[2].mxu1  ;;  %v784_v18 = vpop.f32.mrb[3].mxu0 }
 0x174   : > { %v827_v17 = vadd.f32 %v821_v10, %v343_v8  ;;  %v825_v19 = vpop.f32.mrb[3].mxu1 }
 0x175   : > { %v828_v20 = vadd.f32 %v823_v14, %v344_v12 }
 0x176   : > { %829 = vst [vmem:[#allocation2] sm:$0xff] %v827_v17 }
 0x177   : > { %830 = vst [vmem:[#allocation2 + $0x8] sm:$0xff] %v828_v20 }
 0x17d   : > { %v835_v26 = vld [vmem:[#allocation2] sm:$0xff] }
 0x17e   : > { %v836_v27 = vld [vmem:[#allocation2 + $0x8] sm:$0xff]  ;;  %v849_v30 = vadd.f32 %v842_v28, %v835_v26 }
 0x17f   : > { %v850_v31 = vadd.f32 %v846_v29, %v836_v27 }
 0x180   : > { %v860_v33 = vrot.slane %v849_v30, 4  ;;  %v872_v35 = vmul.f32 %v849_v30, %v849_v30 }
 0x181   : > { %v1166_v32 = vpack.c.bf16 %v850_v31, %v849_v30  ;;  %v866_v34 = vrot.slane %v850_v31, 4  ;;  %v873_v36 = vmul.f32 %v850_v31, %v850_v31 }
 0x182   : > { %v861_v37 = vadd.f32 %v860_v33, %v849_v30  ;;  %v874_v39 = vrot.slane %v872_v35, 4 }
 0x183   : > { %859 = vst [vmem:[%s1730_s3] sm:$0xff] %v1166_v32  ;;  %v867_v38 = vadd.f32 %v866_v34, %v850_v31  ;;  %v880_v40 = vrot.slane %v873_v36, 4 }
 0x184   : > { %v862_v41 = vrot.slane %v861_v37, 2  ;;  %v875_v43 = vadd.f32 %v874_v39, %v872_v35 }
 0x185   : > { %v868_v42 = vrot.slane %v867_v38, 2  ;;  %v881_v44 = vadd.f32 %v880_v40, %v873_v36 }
 0x186   : > { %v863_v45 = vadd.f32 %v862_v41, %v861_v37  ;;  %v876_v47 = vrot.slane %v875_v43, 2 }
 0x187   : > { %v869_v46 = vadd.f32 %v868_v42, %v867_v38  ;;  %v882_v48 = vrot.slane %v881_v44, 2 }
 0x188   : > { %v864_v49 = vrot.slane %v863_v45, 1  ;;  %v877_v51 = vadd.f32 %v876_v47, %v875_v43 }
 0x189   : > { %v870_v50 = vrot.slane %v869_v46, 1  ;;  %v883_v52 = vadd.f32 %v882_v48, %v881_v44 }
 0x18a   : > { %v865_v53 = vadd.f32 %v864_v49, %v863_v45  ;;  %v878_v54 = vrot.slane %v877_v51, 1 }
 0x18b   : > { %v871_v55 = vadd.f32 %v870_v50, %v869_v46  ;;  %v884_v56 = vrot.slane %v883_v52, 1 }
 0x18c   : > { %v879_v57 = vadd.f32 %v878_v54, %v877_v51 }
 0x18d   : > { %v885_v58 = vadd.f32 %v884_v56, %v883_v52 }
 0x18e   : > { %v887_v59 = vsel %vm886_vm0, %v865_v53, %v879_v57 }
 0x18f   : > { %v888_v60 = vsel %vm886_vm0, %v871_v55, %v885_v58 }
 0x190   : > { %v891_v61 = vcombine.low %v887_v59, %v888_v60 }
 0x192   : > { %1157 = vst.sshfl [vmem:[%s1731_s4] sm:$0x33 pattern:$0x76325410] %v891_v61 }
 0x193 PF: > { %s19_s20 = sadd.s32 1, %s1448_s20   ;;  %s1747_s10 = smov %s1754_s15 }
 0x194   : > { %p16_p9 = scmp.ge.s32.totalorder %s19_s20, 6   ;;  %s1748_s15 = smov %s1432_s16 }
 0x195   : > { %s1749_s16 = smov %s1436_s17  ;;  %s1750_s17 = smov %s1614_s12 }
 0x196   : > { %s1751_s18 = smov %s1444_s19  ;;  %s1752_s19 = smov %s1747_s10 }
 0x197   :  { %18 = sbr.rel (!%p16_p9) target bundleno = 5 (0x5), region = 100 }
 0x19e   :  { %956 = vsyncpa [#allocation4], 1 }
 0x19f   :  { %958 = vsyncpa [#allocation4 + $0x1], 1 }
 0x1a0   :  { %959 = vsyncpa [#allocation6], 1 }

// kernel: generator_sngan_forward.24
= control target key start
LH: loop header
LB: loop body
LE: loop exit
PB: predicated region body
PF: predicated region fallthrough
CT: control target
= control target key end

     0   :  { %v33_v2 = vlaneseq  ;;  %s178_s1 = inlined_call_operand.vmem [shape: f32[2,256], index: 1, kind: input, shape index: {}]   ;;  %s179_s0 = inlined_call_operand.vmem [shape: bf16[32,256], index: 0, kind: input, shape index: {}]   ;;  %s180_s2 = inlined_call_operand.vmem [shape: bf16[32,256], index: 2, kind: output, shape index: {}]  }
   0x1   :  { %v11_v0 = vld [vmem:[%s178_s1] sm:$0xf]  ;;  %v21_v13 = vld [vmem:[%s179_s0 + $0x8] sm:$0xff]  ;;  %v22_v14 = vld [vmem:[%s179_s0 + $0x10] sm:$0xff] }
   0x2   :  { %v12_v1 = vmul.f32 0.03125, %v11_v0  ;;  %v34_v5 = vshrl.u32 %v33_v2, 7  ;;  %v20_v12 = vld [vmem:[%s179_s0] sm:$0xff]  ;;  %v23_v15 = vld [vmem:[%s179_s0 + $0x18] sm:$0xff]  ;;  %v26_v22 = vunpack.c.l.bf16 %v21_v13  ;;  %v27_v23 = vunpack.c.h.bf16 %v21_v13 }
   0x3   :  { %v24_v16 = vunpack.c.l.bf16 %v20_v12  ;;  %v25_v17 = vunpack.c.h.bf16 %v20_v12  ;;  %v28_v24 = vunpack.c.l.bf16 %v22_v14  ;;  %v29_v25 = vunpack.c.h.bf16 %v22_v14 }
   0x4   :  { %v13_v3 = vmul.f32 %v12_v1, %v12_v1  ;;  %v35_v8 = vsub.s32 0, %v34_v5  ;;  %v39_v9 = vsub.s32 2, %v34_v5  ;;  %v62_v20 = vsub.s32 1, %v34_v5 }
   0x5   :  { %v66_v21 = vsub.s32 3, %v34_v5  ;;  %v30_v26 = vunpack.c.l.bf16 %v23_v15  ;;  %v31_v27 = vunpack.c.h.bf16 %v23_v15 }
   0x6   :  { %v15_v4 = vrot.slane %v13_v3, 7  ;;  %v36_v10 = vrot.slane %v12_v1, %v35_v8  ;;  %v40_v11 = vrot.slane %v12_v1, %v39_v9 }
   0x8   :  { %v17_v6 = vsub.f32 %v12_v1, %v15_v4  ;;  %v46_v18 = vrot.slane %v36_v10, %v35_v8  ;;  %v50_v19 = vrot.slane %v40_v11, %v35_v8 }
   0xa   :  { %v18_v7 = vadd.f32 1e-05, %v17_v6  ;;  %v51_v29 = vsub.f32 %v24_v16, %v46_v18  ;;  %v52_v30 = vsub.f32 %v25_v17, %v50_v19  ;;  %v53_v33 = vsub.f32 %v26_v22, %v46_v18 }
   0xb   :  { %v54_v34 = vsub.f32 %v27_v23, %v50_v19  ;;  %v55_v35 = vsub.f32 %v28_v24, %v46_v18  ;;  %v56_v36 = vsub.f32 %v29_v25, %v50_v19  ;;  %v57_v37 = vsub.f32 %v30_v26, %v46_v18 }
   0xc   :  { %134 = vrsqrt.f32 %v18_v7  ;;  %v58_v38 = vsub.f32 %v31_v27, %v50_v19 }
  0x16   :  { %v135_v28 = vpop.eup %134 }
  0x17   :  { %v63_v31 = vrot.slane %v135_v28, %v62_v20  ;;  %v67_v32 = vrot.slane %v135_v28, %v66_v21 }
  0x19   :  { %v73_v39 = vrot.slane %v63_v31, %v62_v20  ;;  %v77_v40 = vrot.slane %v67_v32, %v62_v20 }
  0x1b   :  { %v78_v41 = vmul.f32 %v73_v39, %v51_v29  ;;  %v79_v42 = vmul.f32 %v77_v40, %v52_v30  ;;  %v80_v43 = vmul.f32 %v73_v39, %v53_v33  ;;  %v81_v44 = vmul.f32 %v77_v40, %v54_v34 }
  0x1c   :  { %v82_v45 = vmul.f32 %v73_v39, %v55_v35  ;;  %v83_v46 = vmul.f32 %v77_v40, %v56_v36  ;;  %v84_v47 = vmul.f32 %v73_v39, %v57_v37  ;;  %v85_v48 = vmul.f32 %v77_v40, %v58_v38 }
  0x1d   :  { %v86_v49 = vmax.f32 %v78_v41, 0.0  ;;  %v87_v50 = vmax.f32 %v79_v42, 0.0  ;;  %v88_v51 = vmax.f32 %v80_v43, 0.0  ;;  %v89_v52 = vmax.f32 %v81_v44, 0.0 }
  0x1e   :  { %v90_v53 = vmax.f32 %v82_v45, 0.0  ;;  %v91_v54 = vmax.f32 %v83_v46, 0.0  ;;  %v92_v55 = vmax.f32 %v84_v47, 0.0  ;;  %v93_v56 = vmax.f32 %v85_v48, 0.0 }
  0x1f   :  { %v130_v57 = vpack.c.bf16 %v87_v50, %v86_v49  ;;  %v131_v58 = vpack.c.bf16 %v89_v52, %v88_v51 }
  0x20   :  { %v132_v59 = vpack.c.bf16 %v91_v54, %v90_v53  ;;  %v133_v60 = vpack.c.bf16 %v93_v56, %v92_v55 }
  0x21   :  { %118 = vst [vmem:[%s180_s2] sm:$0xff] %v130_v57  ;;  %119 = vst [vmem:[%s180_s2 + $0x8] sm:$0xff] %v131_v58 }
  0x22   :  { %120 = vst [vmem:[%s180_s2 + $0x10] sm:$0xff] %v132_v59  ;;  %121 = vst [vmem:[%s180_s2 + $0x18] sm:$0xff] %v133_v60 }

// kernel: generator_sngan_forward.25
= control target key start
LH: loop header
LB: loop body
LE: loop exit
PB: predicated region body
PF: predicated region fallthrough
CT: control target
= control target key end

     0   :  { %s1255_s15 = smov 0   ;;  %s1257_s16 = smov 0   ;;  %s1378_s0 = inlined_call_operand.vmem [shape: bf16[32,1024], index: 0, kind: input, shape index: {}]   ;;  %s1379_s1 = inlined_call_operand.vmem [shape: bf16[1024,128], index: 1, kind: input, shape index: {}]   ;;  %s1380_s2 = inlined_call_operand.vmem [shape: f32[1,128], index: 2, kind: input, shape index: {}]   ;;  %s1381_s3 = inlined_call_operand.vmem [shape: bf16[32,128], index: 3, kind: output, shape index: {0}]   ;;  %s1382_s4 = inlined_call_operand.vmem [shape: f32[1,2,128], index: 4, kind: output, shape index: {1}]  }
   0x1   :  { %s1259_s17 = smov 0   ;;  %s1261_s18 = smov 0  }
   0x2   :  { %s1263_s19 = smov 0  }
   0x3 LB: > { %s27_s20 = sadd.s32 1, %s1223_s18  ;;  %p50_p1 = scmp.ne.s32.totalorder %s1215_s16, %s1211_s15  ;;  %s1227_s19 = sphi %s1263_s19, %s15_s19   ;;  %s1223_s18 = sphi %s1261_s18, %s1386_s18   ;;  %s1219_s17 = sphi %s1259_s17, %s1385_s17   ;;  %s1215_s16 = sphi %s1257_s16, %s1384_s16   ;;  %s1211_s15 = sphi %s1255_s15, %s1383_s15  }
   0x4   : > { %p28_p0 = scmp.ge.s32.totalorder %s27_s20, 2  ;;  %p51_p2 = scmp.eq.s32.totalorder %s1227_s19, 0 }
   0x5   : > { %s43_s22 = sadd.s32 1, %s1215_s16  ;;  %p972_p5 = scmp.ge.s32.totalorder %s1227_s19, 2 }
   0x6   : > { %s1388_s20 = smov (%p28_p0, %s27_s20), 0  ;;  %p52_p3 = por %p51_p2, %p50_p1 }
   0x7   : > { %s39_s21 = ssub.s32 %s1223_s18, %s1388_s20  ;;  %192 = sbr.rel (%p972_p5) target bundleno = 22 (0x16), region = 20 }
   0x8   : > { %p41_p4 = scmp.eq.s32.totalorder %s39_s21, 0 }
   0xa   : > { %s1290_s23 = scalar_select %p41_p4, %s1215_s16, %s43_s22  }
   0xe   : > { %195 = sbr.rel (!%p52_p3) target bundleno = 22 (0x16), region = 24  ;;  %s197_s24 = sand.u32 (%p52_p3), 1, %s1215_s16  }
   0xf   : > { %s1032_s25 = sshll.u32 (%p52_p3), %s1223_s18, 4  ;;  %s973_s26 = sshll.u32 (%p52_p3), %s197_s24, 6 }
  0x10   : > { %s205_s29 = scalar_lea.vmem (%p52_p3), %s1378_s0, %s1032_s25  ;;  %s199_s30 = scalar_lea.vmem (%p52_p3), [#allocation3], %s973_s26 }
  0x11   : > { %v218_v0 = vld [vmem:[%s205_s29] sm:$0xff] (%p52_p3)  ;;  %v220_v1 = vld [vmem:[%s205_s29 + $0x8] sm:$0xff] (%p52_p3) }
  0x12   : > { %v222_v2 = vld [vmem:[%s205_s29 + $0x20] sm:$0xff] (%p52_p3)  ;;  %219 = vst [vmem:[%s199_s30] sm:$0xff] (%p52_p3), %v218_v0  ;;  %221 = vst [vmem:[%s199_s30 + $0x8] sm:$0xff] (%p52_p3), %v220_v1  ;;  %v224_v3 = vld [vmem:[%s205_s29 + $0x28] sm:$0xff] (%p52_p3) }
  0x13   : > { %223 = vst [vmem:[%s199_s30 + $0x10] sm:$0xff] (%p52_p3), %v222_v2  ;;  %v226_v4 = vld [vmem:[%s205_s29 + $0x40] sm:$0xff] (%p52_p3)  ;;  %v228_v5 = vld [vmem:[%s205_s29 + $0x48] sm:$0xff] (%p52_p3)  ;;  %225 = vst [vmem:[%s199_s30 + $0x18] sm:$0xff] (%p52_p3), %v224_v3 }
  0x14   : > { %227 = vst [vmem:[%s199_s30 + $0x20] sm:$0xff] (%p52_p3), %v226_v4  ;;  %229 = vst [vmem:[%s199_s30 + $0x28] sm:$0xff] (%p52_p3), %v228_v5  ;;  %v230_v6 = vld [vmem:[%s205_s29 + $0x60] sm:$0xff] (%p52_p3)  ;;  %v232_v7 = vld [vmem:[%s205_s29 + $0x68] sm:$0xff] (%p52_p3) }
  0x15   : > { %231 = vst [vmem:[%s199_s30 + $0x30] sm:$0xff] %v230_v6  ;;  %233 = vst [vmem:[%s199_s30 + $0x38] sm:$0xff] %v232_v7 }
  0x16 PF: > { %p976_p6 = scmp.ge.s32.totalorder %s1227_s19, 1  ;;  %p250_p7 = scmp.lt.s32.totalorder %s1227_s19, 3 }
  0x18   : > { %p251_p8 = pnand %p976_p6, %p250_p7 }
  0x19   : > { %s257_s5 = sand.u32 (!%p251_p8), 1, %s1211_s15   ;;  %s978_s6 = sshll.u32 (!%p251_p8), %s1219_s17, 6 }
  0x1a   : > { %254 = sbr.rel (%p251_p8) target bundleno = 332 (0x14c), region = 51  ;;  %s977_s7 = sshll.u32 (!%p251_p8), %s257_s5, 6 }
  0x1b   : > { %p306_p9 = scmp.lt.s32.totalorder (!%p251_p8), %s978_s6, 127  ;;  %s1307_s12 = scalar_lea.vmem (!%p251_p8), [#allocation3], %s977_s7 }
  0x1c   : > { %p980_p10 = scmp.ne.s32.totalorder (!%p251_p8), %s1219_s17, 0 }
  0x21   : > { %s1390_s6 = smov (!%p306_p9, %s978_s6), 127  ;;  %337 = sbr.rel (%p980_p10) target bundleno = 40 (0x28), region = 59 }
  0x22   : > { %s979_s8 = sshll.u32 %s1390_s6, 2  ;;  %v1229_v8 = vmov (!%p980_p10), 0.0  }
  0x23   : > { %s1305_s11 = scalar_lea.vmem %s1379_s1, %s979_s8  ;;  %338 = vst [vmem:[#allocation2] sm:$0xff] (!%p980_p10), %v1229_v8  ;;  %339 = vst [vmem:[#allocation2 + $0x8] sm:$0xff] (!%p980_p10), %v1229_v8 }
  0x24   : > { %340 = vst [vmem:[#allocation2 + $0x10] sm:$0xff] (!%p980_p10), %v1229_v8  ;;  %341 = vst [vmem:[#allocation2 + $0x18] sm:$0xff] (!%p980_p10), %v1229_v8 }
  0x28 PF: > { %v1145_v9 = vld [vmem:[%s1305_s11 + $0x40] sm:$0xff]   ;;  %v1149_v13 = vld [vmem:[%s1305_s11 + $0x48] sm:$0xff]   ;;  %v1153_v17 = vld [vmem:[%s1305_s11 + $0x50] sm:$0xff]   ;;  %p1021_p11 = scmp.ne.s32.totalorder %s1219_s17, 1 }
  0x29   : > { %v1146_v10 = vld [vmem:[%s1305_s11 + $0xc0] sm:$0xff]   ;;  %1048 = vmatprep.subr.bf16.mxu0 %v1145_v9  ;;  %v1150_v14 = vld [vmem:[%s1305_s11 + $0xc8] sm:$0xff]   ;;  %v1154_v18 = vld [vmem:[%s1305_s11 + $0xd0] sm:$0xff]   ;;  %vm817_vm0 = vcmask (!%p1021_p11), 1040384  }
  0x2a   : > { %v1147_v11 = vld [vmem:[%s1305_s11] sm:$0xff]   ;;  %1076 = vmatprep.subr.bf16.mxu1 %v1146_v10  ;;  %v1151_v15 = vld [vmem:[%s1305_s11 + $0x8] sm:$0xff]   ;;  %v1155_v19 = vld [vmem:[%s1305_s11 + $0x10] sm:$0xff]  }
  0x2b   : > { %v1148_v12 = vld [vmem:[%s1305_s11 + $0x80] sm:$0xff]   ;;  %1049 = vmatpush3.bf16.msra.mxu0 %v1147_v11  ;;  %v1152_v16 = vld [vmem:[%s1305_s11 + $0x88] sm:$0xff]   ;;  %v1156_v20 = vld [vmem:[%s1305_s11 + $0x90] sm:$0xff]  }
  0x2c   : > { %1077 = vmatpush3.bf16.msra.mxu1 %v1148_v12  ;;  %1050 = vmatprep.subr.bf16.mxu0 %v1149_v13  ;;  %v1157_v21 = vld [vmem:[%s1305_s11 + $0x58] sm:$0xff]   ;;  %v1161_v25 = vld [vmem:[%s1305_s11 + $0x60] sm:$0xff]   ;;  %v1165_v29 = vld [vmem:[%s1305_s11 + $0x68] sm:$0xff]  }
  0x2d   : > { %1078 = vmatprep.subr.bf16.mxu1 %v1150_v14  ;;  %v1158_v22 = vld [vmem:[%s1305_s11 + $0xd8] sm:$0xff]   ;;  %v1162_v26 = vld [vmem:[%s1305_s11 + $0xe0] sm:$0xff]   ;;  %v1166_v30 = vld [vmem:[%s1305_s11 + $0xe8] sm:$0xff]  }
  0x2e   : > { %v1159_v23 = vld [vmem:[%s1305_s11 + $0x18] sm:$0xff]   ;;  %v1163_v27 = vld [vmem:[%s1305_s11 + $0x20] sm:$0xff]   ;;  %v1167_v31 = vld [vmem:[%s1305_s11 + $0x28] sm:$0xff]  }
  0x2f   : > { %1051 = vmatpush3.bf16.msra.mxu0 %v1151_v15  ;;  %v1160_v24 = vld [vmem:[%s1305_s11 + $0x98] sm:$0xff]   ;;  %v1164_v28 = vld [vmem:[%s1305_s11 + $0xa0] sm:$0xff]   ;;  %v1168_v32 = vld [vmem:[%s1305_s11 + $0xa8] sm:$0xff]  }
  0x30   : > { %1079 = vmatpush3.bf16.msra.mxu1 %v1152_v16  ;;  %1052 = vmatprep.subr.bf16.mxu0 %v1153_v17  ;;  %v1169_v33 = vld [vmem:[%s1305_s11 + $0x70] sm:$0xff]   ;;  %v1173_v37 = vld [vmem:[%s1305_s11 + $0x78] sm:$0xff]   ;;  %v342_v58 = vld [vmem:[#allocation2] sm:$0xff] }
  0x31   : > { %1080 = vmatprep.subr.bf16.mxu1 %v1154_v18  ;;  %v1170_v34 = vld [vmem:[%s1305_s11 + $0xf0] sm:$0xff]   ;;  %v1174_v38 = vld [vmem:[%s1305_s11 + $0xf8] sm:$0xff]   ;;  %v343_v63 = vld [vmem:[#allocation2 + $0x8] sm:$0xff] }
  0x32   : > { %v1171_v35 = vld [vmem:[%s1305_s11 + $0x30] sm:$0xff]   ;;  %v1175_v39 = vld [vmem:[%s1305_s11 + $0x38] sm:$0xff]  }
  0x33   : > { %1053 = vmatpush3.bf16.msra.mxu0 %v1155_v19  ;;  %v1172_v36 = vld [vmem:[%s1305_s11 + $0xb0] sm:$0xff]   ;;  %v1176_v40 = vld [vmem:[%s1305_s11 + $0xb8] sm:$0xff]  }
  0x34   : > { %1081 = vmatpush3.bf16.msra.mxu1 %v1156_v20  ;;  %1054 = vmatprep.subr.bf16.mxu0 %v1157_v21  ;;  %v1177_v41 = vld [vmem:[%s1307_s12] ss:$16 sps:$4 sm:$0xff]   ;;  %v1179_v42 = vld [vmem:[%s1307_s12 + $0x4] ss:$16 sps:$4 sm:$0xff]   ;;  %v1180_v43 = vld [vmem:[%s1307_s12 + $0x8] ss:$16 sps:$4 sm:$0xff]  }
  0x35   : > { %1082 = vmatprep.subr.bf16.mxu1 %v1158_v22  ;;  %v1182_v44 = vld [vmem:[%s1307_s12 + $0xc] ss:$16 sps:$4 sm:$0xff]   ;;  %682 = vmatprep.mubr.bf16.mxu0 %v1179_v42  ;;  %v1183_v45 = vld [vmem:[%s1307_s12 + $0x24] ss:$16 sps:$4 sm:$0xff]   ;;  %v1187_v47 = vld [vmem:[%s1307_s12 + $0x20] ss:$16 sps:$4 sm:$0xff]  }
  0x36   : > { %731 = vmatprep.mubr.bf16.mxu1 %v1182_v44  ;;  %v1185_v46 = vld [vmem:[%s1307_s12 + $0x2c] ss:$16 sps:$4 sm:$0xff]   ;;  %v1188_v48 = vld [vmem:[%s1307_s12 + $0x28] ss:$16 sps:$4 sm:$0xff]   ;;  %v344_v12 = vld [vmem:[#allocation2 + $0x10] sm:$0xff] }
  0x37   : > { %1055 = vmatpush3.bf16.msra.mxu0 %v1159_v23  ;;  %v345_v17 = vld [vmem:[#allocation2 + $0x18] sm:$0xff]  ;;  %v1022_v23 = vld [vmem:[%s1380_s2] ss:$0 sm:$0xff] (!%p1021_p11) }
  0x38   : > { %1083 = vmatpush3.bf16.msra.mxu1 %v1160_v24  ;;  %1056 = vmatprep.subr.bf16.mxu0 %v1161_v25 }
  0x39   : > { %1084 = vmatprep.subr.bf16.mxu1 %v1162_v26 }
  0x3b   : > { %1057 = vmatpush3.bf16.msra.mxu0 %v1163_v27 }
  0x3c   : > { %1085 = vmatpush3.bf16.msra.mxu1 %v1164_v28  ;;  %1058 = vmatprep.subr.bf16.mxu0 %v1165_v29 }
  0x3d   : > { %1086 = vmatprep.subr.bf16.mxu1 %v1166_v30 }
  0x3f   : > { %1059 = vmatpush3.bf16.msra.mxu0 %v1167_v31 }
  0x40   : > { %1087 = vmatpush3.bf16.msra.mxu1 %v1168_v32  ;;  %1060 = vmatprep.subr.bf16.mxu0 %v1169_v33 }
  0x41   : > { %1088 = vmatprep.subr.bf16.mxu1 %v1170_v34 }
  0x43   : > { %1061 = vmatpush3.bf16.msra.mxu0 %v1171_v35 }
  0x44   : > { %1089 = vmatpush3.bf16.msra.mxu1 %v1172_v36  ;;  %1062 = vmatprep.subr.bf16.mxu0 %v1173_v37 }
  0x45   : > { %1090 = vmatprep.subr.bf16.mxu1 %v1174_v38 }
  0x47   : > { %1063 = vmatpush3.bf16.msra.mxu0 %v1175_v39 }
  0x48   : > { %1091 = vmatpush3.bf16.msra.mxu1 %v1176_v40 }
  0x4a   : > { %683 = vmatmul.mubr.bf16.vlgmr.msra.gmra.mrb[0].mxu0 %v1177_v41 }
  0x4b   : > { %732 = vmatmul.mubr.bf16.vlgmr.msra.gmra.mrb[0].mxu1 %v1180_v43  ;;  %690 = vmatprep.mubr.bf16.mxu0 %v1183_v45 }
  0x4c   : > { %739 = vmatprep.mubr.bf16.mxu1 %v1185_v46 }
  0x52   : > { %691 = vmatmul.mubr.bf16.gmra.mrb[4].mxu0 %v1187_v47 }
  0x53   : > { %740 = vmatmul.mubr.bf16.gmra.mrb[4].mxu1 %v1188_v48 }
 0x11d   : > { %v1064_v49 = vpop.f32.mrb[0].mxu0 }
 0x11e   : > { %v1092_v50 = vpop.f32.mrb[0].mxu1  ;;  %v1065_v51 = vpop.f32.mrb[1].mxu0 }
 0x11f   : > { %v1066_v52 = vadd.f32 %v1065_v51, %v1064_v49  ;;  %v1093_v53 = vpop.f32.mrb[1].mxu1  ;;  %v1067_v54 = vpop.f32.mrb[2].mxu0 }
 0x120   : > { %v1094_v55 = vadd.f32 %v1093_v53, %v1092_v50  ;;  %v1095_v56 = vpop.f32.mrb[2].mxu1  ;;  %v1068_v57 = vpop.f32.mrb[3].mxu0 }
 0x121   : > { %v1069_v59 = vadd.f32 %v1068_v57, %v1067_v54  ;;  %v1096_v60 = vpop.f32.mrb[3].mxu1 }
 0x122   : > { %v734_v61 = vadd.f32 %v1094_v55, %v1066_v52  ;;  %v1097_v62 = vadd.f32 %v1096_v60, %v1095_v56 }
 0x124   : > { %v748_v0 = vadd.f32 %v734_v61, %v342_v58  ;;  %v737_v1 = vadd.f32 %v1097_v62, %v1069_v59 }
 0x125   : > { %v1070_v2 = vpop.f32.mrb[4].mxu0 }
 0x126   : > { %752 = vst [vmem:[#allocation2] sm:$0xff] %v748_v0  ;;  %v749_v3 = vadd.f32 %v737_v1, %v343_v63  ;;  %v1098_v4 = vpop.f32.mrb[4].mxu1  ;;  %v1071_v5 = vpop.f32.mrb[5].mxu0 }
 0x127   : > { %v1072_v6 = vadd.f32 %v1071_v5, %v1070_v2  ;;  %v1099_v7 = vpop.f32.mrb[5].mxu1  ;;  %v1073_v8 = vpop.f32.mrb[6].mxu0 }
 0x128   : > { %753 = vst [vmem:[#allocation2 + $0x8] sm:$0xff] %v749_v3  ;;  %v1100_v9 = vadd.f32 %v1099_v7, %v1098_v4  ;;  %v1101_v10 = vpop.f32.mrb[6].mxu1  ;;  %v1074_v11 = vpop.f32.mrb[7].mxu0 }
 0x129   : > { %v1075_v13 = vadd.f32 %v1074_v11, %v1073_v8  ;;  %v1102_v14 = vpop.f32.mrb[7].mxu1 }
 0x12a   : > { %v742_v15 = vadd.f32 %v1100_v9, %v1072_v6  ;;  %v1103_v16 = vadd.f32 %v1102_v14, %v1101_v10  ;;  %759 = sbr.rel (%p1021_p11) target bundleno = 332 (0x14c), region = 63 }
 0x12c   : > { %v750_v18 = vadd.f32 %v742_v15, %v344_v12  ;;  %v745_v19 = vadd.f32 %v1103_v16, %v1075_v13 }
 0x12d   : > { %v760_v21 = vld [vmem:[#allocation2] sm:$0xff] (!%p1021_p11) }
 0x12e   : > { %754 = vst [vmem:[#allocation2 + $0x10] sm:$0xff] %v750_v18  ;;  %v751_v20 = vadd.f32 %v745_v19, %v345_v17  ;;  %v771_v24 = vadd.f32 (!%p1021_p11), %v1022_v23, %v760_v21 }
 0x12f   : > { %v761_v22 = vld [vmem:[#allocation2 + $0x8] sm:$0xff] (!%p1021_p11) }
 0x130   : > { %755 = vst [vmem:[#allocation2 + $0x18] sm:$0xff] %v751_v20  ;;  %v772_v25 = vadd.f32 (!%p1021_p11), %v1022_v23, %v761_v22  ;;  %v804_v32 = vmul.f32 (!%p1021_p11), %v771_v24, %v771_v24 }
 0x132   : > { %v1040_v30 = vpack.c.bf16 %v772_v25, %v771_v24  ;;  %v795_v31 = vadd.f32 %v772_v25, %v771_v24  ;;  %v805_v33 = vmul.f32 %v772_v25, %v772_v25 }
 0x134   : > { %1041 = vst [vmem:[%s1381_s3] sm:$0xff] %v1040_v30   ;;  %v808_v36 = vadd.f32 %v805_v33, %v804_v32 }
 0x135   : > { %v762_v26 = vld [vmem:[#allocation2 + $0x10] sm:$0xff] }
 0x136   : > { %v773_v28 = vadd.f32 %v1022_v23, %v762_v26 }
 0x137   : > { %v763_v27 = vld [vmem:[#allocation2 + $0x18] sm:$0xff] }
 0x138   : > { %v774_v29 = vadd.f32 %v1022_v23, %v763_v27  ;;  %v806_v35 = vmul.f32 %v773_v28, %v773_v28  ;;  %v796_v37 = vadd.f32 %v795_v31, %v773_v28 }
 0x13a   : > { %v1045_v34 = vpack.c.bf16 %v774_v29, %v773_v28  ;;  %v807_v38 = vmul.f32 %v774_v29, %v774_v29  ;;  %v797_v39 = vadd.f32 %v796_v37, %v774_v29  ;;  %v809_v40 = vadd.f32 %v808_v36, %v806_v35 }
 0x13c   : > { %1047 = vst [vmem:[%s1381_s3 + $0x8] sm:$0xff] %v1045_v34   ;;  %v798_v41 = vrot.slane %v797_v39, 4  ;;  %v810_v42 = vadd.f32 %v809_v40, %v807_v38 }
 0x13e   : > { %v799_v43 = vadd.f32 %v798_v41, %v797_v39  ;;  %v811_v44 = vrot.slane %v810_v42, 4 }
 0x140   : > { %v800_v45 = vrot.slane %v799_v43, 2  ;;  %v812_v46 = vadd.f32 %v811_v44, %v810_v42 }
 0x142   : > { %v801_v47 = vadd.f32 %v800_v45, %v799_v43  ;;  %v813_v48 = vrot.slane %v812_v46, 2 }
 0x144   : > { %v802_v49 = vrot.slane %v801_v47, 1  ;;  %v814_v50 = vadd.f32 %v813_v48, %v812_v46 }
 0x146   : > { %v803_v51 = vadd.f32 %v802_v49, %v801_v47  ;;  %v815_v52 = vrot.slane %v814_v50, 1 }
 0x148   : > { %v816_v53 = vadd.f32 %v815_v52, %v814_v50 }
 0x14a   : > { %v818_v54 = vsel %vm817_vm0, %v803_v51, %v816_v53 }
 0x14b   : > { %819 = vst [vmem:[%s1382_s4] sm:$0x3] %v818_v54 }
 0x14c PF: > { %s15_s19 = sadd.s32 1, %s1227_s19   ;;  %s1383_s15 = smov %s1215_s16 }
 0x14d   : > { %p12_p12 = scmp.ge.s32.totalorder %s15_s19, 4   ;;  %s1384_s16 = smov %s1290_s23 }
 0x14e   : > { %s1385_s17 = smov %s1223_s18  ;;  %s1386_s18 = smov %s1388_s20 }
 0x14f   :  { %14 = sbr.rel (!%p12_p12) target bundleno = 3 (0x3), region = 116 }

// kernel: generator_sngan_forward.29
= control target key start
LH: loop header
LB: loop body
LE: loop exit
PB: predicated region body
PF: predicated region fallthrough
CT: control target
= control target key end

     0   :  { %v52_v3 = vlaneseq  ;;  %s378_s1 = inlined_call_operand.vmem [shape: f32[2,128], index: 1, kind: input, shape index: {}]   ;;  %s379_s0 = inlined_call_operand.vmem [shape: bf16[128,128], index: 0, kind: input, shape index: {}]   ;;  %s380_s2 = inlined_call_operand.vmem [shape: bf16[128,128], index: 2, kind: output, shape index: {}]  }
   0x1   :  { %v11_v0 = vld [vmem:[%s378_s1] sm:$0x3]  ;;  %v296_v10 = vld [vmem:[%s379_s0 + $0x8] sm:$0xff]   ;;  %v297_v11 = vld [vmem:[%s379_s0 + $0x10] sm:$0xff]  }
   0x2   :  { %v12_v1 = vmul.f32 0.0078125, %v11_v0  ;;  %v53_v6 = vshrl.u32 %v52_v3, 7  ;;  %v225_v9 = vld [vmem:[%s379_s0] sm:$0xff]   ;;  %v298_v12 = vld [vmem:[%s379_s0 + $0x18] sm:$0xff]   ;;  %v300_v17 = vld [vmem:[%s379_s0 + $0x28] sm:$0xff]   ;;  %v230_v19 = vunpack.c.l.bf16 %v296_v10  ;;  %v231_v20 = vunpack.c.h.bf16 %v296_v10 }
   0x3   :  { %v299_v13 = vld [vmem:[%s379_s0 + $0x20] sm:$0xff]   ;;  %v226_v14 = vunpack.c.l.bf16 %v225_v9  ;;  %v227_v15 = vunpack.c.h.bf16 %v225_v9  ;;  %v301_v18 = vld [vmem:[%s379_s0 + $0x30] sm:$0xff]   ;;  %v234_v21 = vunpack.c.l.bf16 %v297_v11  ;;  %v235_v22 = vunpack.c.h.bf16 %v297_v11  ;;  %v302_v23 = vld [vmem:[%s379_s0 + $0x38] sm:$0xff]  }
   0x4   :  { %v13_v2 = vmul.f32 %v12_v1, %v12_v1  ;;  %v54_v8 = vsub.s32 0, %v53_v6  ;;  %v74_v24 = vsub.s32 1, %v53_v6  ;;  %v238_v25 = vunpack.c.l.bf16 %v298_v12 }
   0x5   :  { %v239_v26 = vunpack.c.h.bf16 %v298_v12  ;;  %v242_v27 = vunpack.c.l.bf16 %v299_v13  ;;  %v243_v28 = vunpack.c.h.bf16 %v299_v13  ;;  %v246_v29 = vunpack.c.l.bf16 %v300_v17 }
   0x6   :  { %v15_v4 = vrot.slane %v13_v2, 7  ;;  %v55_v16 = vrot.slane %v12_v1, %v54_v8  ;;  %v247_v30 = vunpack.c.h.bf16 %v300_v17  ;;  %v250_v31 = vunpack.c.l.bf16 %v301_v18 }
   0x7   :  { %v251_v33 = vunpack.c.h.bf16 %v301_v18  ;;  %v254_v34 = vunpack.c.l.bf16 %v302_v23  ;;  %v255_v35 = vunpack.c.h.bf16 %v302_v23 }
   0x8   :  { %v17_v5 = vsub.f32 %v12_v1, %v15_v4  ;;  %v56_v32 = vsub.f32 %v226_v14, %v55_v16  ;;  %v57_v36 = vsub.f32 %v227_v15, %v55_v16  ;;  %v58_v37 = vsub.f32 %v230_v19, %v55_v16 }
   0x9   :  { %v59_v38 = vsub.f32 %v231_v20, %v55_v16  ;;  %v60_v39 = vsub.f32 %v234_v21, %v55_v16  ;;  %v61_v41 = vsub.f32 %v235_v22, %v55_v16  ;;  %v62_v42 = vsub.f32 %v238_v25, %v55_v16 }
   0xa   :  { %v18_v7 = vadd.f32 1e-05, %v17_v5  ;;  %v63_v43 = vsub.f32 %v239_v26, %v55_v16  ;;  %v64_v44 = vsub.f32 %v242_v27, %v55_v16  ;;  %v65_v46 = vsub.f32 %v243_v28, %v55_v16 }
   0xb   :  { %v66_v47 = vsub.f32 %v246_v29, %v55_v16  ;;  %v67_v48 = vsub.f32 %v247_v30, %v55_v16  ;;  %v68_v49 = vsub.f32 %v250_v31, %v55_v16  ;;  %v69_v50 = vsub.f32 %v251_v33, %v55_v16 }
   0xc   :  { %310 = vrsqrt.f32 %v18_v7  ;;  %v70_v51 = vsub.f32 %v254_v34, %v55_v16  ;;  %v71_v52 = vsub.f32 %v255_v35, %v55_v16 }
  0x16   :  { %v311_v40 = vpop.eup %310 }
  0x17   :  { %v75_v45 = vrot.slane %v311_v40, %v74_v24 }
  0x19   :  { %v76_v53 = vmul.f32 %v75_v45, %v56_v32  ;;  %v77_v54 = vmul.f32 %v75_v45, %v57_v36  ;;  %v78_v55 = vmul.f32 %v75_v45, %v58_v37  ;;  %v79_v56 = vmul.f32 %v75_v45, %v59_v38 }
  0x1a   :  { %v80_v57 = vmul.f32 %v75_v45, %v60_v39  ;;  %v81_v58 = vmul.f32 %v75_v45, %v61_v41  ;;  %v82_v59 = vmul.f32 %v75_v45, %v62_v42  ;;  %v83_v60 = vmul.f32 %v75_v45, %v63_v43 }
  0x1b   :  { %v92_v61 = vmax.f32 %v76_v53, 0.0  ;;  %v93_v62 = vmax.f32 %v77_v54, 0.0  ;;  %v94_v63 = vmax.f32 %v78_v55, 0.0  ;;  %v95_v0 = vmax.f32 %v79_v56, 0.0 }
  0x1c   :  { %v96_v1 = vmax.f32 %v80_v57, 0.0  ;;  %v97_v2 = vmax.f32 %v81_v58, 0.0  ;;  %v98_v3 = vmax.f32 %v82_v59, 0.0  ;;  %v99_v4 = vmax.f32 %v83_v60, 0.0 }
  0x1d   :  { %v259_v5 = vpack.c.bf16 %v93_v62, %v92_v61  ;;  %v264_v6 = vpack.c.bf16 %v95_v0, %v94_v63  ;;  %v84_v7 = vmul.f32 %v75_v45, %v64_v44  ;;  %v85_v8 = vmul.f32 %v75_v45, %v65_v46 }
  0x1e   :  { %v269_v9 = vpack.c.bf16 %v97_v2, %v96_v1  ;;  %v274_v10 = vpack.c.bf16 %v99_v4, %v98_v3  ;;  %v86_v11 = vmul.f32 %v75_v45, %v66_v47  ;;  %v87_v12 = vmul.f32 %v75_v45, %v67_v48 }
  0x1f   :  { %260 = vst [vmem:[%s380_s2] sm:$0xff] %v259_v5   ;;  %303 = vst [vmem:[%s380_s2 + $0x8] sm:$0xff] %v264_v6   ;;  %v100_v13 = vmax.f32 %v84_v7, 0.0  ;;  %v101_v14 = vmax.f32 %v85_v8, 0.0  ;;  %v88_v15 = vmul.f32 %v75_v45, %v68_v49  ;;  %v89_v16 = vmul.f32 %v75_v45, %v69_v50 }
  0x20   :  { %304 = vst [vmem:[%s380_s2 + $0x10] sm:$0xff] %v269_v9   ;;  %305 = vst [vmem:[%s380_s2 + $0x18] sm:$0xff] %v274_v10   ;;  %v102_v17 = vmax.f32 %v86_v11, 0.0  ;;  %v103_v18 = vmax.f32 %v87_v12, 0.0  ;;  %v90_v19 = vmul.f32 %v75_v45, %v70_v51  ;;  %v91_v20 = vmul.f32 %v75_v45, %v71_v52 }
  0x21   :  { %v279_v21 = vpack.c.bf16 %v101_v14, %v100_v13  ;;  %v104_v22 = vmax.f32 %v88_v15, 0.0  ;;  %v105_v23 = vmax.f32 %v89_v16, 0.0 }
  0x22   :  { %v284_v24 = vpack.c.bf16 %v103_v18, %v102_v17  ;;  %v106_v25 = vmax.f32 %v90_v19, 0.0  ;;  %v107_v26 = vmax.f32 %v91_v20, 0.0 }
  0x23   :  { %306 = vst [vmem:[%s380_s2 + $0x20] sm:$0xff] %v279_v21   ;;  %v289_v27 = vpack.c.bf16 %v105_v23, %v104_v22 }
  0x24   :  { %307 = vst [vmem:[%s380_s2 + $0x28] sm:$0xff] %v284_v24   ;;  %v294_v28 = vpack.c.bf16 %v107_v26, %v106_v25 }
  0x25   :  { %308 = vst [vmem:[%s380_s2 + $0x30] sm:$0xff] %v289_v27  }
  0x26   :  { %309 = vst [vmem:[%s380_s2 + $0x38] sm:$0xff] %v294_v28  }

// kernel: generator_sngan_forward.34
= control target key start
LH: loop header
LB: loop body
LE: loop exit
PB: predicated region body
PF: predicated region fallthrough
CT: control target
= control target key end

     0   :  { %v148_v0 = vlaneseq  ;;  %s1626_s0 = inlined_call_operand.vmem [shape: bf16[512,128], index: 0, kind: input, shape index: {}]   ;;  %s1627_s1 = inlined_call_operand.vmem [shape: f32[2,128], index: 1, kind: input, shape index: {}]   ;;  %s1628_s2 = inlined_call_operand.vmem [shape: bf16[512,128], index: 2, kind: output, shape index: {}]  }
   0x1   :  { %v11_v1 = vld [vmem:[%s1627_s1] sm:$0x3]  ;;  %v1088_v3 = vld [vmem:[%s1626_s0 + $0x8] sm:$0xff]   ;;  %v1089_v8 = vld [vmem:[%s1626_s0 + $0x10] sm:$0xff]  }
   0x2   :  { %v801_v2 = vld [vmem:[%s1626_s0] sm:$0xff]   ;;  %v12_v4 = vmul.f32 0.001953125, %v11_v1  ;;  %v1176_v7 = vshrl.u32 %v148_v0, 7  ;;  %v1090_v9 = vld [vmem:[%s1626_s0 + $0x18] sm:$0xff]   ;;  %v806_v11 = vunpack.c.l.bf16 %v1088_v3  ;;  %v807_v12 = vunpack.c.h.bf16 %v1088_v3  ;;  %v1092_v15 = vld [vmem:[%s1626_s0 + $0x28] sm:$0xff]  }
   0x3   :  { %v802_v5 = vunpack.c.l.bf16 %v801_v2  ;;  %v803_v6 = vunpack.c.h.bf16 %v801_v2  ;;  %v1091_v10 = vld [vmem:[%s1626_s0 + $0x20] sm:$0xff]   ;;  %v810_v13 = vunpack.c.l.bf16 %v1089_v8  ;;  %v811_v14 = vunpack.c.h.bf16 %v1089_v8  ;;  %v1093_v16 = vld [vmem:[%s1626_s0 + $0x30] sm:$0xff]   ;;  %v1094_v21 = vld [vmem:[%s1626_s0 + $0x38] sm:$0xff]  }
   0x4   :  { %v13_v17 = vmul.f32 %v12_v4, %v12_v4  ;;  %v150_v18 = vsub.s32 0, %v1176_v7  ;;  %v218_v19 = vsub.s32 1, %v1176_v7  ;;  %v814_v20 = vunpack.c.l.bf16 %v1090_v9  ;;  %v1095_v22 = vld [vmem:[%s1626_s0 + $0x40] sm:$0xff]   ;;  %v1096_v47 = vld [vmem:[%s1626_s0 + $0x48] sm:$0xff]   ;;  %v1097_v48 = vld [vmem:[%s1626_s0 + $0x50] sm:$0xff]  }
   0x5   :  { %v815_v23 = vunpack.c.h.bf16 %v1090_v9  ;;  %v818_v24 = vunpack.c.l.bf16 %v1091_v10  ;;  %v819_v25 = vunpack.c.h.bf16 %v1091_v10  ;;  %v822_v26 = vunpack.c.l.bf16 %v1092_v15  ;;  %v1098_v53 = vld [vmem:[%s1626_s0 + $0x58] sm:$0xff]   ;;  %v1099_v57 = vld [vmem:[%s1626_s0 + $0x60] sm:$0xff]   ;;  %v1100_v2 = vld [vmem:[%s1626_s0 + $0x68] sm:$0xff]  }
   0x6   :  { %v15_v27 = vrot.slane %v13_v17, 7  ;;  %v1201_v28 = vrot.slane %v12_v4, %v150_v18  ;;  %v823_v29 = vunpack.c.h.bf16 %v1092_v15  ;;  %v826_v30 = vunpack.c.l.bf16 %v1093_v16  ;;  %v1101_v3 = vld [vmem:[%s1626_s0 + $0x70] sm:$0xff]   ;;  %v1102_v9 = vld [vmem:[%s1626_s0 + $0x78] sm:$0xff]  }
   0x7   :  { %v827_v31 = vunpack.c.h.bf16 %v1093_v16  ;;  %v830_v32 = vunpack.c.l.bf16 %v1094_v21  ;;  %v831_v33 = vunpack.c.h.bf16 %v1094_v21  ;;  %v834_v34 = vunpack.c.l.bf16 %v1095_v22 }
   0x8   :  { %v17_v35 = vsub.f32 %v12_v4, %v15_v27  ;;  %v1204_v36 = vsub.f32 %v802_v5, %v1201_v28  ;;  %v1207_v37 = vsub.f32 %v803_v6, %v1201_v28  ;;  %v1210_v38 = vsub.f32 %v806_v11, %v1201_v28 }
   0x9   :  { %v1213_v39 = vsub.f32 %v807_v12, %v1201_v28  ;;  %v1216_v40 = vsub.f32 %v810_v13, %v1201_v28  ;;  %v1219_v41 = vsub.f32 %v811_v14, %v1201_v28  ;;  %v1222_v42 = vsub.f32 %v814_v20, %v1201_v28  ;;  %v1103_v14 = vld [vmem:[%s1626_s0 + $0x80] sm:$0xff]  }
   0xa   :  { %v18_v43 = vadd.f32 1e-05, %v17_v35  ;;  %v1225_v44 = vsub.f32 %v815_v23, %v1201_v28  ;;  %v1228_v45 = vsub.f32 %v818_v24, %v1201_v28  ;;  %v1231_v46 = vsub.f32 %v819_v25, %v1201_v28  ;;  %v1104_v24 = vld [vmem:[%s1626_s0 + $0x88] sm:$0xff]   ;;  %v1105_v25 = vld [vmem:[%s1626_s0 + $0x90] sm:$0xff]  }
   0xb   :  { %v1240_v49 = vsub.f32 %v822_v26, %v1201_v28  ;;  %v1243_v50 = vsub.f32 %v823_v29, %v1201_v28  ;;  %v1246_v51 = vsub.f32 %v826_v30, %v1201_v28  ;;  %v1249_v52 = vsub.f32 %v827_v31, %v1201_v28  ;;  %v1106_v31 = vld [vmem:[%s1626_s0 + $0x98] sm:$0xff]  }
   0xc   :  { %1150 = vrsqrt.f32 %v18_v43  ;;  %v1255_v54 = vsub.f32 %v830_v32, %v1201_v28  ;;  %v1258_v55 = vsub.f32 %v831_v33, %v1201_v28  ;;  %v835_v56 = vunpack.c.h.bf16 %v1095_v22 }
   0xd   :  { %v1264_v58 = vsub.f32 %v834_v34, %v1201_v28  ;;  %v838_v59 = vunpack.c.l.bf16 %v1096_v47  ;;  %v839_v60 = vunpack.c.h.bf16 %v1096_v47  ;;  %v842_v61 = vunpack.c.l.bf16 %v1097_v48 }
   0xe   :  { %v1267_v62 = vsub.f32 %v835_v56, %v1201_v28  ;;  %v843_v63 = vunpack.c.h.bf16 %v1097_v48  ;;  %v846_v0 = vunpack.c.l.bf16 %v1098_v53  ;;  %v847_v1 = vunpack.c.h.bf16 %v1098_v53  ;;  %v1338_v56 = vld [vmem:[%s1626_s0 + $0xa0] sm:$0xff]  }
   0xf   :  { %v1276_v4 = vsub.f32 %v838_v59, %v1201_v28  ;;  %v1279_v5 = vsub.f32 %v839_v60, %v1201_v28  ;;  %v1282_v6 = vsub.f32 %v842_v61, %v1201_v28  ;;  %v850_v8 = vunpack.c.l.bf16 %v1099_v57 }
  0x10   :  { %v1288_v10 = vsub.f32 %v843_v63, %v1201_v28  ;;  %v1291_v11 = vsub.f32 %v846_v0, %v1201_v28  ;;  %v1294_v12 = vsub.f32 %v847_v1, %v1201_v28  ;;  %v851_v13 = vunpack.c.h.bf16 %v1099_v57 }
  0x11   :  { %v1300_v15 = vsub.f32 %v850_v8, %v1201_v28  ;;  %v854_v16 = vunpack.c.l.bf16 %v1100_v2  ;;  %v855_v17 = vunpack.c.h.bf16 %v1100_v2  ;;  %v858_v18 = vunpack.c.l.bf16 %v1101_v3 }
  0x12   :  { %v1303_v20 = vsub.f32 %v851_v13, %v1201_v28  ;;  %v859_v21 = vunpack.c.h.bf16 %v1101_v3  ;;  %v862_v22 = vunpack.c.l.bf16 %v1102_v9  ;;  %v863_v23 = vunpack.c.h.bf16 %v1102_v9 }
  0x13   :  { %v1312_v26 = vsub.f32 %v854_v16, %v1201_v28  ;;  %v1315_v27 = vsub.f32 %v855_v17, %v1201_v28  ;;  %v1318_v29 = vsub.f32 %v858_v18, %v1201_v28  ;;  %v866_v30 = vunpack.c.l.bf16 %v1103_v14 }
  0x14   :  { %v1324_v32 = vsub.f32 %v859_v21, %v1201_v28  ;;  %v1327_v33 = vsub.f32 %v862_v22, %v1201_v28  ;;  %v1330_v34 = vsub.f32 %v863_v23, %v1201_v28  ;;  %v867_v35 = vunpack.c.h.bf16 %v1103_v14 }
  0x15   :  { %v1333_v43 = vsub.f32 %v866_v30, %v1201_v28  ;;  %v870_v47 = vunpack.c.l.bf16 %v1104_v24  ;;  %v871_v48 = vunpack.c.h.bf16 %v1104_v24  ;;  %v874_v53 = vunpack.c.l.bf16 %v1105_v25 }
  0x16   :  { %v1151_v57 = vpop.eup %1150  ;;  %v1341_v59 = vsub.f32 %v867_v35, %v1201_v28  ;;  %v875_v60 = vunpack.c.h.bf16 %v1105_v25  ;;  %v878_v61 = vunpack.c.l.bf16 %v1106_v31  ;;  %v879_v63 = vunpack.c.h.bf16 %v1106_v31 }
  0x17   :  { %v1345_v0 = vrot.slane %v1151_v57, %v218_v19  ;;  %v1348_v1 = vsub.f32 %v870_v47, %v1201_v28  ;;  %v1351_v2 = vsub.f32 %v871_v48, %v1201_v28  ;;  %v1354_v3 = vsub.f32 %v874_v53, %v1201_v28 }
  0x18   :  { %v1357_v8 = vsub.f32 %v875_v60, %v1201_v28  ;;  %v1360_v9 = vsub.f32 %v878_v61, %v1201_v28  ;;  %v1363_v13 = vsub.f32 %v879_v63, %v1201_v28  ;;  %v882_v7 = vunpack.c.l.bf16 %v1338_v56 }
  0x19   :  { %v220_v19 = vmul.f32 %v1345_v0, %v1204_v36  ;;  %v221_v14 = vmul.f32 %v1345_v0, %v1207_v37  ;;  %v222_v16 = vmul.f32 %v1345_v0, %v1210_v38  ;;  %v223_v17 = vmul.f32 %v1345_v0, %v1213_v39 }
  0x1a   :  { %v224_v18 = vmul.f32 %v1345_v0, %v1216_v40  ;;  %v225_v21 = vmul.f32 %v1345_v0, %v1219_v41  ;;  %v226_v22 = vmul.f32 %v1345_v0, %v1222_v42  ;;  %v227_v36 = vmul.f32 %v1345_v0, %v1225_v44 }
  0x1b   :  { %v284_v23 = vmax.f32 %v220_v19, 0.0  ;;  %v285_v37 = vmax.f32 %v221_v14, 0.0  ;;  %v286_v24 = vmax.f32 %v222_v16, 0.0  ;;  %v287_v25 = vmax.f32 %v223_v17, 0.0 }
  0x1c   :  { %v288_v38 = vmax.f32 %v224_v18, 0.0  ;;  %v289_v30 = vmax.f32 %v225_v21, 0.0  ;;  %v290_v31 = vmax.f32 %v226_v22, 0.0  ;;  %v291_v39 = vmax.f32 %v227_v36, 0.0 }
  0x1d   :  { %v931_v35 = vpack.c.bf16 %v285_v37, %v284_v23  ;;  %v936_v47 = vpack.c.bf16 %v287_v25, %v286_v24  ;;  %v228_v40 = vmul.f32 %v1345_v0, %v1228_v45  ;;  %v229_v41 = vmul.f32 %v1345_v0, %v1231_v46 }
  0x1e   :  { %v941_v42 = vpack.c.bf16 %v289_v30, %v288_v38  ;;  %v946_v48 = vpack.c.bf16 %v291_v39, %v290_v31  ;;  %v230_v44 = vmul.f32 %v1345_v0, %v1240_v49  ;;  %v231_v53 = vmul.f32 %v1345_v0, %v1243_v50 }
  0x1f   :  { %932 = vst [vmem:[%s1628_s2] sm:$0xff] %v931_v35   ;;  %1119 = vst [vmem:[%s1628_s2 + $0x8] sm:$0xff] %v936_v47   ;;  %v292_v45 = vmax.f32 %v228_v40, 0.0  ;;  %v293_v57 = vmax.f32 %v229_v41, 0.0  ;;  %v232_v46 = vmul.f32 %v1345_v0, %v1246_v51  ;;  %v233_v60 = vmul.f32 %v1345_v0, %v1249_v52 }
  0x20   :  { %1120 = vst [vmem:[%s1628_s2 + $0x10] sm:$0xff] %v941_v42   ;;  %1121 = vst [vmem:[%s1628_s2 + $0x18] sm:$0xff] %v946_v48   ;;  %v294_v49 = vmax.f32 %v230_v44, 0.0  ;;  %v295_v50 = vmax.f32 %v231_v53, 0.0  ;;  %v234_v61 = vmul.f32 %v1345_v0, %v1255_v54  ;;  %v235_v63 = vmul.f32 %v1345_v0, %v1258_v55 }
  0x21   :  { %v951_v51 = vpack.c.bf16 %v293_v57, %v292_v45  ;;  %v296_v19 = vmax.f32 %v232_v46, 0.0  ;;  %v297_v14 = vmax.f32 %v233_v60, 0.0  ;;  %v236_v52 = vmul.f32 %v1345_v0, %v1264_v58 }
  0x22   :  { %v956_v16 = vpack.c.bf16 %v295_v50, %v294_v49  ;;  %v298_v17 = vmax.f32 %v234_v61, 0.0  ;;  %v299_v18 = vmax.f32 %v235_v63, 0.0  ;;  %v237_v21 = vmul.f32 %v1345_v0, %v1267_v62 }
  0x23   :  { %1122 = vst [vmem:[%s1628_s2 + $0x20] sm:$0xff] %v951_v51   ;;  %v961_v54 = vpack.c.bf16 %v297_v14, %v296_v19  ;;  %v300_v22 = vmax.f32 %v236_v52, 0.0  ;;  %v238_v55 = vmul.f32 %v1345_v0, %v1276_v4  ;;  %v239_v36 = vmul.f32 %v1345_v0, %v1279_v5 }
  0x24   :  { %1123 = vst [vmem:[%s1628_s2 + $0x28] sm:$0xff] %v956_v16   ;;  %v966_v58 = vpack.c.bf16 %v299_v18, %v298_v17  ;;  %v301_v23 = vmax.f32 %v237_v21, 0.0  ;;  %v240_v62 = vmul.f32 %v1345_v0, %v1282_v6  ;;  %v241_v37 = vmul.f32 %v1345_v0, %v1288_v10  ;;  %v1108_v16 = vld [vmem:[%s1626_s0 + $0xa8] sm:$0xff]  }
  0x25   :  { %1124 = vst [vmem:[%s1628_s2 + $0x30] sm:$0xff] %v961_v54   ;;  %v302_v4 = vmax.f32 %v238_v55, 0.0  ;;  %v303_v24 = vmax.f32 %v239_v36, 0.0  ;;  %v242_v5 = vmul.f32 %v1345_v0, %v1291_v11  ;;  %v243_v25 = vmul.f32 %v1345_v0, %v1294_v12  ;;  %v1110_v55 = vld [vmem:[%s1626_s0 + $0xb8] sm:$0xff]  }
  0x26   :  { %1125 = vst [vmem:[%s1628_s2 + $0x38] sm:$0xff] %v966_v58   ;;  %v971_v6 = vpack.c.bf16 %v301_v23, %v300_v22  ;;  %v304_v38 = vmax.f32 %v240_v62, 0.0  ;;  %v305_v30 = vmax.f32 %v241_v37, 0.0  ;;  %v244_v10 = vmul.f32 %v1345_v0, %v1300_v15 }
  0x27   :  { %v976_v31 = vpack.c.bf16 %v303_v24, %v302_v4  ;;  %v306_v39 = vmax.f32 %v242_v5, 0.0  ;;  %v307_v35 = vmax.f32 %v243_v25, 0.0  ;;  %v245_v47 = vmul.f32 %v1345_v0, %v1303_v20 }
  0x28   :  { %1126 = vst [vmem:[%s1628_s2 + $0x40] sm:$0xff] %v971_v6   ;;  %v981_v11 = vpack.c.bf16 %v305_v30, %v304_v38  ;;  %v308_v12 = vmax.f32 %v244_v10, 0.0  ;;  %v246_v40 = vmul.f32 %v1345_v0, %v1312_v26  ;;  %v247_v41 = vmul.f32 %v1345_v0, %v1315_v27  ;;  %v1111_v38 = vld [vmem:[%s1626_s0 + $0xc0] sm:$0xff]  }
  0x29   :  { %1127 = vst [vmem:[%s1628_s2 + $0x48] sm:$0xff] %v976_v31   ;;  %v986_v15 = vpack.c.bf16 %v307_v35, %v306_v39  ;;  %v309_v42 = vmax.f32 %v245_v47, 0.0  ;;  %v248_v20 = vmul.f32 %v1345_v0, %v1318_v29  ;;  %v249_v48 = vmul.f32 %v1345_v0, %v1324_v32 }
  0x2a   :  { %1128 = vst [vmem:[%s1628_s2 + $0x50] sm:$0xff] %v981_v11   ;;  %v310_v26 = vmax.f32 %v246_v40, 0.0  ;;  %v311_v44 = vmax.f32 %v247_v41, 0.0  ;;  %v250_v27 = vmul.f32 %v1345_v0, %v1327_v33  ;;  %v251_v53 = vmul.f32 %v1345_v0, %v1330_v34 }
  0x2b   :  { %1129 = vst [vmem:[%s1628_s2 + $0x58] sm:$0xff] %v986_v15   ;;  %v991_v29 = vpack.c.bf16 %v309_v42, %v308_v12  ;;  %v312_v45 = vmax.f32 %v248_v20, 0.0  ;;  %v313_v57 = vmax.f32 %v249_v48, 0.0  ;;  %v252_v32 = vmul.f32 %v1345_v0, %v1333_v43  ;;  %v1112_v20 = vld [vmem:[%s1626_s0 + $0xc8] sm:$0xff]  }
  0x2c   :  { %v996_v46 = vpack.c.bf16 %v311_v44, %v310_v26  ;;  %v314_v60 = vmax.f32 %v250_v27, 0.0  ;;  %v315_v49 = vmax.f32 %v251_v53, 0.0  ;;  %v253_v50 = vmul.f32 %v1345_v0, %v1341_v59 }
  0x2d   :  { %1130 = vst [vmem:[%s1628_s2 + $0x60] sm:$0xff] %v991_v29   ;;  %v1001_v33 = vpack.c.bf16 %v313_v57, %v312_v45  ;;  %v316_v34 = vmax.f32 %v252_v32, 0.0  ;;  %v254_v61 = vmul.f32 %v1345_v0, %v1348_v1  ;;  %v255_v63 = vmul.f32 %v1345_v0, %v1351_v2  ;;  %v1113_v32 = vld [vmem:[%s1626_s0 + $0xd0] sm:$0xff]  }
  0x2e   :  { %1131 = vst [vmem:[%s1628_s2 + $0x68] sm:$0xff] %v996_v46   ;;  %v1006_v43 = vpack.c.bf16 %v315_v49, %v314_v60  ;;  %v317_v51 = vmax.f32 %v253_v50, 0.0  ;;  %v256_v59 = vmul.f32 %v1345_v0, %v1354_v3  ;;  %v257_v19 = vmul.f32 %v1345_v0, %v1357_v8 }
  0x2f   :  { %1132 = vst [vmem:[%s1628_s2 + $0x70] sm:$0xff] %v1001_v33   ;;  %v318_v1 = vmax.f32 %v254_v61, 0.0  ;;  %v319_v14 = vmax.f32 %v255_v63, 0.0  ;;  %v258_v2 = vmul.f32 %v1345_v0, %v1360_v9  ;;  %v259_v52 = vmul.f32 %v1345_v0, %v1363_v13  ;;  %v1109_v9 = vld [vmem:[%s1626_s0 + $0xb0] sm:$0xff]   ;;  %v1114_v33 = vld [vmem:[%s1626_s0 + $0xd8] sm:$0xff]  }
  0x30   :  { %1133 = vst [vmem:[%s1628_s2 + $0x78] sm:$0xff] %v1006_v43   ;;  %v1011_v3 = vpack.c.bf16 %v317_v51, %v316_v34  ;;  %v320_v8 = vmax.f32 %v256_v59, 0.0  ;;  %v321_v17 = vmax.f32 %v257_v19, 0.0  ;;  %v883_v18 = vunpack.c.h.bf16 %v1338_v56 }
  0x31   :  { %v1016_v21 = vpack.c.bf16 %v319_v14, %v318_v1  ;;  %v322_v54 = vmax.f32 %v258_v2, 0.0  ;;  %v323_v13 = vmax.f32 %v259_v52, 0.0  ;;  %v192_v22 = vsub.f32 %v882_v7, %v1201_v28 }
  0x32   :  { %1134 = vst [vmem:[%s1628_s2 + $0x80] sm:$0xff] %v1011_v3   ;;  %v1021_v36 = vpack.c.bf16 %v321_v17, %v320_v8  ;;  %v193_v58 = vsub.f32 %v883_v18, %v1201_v28  ;;  %v886_v23 = vunpack.c.l.bf16 %v1108_v16  ;;  %v887_v62 = vunpack.c.h.bf16 %v1108_v16  ;;  %v1115_v3 = vld [vmem:[%s1626_s0 + $0xe0] sm:$0xff]  }
  0x33   :  { %1135 = vst [vmem:[%s1628_s2 + $0x88] sm:$0xff] %v1016_v21   ;;  %v1026_v37 = vpack.c.bf16 %v323_v13, %v322_v54  ;;  %v260_v56 = vmul.f32 %v1345_v0, %v192_v22  ;;  %v890_v7 = vunpack.c.l.bf16 %v1109_v9  ;;  %v891_v4 = vunpack.c.h.bf16 %v1109_v9 }
  0x34   :  { %1136 = vst [vmem:[%s1628_s2 + $0x90] sm:$0xff] %v1021_v36   ;;  %v261_v24 = vmul.f32 %v1345_v0, %v193_v58  ;;  %v194_v5 = vsub.f32 %v886_v23, %v1201_v28  ;;  %v195_v25 = vsub.f32 %v887_v62, %v1201_v28  ;;  %v894_v6 = vunpack.c.l.bf16 %v1110_v55  ;;  %v1116_v62 = vld [vmem:[%s1626_s0 + $0xe8] sm:$0xff]  }
  0x35   :  { %1137 = vst [vmem:[%s1628_s2 + $0x98] sm:$0xff] %v1026_v37   ;;  %v324_v30 = vmax.f32 %v260_v56, 0.0  ;;  %v196_v10 = vsub.f32 %v890_v7, %v1201_v28  ;;  %v197_v31 = vsub.f32 %v891_v4, %v1201_v28  ;;  %v895_v39 = vunpack.c.h.bf16 %v1110_v55 }
  0x36   :  { %v325_v35 = vmax.f32 %v261_v24, 0.0  ;;  %v262_v47 = vmul.f32 %v1345_v0, %v194_v5  ;;  %v263_v11 = vmul.f32 %v1345_v0, %v195_v25  ;;  %v198_v12 = vsub.f32 %v894_v6, %v1201_v28 }
  0x37   :  { %v264_v40 = vmul.f32 %v1345_v0, %v196_v10  ;;  %v265_v41 = vmul.f32 %v1345_v0, %v197_v31  ;;  %v199_v15 = vsub.f32 %v895_v39, %v1201_v28  ;;  %v898_v42 = vunpack.c.l.bf16 %v1111_v38 }
  0x38   :  { %v1031_v48 = vpack.c.bf16 %v325_v35, %v324_v30  ;;  %v326_v26 = vmax.f32 %v262_v47, 0.0  ;;  %v327_v44 = vmax.f32 %v263_v11, 0.0  ;;  %v266_v27 = vmul.f32 %v1345_v0, %v198_v12  ;;  %v1118_v35 = vld [vmem:[%s1626_s0 + $0xf8] sm:$0xff]  }
  0x39   :  { %v328_v53 = vmax.f32 %v264_v40, 0.0  ;;  %v329_v29 = vmax.f32 %v265_v41, 0.0  ;;  %v267_v45 = vmul.f32 %v1345_v0, %v199_v15  ;;  %v899_v57 = vunpack.c.h.bf16 %v1111_v38  ;;  %v1117_v38 = vld [vmem:[%s1626_s0 + $0xf0] sm:$0xff]  }
  0x3a   :  { %1138 = vst [vmem:[%s1628_s2 + $0xa0] sm:$0xff] %v1031_v48   ;;  %v1036_v46 = vpack.c.bf16 %v327_v44, %v326_v26  ;;  %v330_v60 = vmax.f32 %v266_v27, 0.0  ;;  %v200_v49 = vsub.f32 %v898_v42, %v1201_v28  ;;  %v902_v50 = vunpack.c.l.bf16 %v1112_v20 }
  0x3b   :  { %v1041_v34 = vpack.c.bf16 %v329_v29, %v328_v53  ;;  %v331_v61 = vmax.f32 %v267_v45, 0.0  ;;  %v201_v63 = vsub.f32 %v899_v57, %v1201_v28  ;;  %v903_v43 = vunpack.c.h.bf16 %v1112_v20 }
  0x3c   :  { %1139 = vst [vmem:[%s1628_s2 + $0xa8] sm:$0xff] %v1036_v46   ;;  %v268_v51 = vmul.f32 %v1345_v0, %v200_v49  ;;  %v202_v59 = vsub.f32 %v902_v50, %v1201_v28  ;;  %v906_v19 = vunpack.c.l.bf16 %v1113_v32  ;;  %v907_v1 = vunpack.c.h.bf16 %v1113_v32 }
  0x3d   :  { %1140 = vst [vmem:[%s1628_s2 + $0xb0] sm:$0xff] %v1041_v34   ;;  %v1046_v14 = vpack.c.bf16 %v331_v61, %v330_v60  ;;  %v269_v2 = vmul.f32 %v1345_v0, %v201_v63  ;;  %v203_v52 = vsub.f32 %v903_v43, %v1201_v28  ;;  %v910_v16 = vunpack.c.l.bf16 %v1114_v33 }
  0x3e   :  { %v332_v8 = vmax.f32 %v268_v51, 0.0  ;;  %v270_v17 = vmul.f32 %v1345_v0, %v202_v59  ;;  %v204_v18 = vsub.f32 %v906_v19, %v1201_v28  ;;  %v205_v9 = vsub.f32 %v907_v1, %v1201_v28 }
  0x3f   :  { %1141 = vst [vmem:[%s1628_s2 + $0xb8] sm:$0xff] %v1046_v14   ;;  %v333_v21 = vmax.f32 %v269_v2, 0.0  ;;  %v271_v54 = vmul.f32 %v1345_v0, %v203_v52  ;;  %v911_v13 = vunpack.c.h.bf16 %v1114_v33  ;;  %v206_v22 = vsub.f32 %v910_v16, %v1201_v28 }
  0x40   :  { %v334_v55 = vmax.f32 %v270_v17, 0.0  ;;  %v272_v36 = vmul.f32 %v1345_v0, %v204_v18  ;;  %v273_v58 = vmul.f32 %v1345_v0, %v205_v9  ;;  %v914_v23 = vunpack.c.l.bf16 %v1115_v3 }
  0x41   :  { %v1051_v37 = vpack.c.bf16 %v333_v21, %v332_v8  ;;  %v335_v56 = vmax.f32 %v271_v54, 0.0  ;;  %v207_v7 = vsub.f32 %v911_v13, %v1201_v28  ;;  %v274_v4 = vmul.f32 %v1345_v0, %v206_v22 }
  0x42   :  { %v336_v24 = vmax.f32 %v272_v36, 0.0  ;;  %v337_v5 = vmax.f32 %v273_v58, 0.0  ;;  %v915_v25 = vunpack.c.h.bf16 %v1115_v3  ;;  %v208_v6 = vsub.f32 %v914_v23, %v1201_v28 }
  0x43   :  { %1142 = vst [vmem:[%s1628_s2 + $0xc0] sm:$0xff] %v1051_v37   ;;  %v1056_v30 = vpack.c.bf16 %v335_v56, %v334_v55  ;;  %v275_v10 = vmul.f32 %v1345_v0, %v207_v7  ;;  %v338_v31 = vmax.f32 %v274_v4, 0.0  ;;  %v918_v39 = vunpack.c.l.bf16 %v1116_v62 }
  0x44   :  { %v1061_v47 = vpack.c.bf16 %v337_v5, %v336_v24  ;;  %v209_v11 = vsub.f32 %v915_v25, %v1201_v28  ;;  %v276_v12 = vmul.f32 %v1345_v0, %v208_v6  ;;  %v919_v40 = vunpack.c.h.bf16 %v1116_v62 }
  0x45   :  { %1143 = vst [vmem:[%s1628_s2 + $0xc8] sm:$0xff] %v1056_v30   ;;  %v339_v41 = vmax.f32 %v275_v10, 0.0  ;;  %v210_v15 = vsub.f32 %v918_v39, %v1201_v28  ;;  %v922_v42 = vunpack.c.l.bf16 %v1117_v38  ;;  %v923_v20 = vunpack.c.h.bf16 %v1117_v38 }
  0x46   :  { %1144 = vst [vmem:[%s1628_s2 + $0xd0] sm:$0xff] %v1061_v47   ;;  %v277_v48 = vmul.f32 %v1345_v0, %v209_v11  ;;  %v340_v26 = vmax.f32 %v276_v12, 0.0  ;;  %v211_v44 = vsub.f32 %v919_v40, %v1201_v28  ;;  %v926_v27 = vunpack.c.l.bf16 %v1118_v35 }
  0x47   :  { %v1066_v53 = vpack.c.bf16 %v339_v41, %v338_v31  ;;  %v278_v29 = vmul.f32 %v1345_v0, %v210_v15  ;;  %v212_v45 = vsub.f32 %v922_v42, %v1201_v28  ;;  %v213_v57 = vsub.f32 %v923_v20, %v1201_v28 }
  0x48   :  { %v341_v32 = vmax.f32 %v277_v48, 0.0  ;;  %v279_v46 = vmul.f32 %v1345_v0, %v211_v44  ;;  %v927_v60 = vunpack.c.h.bf16 %v1118_v35  ;;  %v214_v49 = vsub.f32 %v926_v27, %v1201_v28 }
  0x49   :  { %1145 = vst [vmem:[%s1628_s2 + $0xd8] sm:$0xff] %v1066_v53   ;;  %v342_v50 = vmax.f32 %v278_v29, 0.0  ;;  %v280_v33 = vmul.f32 %v1345_v0, %v212_v45  ;;  %v281_v34 = vmul.f32 %v1345_v0, %v213_v57 }
  0x4a   :  { %v1071_v61 = vpack.c.bf16 %v341_v32, %v340_v26  ;;  %v343_v63 = vmax.f32 %v279_v46, 0.0  ;;  %v215_v43 = vsub.f32 %v927_v60, %v1201_v28  ;;  %v282_v51 = vmul.f32 %v1345_v0, %v214_v49 }
  0x4b   :  { %v344_v59 = vmax.f32 %v280_v33, 0.0  ;;  %v345_v19 = vmax.f32 %v281_v34, 0.0 }
  0x4c   :  { %1146 = vst [vmem:[%s1628_s2 + $0xe0] sm:$0xff] %v1071_v61   ;;  %v1076_v1 = vpack.c.bf16 %v343_v63, %v342_v50  ;;  %v283_v14 = vmul.f32 %v1345_v0, %v215_v43  ;;  %v346_v2 = vmax.f32 %v282_v51, 0.0 }
  0x4d   :  { %v1081_v52 = vpack.c.bf16 %v345_v19, %v344_v59 }
  0x4e   :  { %1147 = vst [vmem:[%s1628_s2 + $0xe8] sm:$0xff] %v1076_v1   ;;  %v347_v16 = vmax.f32 %v283_v14, 0.0 }
  0x4f   :  { %1148 = vst [vmem:[%s1628_s2 + $0xf0] sm:$0xff] %v1081_v52  }
  0x50   :  { %v1086_v28 = vpack.c.bf16 %v347_v16, %v346_v2 }
  0x52   :  { %1149 = vst [vmem:[%s1628_s2 + $0xf8] sm:$0xff] %v1086_v28  }

// kernel: generator_sngan_forward.30
= control target key start
LH: loop header
LB: loop body
LE: loop exit
PB: predicated region body
PF: predicated region fallthrough
CT: control target
= control target key end

     0   :  { %vm907_vm0 = vcmask 1040384   ;;  %s1535_s1 = inlined_call_operand.vmem [shape: bf16[512,128], index: 1, kind: input, shape index: {}]   ;;  %s1536_s0 = inlined_call_operand.vmem [shape: bf16[128,512], index: 0, kind: input, shape index: {}]   ;;  %s1537_s2 = inlined_call_operand.vmem [shape: f32[1,128], index: 2, kind: input, shape index: {}]   ;;  %s1538_s3 = inlined_call_operand.vmem [shape: bf16[128,128], index: 3, kind: output, shape index: {0}]   ;;  %s1539_s4 = inlined_call_operand.vmem [shape: f32[1,2,128], index: 4, kind: output, shape index: {1}]  }
   0x1   :  { %v1190_v0 = vld [vmem:[%s1535_s1 + $0x40] sm:$0xff]   ;;  %v1194_v4 = vld [vmem:[%s1535_s1 + $0x48] sm:$0xff]   ;;  %v1198_v8 = vld [vmem:[%s1535_s1 + $0x50] sm:$0xff]  }
   0x2   :  { %v1191_v1 = vld [vmem:[%s1535_s1 + $0xc0] sm:$0xff]   ;;  %1062 = vmatprep.subr.bf16.mxu0 %v1190_v0  ;;  %v1195_v5 = vld [vmem:[%s1535_s1 + $0xc8] sm:$0xff]   ;;  %v1199_v9 = vld [vmem:[%s1535_s1 + $0xd0] sm:$0xff]  }
   0x3   :  { %v1192_v2 = vld [vmem:[%s1535_s1] sm:$0xff]   ;;  %1126 = vmatprep.subr.bf16.mxu1 %v1191_v1  ;;  %v1196_v6 = vld [vmem:[%s1535_s1 + $0x8] sm:$0xff]   ;;  %v1200_v10 = vld [vmem:[%s1535_s1 + $0x10] sm:$0xff]  }
   0x4   :  { %v1193_v3 = vld [vmem:[%s1535_s1 + $0x80] sm:$0xff]   ;;  %1063 = vmatpush3.bf16.msra.mxu0 %v1192_v2  ;;  %v1197_v7 = vld [vmem:[%s1535_s1 + $0x88] sm:$0xff]   ;;  %v1201_v11 = vld [vmem:[%s1535_s1 + $0x90] sm:$0xff]  }
   0x5   :  { %1127 = vmatpush3.bf16.msra.mxu1 %v1193_v3  ;;  %1064 = vmatprep.subr.bf16.mxu0 %v1194_v4  ;;  %v1202_v12 = vld [vmem:[%s1535_s1 + $0x58] sm:$0xff]   ;;  %v1206_v16 = vld [vmem:[%s1535_s1 + $0x60] sm:$0xff]   ;;  %v1210_v20 = vld [vmem:[%s1535_s1 + $0x68] sm:$0xff]  }
   0x6   :  { %1128 = vmatprep.subr.bf16.mxu1 %v1195_v5  ;;  %v1203_v13 = vld [vmem:[%s1535_s1 + $0xd8] sm:$0xff]   ;;  %v1207_v17 = vld [vmem:[%s1535_s1 + $0xe0] sm:$0xff]   ;;  %v1211_v21 = vld [vmem:[%s1535_s1 + $0xe8] sm:$0xff]  }
   0x7   :  { %v1204_v14 = vld [vmem:[%s1535_s1 + $0x18] sm:$0xff]   ;;  %v1208_v18 = vld [vmem:[%s1535_s1 + $0x20] sm:$0xff]   ;;  %v1212_v22 = vld [vmem:[%s1535_s1 + $0x28] sm:$0xff]  }
   0x8   :  { %1065 = vmatpush3.bf16.msra.mxu0 %v1196_v6  ;;  %v1205_v15 = vld [vmem:[%s1535_s1 + $0x98] sm:$0xff]   ;;  %v1209_v19 = vld [vmem:[%s1535_s1 + $0xa0] sm:$0xff]   ;;  %v1213_v23 = vld [vmem:[%s1535_s1 + $0xa8] sm:$0xff]  }
   0x9   :  { %1129 = vmatpush3.bf16.msra.mxu1 %v1197_v7  ;;  %1066 = vmatprep.subr.bf16.mxu0 %v1198_v8  ;;  %v1214_v24 = vld [vmem:[%s1535_s1 + $0x70] sm:$0xff]   ;;  %v1218_v28 = vld [vmem:[%s1535_s1 + $0x78] sm:$0xff]  }
   0xa   :  { %1130 = vmatprep.subr.bf16.mxu1 %v1199_v9  ;;  %v1215_v25 = vld [vmem:[%s1535_s1 + $0xf0] sm:$0xff]   ;;  %v1219_v29 = vld [vmem:[%s1535_s1 + $0xf8] sm:$0xff]   ;;  %v1490_v9 = vld [vmem:[%s1537_s2] ss:$0 sm:$0xff] }
   0xb   :  { %v1216_v26 = vld [vmem:[%s1535_s1 + $0x30] sm:$0xff]   ;;  %v1220_v30 = vld [vmem:[%s1535_s1 + $0x38] sm:$0xff]  }
   0xc   :  { %1067 = vmatpush3.bf16.msra.mxu0 %v1200_v10  ;;  %v1217_v27 = vld [vmem:[%s1535_s1 + $0xb0] sm:$0xff]   ;;  %v1221_v31 = vld [vmem:[%s1535_s1 + $0xb8] sm:$0xff]  }
   0xd   :  { %1131 = vmatpush3.bf16.msra.mxu1 %v1201_v11  ;;  %1068 = vmatprep.subr.bf16.mxu0 %v1202_v12  ;;  %v1222_v32 = vld [vmem:[%s1536_s0] ss:$16 sps:$4 sm:$0xff]   ;;  %v1224_v33 = vld [vmem:[%s1536_s0 + $0x4] ss:$16 sps:$4 sm:$0xff]   ;;  %v1225_v34 = vld [vmem:[%s1536_s0 + $0x8] ss:$16 sps:$4 sm:$0xff]  }
   0xe   :  { %1132 = vmatprep.subr.bf16.mxu1 %v1203_v13  ;;  %v1227_v35 = vld [vmem:[%s1536_s0 + $0xc] ss:$16 sps:$4 sm:$0xff]   ;;  %533 = vmatprep.mubr.bf16.mxu0 %v1224_v33  ;;  %v1228_v36 = vld [vmem:[%s1536_s0 + $0x24] ss:$16 sps:$4 sm:$0xff]   ;;  %v1232_v38 = vld [vmem:[%s1536_s0 + $0x20] ss:$16 sps:$4 sm:$0xff]  }
   0xf   :  { %630 = vmatprep.mubr.bf16.mxu1 %v1227_v35  ;;  %v1230_v37 = vld [vmem:[%s1536_s0 + $0x2c] ss:$16 sps:$4 sm:$0xff]   ;;  %v1233_v39 = vld [vmem:[%s1536_s0 + $0x28] ss:$16 sps:$4 sm:$0xff]   ;;  %v1234_v40 = vld [vmem:[%s1536_s0 + $0x44] ss:$16 sps:$4 sm:$0xff]  }
  0x10   :  { %1069 = vmatpush3.bf16.msra.mxu0 %v1204_v14  ;;  %v1236_v41 = vld [vmem:[%s1536_s0 + $0x4c] ss:$16 sps:$4 sm:$0xff]   ;;  %v1238_v42 = vld [vmem:[%s1536_s0 + $0x40] ss:$16 sps:$4 sm:$0xff]   ;;  %v1239_v43 = vld [vmem:[%s1536_s0 + $0x48] ss:$16 sps:$4 sm:$0xff]  }
  0x11   :  { %1133 = vmatpush3.bf16.msra.mxu1 %v1205_v15  ;;  %1070 = vmatprep.subr.bf16.mxu0 %v1206_v16  ;;  %v1240_v44 = vld [vmem:[%s1536_s0 + $0x64] ss:$16 sps:$4 sm:$0xff]   ;;  %v1242_v45 = vld [vmem:[%s1536_s0 + $0x6c] ss:$16 sps:$4 sm:$0xff]   ;;  %v1244_v46 = vld [vmem:[%s1536_s0 + $0x60] ss:$16 sps:$4 sm:$0xff]  }
  0x12   :  { %1134 = vmatprep.subr.bf16.mxu1 %v1207_v17  ;;  %v1245_v47 = vld [vmem:[%s1536_s0 + $0x68] ss:$16 sps:$4 sm:$0xff]   ;;  %v1246_v48 = vld [vmem:[%s1536_s0 + $0x84] ss:$16 sps:$4 sm:$0xff]   ;;  %v1248_v49 = vld [vmem:[%s1536_s0 + $0x8c] ss:$16 sps:$4 sm:$0xff]  }
  0x13   :  { %v1250_v50 = vld [vmem:[%s1536_s0 + $0x80] ss:$16 sps:$4 sm:$0xff]   ;;  %v1251_v51 = vld [vmem:[%s1536_s0 + $0x88] ss:$16 sps:$4 sm:$0xff]   ;;  %v1252_v52 = vld [vmem:[%s1536_s0 + $0xa4] ss:$16 sps:$4 sm:$0xff]  }
  0x14   :  { %1071 = vmatpush3.bf16.msra.mxu0 %v1208_v18  ;;  %v1254_v53 = vld [vmem:[%s1536_s0 + $0xac] ss:$16 sps:$4 sm:$0xff]   ;;  %v1256_v54 = vld [vmem:[%s1536_s0 + $0xa0] ss:$16 sps:$4 sm:$0xff]   ;;  %v1257_v55 = vld [vmem:[%s1536_s0 + $0xa8] ss:$16 sps:$4 sm:$0xff]  }
  0x15   :  { %1135 = vmatpush3.bf16.msra.mxu1 %v1209_v19  ;;  %1072 = vmatprep.subr.bf16.mxu0 %v1210_v20  ;;  %v1258_v56 = vld [vmem:[%s1536_s0 + $0xc4] ss:$16 sps:$4 sm:$0xff]   ;;  %v1260_v57 = vld [vmem:[%s1536_s0 + $0xcc] ss:$16 sps:$4 sm:$0xff]   ;;  %v1262_v58 = vld [vmem:[%s1536_s0 + $0xc0] ss:$16 sps:$4 sm:$0xff]  }
  0x16   :  { %1136 = vmatprep.subr.bf16.mxu1 %v1211_v21  ;;  %v1263_v59 = vld [vmem:[%s1536_s0 + $0xc8] ss:$16 sps:$4 sm:$0xff]   ;;  %v1264_v60 = vld [vmem:[%s1536_s0 + $0xe4] ss:$16 sps:$4 sm:$0xff]   ;;  %v1266_v61 = vld [vmem:[%s1536_s0 + $0xec] ss:$16 sps:$4 sm:$0xff]  }
  0x17   :  { %v1268_v62 = vld [vmem:[%s1536_s0 + $0xe0] ss:$16 sps:$4 sm:$0xff]   ;;  %v1269_v63 = vld [vmem:[%s1536_s0 + $0xe8] ss:$16 sps:$4 sm:$0xff]  }
  0x18   :  { %1073 = vmatpush3.bf16.msra.mxu0 %v1212_v22 }
  0x19   :  { %1137 = vmatpush3.bf16.msra.mxu1 %v1213_v23  ;;  %1074 = vmatprep.subr.bf16.mxu0 %v1214_v24 }
  0x1a   :  { %1138 = vmatprep.subr.bf16.mxu1 %v1215_v25 }
  0x1c   :  { %1075 = vmatpush3.bf16.msra.mxu0 %v1216_v26 }
  0x1d   :  { %1139 = vmatpush3.bf16.msra.mxu1 %v1217_v27  ;;  %1076 = vmatprep.subr.bf16.mxu0 %v1218_v28 }
  0x1e   :  { %1140 = vmatprep.subr.bf16.mxu1 %v1219_v29 }
  0x20   :  { %1077 = vmatpush3.bf16.msra.mxu0 %v1220_v30 }
  0x21   :  { %1141 = vmatpush3.bf16.msra.mxu1 %v1221_v31 }
  0x23   :  { %534 = vmatmul.mubr.bf16.vlgmr.msra.gmra.mrb[0].mxu0 %v1222_v32 }
  0x24   :  { %631 = vmatmul.mubr.bf16.vlgmr.msra.gmra.mrb[0].mxu1 %v1225_v34  ;;  %541 = vmatprep.mubr.bf16.mxu0 %v1228_v36 }
  0x25   :  { %638 = vmatprep.mubr.bf16.mxu1 %v1230_v37 }
  0x2b   :  { %542 = vmatmul.mubr.bf16.gmra.mrb[4].mxu0 %v1232_v38 }
  0x2c   :  { %639 = vmatmul.mubr.bf16.gmra.mrb[4].mxu1 %v1233_v39  ;;  %549 = vmatprep.mubr.bf16.mxu0 %v1234_v40 }
  0x2d   :  { %646 = vmatprep.mubr.bf16.mxu1 %v1236_v41 }
  0x33   :  { %550 = vmatmul.mubr.bf16.gmra.mrb[8].mxu0 %v1238_v42 }
  0x34   :  { %647 = vmatmul.mubr.bf16.gmra.mrb[8].mxu1 %v1239_v43  ;;  %557 = vmatprep.mubr.bf16.mxu0 %v1240_v44 }
  0x35   :  { %654 = vmatprep.mubr.bf16.mxu1 %v1242_v45 }
  0x3b   :  { %558 = vmatmul.mubr.bf16.gmra.mrb[12].mxu0 %v1244_v46 }
  0x3c   :  { %655 = vmatmul.mubr.bf16.gmra.mrb[12].mxu1 %v1245_v47  ;;  %565 = vmatprep.mubr.bf16.mxu0 %v1246_v48 }
  0x3d   :  { %662 = vmatprep.mubr.bf16.mxu1 %v1248_v49 }
  0x43   :  { %566 = vmatmul.mubr.bf16.gmra.mrb[16].mxu0 %v1250_v50 }
  0x44   :  { %663 = vmatmul.mubr.bf16.gmra.mrb[16].mxu1 %v1251_v51  ;;  %573 = vmatprep.mubr.bf16.mxu0 %v1252_v52 }
  0x45   :  { %670 = vmatprep.mubr.bf16.mxu1 %v1254_v53 }
  0x4b   :  { %574 = vmatmul.mubr.bf16.gmra.mrb[20].mxu0 %v1256_v54 }
  0x4c   :  { %671 = vmatmul.mubr.bf16.gmra.mrb[20].mxu1 %v1257_v55  ;;  %581 = vmatprep.mubr.bf16.mxu0 %v1258_v56 }
  0x4d   :  { %678 = vmatprep.mubr.bf16.mxu1 %v1260_v57 }
  0x53   :  { %582 = vmatmul.mubr.bf16.gmra.mrb[24].mxu0 %v1262_v58 }
  0x54   :  { %679 = vmatmul.mubr.bf16.gmra.mrb[24].mxu1 %v1263_v59  ;;  %589 = vmatprep.mubr.bf16.mxu0 %v1264_v60 }
  0x55   :  { %686 = vmatprep.mubr.bf16.mxu1 %v1266_v61 }
  0x5b   :  { %590 = vmatmul.mubr.bf16.gmra.mrb[28].mxu0 %v1268_v62 }
  0x5c   :  { %687 = vmatmul.mubr.bf16.gmra.mrb[28].mxu1 %v1269_v63 }
  0xf6   :  { %v1078_v0 = vpop.f32.mrb[0].mxu0 }
  0xf7   :  { %v1142_v1 = vpop.f32.mrb[0].mxu1  ;;  %v1079_v2 = vpop.f32.mrb[1].mxu0 }
  0xf8   :  { %v1080_v3 = vadd.f32 %v1079_v2, %v1078_v0  ;;  %v1143_v4 = vpop.f32.mrb[1].mxu1  ;;  %v1081_v5 = vpop.f32.mrb[2].mxu0 }
  0xf9   :  { %v1144_v6 = vadd.f32 %v1143_v4, %v1142_v1  ;;  %v1145_v7 = vpop.f32.mrb[2].mxu1  ;;  %v1082_v8 = vpop.f32.mrb[3].mxu0 }
  0xfa   :  { %v1083_v10 = vadd.f32 %v1082_v8, %v1081_v5  ;;  %v1146_v11 = vpop.f32.mrb[3].mxu1 }
  0xfb   :  { %v633_v12 = vadd.f32 %v1144_v6, %v1080_v3  ;;  %v1147_v13 = vadd.f32 %v1146_v11, %v1145_v7 }
  0xfd   :  { %v753_v14 = vadd.f32 %v1490_v9, %v633_v12  ;;  %v636_v15 = vadd.f32 %v1147_v13, %v1083_v10 }
  0xfe   :  { %v1084_v16 = vpop.f32.mrb[4].mxu0 }
  0xff   :  { %v754_v17 = vadd.f32 %v1490_v9, %v636_v15  ;;  %v1148_v18 = vpop.f32.mrb[4].mxu1  ;;  %v1085_v19 = vpop.f32.mrb[5].mxu0  ;;  %v870_v20 = vmul.f32 %v753_v14, %v753_v14 }
 0x100   :  { %v1086_v21 = vadd.f32 %v1085_v19, %v1084_v16  ;;  %v1149_v22 = vpop.f32.mrb[5].mxu1  ;;  %v1087_v23 = vpop.f32.mrb[6].mxu0 }
 0x101   :  { %v1018_v24 = vpack.c.bf16 %v754_v17, %v753_v14  ;;  %v849_v25 = vadd.f32 %v754_v17, %v753_v14  ;;  %v871_v26 = vmul.f32 %v754_v17, %v754_v17  ;;  %v1150_v27 = vadd.f32 %v1149_v22, %v1148_v18  ;;  %v1151_v28 = vpop.f32.mrb[6].mxu1  ;;  %v1088_v29 = vpop.f32.mrb[7].mxu0 }
 0x102   :  { %v1089_v30 = vadd.f32 %v1088_v29, %v1087_v23  ;;  %v1152_v31 = vpop.f32.mrb[7].mxu1 }
 0x103   :  { %1019 = vst [vmem:[%s1538_s3] sm:$0xff] %v1018_v24   ;;  %v886_v32 = vadd.f32 %v871_v26, %v870_v20  ;;  %v641_v33 = vadd.f32 %v1150_v27, %v1086_v21  ;;  %v1153_v34 = vadd.f32 %v1152_v31, %v1151_v28 }
 0x105   :  { %v755_v35 = vadd.f32 %v1490_v9, %v641_v33  ;;  %v644_v36 = vadd.f32 %v1153_v34, %v1089_v30 }
 0x106   :  { %v1090_v37 = vpop.f32.mrb[8].mxu0 }
 0x107   :  { %v850_v38 = vadd.f32 %v849_v25, %v755_v35  ;;  %v872_v39 = vmul.f32 %v755_v35, %v755_v35  ;;  %v756_v40 = vadd.f32 %v1490_v9, %v644_v36  ;;  %v1154_v41 = vpop.f32.mrb[8].mxu1  ;;  %v1091_v42 = vpop.f32.mrb[9].mxu0 }
 0x108   :  { %v1092_v43 = vadd.f32 %v1091_v42, %v1090_v37  ;;  %v1155_v44 = vpop.f32.mrb[9].mxu1  ;;  %v1093_v45 = vpop.f32.mrb[10].mxu0 }
 0x109   :  { %v887_v46 = vadd.f32 %v886_v32, %v872_v39  ;;  %v1023_v47 = vpack.c.bf16 %v756_v40, %v755_v35  ;;  %v851_v48 = vadd.f32 %v850_v38, %v756_v40  ;;  %v873_v49 = vmul.f32 %v756_v40, %v756_v40  ;;  %v1157_v50 = vpop.f32.mrb[10].mxu1  ;;  %v1094_v51 = vpop.f32.mrb[11].mxu0 }
 0x10a   :  { %v1156_v52 = vadd.f32 %v1155_v44, %v1154_v41  ;;  %v1095_v53 = vadd.f32 %v1094_v51, %v1093_v45  ;;  %v1158_v54 = vpop.f32.mrb[11].mxu1 }
 0x10b   :  { %1055 = vst [vmem:[%s1538_s3 + $0x8] sm:$0xff] %v1023_v47   ;;  %v888_v55 = vadd.f32 %v887_v46, %v873_v49  ;;  %v1159_v56 = vadd.f32 %v1158_v54, %v1157_v50 }
 0x10c   :  { %v649_v57 = vadd.f32 %v1156_v52, %v1092_v43 }
 0x10d   :  { %v652_v58 = vadd.f32 %v1159_v56, %v1095_v53 }
 0x10e   :  { %v757_v59 = vadd.f32 %v1490_v9, %v649_v57  ;;  %v1096_v60 = vpop.f32.mrb[12].mxu0 }
 0x10f   :  { %v758_v61 = vadd.f32 %v1490_v9, %v652_v58  ;;  %v1160_v62 = vpop.f32.mrb[12].mxu1  ;;  %v1097_v63 = vpop.f32.mrb[13].mxu0 }
 0x110   :  { %v852_v0 = vadd.f32 %v851_v48, %v757_v59  ;;  %v874_v1 = vmul.f32 %v757_v59, %v757_v59  ;;  %v1098_v2 = vadd.f32 %v1097_v63, %v1096_v60  ;;  %v1161_v3 = vpop.f32.mrb[13].mxu1  ;;  %v1099_v4 = vpop.f32.mrb[14].mxu0 }
 0x111   :  { %v1028_v5 = vpack.c.bf16 %v758_v61, %v757_v59  ;;  %v875_v6 = vmul.f32 %v758_v61, %v758_v61  ;;  %v1162_v7 = vadd.f32 %v1161_v3, %v1160_v62  ;;  %v1163_v8 = vpop.f32.mrb[14].mxu1  ;;  %v1100_v10 = vpop.f32.mrb[15].mxu0 }
 0x112   :  { %v889_v11 = vadd.f32 %v888_v55, %v874_v1  ;;  %v853_v12 = vadd.f32 %v852_v0, %v758_v61  ;;  %v1101_v13 = vadd.f32 %v1100_v10, %v1099_v4  ;;  %v1164_v14 = vpop.f32.mrb[15].mxu1 }
 0x113   :  { %1056 = vst [vmem:[%s1538_s3 + $0x10] sm:$0xff] %v1028_v5   ;;  %v657_v15 = vadd.f32 %v1162_v7, %v1098_v2  ;;  %v1165_v16 = vadd.f32 %v1164_v14, %v1163_v8 }
 0x114   :  { %v890_v17 = vadd.f32 %v889_v11, %v875_v6 }
 0x115   :  { %v759_v18 = vadd.f32 %v1490_v9, %v657_v15  ;;  %v660_v19 = vadd.f32 %v1165_v16, %v1101_v13 }
 0x116   :  { %v1102_v20 = vpop.f32.mrb[16].mxu0 }
 0x117   :  { %v854_v21 = vadd.f32 %v853_v12, %v759_v18  ;;  %v876_v22 = vmul.f32 %v759_v18, %v759_v18  ;;  %v760_v23 = vadd.f32 %v1490_v9, %v660_v19  ;;  %v1166_v24 = vpop.f32.mrb[16].mxu1  ;;  %v1103_v25 = vpop.f32.mrb[17].mxu0 }
 0x118   :  { %v1104_v26 = vadd.f32 %v1103_v25, %v1102_v20  ;;  %v1167_v27 = vpop.f32.mrb[17].mxu1  ;;  %v1105_v28 = vpop.f32.mrb[18].mxu0 }
 0x119   :  { %v891_v29 = vadd.f32 %v890_v17, %v876_v22  ;;  %v1033_v30 = vpack.c.bf16 %v760_v23, %v759_v18  ;;  %v855_v31 = vadd.f32 %v854_v21, %v760_v23  ;;  %v877_v32 = vmul.f32 %v760_v23, %v760_v23  ;;  %v1169_v33 = vpop.f32.mrb[18].mxu1  ;;  %v1106_v34 = vpop.f32.mrb[19].mxu0 }
 0x11a   :  { %v1168_v35 = vadd.f32 %v1167_v27, %v1166_v24  ;;  %v1107_v36 = vadd.f32 %v1106_v34, %v1105_v28  ;;  %v1170_v37 = vpop.f32.mrb[19].mxu1 }
 0x11b   :  { %1057 = vst [vmem:[%s1538_s3 + $0x18] sm:$0xff] %v1033_v30   ;;  %v892_v38 = vadd.f32 %v891_v29, %v877_v32  ;;  %v1171_v39 = vadd.f32 %v1170_v37, %v1169_v33 }
 0x11c   :  { %v665_v40 = vadd.f32 %v1168_v35, %v1104_v26 }
 0x11d   :  { %v668_v41 = vadd.f32 %v1171_v39, %v1107_v36 }
 0x11e   :  { %v761_v42 = vadd.f32 %v1490_v9, %v665_v40  ;;  %v1108_v43 = vpop.f32.mrb[20].mxu0 }
 0x11f   :  { %v762_v44 = vadd.f32 %v1490_v9, %v668_v41  ;;  %v1172_v45 = vpop.f32.mrb[20].mxu1  ;;  %v1109_v46 = vpop.f32.mrb[21].mxu0 }
 0x120   :  { %v856_v47 = vadd.f32 %v855_v31, %v761_v42  ;;  %v878_v48 = vmul.f32 %v761_v42, %v761_v42  ;;  %v1110_v49 = vadd.f32 %v1109_v46, %v1108_v43  ;;  %v1173_v50 = vpop.f32.mrb[21].mxu1  ;;  %v1111_v51 = vpop.f32.mrb[22].mxu0 }
 0x121   :  { %v1038_v52 = vpack.c.bf16 %v762_v44, %v761_v42  ;;  %v879_v53 = vmul.f32 %v762_v44, %v762_v44  ;;  %v1174_v54 = vadd.f32 %v1173_v50, %v1172_v45  ;;  %v1175_v55 = vpop.f32.mrb[22].mxu1  ;;  %v1112_v56 = vpop.f32.mrb[23].mxu0 }
 0x122   :  { %v893_v57 = vadd.f32 %v892_v38, %v878_v48  ;;  %v857_v58 = vadd.f32 %v856_v47, %v762_v44  ;;  %v1113_v59 = vadd.f32 %v1112_v56, %v1111_v51  ;;  %v1176_v60 = vpop.f32.mrb[23].mxu1 }
 0x123   :  { %1058 = vst [vmem:[%s1538_s3 + $0x20] sm:$0xff] %v1038_v52   ;;  %v673_v61 = vadd.f32 %v1174_v54, %v1110_v49  ;;  %v1177_v62 = vadd.f32 %v1176_v60, %v1175_v55 }
 0x124   :  { %v894_v63 = vadd.f32 %v893_v57, %v879_v53 }
 0x125   :  { %v763_v0 = vadd.f32 %v1490_v9, %v673_v61  ;;  %v676_v1 = vadd.f32 %v1177_v62, %v1113_v59 }
 0x126   :  { %v1114_v2 = vpop.f32.mrb[24].mxu0 }
 0x127   :  { %v858_v3 = vadd.f32 %v857_v58, %v763_v0  ;;  %v880_v4 = vmul.f32 %v763_v0, %v763_v0  ;;  %v764_v5 = vadd.f32 %v1490_v9, %v676_v1  ;;  %v1178_v6 = vpop.f32.mrb[24].mxu1  ;;  %v1115_v7 = vpop.f32.mrb[25].mxu0 }
 0x128   :  { %v1116_v8 = vadd.f32 %v1115_v7, %v1114_v2  ;;  %v1179_v10 = vpop.f32.mrb[25].mxu1  ;;  %v1117_v11 = vpop.f32.mrb[26].mxu0 }
 0x129   :  { %v895_v12 = vadd.f32 %v894_v63, %v880_v4  ;;  %v1043_v13 = vpack.c.bf16 %v764_v5, %v763_v0  ;;  %v859_v14 = vadd.f32 %v858_v3, %v764_v5  ;;  %v881_v15 = vmul.f32 %v764_v5, %v764_v5  ;;  %v1181_v16 = vpop.f32.mrb[26].mxu1  ;;  %v1118_v17 = vpop.f32.mrb[27].mxu0 }
 0x12a   :  { %v1180_v18 = vadd.f32 %v1179_v10, %v1178_v6  ;;  %v1119_v19 = vadd.f32 %v1118_v17, %v1117_v11  ;;  %v1182_v20 = vpop.f32.mrb[27].mxu1 }
 0x12b   :  { %1059 = vst [vmem:[%s1538_s3 + $0x28] sm:$0xff] %v1043_v13   ;;  %v896_v21 = vadd.f32 %v895_v12, %v881_v15  ;;  %v1183_v22 = vadd.f32 %v1182_v20, %v1181_v16 }
 0x12c   :  { %v681_v23 = vadd.f32 %v1180_v18, %v1116_v8 }
 0x12d   :  { %v684_v24 = vadd.f32 %v1183_v22, %v1119_v19 }
 0x12e   :  { %v765_v25 = vadd.f32 %v1490_v9, %v681_v23  ;;  %v1120_v26 = vpop.f32.mrb[28].mxu0 }
 0x12f   :  { %v766_v27 = vadd.f32 %v1490_v9, %v684_v24  ;;  %v1184_v28 = vpop.f32.mrb[28].mxu1  ;;  %v1121_v29 = vpop.f32.mrb[29].mxu0 }
 0x130   :  { %v860_v30 = vadd.f32 %v859_v14, %v765_v25  ;;  %v882_v31 = vmul.f32 %v765_v25, %v765_v25  ;;  %v1122_v32 = vadd.f32 %v1121_v29, %v1120_v26  ;;  %v1185_v33 = vpop.f32.mrb[29].mxu1  ;;  %v1123_v34 = vpop.f32.mrb[30].mxu0 }
 0x131   :  { %v1048_v35 = vpack.c.bf16 %v766_v27, %v765_v25  ;;  %v883_v36 = vmul.f32 %v766_v27, %v766_v27  ;;  %v1186_v37 = vadd.f32 %v1185_v33, %v1184_v28  ;;  %v1187_v38 = vpop.f32.mrb[30].mxu1  ;;  %v1124_v39 = vpop.f32.mrb[31].mxu0 }
 0x132   :  { %v897_v40 = vadd.f32 %v896_v21, %v882_v31  ;;  %v861_v41 = vadd.f32 %v860_v30, %v766_v27  ;;  %v1125_v42 = vadd.f32 %v1124_v39, %v1123_v34  ;;  %v1188_v43 = vpop.f32.mrb[31].mxu1 }
 0x133   :  { %1060 = vst [vmem:[%s1538_s3 + $0x30] sm:$0xff] %v1048_v35   ;;  %v689_v44 = vadd.f32 %v1186_v37, %v1122_v32  ;;  %v1189_v45 = vadd.f32 %v1188_v43, %v1187_v38 }
 0x134   :  { %v898_v46 = vadd.f32 %v897_v40, %v883_v36 }
 0x135   :  { %v767_v47 = vadd.f32 %v1490_v9, %v689_v44  ;;  %v692_v48 = vadd.f32 %v1189_v45, %v1125_v42 }
 0x137   :  { %v862_v49 = vadd.f32 %v861_v41, %v767_v47  ;;  %v884_v50 = vmul.f32 %v767_v47, %v767_v47  ;;  %v768_v51 = vadd.f32 %v1490_v9, %v692_v48 }
 0x139   :  { %v899_v52 = vadd.f32 %v898_v46, %v884_v50  ;;  %v1053_v53 = vpack.c.bf16 %v768_v51, %v767_v47  ;;  %v863_v54 = vadd.f32 %v862_v49, %v768_v51  ;;  %v885_v55 = vmul.f32 %v768_v51, %v768_v51 }
 0x13b   :  { %1061 = vst [vmem:[%s1538_s3 + $0x38] sm:$0xff] %v1053_v53   ;;  %v864_v56 = vrot.slane %v863_v54, 4  ;;  %v900_v57 = vadd.f32 %v899_v52, %v885_v55 }
 0x13d   :  { %v865_v58 = vadd.f32 %v864_v56, %v863_v54  ;;  %v901_v59 = vrot.slane %v900_v57, 4 }
 0x13f   :  { %v866_v60 = vrot.slane %v865_v58, 2  ;;  %v902_v61 = vadd.f32 %v901_v59, %v900_v57 }
 0x141   :  { %v867_v62 = vadd.f32 %v866_v60, %v865_v58  ;;  %v903_v63 = vrot.slane %v902_v61, 2 }
 0x143   :  { %v868_v0 = vrot.slane %v867_v62, 1  ;;  %v904_v1 = vadd.f32 %v903_v63, %v902_v61 }
 0x145   :  { %v905_v2 = vrot.slane %v904_v1, 1  ;;  %v869_v9 = vadd.f32 %v868_v0, %v867_v62 }
 0x147   :  { %v906_v3 = vadd.f32 %v905_v2, %v904_v1 }
 0x149   :  { %v908_v4 = vsel %vm907_vm0, %v869_v9, %v906_v3 }
 0x14a   :  { %909 = vst [vmem:[%s1539_s4] sm:$0x3] %v908_v4 }

// kernel: generator_sngan_forward.35
= control target key start
LH: loop header
LB: loop body
LE: loop exit
PB: predicated region body
PF: predicated region fallthrough
CT: control target
= control target key end

     0   :  { %s3390_s12 = smov 0   ;;  %s3392_s13 = smov 0   ;;  %s4327_s0 = inlined_call_operand.vmem [shape: bf16[512,1152], index: 0, kind: input, shape index: {}]   ;;  %s4328_s1 = inlined_call_operand.vmem [shape: bf16[1152,128], index: 1, kind: input, shape index: {}]   ;;  %s4329_s2 = inlined_call_operand.vmem [shape: f32[1,128], index: 2, kind: input, shape index: {}]   ;;  %s4330_s3 = inlined_call_operand.vmem [shape: f32[512,128], index: 3, kind: output, shape index: {}]  }
   0x1   :  { %s3394_s14 = smov 0   ;;  %s3396_s15 = smov 0  }
   0x2   :  { %s3398_s16 = smov 0  }
   0x3 LB: > { %s25_s17 = sadd.s32 1, %s3362_s15  ;;  %p48_p1 = scmp.ne.s32.totalorder %s3354_s13, %s3350_s12  ;;  %s3366_s16 = sphi %s3398_s16, %s13_s16   ;;  %s3362_s15 = sphi %s3396_s15, %s4334_s15   ;;  %s3358_s14 = sphi %s3394_s14, %s4333_s14   ;;  %s3354_s13 = sphi %s3392_s13, %s4332_s13   ;;  %s3350_s12 = sphi %s3390_s12, %s4331_s12  }
   0x4   : > { %p26_p0 = scmp.ge.s32.totalorder %s25_s17, 3  ;;  %p49_p2 = scmp.eq.s32.totalorder %s3366_s16, 0 }
   0x5   : > { %s41_s19 = sadd.s32 1, %s3354_s13  ;;  %p2592_p5 = scmp.ge.s32.totalorder %s3366_s16, 3 }
   0x6   : > { %s4336_s17 = smov (%p26_p0, %s25_s17), 0  ;;  %p50_p3 = por %p49_p2, %p48_p1 }
   0x7   : > { %s37_s18 = ssub.s32 %s3362_s15, %s4336_s17  ;;  %162 = sbr.rel (%p2592_p5) target bundleno = 93 (0x5d), region = 20 }
   0x8   : > { %p39_p4 = scmp.eq.s32.totalorder %s37_s18, 0 }
   0xa   : > { %s3425_s20 = scalar_select %p39_p4, %s3354_s13, %s41_s19  }
   0xe   : > { %165 = sbr.rel (!%p50_p3) target bundleno = 93 (0x5d), region = 24  ;;  %s167_s21 = sand.u32 (%p50_p3), 1, %s3354_s13  }
   0xf   : > { %s2851_s22 = smul.u32 (%p50_p3), 12, %s3362_s15 }
  0x10   : > { %s3004_s23 = smul.u32 (%p50_p3), 768, %s167_s21 }
  0x11   : > { %s3433_s26 = scalar_lea.vmem (%p50_p3), %s4327_s0, %s2851_s22 }
  0x12   : > { %v190_v0 = vld [vmem:[%s3433_s26] sm:$0xff] (%p50_p3)  ;;  %v194_v2 = vld [vmem:[%s3433_s26 + $0x48] sm:$0xff] (%p50_p3)  ;;  %s3438_s27 = scalar_lea.vmem (%p50_p3), [#allocation3], %s3004_s23  ;;  %v198_v4 = vld [vmem:[%s3433_s26 + $0x90] sm:$0xff] (%p50_p3) }
  0x13   : > { %v192_v1 = vld [vmem:[%s3433_s26 + $0x24] sm:$0xff] (%p50_p3)  ;;  %191 = vst [vmem:[%s3438_s27] sm:$0xff] (%p50_p3), %v190_v0  ;;  %195 = vst [vmem:[%s3438_s27 + $0x18] sm:$0xff] (%p50_p3), %v194_v2  ;;  %v196_v3 = vld [vmem:[%s3433_s26 + $0x6c] sm:$0xff] (%p50_p3) }
  0x14   : > { %193 = vst [vmem:[%s3438_s27 + $0xc] sm:$0xff] (%p50_p3), %v192_v1  ;;  %v200_v5 = vld [vmem:[%s3433_s26 + $0xb4] sm:$0xff] (%p50_p3)  ;;  %197 = vst [vmem:[%s3438_s27 + $0x24] sm:$0xff] (%p50_p3), %v196_v3  ;;  %v204_v7 = vld [vmem:[%s3433_s26 + $0xfc] sm:$0xff] (%p50_p3) }
  0x15   : > { %199 = vst [vmem:[%s3438_s27 + $0x30] sm:$0xff] %v198_v4  ;;  %201 = vst [vmem:[%s3438_s27 + $0x3c] sm:$0xff] %v200_v5  ;;  %v202_v6 = vld [vmem:[%s3433_s26 + $0xd8] sm:$0xff]  ;;  %v206_v8 = vld [vmem:[%s3433_s26 + $0x120] sm:$0xff] }
  0x16   : > { %203 = vst [vmem:[%s3438_s27 + $0x48] sm:$0xff] %v202_v6  ;;  %205 = vst [vmem:[%s3438_s27 + $0x54] sm:$0xff] %v204_v7  ;;  %v208_v9 = vld [vmem:[%s3433_s26 + $0x144] sm:$0xff]  ;;  %v212_v11 = vld [vmem:[%s3433_s26 + $0x18c] sm:$0xff] }
  0x17   : > { %207 = vst [vmem:[%s3438_s27 + $0x60] sm:$0xff] %v206_v8  ;;  %v210_v10 = vld [vmem:[%s3433_s26 + $0x168] sm:$0xff]  ;;  %209 = vst [vmem:[%s3438_s27 + $0x6c] sm:$0xff] %v208_v9  ;;  %v214_v12 = vld [vmem:[%s3433_s26 + $0x1b0] sm:$0xff] }
  0x18   : > { %211 = vst [vmem:[%s3438_s27 + $0x78] sm:$0xff] %v210_v10  ;;  %213 = vst [vmem:[%s3438_s27 + $0x84] sm:$0xff] %v212_v11  ;;  %v216_v13 = vld [vmem:[%s3433_s26 + $0x1d4] sm:$0xff]  ;;  %v220_v15 = vld [vmem:[%s3433_s26 + $0x21c] sm:$0xff] }
  0x19   : > { %v218_v14 = vld [vmem:[%s3433_s26 + $0x1f8] sm:$0xff]  ;;  %215 = vst [vmem:[%s3438_s27 + $0x90] sm:$0xff] %v214_v12  ;;  %217 = vst [vmem:[%s3438_s27 + $0x9c] sm:$0xff] %v216_v13  ;;  %v222_v16 = vld [vmem:[%s3433_s26 + $0x240] sm:$0xff] }
  0x1a   : > { %219 = vst [vmem:[%s3438_s27 + $0xa8] sm:$0xff] %v218_v14  ;;  %v224_v17 = vld [vmem:[%s3433_s26 + $0x264] sm:$0xff]  ;;  %221 = vst [vmem:[%s3438_s27 + $0xb4] sm:$0xff] %v220_v15  ;;  %v228_v19 = vld [vmem:[%s3433_s26 + $0x2ac] sm:$0xff] }
  0x1b   : > { %223 = vst [vmem:[%s3438_s27 + $0xc0] sm:$0xff] %v222_v16  ;;  %225 = vst [vmem:[%s3438_s27 + $0xcc] sm:$0xff] %v224_v17  ;;  %v226_v18 = vld [vmem:[%s3433_s26 + $0x288] sm:$0xff]  ;;  %v230_v20 = vld [vmem:[%s3433_s26 + $0x2d0] sm:$0xff] }
  0x1c   : > { %227 = vst [vmem:[%s3438_s27 + $0xd8] sm:$0xff] %v226_v18  ;;  %229 = vst [vmem:[%s3438_s27 + $0xe4] sm:$0xff] %v228_v19  ;;  %v232_v21 = vld [vmem:[%s3433_s26 + $0x2f4] sm:$0xff]  ;;  %v236_v23 = vld [vmem:[%s3433_s26 + $0x33c] sm:$0xff] }
  0x1d   : > { %231 = vst [vmem:[%s3438_s27 + $0xf0] sm:$0xff] %v230_v20  ;;  %v234_v22 = vld [vmem:[%s3433_s26 + $0x318] sm:$0xff]  ;;  %233 = vst [vmem:[%s3438_s27 + $0xfc] sm:$0xff] %v232_v21  ;;  %v238_v24 = vld [vmem:[%s3433_s26 + $0x360] sm:$0xff] }
  0x1e   : > { %235 = vst [vmem:[%s3438_s27 + $0x108] sm:$0xff] %v234_v22  ;;  %237 = vst [vmem:[%s3438_s27 + $0x114] sm:$0xff] %v236_v23  ;;  %v240_v25 = vld [vmem:[%s3433_s26 + $0x384] sm:$0xff]  ;;  %v244_v27 = vld [vmem:[%s3433_s26 + $0x3cc] sm:$0xff] }
  0x1f   : > { %v242_v26 = vld [vmem:[%s3433_s26 + $0x3a8] sm:$0xff]  ;;  %239 = vst [vmem:[%s3438_s27 + $0x120] sm:$0xff] %v238_v24  ;;  %241 = vst [vmem:[%s3438_s27 + $0x12c] sm:$0xff] %v240_v25  ;;  %v246_v28 = vld [vmem:[%s3433_s26 + $0x3f0] sm:$0xff] }
  0x20   : > { %243 = vst [vmem:[%s3438_s27 + $0x138] sm:$0xff] %v242_v26  ;;  %v248_v29 = vld [vmem:[%s3433_s26 + $0x414] sm:$0xff]  ;;  %245 = vst [vmem:[%s3438_s27 + $0x144] sm:$0xff] %v244_v27  ;;  %v252_v31 = vld [vmem:[%s3433_s26 + $0x45c] sm:$0xff] }
  0x21   : > { %247 = vst [vmem:[%s3438_s27 + $0x150] sm:$0xff] %v246_v28  ;;  %249 = vst [vmem:[%s3438_s27 + $0x15c] sm:$0xff] %v248_v29  ;;  %v250_v30 = vld [vmem:[%s3433_s26 + $0x438] sm:$0xff]  ;;  %v254_v32 = vld [vmem:[%s3433_s26 + $0x480] sm:$0xff] }
  0x22   : > { %251 = vst [vmem:[%s3438_s27 + $0x168] sm:$0xff] %v250_v30  ;;  %253 = vst [vmem:[%s3438_s27 + $0x174] sm:$0xff] %v252_v31  ;;  %v256_v33 = vld [vmem:[%s3433_s26 + $0x4a4] sm:$0xff]  ;;  %v260_v35 = vld [vmem:[%s3433_s26 + $0x4ec] sm:$0xff] }
  0x23   : > { %255 = vst [vmem:[%s3438_s27 + $0x180] sm:$0xff] %v254_v32  ;;  %v258_v34 = vld [vmem:[%s3433_s26 + $0x4c8] sm:$0xff]  ;;  %257 = vst [vmem:[%s3438_s27 + $0x18c] sm:$0xff] %v256_v33  ;;  %v262_v36 = vld [vmem:[%s3433_s26 + $0x510] sm:$0xff] }
  0x24   : > { %259 = vst [vmem:[%s3438_s27 + $0x198] sm:$0xff] %v258_v34  ;;  %261 = vst [vmem:[%s3438_s27 + $0x1a4] sm:$0xff] %v260_v35  ;;  %v264_v37 = vld [vmem:[%s3433_s26 + $0x534] sm:$0xff]  ;;  %v268_v39 = vld [vmem:[%s3433_s26 + $0x57c] sm:$0xff] }
  0x25   : > { %v266_v38 = vld [vmem:[%s3433_s26 + $0x558] sm:$0xff]  ;;  %263 = vst [vmem:[%s3438_s27 + $0x1b0] sm:$0xff] %v262_v36  ;;  %265 = vst [vmem:[%s3438_s27 + $0x1bc] sm:$0xff] %v264_v37  ;;  %v270_v40 = vld [vmem:[%s3433_s26 + $0x5a0] sm:$0xff] }
  0x26   : > { %267 = vst [vmem:[%s3438_s27 + $0x1c8] sm:$0xff] %v266_v38  ;;  %v272_v41 = vld [vmem:[%s3433_s26 + $0x5c4] sm:$0xff]  ;;  %269 = vst [vmem:[%s3438_s27 + $0x1d4] sm:$0xff] %v268_v39  ;;  %v276_v43 = vld [vmem:[%s3433_s26 + $0x60c] sm:$0xff] }
  0x27   : > { %271 = vst [vmem:[%s3438_s27 + $0x1e0] sm:$0xff] %v270_v40  ;;  %273 = vst [vmem:[%s3438_s27 + $0x1ec] sm:$0xff] %v272_v41  ;;  %v274_v42 = vld [vmem:[%s3433_s26 + $0x5e8] sm:$0xff]  ;;  %v278_v44 = vld [vmem:[%s3433_s26 + $0x630] sm:$0xff] }
  0x28   : > { %275 = vst [vmem:[%s3438_s27 + $0x1f8] sm:$0xff] %v274_v42  ;;  %277 = vst [vmem:[%s3438_s27 + $0x204] sm:$0xff] %v276_v43  ;;  %v280_v45 = vld [vmem:[%s3433_s26 + $0x654] sm:$0xff]  ;;  %v284_v47 = vld [vmem:[%s3433_s26 + $0x69c] sm:$0xff] }
  0x29   : > { %279 = vst [vmem:[%s3438_s27 + $0x210] sm:$0xff] %v278_v44  ;;  %v282_v46 = vld [vmem:[%s3433_s26 + $0x678] sm:$0xff]  ;;  %281 = vst [vmem:[%s3438_s27 + $0x21c] sm:$0xff] %v280_v45  ;;  %v286_v48 = vld [vmem:[%s3433_s26 + $0x6c0] sm:$0xff] }
  0x2a   : > { %283 = vst [vmem:[%s3438_s27 + $0x228] sm:$0xff] %v282_v46  ;;  %285 = vst [vmem:[%s3438_s27 + $0x234] sm:$0xff] %v284_v47  ;;  %v288_v49 = vld [vmem:[%s3433_s26 + $0x6e4] sm:$0xff]  ;;  %v292_v51 = vld [vmem:[%s3433_s26 + $0x72c] sm:$0xff] }
  0x2b   : > { %v290_v50 = vld [vmem:[%s3433_s26 + $0x708] sm:$0xff]  ;;  %287 = vst [vmem:[%s3438_s27 + $0x240] sm:$0xff] %v286_v48  ;;  %289 = vst [vmem:[%s3438_s27 + $0x24c] sm:$0xff] %v288_v49  ;;  %v294_v52 = vld [vmem:[%s3433_s26 + $0x750] sm:$0xff] }
  0x2c   : > { %291 = vst [vmem:[%s3438_s27 + $0x258] sm:$0xff] %v290_v50  ;;  %v296_v53 = vld [vmem:[%s3433_s26 + $0x774] sm:$0xff]  ;;  %293 = vst [vmem:[%s3438_s27 + $0x264] sm:$0xff] %v292_v51  ;;  %v300_v55 = vld [vmem:[%s3433_s26 + $0x7bc] sm:$0xff] }
  0x2d   : > { %295 = vst [vmem:[%s3438_s27 + $0x270] sm:$0xff] %v294_v52  ;;  %297 = vst [vmem:[%s3438_s27 + $0x27c] sm:$0xff] %v296_v53  ;;  %v298_v54 = vld [vmem:[%s3433_s26 + $0x798] sm:$0xff]  ;;  %v302_v56 = vld [vmem:[%s3433_s26 + $0x7e0] sm:$0xff] }
  0x2e   : > { %299 = vst [vmem:[%s3438_s27 + $0x288] sm:$0xff] %v298_v54  ;;  %301 = vst [vmem:[%s3438_s27 + $0x294] sm:$0xff] %v300_v55  ;;  %v304_v57 = vld [vmem:[%s3433_s26 + $0x804] sm:$0xff]  ;;  %v308_v59 = vld [vmem:[%s3433_s26 + $0x84c] sm:$0xff] }
  0x2f   : > { %303 = vst [vmem:[%s3438_s27 + $0x2a0] sm:$0xff] %v302_v56  ;;  %v306_v58 = vld [vmem:[%s3433_s26 + $0x828] sm:$0xff]  ;;  %305 = vst [vmem:[%s3438_s27 + $0x2ac] sm:$0xff] %v304_v57  ;;  %v310_v60 = vld [vmem:[%s3433_s26 + $0x870] sm:$0xff] }
  0x30   : > { %307 = vst [vmem:[%s3438_s27 + $0x2b8] sm:$0xff] %v306_v58  ;;  %309 = vst [vmem:[%s3438_s27 + $0x2c4] sm:$0xff] %v308_v59  ;;  %v312_v61 = vld [vmem:[%s3433_s26 + $0x894] sm:$0xff]  ;;  %v316_v63 = vld [vmem:[%s3433_s26 + $0x8dc] sm:$0xff] }
  0x31   : > { %v314_v62 = vld [vmem:[%s3433_s26 + $0x8b8] sm:$0xff]  ;;  %311 = vst [vmem:[%s3438_s27 + $0x2d0] sm:$0xff] %v310_v60  ;;  %313 = vst [vmem:[%s3438_s27 + $0x2dc] sm:$0xff] %v312_v61  ;;  %v2594_v0 = vld [vmem:[%s3433_s26 + $0x8] sm:$0xf] }
  0x32   : > { %315 = vst [vmem:[%s3438_s27 + $0x2e8] sm:$0xff] %v314_v62  ;;  %v2596_v1 = vld [vmem:[%s3433_s26 + $0x2c] sm:$0xf]  ;;  %317 = vst [vmem:[%s3438_s27 + $0x2f4] sm:$0xff] %v316_v63  ;;  %v2598_v2 = vld [vmem:[%s3433_s26 + $0x50] sm:$0xf] }
  0x33   : > { %2595 = vst [vmem:[%s3438_s27 + $0x8] sm:$0xf] %v2594_v0  ;;  %2597 = vst [vmem:[%s3438_s27 + $0x14] sm:$0xf] %v2596_v1  ;;  %v2600_v3 = vld [vmem:[%s3433_s26 + $0x74] sm:$0xf] }
  0x34   : > { %v2602_v4 = vld [vmem:[%s3433_s26 + $0x98] sm:$0xf]  ;;  %2599 = vst [vmem:[%s3438_s27 + $0x20] sm:$0xf] %v2598_v2  ;;  %2601 = vst [vmem:[%s3438_s27 + $0x2c] sm:$0xf] %v2600_v3 }
  0x35   : > { %2603 = vst [vmem:[%s3438_s27 + $0x38] sm:$0xf] %v2602_v4  ;;  %v2604_v5 = vld [vmem:[%s3433_s26 + $0xbc] sm:$0xf]  ;;  %v2606_v6 = vld [vmem:[%s3433_s26 + $0xe0] sm:$0xf] }
  0x36   : > { %v2608_v7 = vld [vmem:[%s3433_s26 + $0x104] sm:$0xf]  ;;  %2605 = vst [vmem:[%s3438_s27 + $0x44] sm:$0xf] %v2604_v5  ;;  %2607 = vst [vmem:[%s3438_s27 + $0x50] sm:$0xf] %v2606_v6 }
  0x37   : > { %2609 = vst [vmem:[%s3438_s27 + $0x5c] sm:$0xf] %v2608_v7  ;;  %v2610_v8 = vld [vmem:[%s3433_s26 + $0x128] sm:$0xf]  ;;  %v2612_v9 = vld [vmem:[%s3433_s26 + $0x14c] sm:$0xf] }
  0x38   : > { %v2614_v10 = vld [vmem:[%s3433_s26 + $0x170] sm:$0xf]  ;;  %2611 = vst [vmem:[%s3438_s27 + $0x68] sm:$0xf] %v2610_v8  ;;  %2613 = vst [vmem:[%s3438_s27 + $0x74] sm:$0xf] %v2612_v9 }
  0x39   : > { %2615 = vst [vmem:[%s3438_s27 + $0x80] sm:$0xf] %v2614_v10  ;;  %v2616_v11 = vld [vmem:[%s3433_s26 + $0x194] sm:$0xf]  ;;  %v2618_v12 = vld [vmem:[%s3433_s26 + $0x1b8] sm:$0xf] }
  0x3a   : > { %v2620_v13 = vld [vmem:[%s3433_s26 + $0x1dc] sm:$0xf]  ;;  %2617 = vst [vmem:[%s3438_s27 + $0x8c] sm:$0xf] %v2616_v11  ;;  %2619 = vst [vmem:[%s3438_s27 + $0x98] sm:$0xf] %v2618_v12 }
  0x3b   : > { %2621 = vst [vmem:[%s3438_s27 + $0xa4] sm:$0xf] %v2620_v13  ;;  %v2622_v14 = vld [vmem:[%s3433_s26 + $0x200] sm:$0xf]  ;;  %v2624_v15 = vld [vmem:[%s3433_s26 + $0x224] sm:$0xf] }
  0x3c   : > { %v2626_v16 = vld [vmem:[%s3433_s26 + $0x248] sm:$0xf]  ;;  %2623 = vst [vmem:[%s3438_s27 + $0xb0] sm:$0xf] %v2622_v14  ;;  %2625 = vst [vmem:[%s3438_s27 + $0xbc] sm:$0xf] %v2624_v15 }
  0x3d   : > { %2627 = vst [vmem:[%s3438_s27 + $0xc8] sm:$0xf] %v2626_v16  ;;  %v2628_v17 = vld [vmem:[%s3433_s26 + $0x26c] sm:$0xf]  ;;  %v2630_v18 = vld [vmem:[%s3433_s26 + $0x290] sm:$0xf] }
  0x3e   : > { %v2632_v19 = vld [vmem:[%s3433_s26 + $0x2b4] sm:$0xf]  ;;  %2629 = vst [vmem:[%s3438_s27 + $0xd4] sm:$0xf] %v2628_v17  ;;  %2631 = vst [vmem:[%s3438_s27 + $0xe0] sm:$0xf] %v2630_v18 }
  0x3f   : > { %2633 = vst [vmem:[%s3438_s27 + $0xec] sm:$0xf] %v2632_v19  ;;  %v2634_v20 = vld [vmem:[%s3433_s26 + $0x2d8] sm:$0xf]  ;;  %v2636_v21 = vld [vmem:[%s3433_s26 + $0x2fc] sm:$0xf] }
  0x40   : > { %v2638_v22 = vld [vmem:[%s3433_s26 + $0x320] sm:$0xf]  ;;  %2635 = vst [vmem:[%s3438_s27 + $0xf8] sm:$0xf] %v2634_v20  ;;  %2637 = vst [vmem:[%s3438_s27 + $0x104] sm:$0xf] %v2636_v21 }
  0x41   : > { %2639 = vst [vmem:[%s3438_s27 + $0x110] sm:$0xf] %v2638_v22  ;;  %v2640_v23 = vld [vmem:[%s3433_s26 + $0x344] sm:$0xf]  ;;  %v2642_v24 = vld [vmem:[%s3433_s26 + $0x368] sm:$0xf] }
  0x42   : > { %v2644_v25 = vld [vmem:[%s3433_s26 + $0x38c] sm:$0xf]  ;;  %2641 = vst [vmem:[%s3438_s27 + $0x11c] sm:$0xf] %v2640_v23  ;;  %2643 = vst [vmem:[%s3438_s27 + $0x128] sm:$0xf] %v2642_v24 }
  0x43   : > { %2645 = vst [vmem:[%s3438_s27 + $0x134] sm:$0xf] %v2644_v25  ;;  %v2646_v26 = vld [vmem:[%s3433_s26 + $0x3b0] sm:$0xf]  ;;  %v2648_v27 = vld [vmem:[%s3433_s26 + $0x3d4] sm:$0xf] }
  0x44   : > { %v2650_v28 = vld [vmem:[%s3433_s26 + $0x3f8] sm:$0xf]  ;;  %2647 = vst [vmem:[%s3438_s27 + $0x140] sm:$0xf] %v2646_v26  ;;  %2649 = vst [vmem:[%s3438_s27 + $0x14c] sm:$0xf] %v2648_v27 }
  0x45   : > { %2651 = vst [vmem:[%s3438_s27 + $0x158] sm:$0xf] %v2650_v28  ;;  %v2652_v29 = vld [vmem:[%s3433_s26 + $0x41c] sm:$0xf]  ;;  %v2654_v30 = vld [vmem:[%s3433_s26 + $0x440] sm:$0xf] }
  0x46   : > { %v2656_v31 = vld [vmem:[%s3433_s26 + $0x464] sm:$0xf]  ;;  %2653 = vst [vmem:[%s3438_s27 + $0x164] sm:$0xf] %v2652_v29  ;;  %2655 = vst [vmem:[%s3438_s27 + $0x170] sm:$0xf] %v2654_v30 }
  0x47   : > { %2657 = vst [vmem:[%s3438_s27 + $0x17c] sm:$0xf] %v2656_v31  ;;  %v2658_v32 = vld [vmem:[%s3433_s26 + $0x488] sm:$0xf]  ;;  %v2660_v33 = vld [vmem:[%s3433_s26 + $0x4ac] sm:$0xf] }
  0x48   : > { %v2662_v34 = vld [vmem:[%s3433_s26 + $0x4d0] sm:$0xf]  ;;  %2659 = vst [vmem:[%s3438_s27 + $0x188] sm:$0xf] %v2658_v32  ;;  %2661 = vst [vmem:[%s3438_s27 + $0x194] sm:$0xf] %v2660_v33 }
  0x49   : > { %2663 = vst [vmem:[%s3438_s27 + $0x1a0] sm:$0xf] %v2662_v34  ;;  %v2664_v35 = vld [vmem:[%s3433_s26 + $0x4f4] sm:$0xf]  ;;  %v2666_v36 = vld [vmem:[%s3433_s26 + $0x518] sm:$0xf] }
  0x4a   : > { %v2668_v37 = vld [vmem:[%s3433_s26 + $0x53c] sm:$0xf]  ;;  %2665 = vst [vmem:[%s3438_s27 + $0x1ac] sm:$0xf] %v2664_v35  ;;  %2667 = vst [vmem:[%s3438_s27 + $0x1b8] sm:$0xf] %v2666_v36 }
  0x4b   : > { %2669 = vst [vmem:[%s3438_s27 + $0x1c4] sm:$0xf] %v2668_v37  ;;  %v2670_v38 = vld [vmem:[%s3433_s26 + $0x560] sm:$0xf]  ;;  %v2672_v39 = vld [vmem:[%s3433_s26 + $0x584] sm:$0xf] }
  0x4c   : > { %v2674_v40 = vld [vmem:[%s3433_s26 + $0x5a8] sm:$0xf]  ;;  %2671 = vst [vmem:[%s3438_s27 + $0x1d0] sm:$0xf] %v2670_v38  ;;  %2673 = vst [vmem:[%s3438_s27 + $0x1dc] sm:$0xf] %v2672_v39 }
  0x4d   : > { %2675 = vst [vmem:[%s3438_s27 + $0x1e8] sm:$0xf] %v2674_v40  ;;  %v2676_v41 = vld [vmem:[%s3433_s26 + $0x5cc] sm:$0xf]  ;;  %v2678_v42 = vld [vmem:[%s3433_s26 + $0x5f0] sm:$0xf] }
  0x4e   : > { %v2680_v43 = vld [vmem:[%s3433_s26 + $0x614] sm:$0xf]  ;;  %2677 = vst [vmem:[%s3438_s27 + $0x1f4] sm:$0xf] %v2676_v41  ;;  %2679 = vst [vmem:[%s3438_s27 + $0x200] sm:$0xf] %v2678_v42 }
  0x4f   : > { %2681 = vst [vmem:[%s3438_s27 + $0x20c] sm:$0xf] %v2680_v43  ;;  %v2682_v44 = vld [vmem:[%s3433_s26 + $0x638] sm:$0xf]  ;;  %v2684_v45 = vld [vmem:[%s3433_s26 + $0x65c] sm:$0xf] }
  0x50   : > { %v2686_v46 = vld [vmem:[%s3433_s26 + $0x680] sm:$0xf]  ;;  %2683 = vst [vmem:[%s3438_s27 + $0x218] sm:$0xf] %v2682_v44  ;;  %2685 = vst [vmem:[%s3438_s27 + $0x224] sm:$0xf] %v2684_v45 }
  0x51   : > { %2687 = vst [vmem:[%s3438_s27 + $0x230] sm:$0xf] %v2686_v46  ;;  %v2688_v47 = vld [vmem:[%s3433_s26 + $0x6a4] sm:$0xf]  ;;  %v2690_v48 = vld [vmem:[%s3433_s26 + $0x6c8] sm:$0xf] }
  0x52   : > { %v2692_v49 = vld [vmem:[%s3433_s26 + $0x6ec] sm:$0xf]  ;;  %2689 = vst [vmem:[%s3438_s27 + $0x23c] sm:$0xf] %v2688_v47  ;;  %2691 = vst [vmem:[%s3438_s27 + $0x248] sm:$0xf] %v2690_v48 }
  0x53   : > { %2693 = vst [vmem:[%s3438_s27 + $0x254] sm:$0xf] %v2692_v49  ;;  %v2694_v50 = vld [vmem:[%s3433_s26 + $0x710] sm:$0xf]  ;;  %v2696_v51 = vld [vmem:[%s3433_s26 + $0x734] sm:$0xf] }
  0x54   : > { %v2698_v52 = vld [vmem:[%s3433_s26 + $0x758] sm:$0xf]  ;;  %2695 = vst [vmem:[%s3438_s27 + $0x260] sm:$0xf] %v2694_v50  ;;  %2697 = vst [vmem:[%s3438_s27 + $0x26c] sm:$0xf] %v2696_v51 }
  0x55   : > { %2699 = vst [vmem:[%s3438_s27 + $0x278] sm:$0xf] %v2698_v52  ;;  %v2700_v53 = vld [vmem:[%s3433_s26 + $0x77c] sm:$0xf]  ;;  %v2702_v54 = vld [vmem:[%s3433_s26 + $0x7a0] sm:$0xf] }
  0x56   : > { %v2704_v55 = vld [vmem:[%s3433_s26 + $0x7c4] sm:$0xf]  ;;  %2701 = vst [vmem:[%s3438_s27 + $0x284] sm:$0xf] %v2700_v53  ;;  %2703 = vst [vmem:[%s3438_s27 + $0x290] sm:$0xf] %v2702_v54 }
  0x57   : > { %2705 = vst [vmem:[%s3438_s27 + $0x29c] sm:$0xf] %v2704_v55  ;;  %v2706_v56 = vld [vmem:[%s3433_s26 + $0x7e8] sm:$0xf]  ;;  %v2708_v57 = vld [vmem:[%s3433_s26 + $0x80c] sm:$0xf] }
  0x58   : > { %v2710_v58 = vld [vmem:[%s3433_s26 + $0x830] sm:$0xf]  ;;  %2707 = vst [vmem:[%s3438_s27 + $0x2a8] sm:$0xf] %v2706_v56  ;;  %2709 = vst [vmem:[%s3438_s27 + $0x2b4] sm:$0xf] %v2708_v57 }
  0x59   : > { %2711 = vst [vmem:[%s3438_s27 + $0x2c0] sm:$0xf] %v2710_v58  ;;  %v2712_v59 = vld [vmem:[%s3433_s26 + $0x854] sm:$0xf]  ;;  %v2714_v60 = vld [vmem:[%s3433_s26 + $0x878] sm:$0xf] }
  0x5a   : > { %v2716_v61 = vld [vmem:[%s3433_s26 + $0x89c] sm:$0xf]  ;;  %2713 = vst [vmem:[%s3438_s27 + $0x2cc] sm:$0xf] %v2712_v59  ;;  %2715 = vst [vmem:[%s3438_s27 + $0x2d8] sm:$0xf] %v2714_v60 }
  0x5b   : > { %2717 = vst [vmem:[%s3438_s27 + $0x2e4] sm:$0xf] %v2716_v61  ;;  %v2718_v62 = vld [vmem:[%s3433_s26 + $0x8c0] sm:$0xf]  ;;  %v2720_v63 = vld [vmem:[%s3433_s26 + $0x8e4] sm:$0xf] }
  0x5c   : > { %2719 = vst [vmem:[%s3438_s27 + $0x2f0] sm:$0xf] %v2718_v62  ;;  %2721 = vst [vmem:[%s3438_s27 + $0x2fc] sm:$0xf] %v2720_v63 }
  0x5d PF: > { %p2722_p6 = scmp.ge.s32.totalorder %s3366_s16, 1  ;;  %p469_p7 = scmp.lt.s32.totalorder %s3366_s16, 4 }
  0x5f   : > { %p470_p8 = pnand %p2722_p6, %p469_p7 }
  0x60   : > { %s476_s28 = sand.u32 (!%p470_p8), 1, %s3350_s12   ;;  %s515_s29 = smul.u32 (!%p470_p8), 48, %s3358_s14 }
  0x61   : > { %473 = sbr.rel (%p470_p8) target bundleno = 680 (0x2a8), region = 54  ;;  %p2724_p10 = scmp.ne.s32.totalorder (!%p470_p8), %s3358_s14, 0 }
  0x62   : > { %s3005_s30 = smul.u32 (!%p470_p8), 768, %s476_s28  ;;  %p516_p9 = scmp.lt.s32.totalorder (!%p470_p8), %s515_s29, 143 }
  0x64   : > { %s3702_s8 = scalar_lea.vmem (!%p470_p8), [#allocation3], %s3005_s30 }
  0x68   : > { %s4338_s29 = smov (!%p516_p9, %s515_s29), 143  ;;  %540 = sbr.rel (%p2724_p10) target bundleno = 138 (0x8a), region = 62 }
  0x69   : > { %s2723_s4 = sshll.u32 %s4338_s29, 2  ;;  %v3368_v0 = vmov (!%p2724_p10), 0.0  }
  0x6a   : > { %s3700_s7 = scalar_lea.vmem %s4328_s1, %s2723_s4  ;;  %541 = vst [vmem:[#allocation2] sm:$0xff] (!%p2724_p10), %v3368_v0  ;;  %542 = vst [vmem:[#allocation2 + $0x8] sm:$0xff] (!%p2724_p10), %v3368_v0 }
  0x6b   : > { %543 = vst [vmem:[#allocation2 + $0x10] sm:$0xff] (!%p2724_p10), %v3368_v0  ;;  %544 = vst [vmem:[#allocation2 + $0x18] sm:$0xff] (!%p2724_p10), %v3368_v0 }
  0x6c   : > { %545 = vst [vmem:[#allocation2 + $0x20] sm:$0xff] (!%p2724_p10), %v3368_v0  ;;  %546 = vst [vmem:[#allocation2 + $0x28] sm:$0xff] (!%p2724_p10), %v3368_v0 }
  0x6d   : > { %547 = vst [vmem:[#allocation2 + $0x30] sm:$0xff] (!%p2724_p10), %v3368_v0  ;;  %548 = vst [vmem:[#allocation2 + $0x38] sm:$0xff] (!%p2724_p10), %v3368_v0 }
  0x6e   : > { %549 = vst [vmem:[#allocation2 + $0x40] sm:$0xff] (!%p2724_p10), %v3368_v0  ;;  %550 = vst [vmem:[#allocation2 + $0x48] sm:$0xff] (!%p2724_p10), %v3368_v0 }
  0x6f   : > { %551 = vst [vmem:[#allocation2 + $0x50] sm:$0xff] %v3368_v0  ;;  %552 = vst [vmem:[#allocation2 + $0x58] sm:$0xff] %v3368_v0 }
  0x70   : > { %553 = vst [vmem:[#allocation2 + $0x60] sm:$0xff] %v3368_v0  ;;  %554 = vst [vmem:[#allocation2 + $0x68] sm:$0xff] %v3368_v0 }
  0x71   : > { %555 = vst [vmem:[#allocation2 + $0x70] sm:$0xff] %v3368_v0  ;;  %556 = vst [vmem:[#allocation2 + $0x78] sm:$0xff] %v3368_v0 }
  0x72   : > { %557 = vst [vmem:[#allocation2 + $0x80] sm:$0xff] %v3368_v0  ;;  %558 = vst [vmem:[#allocation2 + $0x88] sm:$0xff] %v3368_v0 }
  0x73   : > { %559 = vst [vmem:[#allocation2 + $0x90] sm:$0xff] %v3368_v0  ;;  %560 = vst [vmem:[#allocation2 + $0x98] sm:$0xff] %v3368_v0 }
  0x74   : > { %561 = vst [vmem:[#allocation2 + $0xa0] sm:$0xff] %v3368_v0  ;;  %562 = vst [vmem:[#allocation2 + $0xa8] sm:$0xff] %v3368_v0 }
  0x75   : > { %563 = vst [vmem:[#allocation2 + $0xb0] sm:$0xff] %v3368_v0  ;;  %564 = vst [vmem:[#allocation2 + $0xb8] sm:$0xff] %v3368_v0 }
  0x76   : > { %565 = vst [vmem:[#allocation2 + $0xc0] sm:$0xff] %v3368_v0  ;;  %566 = vst [vmem:[#allocation2 + $0xc8] sm:$0xff] %v3368_v0 }
  0x77   : > { %567 = vst [vmem:[#allocation2 + $0xd0] sm:$0xff] %v3368_v0  ;;  %568 = vst [vmem:[#allocation2 + $0xd8] sm:$0xff] %v3368_v0 }
  0x78   : > { %569 = vst [vmem:[#allocation2 + $0xe0] sm:$0xff] %v3368_v0  ;;  %570 = vst [vmem:[#allocation2 + $0xe8] sm:$0xff] %v3368_v0 }
  0x79   : > { %571 = vst [vmem:[#allocation2 + $0xf0] sm:$0xff] %v3368_v0  ;;  %572 = vst [vmem:[#allocation2 + $0xf8] sm:$0xff] %v3368_v0 }
  0x7a   : > { %573 = vst [vmem:[#allocation2 + $0x100] sm:$0xff] %v3368_v0  ;;  %574 = vst [vmem:[#allocation2 + $0x108] sm:$0xff] %v3368_v0 }
  0x7b   : > { %575 = vst [vmem:[#allocation2 + $0x110] sm:$0xff] %v3368_v0  ;;  %576 = vst [vmem:[#allocation2 + $0x118] sm:$0xff] %v3368_v0 }
  0x7c   : > { %577 = vst [vmem:[#allocation2 + $0x120] sm:$0xff] %v3368_v0  ;;  %578 = vst [vmem:[#allocation2 + $0x128] sm:$0xff] %v3368_v0 }
  0x7d   : > { %579 = vst [vmem:[#allocation2 + $0x130] sm:$0xff] %v3368_v0  ;;  %580 = vst [vmem:[#allocation2 + $0x138] sm:$0xff] %v3368_v0 }
  0x7e   : > { %581 = vst [vmem:[#allocation2 + $0x140] sm:$0xff] %v3368_v0  ;;  %582 = vst [vmem:[#allocation2 + $0x148] sm:$0xff] %v3368_v0 }
  0x7f   : > { %583 = vst [vmem:[#allocation2 + $0x150] sm:$0xff] %v3368_v0  ;;  %584 = vst [vmem:[#allocation2 + $0x158] sm:$0xff] %v3368_v0 }
  0x80   : > { %585 = vst [vmem:[#allocation2 + $0x160] sm:$0xff] %v3368_v0  ;;  %586 = vst [vmem:[#allocation2 + $0x168] sm:$0xff] %v3368_v0 }
  0x81   : > { %587 = vst [vmem:[#allocation2 + $0x170] sm:$0xff] %v3368_v0  ;;  %588 = vst [vmem:[#allocation2 + $0x178] sm:$0xff] %v3368_v0 }
  0x82   : > { %589 = vst [vmem:[#allocation2 + $0x180] sm:$0xff] %v3368_v0  ;;  %590 = vst [vmem:[#allocation2 + $0x188] sm:$0xff] %v3368_v0 }
  0x83   : > { %591 = vst [vmem:[#allocation2 + $0x190] sm:$0xff] %v3368_v0  ;;  %592 = vst [vmem:[#allocation2 + $0x198] sm:$0xff] %v3368_v0 }
  0x84   : > { %593 = vst [vmem:[#allocation2 + $0x1a0] sm:$0xff] %v3368_v0  ;;  %594 = vst [vmem:[#allocation2 + $0x1a8] sm:$0xff] %v3368_v0 }
  0x85   : > { %595 = vst [vmem:[#allocation2 + $0x1b0] sm:$0xff] %v3368_v0  ;;  %596 = vst [vmem:[#allocation2 + $0x1b8] sm:$0xff] %v3368_v0 }
  0x86   : > { %597 = vst [vmem:[#allocation2 + $0x1c0] sm:$0xff] %v3368_v0  ;;  %598 = vst [vmem:[#allocation2 + $0x1c8] sm:$0xff] %v3368_v0 }
  0x87   : > { %599 = vst [vmem:[#allocation2 + $0x1d0] sm:$0xff] %v3368_v0  ;;  %600 = vst [vmem:[#allocation2 + $0x1d8] sm:$0xff] %v3368_v0 }
  0x88   : > { %601 = vst [vmem:[#allocation2 + $0x1e0] sm:$0xff] %v3368_v0  ;;  %602 = vst [vmem:[#allocation2 + $0x1e8] sm:$0xff] %v3368_v0 }
  0x89   : > { %603 = vst [vmem:[#allocation2 + $0x1f0] sm:$0xff] %v3368_v0  ;;  %604 = vst [vmem:[#allocation2 + $0x1f8] sm:$0xff] %v3368_v0 }
  0x8a PF: > { %v3048_v1 = vld [vmem:[%s3700_s7] sm:$0xff]   ;;  %v3369_v2 = vmov 0   ;;  %v3049_v3 = vld [vmem:[%s3700_s7 + $0x8] sm:$0xff]   ;;  %v3050_v4 = vld [vmem:[%s3700_s7 + $0x10] sm:$0xff]   ;;  %p2845_p11 = scmp.ne.s32.totalorder %s3358_s14, 2 }
  0x8b   : > { %1501 = vmatprep.subr.bf16.mxu0 %v3369_v2  ;;  %2972 = vmatprep.subr.bf16.mxu1 %v3369_v2  ;;  %v3051_v5 = vld [vmem:[%s3700_s7 + $0x18] sm:$0xff]   ;;  %v3052_v6 = vld [vmem:[%s3700_s7 + $0x20] sm:$0xff]   ;;  %v3053_v8 = vld [vmem:[%s3700_s7 + $0x28] sm:$0xff]  }
  0x8c   : > { %1502 = vmatpush1.bf16.msra.mxu0 %v3048_v1  ;;  %2988 = vmatpush1.bf16.msra.mxu1 %v3048_v1  ;;  %v3066_v7 = vld [vmem:[%s3702_s8 + $0x4] ss:$12 sps:$4 sm:$0xff]   ;;  %v3055_v11 = vld [vmem:[%s3700_s7 + $0x38] sm:$0xff]   ;;  %v3057_v13 = vld [vmem:[%s3700_s7 + $0x48] sm:$0xff]  }
  0x8d   : > { %1503 = vmatprep.subr.bf16.mxu0 %v3369_v2  ;;  %2973 = vmatprep.subr.bf16.mxu1 %v3369_v2  ;;  %v3069_v9 = vld [vmem:[%s3702_s8 + $0x244] ss:$12 sps:$4 sm:$0xff]   ;;  %v3059_v15 = vld [vmem:[%s3700_s7 + $0x58] sm:$0xff]   ;;  %v3061_v17 = vld [vmem:[%s3700_s7 + $0x68] sm:$0xff]  }
  0x8e   : > { %1533 = vmatprep.mubr.bf16.mxu0 %v3066_v7  ;;  %1725 = vmatprep.mubr.bf16.mxu1 %v3069_v9  ;;  %v3054_v10 = vld [vmem:[%s3700_s7 + $0x30] sm:$0xff]   ;;  %v3056_v12 = vld [vmem:[%s3700_s7 + $0x40] sm:$0xff]   ;;  %v3063_v19 = vld [vmem:[%s3700_s7 + $0x78] sm:$0xff]  }
  0x8f   : > { %v3058_v14 = vld [vmem:[%s3700_s7 + $0x50] sm:$0xff]   ;;  %v3060_v16 = vld [vmem:[%s3700_s7 + $0x60] sm:$0xff]   ;;  %v3071_v23 = vld [vmem:[%s3702_s8 + $0x1c] ss:$12 sps:$4 sm:$0xff]  }
  0x90   : > { %1504 = vmatpush1.bf16.msra.mxu0 %v3049_v3  ;;  %2989 = vmatpush1.bf16.msra.mxu1 %v3049_v3  ;;  %v3062_v18 = vld [vmem:[%s3700_s7 + $0x70] sm:$0xff]   ;;  %v3070_v20 = vld [vmem:[%s3700_s7 + $0x80] sm:$0xff]   ;;  %v3073_v24 = vld [vmem:[%s3702_s8 + $0x25c] ss:$12 sps:$4 sm:$0xff]  }
  0x91   : > { %1505 = vmatprep.subr.bf16.mxu0 %v3369_v2  ;;  %2974 = vmatprep.subr.bf16.mxu1 %v3369_v2  ;;  %v3064_v21 = vld [vmem:[%s3702_s8] ss:$12 sps:$4 sm:$0xff]   ;;  %v3084_v26 = vld [vmem:[%s3700_s7 + $0x90] sm:$0xff]   ;;  %v3075_v27 = vld [vmem:[%s3702_s8 + $0x18] ss:$12 sps:$4 sm:$0xff]  }
  0x92   : > { %v3067_v22 = vld [vmem:[%s3702_s8 + $0x240] ss:$12 sps:$4 sm:$0xff]   ;;  %v3076_v28 = vld [vmem:[%s3702_s8 + $0x258] ss:$12 sps:$4 sm:$0xff]   ;;  %v3082_v32 = vld [vmem:[%s3702_s8 + $0x30] ss:$12 sps:$4 sm:$0xff]  }
  0x93   : > { %v3077_v25 = vld [vmem:[%s3700_s7 + $0x88] sm:$0xff]   ;;  %v3078_v29 = vld [vmem:[%s3702_s8 + $0x34] ss:$12 sps:$4 sm:$0xff]   ;;  %v3091_v31 = vld [vmem:[%s3700_s7 + $0x98] sm:$0xff]  }
  0x94   : > { %1506 = vmatpush1.bf16.msra.mxu0 %v3050_v4  ;;  %2990 = vmatpush1.bf16.msra.mxu1 %v3050_v4  ;;  %v3080_v30 = vld [vmem:[%s3702_s8 + $0x274] ss:$12 sps:$4 sm:$0xff]   ;;  %v3083_v34 = vld [vmem:[%s3702_s8 + $0x270] ss:$12 sps:$4 sm:$0xff]   ;;  %v3085_v35 = vld [vmem:[%s3702_s8 + $0x4c] ss:$12 sps:$4 sm:$0xff]  }
  0x95   : > { %1507 = vmatprep.subr.bf16.mxu0 %v3369_v2  ;;  %2975 = vmatprep.subr.bf16.mxu1 %v3369_v2  ;;  %v3098_v33 = vld [vmem:[%s3700_s7 + $0xa0] sm:$0xff]   ;;  %v3087_v36 = vld [vmem:[%s3702_s8 + $0x28c] ss:$12 sps:$4 sm:$0xff]   ;;  %v3089_v38 = vld [vmem:[%s3702_s8 + $0x48] ss:$12 sps:$4 sm:$0xff]  }
  0x96   : > { %v3105_v37 = vld [vmem:[%s3700_s7 + $0xa8] sm:$0xff]   ;;  %v3092_v40 = vld [vmem:[%s3702_s8 + $0x64] ss:$12 sps:$4 sm:$0xff]   ;;  %v3119_v43 = vld [vmem:[%s3700_s7 + $0xb8] sm:$0xff]  }
  0x97   : > { %v3090_v39 = vld [vmem:[%s3702_s8 + $0x288] ss:$12 sps:$4 sm:$0xff]   ;;  %v3094_v41 = vld [vmem:[%s3702_s8 + $0x2a4] ss:$12 sps:$4 sm:$0xff]   ;;  %v3096_v44 = vld [vmem:[%s3702_s8 + $0x60] ss:$12 sps:$4 sm:$0xff]  }
  0x98   : > { %1508 = vmatpush1.bf16.msra.mxu0 %v3051_v5  ;;  %2991 = vmatpush1.bf16.msra.mxu1 %v3051_v5  ;;  %v3112_v42 = vld [vmem:[%s3700_s7 + $0xb0] sm:$0xff]   ;;  %v3097_v45 = vld [vmem:[%s3702_s8 + $0x2a0] ss:$12 sps:$4 sm:$0xff]   ;;  %v3099_v46 = vld [vmem:[%s3702_s8 + $0x7c] ss:$12 sps:$4 sm:$0xff]  }
  0x99   : > { %1509 = vmatprep.subr.bf16.mxu0 %v3369_v2  ;;  %2976 = vmatprep.subr.bf16.mxu1 %v3369_v2  ;;  %v3101_v47 = vld [vmem:[%s3702_s8 + $0x2bc] ss:$12 sps:$4 sm:$0xff]   ;;  %v3103_v48 = vld [vmem:[%s3702_s8 + $0x78] ss:$12 sps:$4 sm:$0xff]   ;;  %v3106_v50 = vld [vmem:[%s3702_s8 + $0x94] ss:$12 sps:$4 sm:$0xff]  }
  0x9a   : > { %v3104_v49 = vld [vmem:[%s3702_s8 + $0x2b8] ss:$12 sps:$4 sm:$0xff]   ;;  %v3108_v51 = vld [vmem:[%s3702_s8 + $0x2d4] ss:$12 sps:$4 sm:$0xff]   ;;  %v3110_v52 = vld [vmem:[%s3702_s8 + $0x90] ss:$12 sps:$4 sm:$0xff]  }
  0x9b   : > { %v3111_v53 = vld [vmem:[%s3702_s8 + $0x2d0] ss:$12 sps:$4 sm:$0xff]   ;;  %v3113_v54 = vld [vmem:[%s3702_s8 + $0xac] ss:$12 sps:$4 sm:$0xff]   ;;  %v3117_v56 = vld [vmem:[%s3702_s8 + $0xa8] ss:$12 sps:$4 sm:$0xff]  }
  0x9c   : > { %1510 = vmatpush1.bf16.msra.mxu0 %v3052_v6  ;;  %2992 = vmatpush1.bf16.msra.mxu1 %v3052_v6  ;;  %v3115_v55 = vld [vmem:[%s3702_s8 + $0x2ec] ss:$12 sps:$4 sm:$0xff]   ;;  %v3118_v57 = vld [vmem:[%s3702_s8 + $0x2e8] ss:$12 sps:$4 sm:$0xff]   ;;  %v3120_v58 = vld [vmem:[%s3702_s8 + $0xc4] ss:$12 sps:$4 sm:$0xff]  }
  0x9d   : > { %1511 = vmatprep.subr.bf16.mxu0 %v3369_v2  ;;  %2977 = vmatprep.subr.bf16.mxu1 %v3369_v2  ;;  %v3122_v59 = vld [vmem:[%s3702_s8 + $0x8] ss:$12 sps:$4 sm:$0xff]   ;;  %v3123_v60 = vld [vmem:[%s3702_s8 + $0xc0] ss:$12 sps:$4 sm:$0xff]   ;;  %v3127_v63 = vld [vmem:[%s3702_s8 + $0x38] ss:$12 sps:$4 sm:$0xff]  }
  0x9e   : > { %v3124_v61 = vld [vmem:[%s3702_s8 + $0x20] ss:$12 sps:$4 sm:$0xff]   ;;  %v3125_v62 = vld [vmem:[%s3702_s8 + $0xdc] ss:$12 sps:$4 sm:$0xff]   ;;  %v3128_v0 = vld [vmem:[%s3702_s8 + $0xd8] ss:$12 sps:$4 sm:$0xff]  }
  0x9f   : > { %v3129_v1 = vld [vmem:[%s3702_s8 + $0x50] ss:$12 sps:$4 sm:$0xff]   ;;  %v3132_v3 = vld [vmem:[%s3702_s8 + $0x68] ss:$12 sps:$4 sm:$0xff]   ;;  %v3134_v5 = vld [vmem:[%s3702_s8 + $0x80] ss:$12 sps:$4 sm:$0xff]  }
  0xa0   : > { %1512 = vmatpush1.bf16.msra.mxu0 %v3053_v8  ;;  %2993 = vmatpush1.bf16.msra.mxu1 %v3053_v8  ;;  %v3133_v4 = vld [vmem:[%s3702_s8 + $0xf0] ss:$12 sps:$4 sm:$0xff]   ;;  %v3135_v6 = vld [vmem:[%s3702_s8 + $0x10c] ss:$12 sps:$4 sm:$0xff]   ;;  %v3138_v8 = vld [vmem:[%s3702_s8 + $0x108] ss:$12 sps:$4 sm:$0xff]  }
  0xa1   : > { %1513 = vmatprep.subr.bf16.mxu0 %v3369_v2  ;;  %2978 = vmatprep.subr.bf16.mxu1 %v3369_v2  ;;  %v3137_v7 = vld [vmem:[%s3702_s8 + $0x98] ss:$12 sps:$4 sm:$0xff]   ;;  %v3139_v9 = vld [vmem:[%s3702_s8 + $0xb0] ss:$12 sps:$4 sm:$0xff]  }
  0xa4   : > { %1514 = vmatpush1.bf16.msra.mxu0 %v3054_v10  ;;  %2994 = vmatpush1.bf16.msra.mxu1 %v3054_v10  ;;  %v3140_v10 = vld [vmem:[%s3702_s8 + $0x124] ss:$12 sps:$4 sm:$0xff]  }
  0xa5   : > { %1515 = vmatprep.subr.bf16.mxu0 %v3369_v2  ;;  %2979 = vmatprep.subr.bf16.mxu1 %v3369_v2 }
  0xa8   : > { %1516 = vmatpush1.bf16.msra.mxu0 %v3055_v11  ;;  %2995 = vmatpush1.bf16.msra.mxu1 %v3055_v11  ;;  %v3142_v11 = vld [vmem:[%s3702_s8 + $0xc8] ss:$12 sps:$4 sm:$0xff]  }
  0xa9   : > { %1517 = vmatprep.subr.bf16.mxu0 %v3369_v2  ;;  %2980 = vmatprep.subr.bf16.mxu1 %v3369_v2 }
  0xac   : > { %1518 = vmatpush1.bf16.msra.mxu0 %v3056_v12  ;;  %2996 = vmatpush1.bf16.msra.mxu1 %v3056_v12  ;;  %v3143_v12 = vld [vmem:[%s3702_s8 + $0x120] ss:$12 sps:$4 sm:$0xff]  }
  0xad   : > { %1519 = vmatprep.subr.bf16.mxu0 %v3369_v2  ;;  %2981 = vmatprep.subr.bf16.mxu1 %v3369_v2 }
  0xb0   : > { %1520 = vmatpush1.bf16.msra.mxu0 %v3057_v13  ;;  %2997 = vmatpush1.bf16.msra.mxu1 %v3057_v13  ;;  %v3144_v13 = vld [vmem:[%s3702_s8 + $0xe0] ss:$12 sps:$4 sm:$0xff]  }
  0xb1   : > { %1521 = vmatprep.subr.bf16.mxu0 %v3369_v2  ;;  %2982 = vmatprep.subr.bf16.mxu1 %v3369_v2 }
  0xb4   : > { %1522 = vmatpush1.bf16.msra.mxu0 %v3058_v14  ;;  %2998 = vmatpush1.bf16.msra.mxu1 %v3058_v14  ;;  %v3145_v14 = vld [vmem:[%s3702_s8 + $0x13c] ss:$12 sps:$4 sm:$0xff]  }
  0xb5   : > { %1523 = vmatprep.subr.bf16.mxu0 %v3369_v2  ;;  %2983 = vmatprep.subr.bf16.mxu1 %v3369_v2 }
  0xb8   : > { %1524 = vmatpush1.bf16.msra.mxu0 %v3059_v15  ;;  %2999 = vmatpush1.bf16.msra.mxu1 %v3059_v15  ;;  %v3147_v15 = vld [vmem:[%s3702_s8 + $0xf8] ss:$12 sps:$4 sm:$0xff]  }
  0xb9   : > { %1525 = vmatprep.subr.bf16.mxu0 %v3369_v2  ;;  %2984 = vmatprep.subr.bf16.mxu1 %v3369_v2 }
  0xbc   : > { %1526 = vmatpush1.bf16.msra.mxu0 %v3060_v16  ;;  %3000 = vmatpush1.bf16.msra.mxu1 %v3060_v16  ;;  %v3148_v16 = vld [vmem:[%s3702_s8 + $0x138] ss:$12 sps:$4 sm:$0xff]  }
  0xbd   : > { %1527 = vmatprep.subr.bf16.mxu0 %v3369_v2  ;;  %2985 = vmatprep.subr.bf16.mxu1 %v3369_v2 }
  0xc0   : > { %1528 = vmatpush1.bf16.msra.mxu0 %v3061_v17  ;;  %3001 = vmatpush1.bf16.msra.mxu1 %v3061_v17  ;;  %v3149_v17 = vld [vmem:[%s3702_s8 + $0x110] ss:$12 sps:$4 sm:$0xff]  }
  0xc1   : > { %1529 = vmatprep.subr.bf16.mxu0 %v3369_v2  ;;  %2986 = vmatprep.subr.bf16.mxu1 %v3369_v2 }
  0xc4   : > { %1530 = vmatpush1.bf16.msra.mxu0 %v3062_v18  ;;  %3002 = vmatpush1.bf16.msra.mxu1 %v3062_v18  ;;  %v3150_v18 = vld [vmem:[%s3702_s8 + $0x154] ss:$12 sps:$4 sm:$0xff]  }
  0xc5   : > { %1531 = vmatprep.subr.bf16.mxu0 %v3369_v2  ;;  %2987 = vmatprep.subr.bf16.mxu1 %v3369_v2  ;;  %v3130_v2 = vld [vmem:[%s3702_s8 + $0xf4] ss:$12 sps:$4 sm:$0xff]  }
  0xc8   : > { %1532 = vmatpush1.bf16.msra.mxu0 %v3063_v19  ;;  %3003 = vmatpush1.bf16.msra.mxu1 %v3063_v19  ;;  %v3152_v19 = vld [vmem:[%s3702_s8 + $0x128] ss:$12 sps:$4 sm:$0xff]  }
  0xc9   : > { %2892 = vmatprep.subr.bf16.mxu1 %v3070_v20 }
  0xcb   : > { %1534 = vmatmul.mubr.bf16.vlgmr.msra.gmra.mrb[0].mxu0 %v3064_v21  ;;  %1726 = vmatmul.mubr.bf16.vlgmr.msra.gmra.mrb[0].mxu1 %v3067_v22  ;;  %v3154_v21 = vld [vmem:[%s3702_s8 + $0x140] ss:$12 sps:$4 sm:$0xff]  }
  0xcc   : > { %2893 = vmatpush3.bf16.msra.mxu1 %v3070_v20  ;;  %1541 = vmatprep.mubr.bf16.mxu0 %v3071_v23  ;;  %v3153_v20 = vld [vmem:[%s3702_s8 + $0x150] ss:$12 sps:$4 sm:$0xff]   ;;  %v3155_v22 = vld [vmem:[%s3702_s8 + $0x16c] ss:$12 sps:$4 sm:$0xff]  }
  0xcd   : > { %1733 = vmatprep.mubr.bf16.mxu1 %v3073_v24  ;;  %2894 = vmatprep.subr.bf16.mxu1 %v3077_v25  ;;  %v3157_v23 = vld [vmem:[%s3702_s8 + $0x158] ss:$12 sps:$4 sm:$0xff]   ;;  %v3158_v24 = vld [vmem:[%s3702_s8 + $0x168] ss:$12 sps:$4 sm:$0xff]  }
  0xd0   : > { %2895 = vmatpush3.bf16.msra.mxu1 %v3077_v25  ;;  %v3159_v25 = vld [vmem:[%s3702_s8 + $0x170] ss:$12 sps:$4 sm:$0xff]  }
  0xd1   : > { %2896 = vmatprep.subr.bf16.mxu1 %v3084_v26 }
  0xd3   : > { %1542 = vmatmul.mubr.bf16.gmra.mrb[4].mxu0 %v3075_v27  ;;  %1734 = vmatmul.mubr.bf16.gmra.mrb[4].mxu1 %v3076_v28  ;;  %v3162_v27 = vld [vmem:[%s3702_s8 + $0x188] ss:$12 sps:$4 sm:$0xff]   ;;  %v3163_v28 = vld [vmem:[%s3702_s8 + $0x180] ss:$12 sps:$4 sm:$0xff]  }
  0xd4   : > { %1549 = vmatprep.mubr.bf16.mxu0 %v3078_v29  ;;  %1741 = vmatprep.mubr.bf16.mxu1 %v3080_v30  ;;  %v3164_v29 = vld [vmem:[%s3702_s8 + $0x1a0] ss:$12 sps:$4 sm:$0xff]   ;;  %v3165_v30 = vld [vmem:[%s3702_s8 + $0x19c] ss:$12 sps:$4 sm:$0xff]  }
  0xd5   : > { %2897 = vmatpush3.bf16.msra.mxu1 %v3084_v26  ;;  %v3160_v26 = vld [vmem:[%s3702_s8 + $0x184] ss:$12 sps:$4 sm:$0xff]  }
  0xd6   : > { %2898 = vmatprep.subr.bf16.mxu1 %v3091_v31 }
  0xd9   : > { %2899 = vmatpush3.bf16.msra.mxu1 %v3091_v31  ;;  %v3167_v31 = vld [vmem:[%s3702_s8 + $0x1b8] ss:$12 sps:$4 sm:$0xff]  }
  0xda   : > { %2900 = vmatprep.subr.bf16.mxu1 %v3098_v33 }
  0xdb   : > { %1550 = vmatmul.mubr.bf16.gmra.mrb[8].mxu0 %v3082_v32  ;;  %1742 = vmatmul.mubr.bf16.gmra.mrb[8].mxu1 %v3083_v34  ;;  %v3168_v32 = vld [vmem:[%s3702_s8 + $0x198] ss:$12 sps:$4 sm:$0xff]   ;;  %v3170_v34 = vld [vmem:[%s3702_s8 + $0x1b4] ss:$12 sps:$4 sm:$0xff]  }
  0xdc   : > { %1557 = vmatprep.mubr.bf16.mxu0 %v3085_v35  ;;  %1749 = vmatprep.mubr.bf16.mxu1 %v3087_v36  ;;  %v3172_v35 = vld [vmem:[%s3702_s8 + $0x1e8] ss:$12 sps:$4 sm:$0xff]   ;;  %v3173_v36 = vld [vmem:[%s3702_s8 + $0x1b0] ss:$12 sps:$4 sm:$0xff]  }
  0xdd   : > { %2901 = vmatpush3.bf16.msra.mxu1 %v3098_v33  ;;  %v3169_v33 = vld [vmem:[%s3702_s8 + $0x1d0] ss:$12 sps:$4 sm:$0xff]  }
  0xde   : > { %2902 = vmatprep.subr.bf16.mxu1 %v3105_v37 }
  0xe1   : > { %2903 = vmatpush3.bf16.msra.mxu1 %v3105_v37  ;;  %v3174_v37 = vld [vmem:[%s3702_s8 + $0x200] ss:$12 sps:$4 sm:$0xff]  }
  0xe2   : > { %2904 = vmatprep.subr.bf16.mxu1 %v3112_v42 }
  0xe3   : > { %1558 = vmatmul.mubr.bf16.gmra.mrb[12].mxu0 %v3089_v38  ;;  %1750 = vmatmul.mubr.bf16.gmra.mrb[12].mxu1 %v3090_v39  ;;  %v3175_v38 = vld [vmem:[%s3702_s8 + $0x1cc] ss:$12 sps:$4 sm:$0xff]  }
  0xe4   : > { %1565 = vmatprep.mubr.bf16.mxu0 %v3092_v40  ;;  %1757 = vmatprep.mubr.bf16.mxu1 %v3094_v41  ;;  %v3177_v39 = vld [vmem:[%s3702_s8 + $0x218] ss:$12 sps:$4 sm:$0xff]   ;;  %v3178_v40 = vld [vmem:[%s3702_s8 + $0x1c8] ss:$12 sps:$4 sm:$0xff]   ;;  %v3179_v41 = vld [vmem:[%s3702_s8 + $0x230] ss:$12 sps:$4 sm:$0xff]  }
  0xe5   : > { %2905 = vmatpush3.bf16.msra.mxu1 %v3112_v42  ;;  %v3180_v42 = vld [vmem:[%s3702_s8 + $0x1e4] ss:$12 sps:$4 sm:$0xff]  }
  0xe6   : > { %2906 = vmatprep.subr.bf16.mxu1 %v3119_v43 }
  0xe9   : > { %2907 = vmatpush3.bf16.msra.mxu1 %v3119_v43  ;;  %v3182_v43 = vld [vmem:[%s3702_s8 + $0x248] ss:$12 sps:$4 sm:$0xff]  }
  0xeb   : > { %1566 = vmatmul.mubr.bf16.gmra.mrb[16].mxu0 %v3096_v44  ;;  %1758 = vmatmul.mubr.bf16.gmra.mrb[16].mxu1 %v3097_v45  ;;  %v3183_v44 = vld [vmem:[%s3702_s8 + $0x1e0] ss:$12 sps:$4 sm:$0xff]  }
  0xec   : > { %1573 = vmatprep.mubr.bf16.mxu0 %v3099_v46  ;;  %1765 = vmatprep.mubr.bf16.mxu1 %v3101_v47  ;;  %v3184_v45 = vld [vmem:[%s3702_s8 + $0x260] ss:$12 sps:$4 sm:$0xff]   ;;  %v3185_v46 = vld [vmem:[%s3702_s8 + $0x1fc] ss:$12 sps:$4 sm:$0xff]   ;;  %v3187_v47 = vld [vmem:[%s3702_s8 + $0x278] ss:$12 sps:$4 sm:$0xff]  }
  0xf3   : > { %1574 = vmatmul.mubr.bf16.gmra.mrb[20].mxu0 %v3103_v48  ;;  %1766 = vmatmul.mubr.bf16.gmra.mrb[20].mxu1 %v3104_v49  ;;  %v3188_v48 = vld [vmem:[%s3702_s8 + $0x1f8] ss:$12 sps:$4 sm:$0xff]   ;;  %v3189_v49 = vld [vmem:[%s3702_s8 + $0x290] ss:$12 sps:$4 sm:$0xff]  }
  0xf4   : > { %1581 = vmatprep.mubr.bf16.mxu0 %v3106_v50  ;;  %1773 = vmatprep.mubr.bf16.mxu1 %v3108_v51  ;;  %v3190_v50 = vld [vmem:[%s3702_s8 + $0x214] ss:$12 sps:$4 sm:$0xff]  }
  0xf5   : > { %v3192_v51 = vld [vmem:[%s3702_s8 + $0x2a8] ss:$12 sps:$4 sm:$0xff]  }
  0xfb   : > { %1582 = vmatmul.mubr.bf16.gmra.mrb[24].mxu0 %v3110_v52  ;;  %1774 = vmatmul.mubr.bf16.gmra.mrb[24].mxu1 %v3111_v53  ;;  %v3193_v52 = vld [vmem:[%s3702_s8 + $0x210] ss:$12 sps:$4 sm:$0xff]   ;;  %v3194_v53 = vld [vmem:[%s3702_s8 + $0x2c0] ss:$12 sps:$4 sm:$0xff]  }
  0xfc   : > { %1589 = vmatprep.mubr.bf16.mxu0 %v3113_v54  ;;  %1781 = vmatprep.mubr.bf16.mxu1 %v3115_v55  ;;  %v3195_v54 = vld [vmem:[%s3702_s8 + $0x22c] ss:$12 sps:$4 sm:$0xff]  }
  0xfd   : > { %v3197_v55 = vld [vmem:[%s3702_s8 + $0x2d8] ss:$12 sps:$4 sm:$0xff]  }
 0x103   : > { %1590 = vmatmul.mubr.bf16.gmra.mrb[28].mxu0 %v3117_v56  ;;  %1782 = vmatmul.mubr.bf16.gmra.mrb[28].mxu1 %v3118_v57  ;;  %v3198_v56 = vld [vmem:[%s3702_s8 + $0x228] ss:$12 sps:$4 sm:$0xff]   ;;  %v3199_v57 = vld [vmem:[%s3702_s8 + $0x2f0] ss:$12 sps:$4 sm:$0xff]  }
 0x104   : > { %1597 = vmatprep.mubr.bf16.mxu0 %v3120_v58  ;;  %2908 = vmatprep.mubr.bf16.mxu1 %v3122_v59 }
 0x10b   : > { %1598 = vmatmul.mubr.bf16.gmra.mrb[32].mxu0 %v3123_v60  ;;  %2909 = vmatmul.mubr.bf16.vlgmr.msra.gmra.mrb[32].mxu1 %v3124_v61 }
 0x10c   : > { %1605 = vmatprep.mubr.bf16.mxu0 %v3125_v62  ;;  %2912 = vmatprep.mubr.bf16.mxu1 %v3127_v63 }
 0x113   : > { %1606 = vmatmul.mubr.bf16.gmra.mrb[36].mxu0 %v3128_v0  ;;  %2913 = vmatmul.mubr.bf16.gmra.mrb[36].mxu1 %v3129_v1 }
 0x114   : > { %1613 = vmatprep.mubr.bf16.mxu0 %v3130_v2  ;;  %2916 = vmatprep.mubr.bf16.mxu1 %v3132_v3 }
 0x11b   : > { %1614 = vmatmul.mubr.bf16.gmra.mrb[40].mxu0 %v3133_v4  ;;  %2917 = vmatmul.mubr.bf16.gmra.mrb[40].mxu1 %v3134_v5 }
 0x11c   : > { %1621 = vmatprep.mubr.bf16.mxu0 %v3135_v6  ;;  %2920 = vmatprep.mubr.bf16.mxu1 %v3137_v7 }
 0x123   : > { %1622 = vmatmul.mubr.bf16.gmra.mrb[44].mxu0 %v3138_v8  ;;  %2921 = vmatmul.mubr.bf16.gmra.mrb[44].mxu1 %v3139_v9 }
 0x124   : > { %1629 = vmatprep.mubr.bf16.mxu0 %v3140_v10  ;;  %2924 = vmatprep.mubr.bf16.mxu1 %v3142_v11 }
 0x12b   : > { %1630 = vmatmul.mubr.bf16.gmra.mrb[48].mxu0 %v3143_v12  ;;  %2925 = vmatmul.mubr.bf16.gmra.mrb[48].mxu1 %v3144_v13 }
 0x12c   : > { %1637 = vmatprep.mubr.bf16.mxu0 %v3145_v14  ;;  %2928 = vmatprep.mubr.bf16.mxu1 %v3147_v15 }
 0x133   : > { %1638 = vmatmul.mubr.bf16.gmra.mrb[52].mxu0 %v3148_v16  ;;  %2929 = vmatmul.mubr.bf16.gmra.mrb[52].mxu1 %v3149_v17 }
 0x134   : > { %1645 = vmatprep.mubr.bf16.mxu0 %v3150_v18  ;;  %2932 = vmatprep.mubr.bf16.mxu1 %v3152_v19 }
 0x13b   : > { %1646 = vmatmul.mubr.bf16.gmra.mrb[56].mxu0 %v3153_v20  ;;  %2933 = vmatmul.mubr.bf16.gmra.mrb[56].mxu1 %v3154_v21 }
 0x13c   : > { %1653 = vmatprep.mubr.bf16.mxu0 %v3155_v22  ;;  %2936 = vmatprep.mubr.bf16.mxu1 %v3157_v23 }
 0x143   : > { %1654 = vmatmul.mubr.bf16.gmra.mrb[60].mxu0 %v3158_v24  ;;  %2937 = vmatmul.mubr.bf16.gmra.mrb[60].mxu1 %v3159_v25 }
 0x144   : > { %1661 = vmatprep.mubr.bf16.mxu0 %v3160_v26  ;;  %2940 = vmatprep.mubr.bf16.mxu1 %v3162_v27 }
 0x14b   : > { %1662 = vmatmul.mubr.bf16.gmra.mrb[64].mxu0 %v3163_v28  ;;  %2941 = vmatmul.mubr.bf16.gmra.mrb[64].mxu1 %v3164_v29 }
 0x14c   : > { %1669 = vmatprep.mubr.bf16.mxu0 %v3165_v30  ;;  %2944 = vmatprep.mubr.bf16.mxu1 %v3167_v31 }
 0x153   : > { %1670 = vmatmul.mubr.bf16.gmra.mrb[68].mxu0 %v3168_v32  ;;  %2945 = vmatmul.mubr.bf16.gmra.mrb[68].mxu1 %v3169_v33 }
 0x154   : > { %1677 = vmatprep.mubr.bf16.mxu0 %v3170_v34  ;;  %2948 = vmatprep.mubr.bf16.mxu1 %v3172_v35 }
 0x15b   : > { %1678 = vmatmul.mubr.bf16.gmra.mrb[72].mxu0 %v3173_v36  ;;  %2949 = vmatmul.mubr.bf16.gmra.mrb[72].mxu1 %v3174_v37 }
 0x15c   : > { %1685 = vmatprep.mubr.bf16.mxu0 %v3175_v38  ;;  %2952 = vmatprep.mubr.bf16.mxu1 %v3177_v39 }
 0x163   : > { %1686 = vmatmul.mubr.bf16.gmra.mrb[76].mxu0 %v3178_v40  ;;  %2953 = vmatmul.mubr.bf16.gmra.mrb[76].mxu1 %v3179_v41 }
 0x164   : > { %1693 = vmatprep.mubr.bf16.mxu0 %v3180_v42  ;;  %2956 = vmatprep.mubr.bf16.mxu1 %v3182_v43 }
 0x16b   : > { %1694 = vmatmul.mubr.bf16.gmra.mrb[80].mxu0 %v3183_v44  ;;  %2957 = vmatmul.mubr.bf16.gmra.mrb[80].mxu1 %v3184_v45 }
 0x16c   : > { %1701 = vmatprep.mubr.bf16.mxu0 %v3185_v46  ;;  %2960 = vmatprep.mubr.bf16.mxu1 %v3187_v47 }
 0x173   : > { %1702 = vmatmul.mubr.bf16.gmra.mrb[84].mxu0 %v3188_v48  ;;  %2961 = vmatmul.mubr.bf16.gmra.mrb[84].mxu1 %v3189_v49 }
 0x174   : > { %1709 = vmatprep.mubr.bf16.mxu0 %v3190_v50  ;;  %2964 = vmatprep.mubr.bf16.mxu1 %v3192_v51 }
 0x17b   : > { %1710 = vmatmul.mubr.bf16.gmra.mrb[88].mxu0 %v3193_v52  ;;  %2965 = vmatmul.mubr.bf16.gmra.mrb[88].mxu1 %v3194_v53 }
 0x17c   : > { %1717 = vmatprep.mubr.bf16.mxu0 %v3195_v54  ;;  %2968 = vmatprep.mubr.bf16.mxu1 %v3197_v55 }
 0x183   : > { %1718 = vmatmul.mubr.bf16.gmra.mrb[92].mxu0 %v3198_v56  ;;  %2969 = vmatmul.mubr.bf16.gmra.mrb[92].mxu1 %v3199_v57 }
 0x19e   : > { %v3921_v58 = vpop.f32.mrb[0].mxu0  ;;  %v3923_v59 = vpop.f32.mrb[0].mxu1 }
 0x19f   : > { %v1537_v60 = vpop.f32.mrb[1].mxu0  ;;  %v1729_v61 = vpop.f32.mrb[1].mxu1 }
 0x1a0   : > { %v3925_v62 = vpop.f32.mrb[2].mxu0  ;;  %v3927_v63 = vpop.f32.mrb[2].mxu1  ;;  %v607_v61 = vld [vmem:[#allocation2 + $0x10] sm:$0xff] }
 0x1a1   : > { %v1540_v0 = vpop.f32.mrb[3].mxu0  ;;  %v1732_v1 = vpop.f32.mrb[3].mxu1 }
 0x1a6   : > { %v1543_v2 = vpop.f32.mrb[4].mxu0  ;;  %v3929_v3 = vpop.f32.mrb[4].mxu1 }
 0x1a7   : > { %v1545_v4 = vpop.f32.mrb[5].mxu0  ;;  %v1737_v5 = vpop.f32.mrb[5].mxu1 }
 0x1a8   : > { %v3931_v6 = vpop.f32.mrb[6].mxu0  ;;  %v3933_v7 = vpop.f32.mrb[6].mxu1  ;;  %v605_v5 = vld [vmem:[#allocation2] sm:$0xff] }
 0x1a9   : > { %v1548_v8 = vpop.f32.mrb[7].mxu0  ;;  %v1740_v9 = vpop.f32.mrb[7].mxu1 }
 0x1ae   : > { %v3935_v10 = vpop.f32.mrb[8].mxu0  ;;  %v3937_v11 = vpop.f32.mrb[8].mxu1 }
 0x1af   : > { %v1553_v12 = vpop.f32.mrb[9].mxu0  ;;  %v1745_v13 = vpop.f32.mrb[9].mxu1 }
 0x1b0   : > { %v3939_v14 = vpop.f32.mrb[10].mxu0  ;;  %v3941_v15 = vpop.f32.mrb[10].mxu1  ;;  %v608_v13 = vld [vmem:[#allocation2 + $0x18] sm:$0xff] }
 0x1b1   : > { %v1556_v16 = vpop.f32.mrb[11].mxu0  ;;  %v1748_v17 = vpop.f32.mrb[11].mxu1 }
 0x1b6   : > { %v3943_v18 = vpop.f32.mrb[12].mxu0  ;;  %v3945_v19 = vpop.f32.mrb[12].mxu1 }
 0x1b7   : > { %v1561_v20 = vpop.f32.mrb[13].mxu0  ;;  %v1753_v21 = vpop.f32.mrb[13].mxu1 }
 0x1b8   : > { %v3947_v22 = vpop.f32.mrb[14].mxu0  ;;  %v3949_v23 = vpop.f32.mrb[14].mxu1 }
 0x1b9   : > { %v1564_v24 = vpop.f32.mrb[15].mxu0  ;;  %v1756_v25 = vpop.f32.mrb[15].mxu1 }
 0x1ba   : > { %v606_v24 = vld [vmem:[#allocation2 + $0x8] sm:$0xff] }
 0x1be   : > { %v3951_v26 = vpop.f32.mrb[16].mxu0  ;;  %v3953_v27 = vpop.f32.mrb[16].mxu1 }
 0x1bf   : > { %v1569_v28 = vpop.f32.mrb[17].mxu0  ;;  %v1761_v29 = vpop.f32.mrb[17].mxu1 }
 0x1c0   : > { %v3955_v30 = vpop.f32.mrb[18].mxu0  ;;  %v3957_v31 = vpop.f32.mrb[18].mxu1 }
 0x1c1   : > { %v1572_v32 = vpop.f32.mrb[19].mxu0  ;;  %v1764_v33 = vpop.f32.mrb[19].mxu1 }
 0x1c2   : > { %v611_v33 = vld [vmem:[#allocation2 + $0x30] sm:$0xff] }
 0x1c6   : > { %v3959_v34 = vpop.f32.mrb[20].mxu0  ;;  %v3961_v35 = vpop.f32.mrb[20].mxu1 }
 0x1c7   : > { %v1577_v36 = vpop.f32.mrb[21].mxu0  ;;  %v1769_v37 = vpop.f32.mrb[21].mxu1 }
 0x1c8   : > { %v3963_v38 = vpop.f32.mrb[22].mxu0  ;;  %v3965_v39 = vpop.f32.mrb[22].mxu1 }
 0x1c9   : > { %v1580_v40 = vpop.f32.mrb[23].mxu0  ;;  %v1772_v41 = vpop.f32.mrb[23].mxu1 }
 0x1ce   : > { %v3967_v42 = vpop.f32.mrb[24].mxu0  ;;  %v3969_v43 = vpop.f32.mrb[24].mxu1 }
 0x1cf   : > { %v1585_v44 = vpop.f32.mrb[25].mxu0  ;;  %v1777_v45 = vpop.f32.mrb[25].mxu1 }
 0x1d0   : > { %v3971_v46 = vpop.f32.mrb[26].mxu0  ;;  %v3973_v47 = vpop.f32.mrb[26].mxu1 }
 0x1d1   : > { %v1588_v48 = vpop.f32.mrb[27].mxu0  ;;  %v1780_v49 = vpop.f32.mrb[27].mxu1 }
 0x1d6   : > { %v3975_v50 = vpop.f32.mrb[28].mxu0  ;;  %v3977_v51 = vpop.f32.mrb[28].mxu1 }
 0x1d7   : > { %v1593_v52 = vpop.f32.mrb[29].mxu0  ;;  %v1785_v53 = vpop.f32.mrb[29].mxu1 }
 0x1d8   : > { %v3979_v54 = vpop.f32.mrb[30].mxu0  ;;  %v3981_v55 = vpop.f32.mrb[30].mxu1 }
 0x1d9   : > { %v1596_v56 = vpop.f32.mrb[31].mxu0  ;;  %v1788_v57 = vpop.f32.mrb[31].mxu1 }
 0x1da   : > { %v610_v56 = vld [vmem:[#allocation2 + $0x28] sm:$0xff] }
 0x1de   : > { %v3983_v60 = vpop.f32.mrb[32].mxu0  ;;  %v2910_v0 = vpop.f32.mrb[32].mxu1 }
 0x1df   : > { %v1833_v1 = vadd.f32 %v2910_v0, %v1543_v2  ;;  %v1601_v4 = vpop.f32.mrb[33].mxu0  ;;  %v1824_v8 = vpop.f32.mrb[33].mxu1 }
 0x1e0   : > { %v1825_v9 = vadd.f32 %v1824_v8, %v3921_v58  ;;  %v3986_v12 = vpop.f32.mrb[34].mxu0  ;;  %v2911_v16 = vpop.f32.mrb[34].mxu1  ;;  %v615_v4 = vld [vmem:[#allocation2 + $0x50] sm:$0xff] }
 0x1e1   : > { %v2081_v17 = vadd.f32 %v1833_v1, %v607_v61  ;;  %v1836_v20 = vadd.f32 %v2911_v16, %v3931_v6  ;;  %v1604_v21 = vpop.f32.mrb[35].mxu0  ;;  %v1827_v25 = vpop.f32.mrb[35].mxu1  ;;  %v609_v6 = vld [vmem:[#allocation2 + $0x20] sm:$0xff] }
 0x1e2   : > { %v2079_v28 = vadd.f32 %v1825_v9, %v605_v5  ;;  %v1828_v29 = vadd.f32 %v1827_v25, %v3925_v62  ;;  %v612_v62 = vld [vmem:[#allocation2 + $0x38] sm:$0xff] }
 0x1e3   : > { %2145 = vst [vmem:[#allocation2 + $0x10] sm:$0xff] %v2081_v17  ;;  %v2082_v2 = vadd.f32 %v1836_v20, %v608_v13 }
 0x1e4   : > { %2143 = vst [vmem:[#allocation2] sm:$0xff] %v2079_v28  ;;  %v2080_v32 = vadd.f32 %v1828_v29, %v606_v24  ;;  %v614_v28 = vld [vmem:[#allocation2 + $0x48] sm:$0xff] }
 0x1e5   : > { %2146 = vst [vmem:[#allocation2 + $0x18] sm:$0xff] %v2082_v2 }
 0x1e6   : > { %2144 = vst [vmem:[#allocation2 + $0x8] sm:$0xff] %v2080_v32  ;;  %v3990_v58 = vpop.f32.mrb[36].mxu0  ;;  %v2914_v36 = vpop.f32.mrb[36].mxu1 }
 0x1e7   : > { %v1849_v37 = vadd.f32 %v2914_v36, %v3943_v18  ;;  %v1609_v40 = vpop.f32.mrb[37].mxu0  ;;  %v1840_v41 = vpop.f32.mrb[37].mxu1  ;;  %v619_v36 = vld [vmem:[#allocation2 + $0x70] sm:$0xff] }
 0x1e8   : > { %v1841_v44 = vadd.f32 %v1840_v41, %v3935_v10  ;;  %v3994_v45 = vpop.f32.mrb[38].mxu0  ;;  %v2915_v48 = vpop.f32.mrb[38].mxu1  ;;  %v617_v41 = vld [vmem:[#allocation2 + $0x60] sm:$0xff] }
 0x1e9   : > { %v2085_v49 = vadd.f32 %v1849_v37, %v611_v33  ;;  %v1852_v52 = vadd.f32 %v2915_v48, %v3947_v22  ;;  %v1612_v53 = vpop.f32.mrb[39].mxu0  ;;  %v1843_v57 = vpop.f32.mrb[39].mxu1  ;;  %v613_v22 = vld [vmem:[#allocation2 + $0x40] sm:$0xff]  ;;  %v620_v48 = vld [vmem:[#allocation2 + $0x78] sm:$0xff] }
 0x1ea   : > { %v2083_v61 = vadd.f32 %v1841_v44, %v609_v6  ;;  %v1844_v0 = vadd.f32 %v1843_v57, %v3939_v14  ;;  %v616_v14 = vld [vmem:[#allocation2 + $0x58] sm:$0xff] }
 0x1eb   : > { %2149 = vst [vmem:[#allocation2 + $0x30] sm:$0xff] %v2085_v49  ;;  %v2086_v18 = vadd.f32 %v1852_v52, %v612_v62 }
 0x1ec   : > { %2147 = vst [vmem:[#allocation2 + $0x20] sm:$0xff] %v2083_v61  ;;  %v2084_v1 = vadd.f32 %v1844_v0, %v610_v56  ;;  %v618_v56 = vld [vmem:[#allocation2 + $0x68] sm:$0xff] }
 0x1ed   : > { %2150 = vst [vmem:[#allocation2 + $0x38] sm:$0xff] %v2086_v18 }
 0x1ee   : > { %2148 = vst [vmem:[#allocation2 + $0x28] sm:$0xff] %v2084_v1  ;;  %v3998_v10 = vpop.f32.mrb[40].mxu0  ;;  %v2918_v5 = vpop.f32.mrb[40].mxu1 }
 0x1ef   : > { %v1865_v8 = vadd.f32 %v2918_v5, %v3959_v34  ;;  %v1617_v9 = vpop.f32.mrb[41].mxu0  ;;  %v1856_v13 = vpop.f32.mrb[41].mxu1 }
 0x1f0   : > { %v1857_v16 = vadd.f32 %v1856_v13, %v3951_v26  ;;  %v4002_v17 = vpop.f32.mrb[42].mxu0  ;;  %v2919_v20 = vpop.f32.mrb[42].mxu1  ;;  %v621_v9 = vld [vmem:[#allocation2 + $0x80] sm:$0xff] }
 0x1f1   : > { %v2089_v21 = vadd.f32 %v1865_v8, %v615_v4  ;;  %v1868_v24 = vadd.f32 %v2919_v20, %v3963_v38  ;;  %v1620_v25 = vpop.f32.mrb[43].mxu0  ;;  %v1859_v29 = vpop.f32.mrb[43].mxu1 }
 0x1f2   : > { %v2087_v2 = vadd.f32 %v1857_v16, %v613_v22  ;;  %v1860_v32 = vadd.f32 %v1859_v29, %v3955_v30  ;;  %v624_v16 = vld [vmem:[#allocation2 + $0x98] sm:$0xff] }
 0x1f3   : > { %2153 = vst [vmem:[#allocation2 + $0x50] sm:$0xff] %v2089_v21  ;;  %v2090_v34 = vadd.f32 %v1868_v24, %v616_v14  ;;  %v622_v24 = vld [vmem:[#allocation2 + $0x88] sm:$0xff] }
 0x1f4   : > { %2151 = vst [vmem:[#allocation2 + $0x40] sm:$0xff] %v2087_v2  ;;  %v2088_v33 = vadd.f32 %v1860_v32, %v614_v28 }
 0x1f5   : > { %2154 = vst [vmem:[#allocation2 + $0x58] sm:$0xff] %v2090_v34 }
 0x1f6   : > { %2152 = vst [vmem:[#allocation2 + $0x48] sm:$0xff] %v2088_v33  ;;  %v1623_v26 = vpop.f32.mrb[44].mxu0  ;;  %v2922_v37 = vpop.f32.mrb[44].mxu1 }
 0x1f7   : > { %v1881_v40 = vadd.f32 %v2922_v37, %v3975_v50  ;;  %v1625_v6 = vpop.f32.mrb[45].mxu0  ;;  %v1872_v38 = vpop.f32.mrb[45].mxu1  ;;  %v625_v37 = vld [vmem:[#allocation2 + $0xa0] sm:$0xff] }
 0x1f8   : > { %v1873_v44 = vadd.f32 %v1872_v38, %v3967_v42  ;;  %v1626_v62 = vpop.f32.mrb[46].mxu0  ;;  %v2923_v49 = vpop.f32.mrb[46].mxu1  ;;  %v623_v42 = vld [vmem:[#allocation2 + $0x90] sm:$0xff] }
 0x1f9   : > { %v2093_v30 = vadd.f32 %v1881_v40, %v619_v36  ;;  %v1884_v52 = vadd.f32 %v2923_v49, %v3979_v54  ;;  %v1628_v53 = vpop.f32.mrb[47].mxu0  ;;  %v1875_v57 = vpop.f32.mrb[47].mxu1  ;;  %v626_v49 = vld [vmem:[#allocation2 + $0xa8] sm:$0xff] }
 0x1fa   : > { %v2091_v61 = vadd.f32 %v1873_v44, %v617_v41  ;;  %v1876_v0 = vadd.f32 %v1875_v57, %v3971_v46  ;;  %v628_v41 = vld [vmem:[#allocation2 + $0xb8] sm:$0xff] }
 0x1fb   : > { %2157 = vst [vmem:[#allocation2 + $0x70] sm:$0xff] %v2093_v30  ;;  %v2094_v18 = vadd.f32 %v1884_v52, %v620_v48 }
 0x1fc   : > { %2155 = vst [vmem:[#allocation2 + $0x60] sm:$0xff] %v2091_v61  ;;  %v2092_v50 = vadd.f32 %v1876_v0, %v618_v56  ;;  %v631_v61 = vld [vmem:[#allocation2 + $0xd0] sm:$0xff] }
 0x1fd   : > { %2158 = vst [vmem:[#allocation2 + $0x78] sm:$0xff] %v2094_v18 }
 0x1fe   : > { %2156 = vst [vmem:[#allocation2 + $0x68] sm:$0xff] %v2092_v50  ;;  %v1631_v1 = vpop.f32.mrb[48].mxu0  ;;  %v2926_v4 = vpop.f32.mrb[48].mxu1  ;;  %v629_v50 = vld [vmem:[#allocation2 + $0xc0] sm:$0xff] }
 0x1ff   : > { %v1897_v5 = vadd.f32 %v2926_v4, %v3990_v58  ;;  %v1633_v8 = vpop.f32.mrb[49].mxu0  ;;  %v1888_v54 = vpop.f32.mrb[49].mxu1 }
 0x200   : > { %v1889_v22 = vadd.f32 %v1888_v54, %v3983_v60  ;;  %v1634_v13 = vpop.f32.mrb[50].mxu0  ;;  %v2927_v14 = vpop.f32.mrb[50].mxu1  ;;  %v627_v60 = vld [vmem:[#allocation2 + $0xb0] sm:$0xff] }
 0x201   : > { %v2097_v46 = vadd.f32 %v1897_v5, %v623_v42  ;;  %v1900_v20 = vadd.f32 %v2927_v14, %v3994_v45  ;;  %v1636_v21 = vpop.f32.mrb[51].mxu0  ;;  %v1891_v25 = vpop.f32.mrb[51].mxu1  ;;  %v632_v5 = vld [vmem:[#allocation2 + $0xd8] sm:$0xff] }
 0x202   : > { %v2095_v28 = vadd.f32 %v1889_v22, %v621_v9  ;;  %v1892_v29 = vadd.f32 %v1891_v25, %v3986_v12  ;;  %v630_v22 = vld [vmem:[#allocation2 + $0xc8] sm:$0xff]  ;;  %v635_v25 = vld [vmem:[#allocation2 + $0xf0] sm:$0xff] }
 0x203   : > { %2161 = vst [vmem:[#allocation2 + $0x90] sm:$0xff] %v2097_v46  ;;  %v2098_v2 = vadd.f32 %v1900_v20, %v624_v16 }
 0x204   : > { %2159 = vst [vmem:[#allocation2 + $0x80] sm:$0xff] %v2095_v28  ;;  %v2096_v58 = vadd.f32 %v1892_v29, %v622_v24 }
 0x205   : > { %2162 = vst [vmem:[#allocation2 + $0x98] sm:$0xff] %v2098_v2  ;;  %v633_v2 = vld [vmem:[#allocation2 + $0xe0] sm:$0xff] }
 0x206   : > { %2160 = vst [vmem:[#allocation2 + $0x88] sm:$0xff] %v2096_v58  ;;  %v1639_v32 = vpop.f32.mrb[52].mxu0  ;;  %v2930_v34 = vpop.f32.mrb[52].mxu1 }
 0x207   : > { %v1913_v33 = vadd.f32 %v2930_v34, %v1623_v26  ;;  %v1641_v36 = vpop.f32.mrb[53].mxu0  ;;  %v1904_v40 = vpop.f32.mrb[53].mxu1  ;;  %v636_v34 = vld [vmem:[#allocation2 + $0xf8] sm:$0xff] }
 0x208   : > { %v1905_v45 = vadd.f32 %v1904_v40, %v3998_v10  ;;  %v1642_v6 = vpop.f32.mrb[54].mxu0  ;;  %v2931_v38 = vpop.f32.mrb[54].mxu1  ;;  %v634_v40 = vld [vmem:[#allocation2 + $0xe8] sm:$0xff] }
 0x209   : > { %v2101_v44 = vadd.f32 %v1913_v33, %v627_v60  ;;  %v1916_v12 = vadd.f32 %v2931_v38, %v1626_v62  ;;  %v1644_v48 = vpop.f32.mrb[55].mxu0  ;;  %v1907_v30 = vpop.f32.mrb[55].mxu1 }
 0x20a   : > { %v2099_v52 = vadd.f32 %v1905_v45, %v625_v37  ;;  %v1908_v53 = vadd.f32 %v1907_v30, %v4002_v17  ;;  %v637_v30 = vld [vmem:[#allocation2 + $0x100] sm:$0xff] }
 0x20b   : > { %2165 = vst [vmem:[#allocation2 + $0xb0] sm:$0xff] %v2101_v44  ;;  %v2102_v56 = vadd.f32 %v1916_v12, %v628_v41 }
 0x20c   : > { %2163 = vst [vmem:[#allocation2 + $0xa0] sm:$0xff] %v2099_v52  ;;  %v2100_v26 = vadd.f32 %v1908_v53, %v626_v49 }
 0x20d   : > { %2166 = vst [vmem:[#allocation2 + $0xb8] sm:$0xff] %v2102_v56 }
 0x20e   : > { %2164 = vst [vmem:[#allocation2 + $0xa8] sm:$0xff] %v2100_v26  ;;  %v1647_v57 = vpop.f32.mrb[56].mxu0  ;;  %v2934_v10 = vpop.f32.mrb[56].mxu1 }
 0x20f   : > { %v1929_v0 = vadd.f32 %v2934_v10, %v1639_v32  ;;  %v1649_v18 = vpop.f32.mrb[57].mxu0  ;;  %v1920_v42 = vpop.f32.mrb[57].mxu1 }
 0x210   : > { %v1921_v62 = vadd.f32 %v1920_v42, %v1631_v1  ;;  %v1650_v4 = vpop.f32.mrb[58].mxu0  ;;  %v2935_v8 = vpop.f32.mrb[58].mxu1  ;;  %v639_v42 = vld [vmem:[#allocation2 + $0x110] sm:$0xff] }
 0x211   : > { %v2105_v9 = vadd.f32 %v1929_v0, %v631_v61  ;;  %v1932_v54 = vadd.f32 %v2935_v8, %v1642_v6  ;;  %v1652_v17 = vpop.f32.mrb[59].mxu0  ;;  %v1923_v16 = vpop.f32.mrb[59].mxu1  ;;  %v638_v61 = vld [vmem:[#allocation2 + $0x108] sm:$0xff] }
 0x212   : > { %v2103_v14 = vadd.f32 %v1921_v62, %v629_v50  ;;  %v1924_v46 = vadd.f32 %v1923_v16, %v1634_v13 }
 0x213   : > { %2169 = vst [vmem:[#allocation2 + $0xd0] sm:$0xff] %v2105_v9  ;;  %v2106_v20 = vadd.f32 %v1932_v54, %v632_v5  ;;  %v640_v54 = vld [vmem:[#allocation2 + $0x118] sm:$0xff] }
 0x214   : > { %2167 = vst [vmem:[#allocation2 + $0xc0] sm:$0xff] %v2103_v14  ;;  %v2104_v21 = vadd.f32 %v1924_v46, %v630_v22 }
 0x215   : > { %2170 = vst [vmem:[#allocation2 + $0xd8] sm:$0xff] %v2106_v20 }
 0x216   : > { %2168 = vst [vmem:[#allocation2 + $0xc8] sm:$0xff] %v2104_v21  ;;  %v1655_v24 = vpop.f32.mrb[60].mxu0  ;;  %v2938_v28 = vpop.f32.mrb[60].mxu1 }
 0x217   : > { %v1945_v1 = vadd.f32 %v2938_v28, %v1655_v24  ;;  %v1657_v29 = vpop.f32.mrb[61].mxu0  ;;  %v1936_v58 = vpop.f32.mrb[61].mxu1  ;;  %v641_v24 = vld [vmem:[#allocation2 + $0x120] sm:$0xff] }
 0x218   : > { %v1937_v32 = vadd.f32 %v1936_v58, %v1647_v57  ;;  %v1658_v60 = vpop.f32.mrb[62].mxu0  ;;  %v2939_v33 = vpop.f32.mrb[62].mxu1  ;;  %v642_v58 = vld [vmem:[#allocation2 + $0x128] sm:$0xff] }
 0x219   : > { %v2109_v36 = vadd.f32 %v1945_v1, %v635_v25  ;;  %v1948_v37 = vadd.f32 %v2939_v33, %v1658_v60  ;;  %v1660_v13 = vpop.f32.mrb[63].mxu0  ;;  %v1939_v45 = vpop.f32.mrb[63].mxu1 }
 0x21a   : > { %v2107_v6 = vadd.f32 %v1937_v32, %v633_v2  ;;  %v1940_v41 = vadd.f32 %v1939_v45, %v1650_v4 }
 0x21b   : > { %2173 = vst [vmem:[#allocation2 + $0xf0] sm:$0xff] %v2109_v36  ;;  %v2110_v38 = vadd.f32 %v1948_v37, %v636_v34 }
 0x21c   : > { %2171 = vst [vmem:[#allocation2 + $0xe0] sm:$0xff] %v2107_v6  ;;  %v2108_v44 = vadd.f32 %v1940_v41, %v634_v40  ;;  %v643_v40 = vld [vmem:[#allocation2 + $0x130] sm:$0xff] }
 0x21d   : > { %2174 = vst [vmem:[#allocation2 + $0xf8] sm:$0xff] %v2110_v38 }
 0x21e   : > { %2172 = vst [vmem:[#allocation2 + $0xe8] sm:$0xff] %v2108_v44  ;;  %v1663_v12 = vpop.f32.mrb[64].mxu0  ;;  %v2942_v48 = vpop.f32.mrb[64].mxu1 }
 0x21f   : > { %v1665_v49 = vpop.f32.mrb[65].mxu0  ;;  %v1952_v52 = vpop.f32.mrb[65].mxu1 }
 0x220   : > { %v1953_v53 = vadd.f32 %v1952_v52, %v1663_v12  ;;  %v1666_v56 = vpop.f32.mrb[66].mxu0  ;;  %v2943_v26 = vpop.f32.mrb[66].mxu1  ;;  %v644_v12 = vld [vmem:[#allocation2 + $0x138] sm:$0xff] }
 0x221   : > { %v1668_v57 = vpop.f32.mrb[67].mxu0  ;;  %v1955_v10 = vpop.f32.mrb[67].mxu1 }
 0x222   : > { %v2111_v0 = vadd.f32 %v1953_v53, %v637_v30  ;;  %v1956_v18 = vadd.f32 %v1955_v10, %v1666_v56  ;;  %v645_v57 = vld [vmem:[#allocation2 + $0x140] sm:$0xff]  ;;  %v655_v10 = vld [vmem:[#allocation2 + $0x190] sm:$0xff] }
 0x224   : > { %2175 = vst [vmem:[#allocation2 + $0x100] sm:$0xff] %v2111_v0  ;;  %v2112_v50 = vadd.f32 %v1956_v18, %v638_v61 }
 0x226   : > { %2176 = vst [vmem:[#allocation2 + $0x108] sm:$0xff] %v2112_v50  ;;  %v1671_v62 = vpop.f32.mrb[68].mxu0  ;;  %v2946_v4 = vpop.f32.mrb[68].mxu1 }
 0x227   : > { %v1961_v5 = vadd.f32 %v2942_v48, %v1671_v62  ;;  %v1673_v8 = vpop.f32.mrb[69].mxu0  ;;  %v1968_v9 = vpop.f32.mrb[69].mxu1  ;;  %v653_v62 = vld [vmem:[#allocation2 + $0x180] sm:$0xff] }
 0x228   : > { %v1674_v17 = vpop.f32.mrb[70].mxu0  ;;  %v2947_v22 = vpop.f32.mrb[70].mxu1  ;;  %v646_v8 = vld [vmem:[#allocation2 + $0x148] sm:$0xff] }
 0x229   : > { %v2113_v16 = vadd.f32 %v1961_v5, %v639_v42  ;;  %v1964_v14 = vadd.f32 %v2943_v26, %v1674_v17  ;;  %v1676_v46 = vpop.f32.mrb[71].mxu0  ;;  %v1971_v20 = vpop.f32.mrb[71].mxu1 }
 0x22b   : > { %2177 = vst [vmem:[#allocation2 + $0x110] sm:$0xff] %v2113_v16  ;;  %v2114_v21 = vadd.f32 %v1964_v14, %v640_v54  ;;  %v656_v54 = vld [vmem:[#allocation2 + $0x198] sm:$0xff] }
 0x22d   : > { %2178 = vst [vmem:[#allocation2 + $0x118] sm:$0xff] %v2114_v21  ;;  %v654_v21 = vld [vmem:[#allocation2 + $0x188] sm:$0xff] }
 0x22e   : > { %v1679_v25 = vpop.f32.mrb[72].mxu0  ;;  %v4016_v28 = vpop.f32.mrb[72].mxu1 }
 0x22f   : > { %v1969_v1 = vadd.f32 %v1968_v9, %v1679_v25  ;;  %v1681_v29 = vpop.f32.mrb[73].mxu0  ;;  %v1984_v2 = vpop.f32.mrb[73].mxu1 }
 0x230   : > { %v1682_v32 = vpop.f32.mrb[74].mxu0  ;;  %v4018_v60 = vpop.f32.mrb[74].mxu1 }
 0x231   : > { %v2115_v34 = vadd.f32 %v1969_v1, %v641_v24  ;;  %v1972_v33 = vadd.f32 %v1971_v20, %v1682_v32  ;;  %v1684_v36 = vpop.f32.mrb[75].mxu0  ;;  %v1987_v37 = vpop.f32.mrb[75].mxu1  ;;  %v659_v32 = vld [vmem:[#allocation2 + $0x1b0] sm:$0xff] }
 0x233   : > { %2179 = vst [vmem:[#allocation2 + $0x120] sm:$0xff] %v2115_v34  ;;  %v2116_v13 = vadd.f32 %v1972_v33, %v642_v58 }
 0x235   : > { %2180 = vst [vmem:[#allocation2 + $0x128] sm:$0xff] %v2116_v13 }
 0x236   : > { %v1687_v45 = vpop.f32.mrb[76].mxu0  ;;  %v4020_v6 = vpop.f32.mrb[76].mxu1 }
 0x237   : > { %v1977_v41 = vadd.f32 %v2946_v4, %v1687_v45  ;;  %v1689_v38 = vpop.f32.mrb[77].mxu0  ;;  %v4022_v44 = vpop.f32.mrb[77].mxu1 }
 0x238   : > { %v1690_v48 = vpop.f32.mrb[78].mxu0  ;;  %v4024_v49 = vpop.f32.mrb[78].mxu1 }
 0x239   : > { %v2117_v30 = vadd.f32 %v1977_v41, %v643_v40  ;;  %v1980_v52 = vadd.f32 %v2947_v22, %v1690_v48  ;;  %v1692_v53 = vpop.f32.mrb[79].mxu0  ;;  %v4026_v56 = vpop.f32.mrb[79].mxu1  ;;  %v648_v40 = vld [vmem:[#allocation2 + $0x158] sm:$0xff] }
 0x23a   : > { %v660_v41 = vld [vmem:[#allocation2 + $0x1b8] sm:$0xff] }
 0x23b   : > { %2181 = vst [vmem:[#allocation2 + $0x130] sm:$0xff] %v2117_v30  ;;  %v2118_v26 = vadd.f32 %v1980_v52, %v644_v12 }
 0x23d   : > { %2182 = vst [vmem:[#allocation2 + $0x138] sm:$0xff] %v2118_v26  ;;  %v658_v26 = vld [vmem:[#allocation2 + $0x1a8] sm:$0xff] }
 0x23e   : > { %v1695_v61 = vpop.f32.mrb[80].mxu0  ;;  %v2958_v0 = vpop.f32.mrb[80].mxu1 }
 0x23f   : > { %v1985_v18 = vadd.f32 %v1984_v2, %v1695_v61  ;;  %v2025_v50 = vadd.f32 %v2958_v0, %v3929_v3  ;;  %v1697_v42 = vpop.f32.mrb[81].mxu0  ;;  %v2016_v4 = vpop.f32.mrb[81].mxu1  ;;  %v647_v2 = vld [vmem:[#allocation2 + $0x150] sm:$0xff]  ;;  %v649_v0 = vld [vmem:[#allocation2 + $0x160] sm:$0xff] }
 0x240   : > { %v2017_v5 = vadd.f32 %v2016_v4, %v3923_v59  ;;  %v1698_v9 = vpop.f32.mrb[82].mxu0  ;;  %v2959_v17 = vpop.f32.mrb[82].mxu1  ;;  %v661_v4 = vld [vmem:[#allocation2 + $0x1c0] sm:$0xff] }
 0x241   : > { %v2119_v22 = vadd.f32 %v1985_v18, %v645_v57  ;;  %v2129_v16 = vadd.f32 %v2025_v50, %v655_v10  ;;  %v1988_v14 = vadd.f32 %v1987_v37, %v1698_v9  ;;  %v2028_v46 = vadd.f32 %v2959_v17, %v3933_v7  ;;  %v1700_v20 = vpop.f32.mrb[83].mxu0  ;;  %v2019_v24 = vpop.f32.mrb[83].mxu1  ;;  %v657_v37 = vld [vmem:[#allocation2 + $0x1a0] sm:$0xff] }
 0x242   : > { %v2127_v25 = vadd.f32 %v2017_v5, %v653_v62  ;;  %v2020_v3 = vadd.f32 %v2019_v24, %v3927_v63 }
 0x243   : > { %2183 = vst [vmem:[#allocation2 + $0x140] sm:$0xff] %v2119_v22  ;;  %2193 = vst [vmem:[#allocation2 + $0x190] sm:$0xff] %v2129_v16  ;;  %v2120_v1 = vadd.f32 %v1988_v14, %v646_v8  ;;  %v2130_v29 = vadd.f32 %v2028_v46, %v656_v54  ;;  %v650_v8 = vld [vmem:[#allocation2 + $0x168] sm:$0xff]  ;;  %v664_v54 = vld [vmem:[#allocation2 + $0x1d8] sm:$0xff] }
 0x244   : > { %2191 = vst [vmem:[#allocation2 + $0x180] sm:$0xff] %v2127_v25  ;;  %v2128_v59 = vadd.f32 %v2020_v3, %v654_v21  ;;  %v662_v21 = vld [vmem:[#allocation2 + $0x1c8] sm:$0xff] }
 0x245   : > { %2184 = vst [vmem:[#allocation2 + $0x148] sm:$0xff] %v2120_v1  ;;  %2194 = vst [vmem:[#allocation2 + $0x198] sm:$0xff] %v2130_v29  ;;  %v651_v1 = vld [vmem:[#allocation2 + $0x170] sm:$0xff] }
 0x246   : > { %2192 = vst [vmem:[#allocation2 + $0x188] sm:$0xff] %v2128_v59  ;;  %v1703_v58 = vpop.f32.mrb[84].mxu0  ;;  %v2962_v34 = vpop.f32.mrb[84].mxu1 }
 0x247   : > { %v1993_v7 = vadd.f32 %v4016_v28, %v1703_v58  ;;  %v2041_v33 = vadd.f32 %v2962_v34, %v3945_v19  ;;  %v1705_v36 = vpop.f32.mrb[85].mxu0  ;;  %v2032_v63 = vpop.f32.mrb[85].mxu1 }
 0x248   : > { %v2033_v13 = vadd.f32 %v2032_v63, %v3937_v11  ;;  %v1706_v45 = vpop.f32.mrb[86].mxu0  ;;  %v2963_v38 = vpop.f32.mrb[86].mxu1  ;;  %v668_v36 = vld [vmem:[#allocation2 + $0x1f8] sm:$0xff] }
 0x249   : > { %v2121_v12 = vadd.f32 %v1993_v7, %v647_v2  ;;  %v2133_v48 = vadd.f32 %v2041_v33, %v659_v32  ;;  %v1996_v30 = vadd.f32 %v4018_v60, %v1706_v45  ;;  %v2044_v52 = vadd.f32 %v2963_v38, %v3949_v23  ;;  %v1708_v53 = vpop.f32.mrb[87].mxu0  ;;  %v2035_v28 = vpop.f32.mrb[87].mxu1  ;;  %v663_v60 = vld [vmem:[#allocation2 + $0x1d0] sm:$0xff]  ;;  %v665_v32 = vld [vmem:[#allocation2 + $0x1e0] sm:$0xff]  ;;  %v652_v7 = vld [vmem:[#allocation2 + $0x178] sm:$0xff] }
 0x24a   : > { %v2131_v57 = vadd.f32 %v2033_v13, %v657_v37  ;;  %v2036_v19 = vadd.f32 %v2035_v28, %v3941_v15  ;;  %v666_v38 = vld [vmem:[#allocation2 + $0x1e8] sm:$0xff]  ;;  %v2214_v28 = vld [vmem:[#allocation2 + $0x18] sm:$0xff] (!%p2845_p11) }
 0x24b   : > { %2185 = vst [vmem:[#allocation2 + $0x150] sm:$0xff] %v2121_v12  ;;  %2197 = vst [vmem:[#allocation2 + $0x1b0] sm:$0xff] %v2133_v48  ;;  %v2122_v61 = vadd.f32 %v1996_v30, %v648_v40  ;;  %v2134_v11 = vadd.f32 %v2044_v52, %v660_v41  ;;  %v2212_v52 = vld [vmem:[#allocation2 + $0x8] sm:$0xff] (!%p2845_p11) }
 0x24c   : > { %2195 = vst [vmem:[#allocation2 + $0x1a0] sm:$0xff] %v2131_v57  ;;  %v2132_v10 = vadd.f32 %v2036_v19, %v658_v26  ;;  %v2213_v26 = vld [vmem:[#allocation2 + $0x10] sm:$0xff] (!%p2845_p11)  ;;  %v2215_v57 = vld [vmem:[#allocation2 + $0x20] sm:$0xff] (!%p2845_p11) }
 0x24d   : > { %2186 = vst [vmem:[#allocation2 + $0x158] sm:$0xff] %v2122_v61  ;;  %2198 = vst [vmem:[#allocation2 + $0x1b8] sm:$0xff] %v2134_v11  ;;  %v2216_v11 = vld [vmem:[#allocation2 + $0x28] sm:$0xff] (!%p2845_p11) }
 0x24e   : > { %2196 = vst [vmem:[#allocation2 + $0x1a8] sm:$0xff] %v2132_v10  ;;  %v1711_v18 = vpop.f32.mrb[88].mxu0  ;;  %v2966_v50 = vpop.f32.mrb[88].mxu1  ;;  %v2217_v10 = vld [vmem:[#allocation2 + $0x30] sm:$0xff] (!%p2845_p11) }
 0x24f   : > { %v2001_v23 = vadd.f32 %v4022_v44, %v1711_v18  ;;  %v2057_v42 = vadd.f32 %v2966_v50, %v3961_v35  ;;  %v1713_v62 = vpop.f32.mrb[89].mxu0  ;;  %v2048_v15 = vpop.f32.mrb[89].mxu1  ;;  %v2218_v18 = vld [vmem:[#allocation2 + $0x38] sm:$0xff] (!%p2845_p11)  ;;  %v2219_v50 = vld [vmem:[#allocation2 + $0x40] sm:$0xff] (!%p2845_p11) }
 0x250   : > { %v2049_v5 = vadd.f32 %v2048_v15, %v3953_v27  ;;  %v1714_v9 = vpop.f32.mrb[90].mxu0  ;;  %v2967_v17 = vpop.f32.mrb[90].mxu1 }
 0x251   : > { %v2123_v22 = vadd.f32 %v2001_v23, %v649_v0  ;;  %v2137_v16 = vadd.f32 %v2057_v42, %v663_v60  ;;  %v2004_v14 = vadd.f32 %v4026_v56, %v1714_v9  ;;  %v2060_v46 = vadd.f32 %v2967_v17, %v3965_v39  ;;  %v1716_v20 = vpop.f32.mrb[91].mxu0  ;;  %v2051_v44 = vpop.f32.mrb[91].mxu1  ;;  %v667_v56 = vld [vmem:[#allocation2 + $0x1f0] sm:$0xff]  ;;  %v2220_v42 = vld [vmem:[#allocation2 + $0x48] sm:$0xff] (!%p2845_p11)  ;;  %v2223_v9 = vld [vmem:[#allocation2 + $0x60] sm:$0xff] (!%p2845_p11) }
 0x252   : > { %v2135_v24 = vadd.f32 %v2049_v5, %v661_v4  ;;  %v2052_v35 = vadd.f32 %v2051_v44, %v3957_v31  ;;  %v2221_v4 = vld [vmem:[#allocation2 + $0x50] sm:$0xff] (!%p2845_p11)  ;;  %v2222_v5 = vld [vmem:[#allocation2 + $0x58] sm:$0xff] (!%p2845_p11)  ;;  %v2224_v17 = vld [vmem:[#allocation2 + $0x68] sm:$0xff] (!%p2845_p11) }
 0x253   : > { %2187 = vst [vmem:[#allocation2 + $0x160] sm:$0xff] %v2123_v22  ;;  %2201 = vst [vmem:[#allocation2 + $0x1d0] sm:$0xff] %v2137_v16  ;;  %v2124_v25 = vadd.f32 %v2004_v14, %v650_v8  ;;  %v2138_v27 = vadd.f32 %v2060_v46, %v664_v54  ;;  %v2225_v16 = vld [vmem:[#allocation2 + $0x70] sm:$0xff] (!%p2845_p11)  ;;  %v2226_v46 = vld [vmem:[#allocation2 + $0x78] sm:$0xff] (!%p2845_p11) }
 0x254   : > { %2199 = vst [vmem:[#allocation2 + $0x1c0] sm:$0xff] %v2135_v24  ;;  %v2136_v3 = vadd.f32 %v2052_v35, %v662_v21  ;;  %v2227_v21 = vld [vmem:[#allocation2 + $0x80] sm:$0xff] (!%p2845_p11)  ;;  %v2228_v35 = vld [vmem:[#allocation2 + $0x88] sm:$0xff] (!%p2845_p11) }
 0x255   : > { %2188 = vst [vmem:[#allocation2 + $0x168] sm:$0xff] %v2124_v25  ;;  %2202 = vst [vmem:[#allocation2 + $0x1d8] sm:$0xff] %v2138_v27 }
 0x256   : > { %2200 = vst [vmem:[#allocation2 + $0x1c8] sm:$0xff] %v2136_v3  ;;  %v1719_v29 = vpop.f32.mrb[92].mxu0  ;;  %v2970_v59 = vpop.f32.mrb[92].mxu1  ;;  %v2229_v3 = vld [vmem:[#allocation2 + $0x90] sm:$0xff] (!%p2845_p11) }
 0x257   : > { %v2009_v39 = vadd.f32 %v4020_v6, %v1719_v29  ;;  %v2073_v2 = vadd.f32 %v2970_v59, %v3977_v51  ;;  %v1721_v58 = vpop.f32.mrb[93].mxu0  ;;  %v2064_v31 = vpop.f32.mrb[93].mxu1 }
 0x258   : > { %v2065_v34 = vadd.f32 %v2064_v31, %v3969_v43  ;;  %v1722_v33 = vpop.f32.mrb[94].mxu0  ;;  %v2971_v37 = vpop.f32.mrb[94].mxu1  ;;  %2210 = sbr.rel (%p2845_p11) target bundleno = 680 (0x2a8), region = 66  ;;  %v2232_v31 = vld [vmem:[#allocation2 + $0xa8] sm:$0xff] (!%p2845_p11) }
 0x259   : > { %v2125_v63 = vadd.f32 %v2009_v39, %v651_v1  ;;  %v2141_v13 = vadd.f32 %v2073_v2, %v667_v56  ;;  %v2012_v40 = vadd.f32 %v4024_v49, %v1722_v33  ;;  %v2076_v45 = vadd.f32 %v2971_v37, %v3981_v55  ;;  %v1724_v41 = vpop.f32.mrb[95].mxu0  ;;  %v2067_v6 = vpop.f32.mrb[95].mxu1  ;;  %v2211_v49 = vld [vmem:[#allocation2] sm:$0xff] (!%p2845_p11)  ;;  %v2230_v56 = vld [vmem:[#allocation2 + $0x98] sm:$0xff] (!%p2845_p11)  ;;  %v2233_v33 = vld [vmem:[#allocation2 + $0xb0] sm:$0xff] (!%p2845_p11) }
 0x25a   : > { %v2139_v12 = vadd.f32 %v2065_v34, %v665_v32  ;;  %v2068_v51 = vadd.f32 %v2067_v6, %v3973_v47  ;;  %v4054_v55 = vld [vmem:[%s4329_s2] ss:$0 sm:$0xff] (!%p2845_p11)  ;;  %v2236_v6 = vld [vmem:[#allocation2 + $0xc8] sm:$0xff] (!%p2845_p11) }
 0x25b   : > { %2189 = vst [vmem:[#allocation2 + $0x170] sm:$0xff] %v2125_v63  ;;  %2205 = vst [vmem:[#allocation2 + $0x1f0] sm:$0xff] %v2141_v13  ;;  %v2126_v48 = vadd.f32 %v2012_v40, %v652_v7  ;;  %v2142_v43 = vadd.f32 %v2076_v45, %v668_v36  ;;  %v2282_v47 = vadd.f32 (!%p2845_p11), %v4054_v55, %v2211_v49  ;;  %v2231_v2 = vld [vmem:[#allocation2 + $0xa0] sm:$0xff] (!%p2845_p11)  ;;  %v2234_v63 = vld [vmem:[#allocation2 + $0xb8] sm:$0xff] (!%p2845_p11) }
 0x25c   : > { %2203 = vst [vmem:[#allocation2 + $0x1e0] sm:$0xff] %v2139_v12  ;;  %v2140_v30 = vadd.f32 %v2068_v51, %v666_v38  ;;  %v2283_v53 = vadd.f32 (!%p2845_p11), %v4054_v55, %v2212_v52  ;;  %v2284_v19 = vadd.f32 (!%p2845_p11), %v4054_v55, %v2213_v26  ;;  %v2285_v61 = vadd.f32 (!%p2845_p11), %v4054_v55, %v2214_v28  ;;  %v2235_v45 = vld [vmem:[#allocation2 + $0xc0] sm:$0xff] (!%p2845_p11)  ;;  %v2238_v49 = vld [vmem:[#allocation2 + $0xd8] sm:$0xff] (!%p2845_p11) }
 0x25d   : > { %2190 = vst [vmem:[#allocation2 + $0x178] sm:$0xff] %v2126_v48  ;;  %2206 = vst [vmem:[#allocation2 + $0x1f8] sm:$0xff] %v2142_v43  ;;  %3200 = vtanh.f32 (!%p2845_p11), %v2282_v47  ;;  %v2286_v0 = vadd.f32 (!%p2845_p11), %v4054_v55, %v2215_v57  ;;  %v2287_v60 = vadd.f32 (!%p2845_p11), %v4054_v55, %v2216_v11  ;;  %v2288_v23 = vadd.f32 (!%p2845_p11), %v4054_v55, %v2217_v10  ;;  %v2237_v48 = vld [vmem:[#allocation2 + $0xd0] sm:$0xff] (!%p2845_p11)  ;;  %v2240_v57 = vld [vmem:[#allocation2 + $0xe8] sm:$0xff] (!%p2845_p11) }
 0x25e   : > { %2204 = vst [vmem:[#allocation2 + $0x1e8] sm:$0xff] %v2140_v30  ;;  %3202 = vtanh.f32 (!%p2845_p11), %v2283_v53  ;;  %v2289_v62 = vadd.f32 (!%p2845_p11), %v4054_v55, %v2218_v18  ;;  %v2290_v15 = vadd.f32 (!%p2845_p11), %v4054_v55, %v2219_v50  ;;  %v2291_v8 = vadd.f32 (!%p2845_p11), %v4054_v55, %v2220_v42  ;;  %v2239_v53 = vld [vmem:[#allocation2 + $0xe0] sm:$0xff] (!%p2845_p11)  ;;  %v2241_v11 = vld [vmem:[#allocation2 + $0xf0] sm:$0xff] (!%p2845_p11)  ;;  %v2242_v18 = vld [vmem:[#allocation2 + $0xf8] sm:$0xff] (!%p2845_p11) }
 0x25f   : > { %3204 = vtanh.f32 %v2284_v19  ;;  %v2292_v54 = vadd.f32 %v4054_v55, %v2221_v4  ;;  %v2293_v22 = vadd.f32 %v4054_v55, %v2222_v5  ;;  %v2294_v14 = vadd.f32 %v4054_v55, %v2223_v9  ;;  %v2244_v4 = vld [vmem:[#allocation2 + $0x108] sm:$0xff] }
 0x260   : > { %3206 = vtanh.f32 %v2285_v61  ;;  %v2295_v20 = vadd.f32 %v4054_v55, %v2224_v17  ;;  %v2296_v24 = vadd.f32 %v4054_v55, %v2225_v16  ;;  %v2297_v27 = vadd.f32 %v4054_v55, %v2226_v46  ;;  %v2246_v17 = vld [vmem:[#allocation2 + $0x118] sm:$0xff] }
 0x261   : > { %3208 = vtanh.f32 %v2286_v0  ;;  %v2298_v29 = vadd.f32 %v4054_v55, %v2227_v21  ;;  %v2299_v39 = vadd.f32 %v4054_v55, %v2228_v35  ;;  %v2300_v32 = vadd.f32 %v4054_v55, %v2229_v3  ;;  %v2248_v21 = vld [vmem:[#allocation2 + $0x128] sm:$0xff]  ;;  %v2249_v35 = vld [vmem:[#allocation2 + $0x130] sm:$0xff]  ;;  %v2250_v3 = vld [vmem:[#allocation2 + $0x138] sm:$0xff] }
 0x262   : > { %3210 = vtanh.f32 %v2287_v60  ;;  %v2301_v7 = vadd.f32 %v4054_v55, %v2230_v56  ;;  %v2302_v37 = vadd.f32 %v4054_v55, %v2231_v2  ;;  %v2303_v40 = vadd.f32 %v4054_v55, %v2232_v31  ;;  %v2251_v56 = vld [vmem:[#allocation2 + $0x140] sm:$0xff]  ;;  %v2252_v2 = vld [vmem:[#allocation2 + $0x148] sm:$0xff]  ;;  %v2253_v31 = vld [vmem:[#allocation2 + $0x150] sm:$0xff] }
 0x263   : > { %3212 = vtanh.f32 %v2288_v23  ;;  %v2304_v38 = vadd.f32 %v4054_v55, %v2233_v33  ;;  %v2305_v51 = vadd.f32 %v4054_v55, %v2234_v63  ;;  %v2306_v30 = vadd.f32 %v4054_v55, %v2235_v45  ;;  %v2243_v23 = vld [vmem:[#allocation2 + $0x100] sm:$0xff]  ;;  %v2254_v33 = vld [vmem:[#allocation2 + $0x158] sm:$0xff]  ;;  %v2256_v45 = vld [vmem:[#allocation2 + $0x168] sm:$0xff] }
 0x264   : > { %3214 = vtanh.f32 %v2289_v62  ;;  %v2307_v47 = vadd.f32 %v4054_v55, %v2236_v6  ;;  %v2308_v28 = vadd.f32 %v4054_v55, %v2237_v48  ;;  %v2309_v61 = vadd.f32 %v4054_v55, %v2238_v49  ;;  %v2255_v63 = vld [vmem:[#allocation2 + $0x160] sm:$0xff]  ;;  %v2257_v6 = vld [vmem:[#allocation2 + $0x170] sm:$0xff]  ;;  %v2258_v48 = vld [vmem:[#allocation2 + $0x178] sm:$0xff] }
 0x265   : > { %3216 = vtanh.f32 %v2290_v15  ;;  %v2310_v0 = vadd.f32 %v4054_v55, %v2239_v53  ;;  %v2311_v50 = vadd.f32 %v4054_v55, %v2240_v57  ;;  %v2312_v62 = vadd.f32 %v4054_v55, %v2241_v11  ;;  %v2259_v49 = vld [vmem:[#allocation2 + $0x180] sm:$0xff]  ;;  %v2260_v53 = vld [vmem:[#allocation2 + $0x188] sm:$0xff]  ;;  %v2261_v57 = vld [vmem:[#allocation2 + $0x190] sm:$0xff] }
 0x266   : > { %3218 = vtanh.f32 %v2291_v8  ;;  %v2313_v5 = vadd.f32 %v4054_v55, %v2242_v18  ;;  %v2245_v8 = vld [vmem:[#allocation2 + $0x110] sm:$0xff]  ;;  %v2315_v16 = vadd.f32 %v4054_v55, %v2244_v4  ;;  %v2262_v11 = vld [vmem:[#allocation2 + $0x198] sm:$0xff]  ;;  %v2263_v18 = vld [vmem:[#allocation2 + $0x1a0] sm:$0xff] }
 0x267   : > { %v3201_v44 = vpop.eup %3200  ;;  %3220 = vtanh.f32 %v2292_v54  ;;  %v2314_v54 = vadd.f32 %v4054_v55, %v2243_v23  ;;  %v2264_v23 = vld [vmem:[#allocation2 + $0x1a8] sm:$0xff]  ;;  %v2265_v4 = vld [vmem:[#allocation2 + $0x1b0] sm:$0xff] }
 0x268   : > { %v3203_v25 = vpop.eup %3202  ;;  %2410 = vst [vmem:[%s4330_s3] sm:$0xff] %v3201_v44  ;;  %3222 = vtanh.f32 %v2293_v22 }
 0x269   : > { %v3205_v1 = vpop.eup %3204  ;;  %2411 = vst [vmem:[%s4330_s3 + $0x8] sm:$0xff] %v3203_v25  ;;  %3224 = vtanh.f32 %v2294_v14  ;;  %v2247_v14 = vld [vmem:[#allocation2 + $0x120] sm:$0xff] }
 0x26a   : > { %v3207_v59 = vpop.eup %3206  ;;  %2412 = vst [vmem:[%s4330_s3 + $0x10] sm:$0xff] %v3205_v1  ;;  %3226 = vtanh.f32 %v2295_v20  ;;  %v2316_v20 = vadd.f32 %v4054_v55, %v2245_v8  ;;  %v2266_v8 = vld [vmem:[#allocation2 + $0x1b8] sm:$0xff] }
 0x26b   : > { %v3209_v58 = vpop.eup %3208  ;;  %2413 = vst [vmem:[%s4330_s3 + $0x18] sm:$0xff] %v3207_v59  ;;  %3228 = vtanh.f32 %v2296_v24  ;;  %v2317_v24 = vadd.f32 %v4054_v55, %v2246_v17  ;;  %v2267_v17 = vld [vmem:[#allocation2 + $0x1c0] sm:$0xff] }
 0x26c   : > { %v3211_v34 = vpop.eup %3210  ;;  %2414 = vst [vmem:[%s4330_s3 + $0x20] sm:$0xff] %v3209_v58  ;;  %3230 = vtanh.f32 %v2297_v27  ;;  %v2318_v27 = vadd.f32 %v4054_v55, %v2247_v14  ;;  %v2268_v14 = vld [vmem:[#allocation2 + $0x1c8] sm:$0xff] }
 0x26d   : > { %v3213_v36 = vpop.eup %3212  ;;  %2415 = vst [vmem:[%s4330_s3 + $0x28] sm:$0xff] %v3211_v34  ;;  %3232 = vtanh.f32 %v2298_v29  ;;  %v2319_v29 = vadd.f32 %v4054_v55, %v2248_v21  ;;  %v2269_v21 = vld [vmem:[#allocation2 + $0x1d0] sm:$0xff] }
 0x26e   : > { %v3215_v13 = vpop.eup %3214  ;;  %2416 = vst [vmem:[%s4330_s3 + $0x30] sm:$0xff] %v3213_v36  ;;  %3234 = vtanh.f32 %v2299_v39  ;;  %v2320_v39 = vadd.f32 %v4054_v55, %v2249_v35  ;;  %v2270_v35 = vld [vmem:[#allocation2 + $0x1d8] sm:$0xff] }
 0x26f   : > { %v3217_v41 = vpop.eup %3216  ;;  %2417 = vst [vmem:[%s4330_s3 + $0x38] sm:$0xff] %v3215_v13  ;;  %3236 = vtanh.f32 %v2300_v32  ;;  %v2321_v32 = vadd.f32 %v4054_v55, %v2250_v3  ;;  %v2271_v3 = vld [vmem:[#allocation2 + $0x1e0] sm:$0xff] }
 0x270   : > { %v3219_v12 = vpop.eup %3218  ;;  %2418 = vst [vmem:[%s4330_s3 + $0x40] sm:$0xff] %v3217_v41  ;;  %3238 = vtanh.f32 %v2301_v7  ;;  %v2322_v7 = vadd.f32 %v4054_v55, %v2251_v56  ;;  %v2272_v56 = vld [vmem:[#allocation2 + $0x1e8] sm:$0xff] }
 0x271   : > { %v3221_v43 = vpop.eup %3220  ;;  %2419 = vst [vmem:[%s4330_s3 + $0x48] sm:$0xff] %v3219_v12  ;;  %3240 = vtanh.f32 %v2302_v37  ;;  %v2323_v37 = vadd.f32 %v4054_v55, %v2252_v2  ;;  %v2273_v2 = vld [vmem:[#allocation2 + $0x1f0] sm:$0xff] }
 0x272   : > { %v3223_v52 = vpop.eup %3222  ;;  %2420 = vst [vmem:[%s4330_s3 + $0x50] sm:$0xff] %v3221_v43  ;;  %3242 = vtanh.f32 %v2303_v40  ;;  %v2324_v40 = vadd.f32 %v4054_v55, %v2253_v31  ;;  %v2274_v31 = vld [vmem:[#allocation2 + $0x1f8] sm:$0xff] }
 0x273   : > { %v3225_v26 = vpop.eup %3224  ;;  %2421 = vst [vmem:[%s4330_s3 + $0x58] sm:$0xff] %v3223_v52  ;;  %3244 = vtanh.f32 %v2304_v38  ;;  %v2325_v38 = vadd.f32 %v4054_v55, %v2254_v33 }
 0x274   : > { %v3227_v19 = vpop.eup %3226  ;;  %2422 = vst [vmem:[%s4330_s3 + $0x60] sm:$0xff] %v3225_v26  ;;  %3246 = vtanh.f32 %v2305_v51  ;;  %v2326_v51 = vadd.f32 %v4054_v55, %v2255_v63  ;;  %v2345_v63 = vadd.f32 %v4054_v55, %v2274_v31 }
 0x275   : > { %v3229_v10 = vpop.eup %3228  ;;  %2423 = vst [vmem:[%s4330_s3 + $0x68] sm:$0xff] %v3227_v19  ;;  %3248 = vtanh.f32 %v2306_v30  ;;  %v2327_v30 = vadd.f32 %v4054_v55, %v2256_v45 }
 0x276   : > { %v3231_v60 = vpop.eup %3230  ;;  %2424 = vst [vmem:[%s4330_s3 + $0x70] sm:$0xff] %v3229_v10  ;;  %3250 = vtanh.f32 %v2307_v47  ;;  %v2328_v47 = vadd.f32 %v4054_v55, %v2257_v6 }
 0x277   : > { %v3233_v42 = vpop.eup %3232  ;;  %2425 = vst [vmem:[%s4330_s3 + $0x78] sm:$0xff] %v3231_v60  ;;  %3252 = vtanh.f32 %v2308_v28  ;;  %v2329_v28 = vadd.f32 %v4054_v55, %v2258_v48 }
 0x278   : > { %v3235_v15 = vpop.eup %3234  ;;  %2426 = vst [vmem:[%s4330_s3 + $0x80] sm:$0xff] %v3233_v42  ;;  %3254 = vtanh.f32 %v2309_v61  ;;  %v2330_v61 = vadd.f32 %v4054_v55, %v2259_v49 }
 0x279   : > { %v3237_v9 = vpop.eup %3236  ;;  %2427 = vst [vmem:[%s4330_s3 + $0x88] sm:$0xff] %v3235_v15  ;;  %3256 = vtanh.f32 %v2310_v0  ;;  %v2331_v0 = vadd.f32 %v4054_v55, %v2260_v53 }
 0x27a   : > { %v3239_v22 = vpop.eup %3238  ;;  %2428 = vst [vmem:[%s4330_s3 + $0x90] sm:$0xff] %v3237_v9  ;;  %3258 = vtanh.f32 %v2311_v50  ;;  %v2332_v50 = vadd.f32 %v4054_v55, %v2261_v57 }
 0x27b   : > { %v3241_v46 = vpop.eup %3240  ;;  %2429 = vst [vmem:[%s4330_s3 + $0x98] sm:$0xff] %v3239_v22  ;;  %3260 = vtanh.f32 %v2312_v62  ;;  %v2333_v62 = vadd.f32 %v4054_v55, %v2262_v11 }
 0x27c   : > { %v3243_v44 = vpop.eup %3242  ;;  %2430 = vst [vmem:[%s4330_s3 + $0xa0] sm:$0xff] %v3241_v46  ;;  %3262 = vtanh.f32 %v2313_v5  ;;  %v2334_v5 = vadd.f32 %v4054_v55, %v2263_v18 }
 0x27d   : > { %v3245_v25 = vpop.eup %3244  ;;  %2431 = vst [vmem:[%s4330_s3 + $0xa8] sm:$0xff] %v3243_v44  ;;  %3264 = vtanh.f32 %v2314_v54  ;;  %v2335_v54 = vadd.f32 %v4054_v55, %v2264_v23 }
 0x27e   : > { %v3247_v1 = vpop.eup %3246  ;;  %2432 = vst [vmem:[%s4330_s3 + $0xb0] sm:$0xff] %v3245_v25  ;;  %3266 = vtanh.f32 %v2315_v16  ;;  %v2336_v16 = vadd.f32 %v4054_v55, %v2265_v4 }
 0x27f   : > { %v3249_v59 = vpop.eup %3248  ;;  %2433 = vst [vmem:[%s4330_s3 + $0xb8] sm:$0xff] %v3247_v1  ;;  %3268 = vtanh.f32 %v2316_v20  ;;  %v2337_v20 = vadd.f32 %v4054_v55, %v2266_v8 }
 0x280   : > { %v3251_v58 = vpop.eup %3250  ;;  %2434 = vst [vmem:[%s4330_s3 + $0xc0] sm:$0xff] %v3249_v59  ;;  %3270 = vtanh.f32 %v2317_v24  ;;  %v2338_v24 = vadd.f32 %v4054_v55, %v2267_v17 }
 0x281   : > { %v3253_v34 = vpop.eup %3252  ;;  %2435 = vst [vmem:[%s4330_s3 + $0xc8] sm:$0xff] %v3251_v58  ;;  %3272 = vtanh.f32 %v2318_v27  ;;  %v2339_v27 = vadd.f32 %v4054_v55, %v2268_v14 }
 0x282   : > { %v3255_v36 = vpop.eup %3254  ;;  %2436 = vst [vmem:[%s4330_s3 + $0xd0] sm:$0xff] %v3253_v34  ;;  %3274 = vtanh.f32 %v2319_v29  ;;  %v2340_v29 = vadd.f32 %v4054_v55, %v2269_v21 }
 0x283   : > { %v3257_v13 = vpop.eup %3256  ;;  %2437 = vst [vmem:[%s4330_s3 + $0xd8] sm:$0xff] %v3255_v36  ;;  %3276 = vtanh.f32 %v2320_v39  ;;  %v2341_v39 = vadd.f32 %v4054_v55, %v2270_v35  ;;  %v2344_v36 = vadd.f32 %v4054_v55, %v2273_v2 }
 0x284   : > { %v3259_v41 = vpop.eup %3258  ;;  %2438 = vst [vmem:[%s4330_s3 + $0xe0] sm:$0xff] %v3257_v13  ;;  %3278 = vtanh.f32 %v2321_v32  ;;  %v2342_v32 = vadd.f32 %v4054_v55, %v2271_v3 }
 0x285   : > { %v3261_v12 = vpop.eup %3260  ;;  %2439 = vst [vmem:[%s4330_s3 + $0xe8] sm:$0xff] %v3259_v41  ;;  %3280 = vtanh.f32 %v2322_v7  ;;  %v2343_v7 = vadd.f32 %v4054_v55, %v2272_v56 }
 0x286   : > { %v3263_v43 = vpop.eup %3262  ;;  %2440 = vst [vmem:[%s4330_s3 + $0xf0] sm:$0xff] %v3261_v12  ;;  %3282 = vtanh.f32 %v2323_v37 }
 0x287   : > { %v3265_v52 = vpop.eup %3264  ;;  %2441 = vst [vmem:[%s4330_s3 + $0xf8] sm:$0xff] %v3263_v43  ;;  %3284 = vtanh.f32 %v2324_v40 }
 0x288   : > { %v3267_v26 = vpop.eup %3266  ;;  %2442 = vst [vmem:[%s4330_s3 + $0x100] sm:$0xff] %v3265_v52  ;;  %3286 = vtanh.f32 %v2325_v38 }
 0x289   : > { %v3269_v19 = vpop.eup %3268  ;;  %2443 = vst [vmem:[%s4330_s3 + $0x108] sm:$0xff] %v3267_v26  ;;  %3288 = vtanh.f32 %v2326_v51 }
 0x28a   : > { %v3271_v10 = vpop.eup %3270  ;;  %2444 = vst [vmem:[%s4330_s3 + $0x110] sm:$0xff] %v3269_v19  ;;  %3290 = vtanh.f32 %v2327_v30 }
 0x28b   : > { %v3273_v60 = vpop.eup %3272  ;;  %2445 = vst [vmem:[%s4330_s3 + $0x118] sm:$0xff] %v3271_v10  ;;  %3292 = vtanh.f32 %v2328_v47 }
 0x28c   : > { %v3275_v42 = vpop.eup %3274  ;;  %2446 = vst [vmem:[%s4330_s3 + $0x120] sm:$0xff] %v3273_v60  ;;  %3294 = vtanh.f32 %v2329_v28 }
 0x28d   : > { %v3277_v15 = vpop.eup %3276  ;;  %2447 = vst [vmem:[%s4330_s3 + $0x128] sm:$0xff] %v3275_v42  ;;  %3296 = vtanh.f32 %v2330_v61 }
 0x28e   : > { %v3279_v9 = vpop.eup %3278  ;;  %2448 = vst [vmem:[%s4330_s3 + $0x130] sm:$0xff] %v3277_v15  ;;  %3298 = vtanh.f32 %v2331_v0 }
 0x28f   : > { %v3281_v22 = vpop.eup %3280  ;;  %2449 = vst [vmem:[%s4330_s3 + $0x138] sm:$0xff] %v3279_v9  ;;  %3300 = vtanh.f32 %v2332_v50 }
 0x290   : > { %v3283_v46 = vpop.eup %3282  ;;  %2450 = vst [vmem:[%s4330_s3 + $0x140] sm:$0xff] %v3281_v22  ;;  %3302 = vtanh.f32 %v2333_v62 }
 0x291   : > { %v3285_v44 = vpop.eup %3284  ;;  %2451 = vst [vmem:[%s4330_s3 + $0x148] sm:$0xff] %v3283_v46  ;;  %3304 = vtanh.f32 %v2334_v5 }
 0x292   : > { %v3287_v25 = vpop.eup %3286  ;;  %2452 = vst [vmem:[%s4330_s3 + $0x150] sm:$0xff] %v3285_v44  ;;  %3306 = vtanh.f32 %v2335_v54 }
 0x293   : > { %v3289_v1 = vpop.eup %3288  ;;  %2453 = vst [vmem:[%s4330_s3 + $0x158] sm:$0xff] %v3287_v25  ;;  %3308 = vtanh.f32 %v2336_v16 }
 0x294   : > { %v3291_v59 = vpop.eup %3290  ;;  %2454 = vst [vmem:[%s4330_s3 + $0x160] sm:$0xff] %v3289_v1  ;;  %3310 = vtanh.f32 %v2337_v20 }
 0x295   : > { %v3293_v58 = vpop.eup %3292  ;;  %2455 = vst [vmem:[%s4330_s3 + $0x168] sm:$0xff] %v3291_v59  ;;  %3312 = vtanh.f32 %v2338_v24 }
 0x296   : > { %v3295_v34 = vpop.eup %3294  ;;  %2456 = vst [vmem:[%s4330_s3 + $0x170] sm:$0xff] %v3293_v58  ;;  %3314 = vtanh.f32 %v2339_v27 }
 0x297   : > { %v3297_v33 = vpop.eup %3296  ;;  %2457 = vst [vmem:[%s4330_s3 + $0x178] sm:$0xff] %v3295_v34  ;;  %3316 = vtanh.f32 %v2340_v29 }
 0x298   : > { %v3299_v37 = vpop.eup %3298  ;;  %2458 = vst [vmem:[%s4330_s3 + $0x180] sm:$0xff] %v3297_v33  ;;  %3318 = vtanh.f32 %v2341_v39 }
 0x299   : > { %v3301_v13 = vpop.eup %3300  ;;  %2459 = vst [vmem:[%s4330_s3 + $0x188] sm:$0xff] %v3299_v37  ;;  %3320 = vtanh.f32 %v2342_v32 }
 0x29a   : > { %v3303_v40 = vpop.eup %3302  ;;  %2460 = vst [vmem:[%s4330_s3 + $0x190] sm:$0xff] %v3301_v13  ;;  %3322 = vtanh.f32 %v2343_v7 }
 0x29b   : > { %v3305_v45 = vpop.eup %3304  ;;  %2461 = vst [vmem:[%s4330_s3 + $0x198] sm:$0xff] %v3303_v40  ;;  %3324 = vtanh.f32 %v2344_v36 }
 0x29c   : > { %v3307_v41 = vpop.eup %3306  ;;  %2462 = vst [vmem:[%s4330_s3 + $0x1a0] sm:$0xff] %v3305_v45  ;;  %3326 = vtanh.f32 %v2345_v63 }
 0x29d   : > { %v3309_v55 = vpop.eup %3308  ;;  %2463 = vst [vmem:[%s4330_s3 + $0x1a8] sm:$0xff] %v3307_v41 }
 0x29e   : > { %v3311_v38 = vpop.eup %3310  ;;  %2464 = vst [vmem:[%s4330_s3 + $0x1b0] sm:$0xff] %v3309_v55 }
 0x29f   : > { %v3313_v6 = vpop.eup %3312  ;;  %2465 = vst [vmem:[%s4330_s3 + $0x1b8] sm:$0xff] %v3311_v38 }
 0x2a0   : > { %v3315_v12 = vpop.eup %3314  ;;  %2466 = vst [vmem:[%s4330_s3 + $0x1c0] sm:$0xff] %v3313_v6 }
 0x2a1   : > { %v3317_v51 = vpop.eup %3316  ;;  %2467 = vst [vmem:[%s4330_s3 + $0x1c8] sm:$0xff] %v3315_v12 }
 0x2a2   : > { %v3319_v48 = vpop.eup %3318  ;;  %2468 = vst [vmem:[%s4330_s3 + $0x1d0] sm:$0xff] %v3317_v51 }
 0x2a3   : > { %v3321_v43 = vpop.eup %3320  ;;  %2469 = vst [vmem:[%s4330_s3 + $0x1d8] sm:$0xff] %v3319_v48 }
 0x2a4   : > { %v3323_v30 = vpop.eup %3322  ;;  %2470 = vst [vmem:[%s4330_s3 + $0x1e0] sm:$0xff] %v3321_v43 }
 0x2a5   : > { %v3325_v49 = vpop.eup %3324  ;;  %2471 = vst [vmem:[%s4330_s3 + $0x1e8] sm:$0xff] %v3323_v30 }
 0x2a6   : > { %v3327_v52 = vpop.eup %3326  ;;  %2472 = vst [vmem:[%s4330_s3 + $0x1f0] sm:$0xff] %v3325_v49 }
 0x2a7   : > { %2473 = vst [vmem:[%s4330_s3 + $0x1f8] sm:$0xff] %v3327_v52 }
 0x2a8 PF: > { %s13_s16 = sadd.s32 1, %s3366_s16   ;;  %s4331_s12 = smov %s3354_s13 }
 0x2a9   : > { %p10_p12 = scmp.ge.s32.totalorder %s13_s16, 5   ;;  %s4332_s13 = smov %s3425_s20 }
 0x2aa   : > { %s4333_s14 = smov %s3362_s15  ;;  %s4334_s15 = smov %s4336_s17 }
 0x2ab   :  { %12 = sbr.rel (!%p10_p12) target bundleno = 3 (0x3), region = 113 }

</bundles_post_ra>
